<compile_context>
chip_gen: v5e
topology: v5e:2x2
jax: 0.10.0
libtpu: 0.0.40
codegen_flags: <defaults>
</compile_context>

<pallas_src>
import jax
import jax.numpy as jnp
import numpy as np
from jax.experimental import pallas as pl
from jax.experimental.pallas import tpu as pltpu

H_IN = 5
W_IN = 5
P = H_IN * W_IN          # 25 spatial positions
KH = KW = 3
A_PAD = 128              # lane-dense padded action dimension
NEG_INF = -1e30
B_TILE = 128             # batch rows per grid step


def actor_kernel(x_ref, w1_ref, b1_ref, w2_ref, b2_ref, w3_ref, b3_ref, o_ref):
    """One batch tile per grid step: conv1 -> ReLU -> conv2 -> ReLU -> linear -> softmax.

    Activations stay in a 2-D (batch, position*channel) layout the whole way:
    batch on sublanes, features on lanes. Each layer is a single MXU matmul.
    """
    x = x_ref[...]                                                      # (BT, 25)

    h1 = jnp.dot(x, w1_ref[...], preferred_element_type=jnp.float32)    # (BT, 25*C)
    h1 = jnp.maximum(h1 + b1_ref[...], 0.0)

    h2 = jnp.dot(h1, w2_ref[...], preferred_element_type=jnp.float32)   # (BT, 25*C)
    h2 = jnp.maximum(h2 + b2_ref[...], 0.0)

    logits = jnp.dot(h2, w3_ref[...],
                     preferred_element_type=jnp.float32) + b3_ref[...]  # (BT, A_PAD)

    # Padded action lanes carry a -1e30 bias -> exp() == 0 -> they drop out of
    # both the max and the sum, so the softmax over the real actions is exact.
    m = jnp.max(logits, axis=-1, keepdims=True)
    e = jnp.exp(logits - m)
    s = jnp.sum(e, axis=-1, keepdims=True)
    o_ref[...] = (e / s).astype(o_ref.dtype)


def _shift_matrices():
    """S[u, v, p, q] = 1 iff spatial position q is the (u,v) tap of position p
    under a 3x3 / stride 1 / pad 1 convolution on a 5x5 grid (p = y*5 + x)."""
    S = np.zeros((KH, KW, P, P), np.float32)
    for u in range(KH):
        for v in range(KW):
            for y in range(H_IN):
                for x in range(W_IN):
                    yy, xx = y + u - 1, x + v - 1
                    if 0 <= yy < H_IN and 0 <= xx < W_IN:
                        S[u, v, y * W_IN + x, yy * W_IN + xx] = 1.0
    return S


def prepare_params(w1_t, b1_t, w2_t, b2_t, w3_t, b3_t):
    """One-time rearrangement of PyTorch-layout weights into the kernel's
    matmul-friendly layouts (pure weight plumbing; no per-forward compute)."""
    C = w1_t.shape[0]
    A = w3_t.shape[0]
    S = jnp.asarray(_shift_matrices())                                   # (3,3,25,25)

    # conv1 (Cin = 1): h1[b, p*C+c] = sum_q x[b,q] * W1eff[q, p*C+c]
    w1_hwc = jnp.transpose(w1_t[:, 0], (1, 2, 0))                        # (3,3,C)
    w1_eff = jnp.einsum('uvpq,uvc->qpc', S, w1_hwc).reshape(P, P * C)
    b1_full = jnp.tile(b1_t[None, :], (P, 1)).reshape(1, P * C)

    # conv2: h2[b, p*C+co] = sum_{q,ci} h1[b, q*C+ci] * W2eff[q*C+ci, p*C+co]
    w2_hwio = jnp.transpose(w2_t, (2, 3, 1, 0))                          # (3,3,Ci,Co)
    w2_eff = jnp.einsum('uvpq,uvio->qipo', S, w2_hwio).reshape(P * C, P * C)
    b2_full = jnp.tile(b2_t[None, :], (P, 1)).reshape(1, P * C)

    # Linear: torch Flatten order is (c, y, x) -> column c*25 + p.
    # Kernel's feature order is p*C + c, so permute accordingly; pad actions to
    # 128 lanes (zero weights, -1e30 bias on the padded lanes).
    w3_r = jnp.transpose(w3_t.reshape(A, C, P), (2, 1, 0)).reshape(P * C, A)
    w3_pad = jnp.zeros((P * C, A_PAD), jnp.float32).at[:, :A].set(w3_r)
    b3_pad = jnp.full((1, A_PAD), NEG_INF, jnp.float32).at[0, :A].set(b3_t)

    return (w1_eff.astype(jnp.float32), b1_full.astype(jnp.float32),
            w2_eff.astype(jnp.float32), b2_full.astype(jnp.float32),
            w3_pad, b3_pad)


def actor_forward(x_nchw, kernel_params, n_actions, b_tile=B_TILE):
    """x_nchw: (B, 1, 5, 5) float32. Returns (B, n_actions) action probabilities."""
    w1_eff, b1_full, w2_eff, b2_full, w3_pad, b3_pad = kernel_params
    B = x_nchw.shape[0]
    PC = w1_eff.shape[1]

    x_flat = x_nchw.reshape(B, P).astype(jnp.float32)        # row order p = y*5 + x
    n_tiles = pl.cdiv(B, b_tile)
    Bp = n_tiles * b_tile
    if Bp != B:
        x_flat = jnp.pad(x_flat, ((0, Bp - B), (0, 0)))

    out = pl.pallas_call(
        actor_kernel,
        out_shape=jax.ShapeDtypeStruct((Bp, A_PAD), jnp.float32),
        grid_spec=pltpu.PrefetchScalarGridSpec(
            num_scalar_prefetch=0,
            grid=(n_tiles,),
            in_specs=[
                pl.BlockSpec((b_tile, P), lambda i: (i, 0)),     # x tile
                pl.BlockSpec((P, PC), lambda i: (0, 0)),         # W1eff   (resident)
                pl.BlockSpec((1, PC), lambda i: (0, 0)),         # b1
                pl.BlockSpec((PC, PC), lambda i: (0, 0)),        # W2eff   (resident)
                pl.BlockSpec((1, PC), lambda i: (0, 0)),         # b2
                pl.BlockSpec((PC, A_PAD), lambda i: (0, 0)),     # W3      (resident)
                pl.BlockSpec((1, A_PAD), lambda i: (0, 0)),      # b3
            ],
            out_specs=pl.BlockSpec((b_tile, A_PAD), lambda i: (i, 0)),
        ),
        compiler_params=pltpu.CompilerParams(
            dimension_semantics=("parallel",)),                  # v7x: split tiles across TCs
    )(x_flat, w1_eff, b1_full, w2_eff, b2_full, w3_pad, b3_pad)

    return out[:B, :n_actions]


def reference_forward(x_nchw, w1_t, b1_t, w2_t, b2_t, w3_t, b3_t):
    """Pure-JAX reference matching the PyTorch module exactly (NCHW / OIHW)."""
    dn = ('NCHW', 'OIHW', 'NCHW')
    h1 = jax.lax.conv_general_dilated(x_nchw, w1_t, (1, 1),
                                      [(1, 1), (1, 1)], dimension_numbers=dn)
    h1 = jax.nn.relu(h1 + b1_t[None, :, None, None])
    h2 = jax.lax.conv_general_dilated(h1, w2_t, (1, 1),
                                      [(1, 1), (1, 1)], dimension_numbers=dn)
    h2 = jax.nn.relu(h2 + b2_t[None, :, None, None])
    flat = h2.reshape(x_nchw.shape[0], -1)            # torch Flatten: (c, y, x) order
    logits = flat @ w3_t.T + b3_t[None, :]
    return jax.nn.softmax(logits, axis=1)


if __name__ == "__main__":
    B = 2                 # batch
    HIDDEN = 32           # hidden_channels
    N_ACTIONS = 4         # n_actions
    # learning_rate / optimizer are training-time only; forward pass ignores them.

    key = jax.random.PRNGKey(0)
    k = jax.random.split(key, 7)

    # Deterministic synthetic parameters in PyTorch layouts.
    w1_t = 0.20 * jax.random.normal(k[0], (HIDDEN, 1, 3, 3), jnp.float32)   # (Cout, Cin, kh, kw)
    b1_t = 0.10 * jax.random.normal(k[1], (HIDDEN,), jnp.float32)
    w2_t = 0.10 * jax.random.normal(k[2], (HIDDEN, HIDDEN, 3, 3), jnp.float32)
    b2_t = 0.10 * jax.random.normal(k[3], (HIDDEN,), jnp.float32)
    w3_t = 0.05 * jax.random.normal(k[4], (N_ACTIONS, HIDDEN * 5 * 5), jnp.float32)
    b3_t = 0.10 * jax.random.normal(k[5], (N_ACTIONS,), jnp.float32)

    x = jax.random.normal(k[6], (B, 1, 5, 5), jnp.float32)                  # NCHW input

    kernel_params = prepare_params(w1_t, b1_t, w2_t, b2_t, w3_t, b3_t)

    probs = actor_forward(x, kernel_params, N_ACTIONS)
    probs = jax.block_until_ready(probs)

    ref = reference_forward(x, w1_t, b1_t, w2_t, b2_t, w3_t, b3_t)
    assert probs.shape == (B, N_ACTIONS)
    assert np.allclose(np.asarray(probs).sum(axis=1), 1.0, atol=1e-5)
    assert np.allclose(np.asarray(probs), np.asarray(ref), rtol=2e-4, atol=2e-5)

    print("KERNEL_OK")
</pallas_src>

<mosaic_0001>
module attributes {stable_mosaic.version = 11 : i64} {
  func.func @actor_kernel(%arg0: i32, %arg1: memref<128x25xf32, #tpu.memory_space<vmem>>, %arg2: memref<25x800xf32, #tpu.memory_space<vmem>>, %arg3: memref<1x800xf32, #tpu.memory_space<vmem>>, %arg4: memref<800x800xf32, #tpu.memory_space<vmem>>, %arg5: memref<1x800xf32, #tpu.memory_space<vmem>>, %arg6: memref<800x128xf32, #tpu.memory_space<vmem>>, %arg7: memref<1x128xf32, #tpu.memory_space<vmem>>, %arg8: memref<128x128xf32, #tpu.memory_space<vmem>>) attributes {dimension_semantics = [#tpu.dimension_semantics<parallel>], iteration_bounds = array<i64: 1>, scalar_prefetch = 0 : i64, scratch_operands = 0 : i64, tpu.core_type = #tpu.core_type<tc>, window_params = [{transform_indices = @transform_0, window_bounds = array<i64: 128, 25>}, {pipeline_mode = #tpu.pipeline_mode<synchronous>, transform_indices = @transform_1, window_bounds = array<i64: 25, 800>}, {pipeline_mode = #tpu.pipeline_mode<synchronous>, transform_indices = @transform_2, window_bounds = array<i64: 1, 800>}, {pipeline_mode = #tpu.pipeline_mode<synchronous>, transform_indices = @transform_3, window_bounds = array<i64: 800, 800>}, {pipeline_mode = #tpu.pipeline_mode<synchronous>, transform_indices = @transform_4, window_bounds = array<i64: 1, 800>}, {pipeline_mode = #tpu.pipeline_mode<synchronous>, transform_indices = @transform_5, window_bounds = array<i64: 800, 128>}, {pipeline_mode = #tpu.pipeline_mode<synchronous>, transform_indices = @transform_6, window_bounds = array<i64: 1, 128>}, {transform_indices = @transform_7, window_bounds = array<i64: 128, 128>}]} {
    %c0 = arith.constant 0 : index
    %c0_0 = arith.constant 0 : index
    %0 = vector.load %arg1[%c0, %c0_0] : memref<128x25xf32, #tpu.memory_space<vmem>>, vector<128x25xf32>
    %c0_1 = arith.constant 0 : index
    %c0_2 = arith.constant 0 : index
    %1 = vector.load %arg2[%c0_1, %c0_2] : memref<25x800xf32, #tpu.memory_space<vmem>>, vector<25x800xf32>
    %cst = arith.constant dense<0.000000e+00> : vector<128x800xf32>
    %2 = tpu.matmul %0, %1, %cst {dimension_numbers = #tpu.dot_dimension_numbers<[1], [0], [0], [1], [0, 0, 1, 1], [], []>} : vector<128x25xf32>, vector<25x800xf32>, vector<128x800xf32> -> vector<128x800xf32>
    %c0_3 = arith.constant 0 : index
    %c0_4 = arith.constant 0 : index
    %3 = vector.load %arg3[%c0_3, %c0_4] : memref<1x800xf32, #tpu.memory_space<vmem>>, vector<1x800xf32>
    %4 = vector.broadcast %3 : vector<1x800xf32> to vector<128x800xf32>
    %5 = arith.addf %2, %4 : vector<128x800xf32>
    %cst_5 = arith.constant 0.000000e+00 : f32
    %6 = vector.broadcast %cst_5 : f32 to vector<128x800xf32>
    %7 = arith.maximumf %5, %6 : vector<128x800xf32>
    %c0_6 = arith.constant 0 : index
    %c0_7 = arith.constant 0 : index
    %8 = vector.load %arg4[%c0_6, %c0_7] : memref<800x800xf32, #tpu.memory_space<vmem>>, vector<800x800xf32>
    %cst_8 = arith.constant dense<0.000000e+00> : vector<128x800xf32>
    %9 = tpu.matmul %7, %8, %cst_8 {dimension_numbers = #tpu.dot_dimension_numbers<[1], [0], [0], [1], [0, 0, 1, 1], [], []>} : vector<128x800xf32>, vector<800x800xf32>, vector<128x800xf32> -> vector<128x800xf32>
    %c0_9 = arith.constant 0 : index
    %c0_10 = arith.constant 0 : index
    %10 = vector.load %arg5[%c0_9, %c0_10] : memref<1x800xf32, #tpu.memory_space<vmem>>, vector<1x800xf32>
    %11 = vector.broadcast %10 : vector<1x800xf32> to vector<128x800xf32>
    %12 = arith.addf %9, %11 : vector<128x800xf32>
    %cst_11 = arith.constant 0.000000e+00 : f32
    %13 = vector.broadcast %cst_11 : f32 to vector<128x800xf32>
    %14 = arith.maximumf %12, %13 : vector<128x800xf32>
    %c0_12 = arith.constant 0 : index
    %c0_13 = arith.constant 0 : index
    %15 = vector.load %arg6[%c0_12, %c0_13] : memref<800x128xf32, #tpu.memory_space<vmem>>, vector<800x128xf32>
    %cst_14 = arith.constant dense<0.000000e+00> : vector<128x128xf32>
    %16 = tpu.matmul %14, %15, %cst_14 {dimension_numbers = #tpu.dot_dimension_numbers<[1], [0], [0], [1], [0, 0, 1, 1], [], []>} : vector<128x800xf32>, vector<800x128xf32>, vector<128x128xf32> -> vector<128x128xf32>
    %c0_15 = arith.constant 0 : index
    %c0_16 = arith.constant 0 : index
    %17 = vector.load %arg7[%c0_15, %c0_16] : memref<1x128xf32, #tpu.memory_space<vmem>>, vector<1x128xf32>
    %18 = vector.broadcast %17 : vector<1x128xf32> to vector<128x128xf32>
    %19 = arith.addf %16, %18 : vector<128x128xf32>
    %cst_17 = arith.constant dense<0xFF800000> : vector<128xf32>
    %20 = vector.multi_reduction <maximumf>, %19, %cst_17 [1] : vector<128x128xf32> to vector<128xf32>
    %21 = vector.shape_cast %20 : vector<128xf32> to vector<128x1xf32>
    %22 = vector.broadcast %21 : vector<128x1xf32> to vector<128x128xf32>
    %23 = arith.subf %19, %22 : vector<128x128xf32>
    %24 = math.exp %23 : vector<128x128xf32>
    %cst_18 = arith.constant dense<0.000000e+00> : vector<128xf32>
    %25 = vector.multi_reduction <add>, %24, %cst_18 [1] : vector<128x128xf32> to vector<128xf32>
    %26 = vector.shape_cast %25 : vector<128xf32> to vector<128x1xf32>
    %27 = vector.broadcast %26 : vector<128x1xf32> to vector<128x128xf32>
    %28 = arith.divf %24, %27 : vector<128x128xf32>
    %c0_19 = arith.constant 0 : index
    %c0_20 = arith.constant 0 : index
    %29 = vector.load %arg8[%c0_19, %c0_20] : memref<128x128xf32, #tpu.memory_space<vmem>>, vector<128x128xf32>
    tpu.vector_store %arg8[%c0_19, %c0_20], %28 {strides = array<i32>} : memref<128x128xf32, #tpu.memory_space<vmem>>, vector<128x128xf32>,
    return
  }
  func.func @transform_0(%arg0: i32) -> (i32, i32) {
    %c0_i32 = arith.constant 0 : i32
    %c0_i32_0 = arith.constant 0 : i32
    return %arg0, %c0_i32 : i32, i32
  }
  func.func @transform_1(%arg0: i32) -> (i32, i32) {
    %c0_i32 = arith.constant 0 : i32
    %c0_i32_0 = arith.constant 0 : i32
    %c0_i32_1 = arith.constant 0 : i32
    return %c0_i32, %c0_i32_0 : i32, i32
  }
  func.func @transform_2(%arg0: i32) -> (i32, i32) {
    %c0_i32 = arith.constant 0 : i32
    %c0_i32_0 = arith.constant 0 : i32
    %c0_i32_1 = arith.constant 0 : i32
    return %c0_i32, %c0_i32_0 : i32, i32
  }
  func.func @transform_3(%arg0: i32) -> (i32, i32) {
    %c0_i32 = arith.constant 0 : i32
    %c0_i32_0 = arith.constant 0 : i32
    %c0_i32_1 = arith.constant 0 : i32
    return %c0_i32, %c0_i32_0 : i32, i32
  }
  func.func @transform_4(%arg0: i32) -> (i32, i32) {
    %c0_i32 = arith.constant 0 : i32
    %c0_i32_0 = arith.constant 0 : i32
    %c0_i32_1 = arith.constant 0 : i32
    return %c0_i32, %c0_i32_0 : i32, i32
  }
  func.func @transform_5(%arg0: i32) -> (i32, i32) {
    %c0_i32 = arith.constant 0 : i32
    %c0_i32_0 = arith.constant 0 : i32
    %c0_i32_1 = arith.constant 0 : i32
    return %c0_i32, %c0_i32_0 : i32, i32
  }
  func.func @transform_6(%arg0: i32) -> (i32, i32) {
    %c0_i32 = arith.constant 0 : i32
    %c0_i32_0 = arith.constant 0 : i32
    %c0_i32_1 = arith.constant 0 : i32
    return %c0_i32, %c0_i32_0 : i32, i32
  }
  func.func @transform_7(%arg0: i32) -> (i32, i32) {
    %c0_i32 = arith.constant 0 : i32
    %c0_i32_0 = arith.constant 0 : i32
    return %arg0, %c0_i32 : i32, i32
  }
}

</mosaic_0001>

<bundles_post_ra>
// kernel: tpu_custom_call.1
= control target key start
LH: loop header
LB: loop body
LE: loop exit
PB: predicated region body
PF: predicated region fallthrough
CT: control target
= control target key end

     0   :  { %12 = vsyncpa [#allocation3], 0  ;;  %s9721_s0 = inlined_call_operand.vmem [shape: f32[128,25], index: 0, kind: input, shape index: {}]   ;;  %s9722_s1 = inlined_call_operand.hbm [shape: f32[25,800], index: 1, kind: input, shape index: {}]   ;;  %s9723_s2 = inlined_call_operand.hbm [shape: f32[1,800], index: 2, kind: input, shape index: {}]   ;;  %s9724_s3 = inlined_call_operand.hbm [shape: f32[800,800], index: 3, kind: input, shape index: {}]   ;;  %s9725_s4 = inlined_call_operand.hbm [shape: f32[1,800], index: 4, kind: input, shape index: {}]   ;;  %s9726_s5 = inlined_call_operand.hbm [shape: f32[800,128], index: 5, kind: input, shape index: {}]   ;;  %s9727_s6 = inlined_call_operand.hbm [shape: f32[1,128], index: 6, kind: input, shape index: {}]   ;;  %s9728_s7 = inlined_call_operand.hbm [shape: f32[128,128], index: 7, kind: output, shape index: {}]  }
   0x1   :  { %13 = vsyncpa [#allocation6], 0 }
   0x2   :  { %14 = vsyncpa [#allocation9], 0 }
   0x3   :  { %15 = vsyncpa [#allocation12], 0  ;;  %s37_s26 = sshll.u32 %s9723_s2, 4  ;;  %s38_s26 = int_to_ptr.hbm [resolvable:$true] %s37_s26 }
   0x4   :  { %16 = vsyncpa [#allocation4], 0  ;;  %s6390_s27 = smov [#allocation5]   ;;  %s61_s8 = sshll.u32 %s9725_s4, 4  ;;  %s62_s8 = int_to_ptr.hbm [resolvable:$true] %s61_s8 }
   0x5   :  { %s39_s28 = sshll.u32 %s6390_s27, 4  ;;  %s6391_s9 = smov [#allocation8]   ;;  %s40_s28 = int_to_ptr.vmem [resolvable:$true] %s39_s28 }
   0x6   :  { %42 = dma.hbm_to_vmem [thread:$0]  %s38_s26, 112, %s40_s28, [#allocation6]  }
   0x7   :  { %s63_s10 = sshll.u32 %s6391_s9, 4  ;;  %s23_s13 = sshll.u32 %s9722_s1, 4  ;;  %s64_s10 = int_to_ptr.vmem [resolvable:$true] %s63_s10  ;;  %s24_s13 = int_to_ptr.hbm [resolvable:$true] %s23_s13 }
   0x8   :  { %66 = dma.hbm_to_vmem [thread:$0]  %s62_s8, 112, %s64_s10, [#allocation9]  }
   0x9   :  { %s6392_s2 = smov [#allocation2]   ;;  %s47_s17 = sshll.u32 %s9724_s3, 4  ;;  %s48_s17 = int_to_ptr.hbm [resolvable:$true] %s47_s17 }
   0xa   :  { %s25_s14 = sshll.u32 %s6392_s2, 4  ;;  %s6393_s18 = smov 896   ;;  %s26_s14 = int_to_ptr.vmem [resolvable:$true] %s25_s14 }
   0xb   :  { %s6394_s4 = smov 56   ;;  %s6395_s19 = smov [#allocation7]  }
   0xc   :  { %31 = dma.hbm_to_vmem [thread:$0]  %s24_s13, 3584, %s26_s14, [#allocation3], %s6393_s18, %s6393_s18, %s6394_s4  }
   0xd   :  { %s49_s20 = sshll.u32 %s6395_s19, 4  ;;  %s71_s1 = sshll.u32 %s9726_s5, 4  ;;  %s50_s20 = int_to_ptr.vmem [resolvable:$true] %s49_s20  ;;  %s72_s1 = int_to_ptr.hbm [resolvable:$true] %s71_s1 }
   0xe   :  { %55 = dma.hbm_to_vmem [thread:$0]  %s48_s17, 89600, %s50_s20, [#allocation6], %s6393_s18, %s6393_s18, %s6394_s4  }
   0xf   :  { %s6396_s23 = smov [#allocation10]   ;;  %s85_s3 = sshll.u32 %s9727_s6, 4  ;;  %s86_s3 = int_to_ptr.hbm [resolvable:$true] %s85_s3 }
  0x10   :  { %s73_s24 = sshll.u32 %s6396_s23, 4  ;;  %s6397_s27 = smov 128   ;;  %s74_s24 = int_to_ptr.vmem [resolvable:$true] %s73_s24 }
  0x11   :  { %s6398_s28 = smov 8   ;;  %s6399_s29 = smov [#allocation11]  }
  0x12   :  { %79 = dma.hbm_to_vmem [thread:$0]  %s72_s1, 12800, %s74_s24, [#allocation9], %s6397_s27, %s6397_s27, %s6398_s28  }
  0x13   :  { %s87_s30 = sshll.u32 %s6399_s29, 4  ;;  %s88_s30 = int_to_ptr.vmem [resolvable:$true] %s87_s30 }
  0x14   :  { %90 = dma.hbm_to_vmem [thread:$0]  %s86_s3, 16, %s88_s30, [#allocation12]  }
  0x15   :  { %6380 = dma.done.wait [#allocation3], 3584  }
  0x16   :  { %6381 = vsyncadd [#allocation3], 4294963712 }
  0x17   :  { %6382 = dma.done.wait [#allocation6], 89712  }
  0x18   :  { %6383 = vsyncadd [#allocation6], 4294877584 }
  0x19   :  { %6384 = dma.done.wait [#allocation9], 12912  }
  0x1a   :  { %6385 = vsyncadd [#allocation9], 4294954384 }
  0x1b   :  { %6386 = dma.done.wait [#allocation12], 16  }
  0x1c   :  { %6387 = vsyncadd [#allocation12], 4294967280  ;;  %vm224_vm0 = vcmask 1040384   ;;  %v152_v0 = vld [vmem:[#allocation2 + $0xa8] sm:$0x1]  ;;  %v145_v2 = vld [vmem:[#allocation2 + $0x70] sm:$0xff] }
  0x1d   :  { %v153_v1 = vld [vmem:[#allocation2 + $0xb0] sm:$0x1]  ;;  %5872 = vmatpush.msk.msra.mxu0 %vm224_vm0, %v152_v0  ;;  %6119 = vmatpush.msk.msra.mxu3 %vm224_vm0, %v152_v0  ;;  %v146_v3 = vld [vmem:[#allocation2 + $0x78] sm:$0xff]  ;;  %v139_v5 = vld [vmem:[#allocation2 + $0x40] sm:$0xff]  ;;  %vm175_vm1 = vcmask 203776   ;;  %vm1529_vm2 = vcmask 261120  }
  0x1e   :  { %5889 = vmatpush.msk.msra.mxu1 %vm224_vm0, %v153_v1  ;;  %v138_v4 = vld [vmem:[#allocation2 + $0x38] sm:$0xff]  ;;  %v147_v7 = vld [vmem:[#allocation2 + $0x80] sm:$0xff]  ;;  %v132_v9 = vld [vmem:[#allocation2 + $0x8] sm:$0xff]  ;;  %s5856_s2 = sshll.u32 %s9728_s7, 4  ;;  %s5857_s2 = int_to_ptr.hbm [resolvable:$true] %s5856_s2 }
  0x1f   :  { %259 = vmatpush.msra.mxu0 %v145_v2  ;;  %6120 = vmatpush.msra.mxu3 %v145_v2  ;;  %v154_v6 = vld [vmem:[#allocation2 + $0xb8] sm:$0x1]  ;;  %v131_v8 = vld [vmem:[#allocation2] sm:$0xff]  ;;  %v140_v12 = vld [vmem:[#allocation2 + $0x48] sm:$0xff] }
  0x20   :  { %324 = vmatpush.msra.mxu1 %v146_v3  ;;  %5906 = vmatpush.msk.msra.mxu2 %vm224_vm0, %v154_v6  ;;  %v6469_v10 = vld [vmem:[%s9721_s0] sm:$0xff]  ;;  %v156_v13 = vld [vmem:[#allocation2 + $0xc8] sm:$0x1]  ;;  %v157_v14 = vld [vmem:[#allocation2 + $0xd0] sm:$0x1] }
  0x21   :  { %260 = vmatpush.msra.mxu0 %v138_v4  ;;  %6121 = vmatpush.msra.mxu3 %v138_v4  ;;  %v6474_v11 = vld [vmem:[%s9721_s0 + $0x60] sm:$0xff]  ;;  %v133_v15 = vld [vmem:[#allocation2 + $0x10] sm:$0xff]  ;;  %v158_v17 = vld [vmem:[#allocation2 + $0xd8] sm:$0x1] }
  0x22   :  { %325 = vmatpush.msra.mxu1 %v139_v5  ;;  %389 = vmatpush.msra.mxu2 %v147_v7  ;;  %v149_v16 = vld [vmem:[#allocation2 + $0x90] sm:$0xff]  ;;  %v150_v18 = vld [vmem:[#allocation2 + $0x98] sm:$0xff]  ;;  %v6488_v19 = vld [vmem:[%s9721_s0 + $0x8] sm:$0xff] }
  0x23   :  { %261 = vmatpush.msra.mxu0 %v131_v8  ;;  %6122 = vmatpush.msra.mxu3 %v131_v8  ;;  %v6495_v20 = vld [vmem:[%s9721_s0 + $0x68] sm:$0xff]  ;;  %v151_v21 = vld [vmem:[#allocation2 + $0xa0] sm:$0xff]  ;;  %v6508_v22 = vld [vmem:[%s9721_s0 + $0x10] sm:$0xff] }
  0x24   :  { %326 = vmatpush.msra.mxu1 %v132_v9  ;;  %5873 = vmatmul.msk.f32.vlgmr.msra.gmra.mxu0 %vm175_vm1, %v6469_v10  ;;  %v6515_v23 = vld [vmem:[%s9721_s0 + $0x70] sm:$0xff]  ;;  %v6526_v24 = vld [vmem:[%s9721_s0 + $0x18] sm:$0xff]  ;;  %v144_v26 = vld [vmem:[#allocation2 + $0x68] sm:$0xff] }
  0x25   :  { %5885 = vmatmul.msk.f32.vlgmr.msra.gmra.mxu3 %vm175_vm1, %v6474_v11  ;;  %5890 = vmatmul.msk.f32.vlgmr.msra.gmra.mxu1 %vm175_vm1, %v6469_v10  ;;  %v6533_v25 = vld [vmem:[%s9721_s0 + $0x78] sm:$0xff]  ;;  %v143_v28 = vld [vmem:[#allocation2 + $0x60] sm:$0xff]  ;;  %v6558_v31 = vld [vmem:[%s9721_s0 + $0x28] sm:$0xff] }
  0x26   :  { %6123 = vmatpush.msk.msrb.mxu3 %vm224_vm0, %v153_v1  ;;  %390 = vmatpush.msra.mxu2 %v140_v12  ;;  %v142_v27 = vld [vmem:[#allocation2 + $0x58] sm:$0xff]  ;;  %v6544_v29 = vld [vmem:[%s9721_s0 + $0x20] sm:$0xff]  ;;  %v148_v32 = vld [vmem:[#allocation2 + $0x88] sm:$0xff] }
  0x27   :  { %5940 = vmatpush.msk.msrb.mxu0 %vm224_vm0, %v156_v13  ;;  %5957 = vmatpush.msk.msrb.mxu1 %vm224_vm0, %v157_v14  ;;  %v155_v30 = vld [vmem:[#allocation2 + $0xc0] sm:$0x1]  ;;  %v6571_v33 = vld [vmem:[%s9721_s0 + $0x30] sm:$0xff]  ;;  %v136_v37 = vld [vmem:[#allocation2 + $0x28] sm:$0xff] }
  0x28   :  { %391 = vmatpush.msra.mxu2 %v133_v15  ;;  %6124 = vmatpush.msrb.mxu3 %v146_v3  ;;  %v141_v34 = vld [vmem:[#allocation2 + $0x50] sm:$0xff]  ;;  %v135_v36 = vld [vmem:[#allocation2 + $0x20] sm:$0xff]  ;;  %v6584_v38 = vld [vmem:[%s9721_s0 + $0x38] sm:$0xff] }
  0x29   :  { %5907 = vmatmul.msk.f32.vlgmr.msra.gmra.mxu2 %vm175_vm1, %v6469_v10  ;;  %519 = vmatpush.msrb.mxu0 %v149_v16  ;;  %v137_v35 = vld [vmem:[#allocation2 + $0x30] sm:$0xff]  ;;  %v134_v39 = vld [vmem:[#allocation2 + $0x18] sm:$0xff]  ;;  %v6597_v40 = vld [vmem:[%s9721_s0 + $0x40] sm:$0xff] }
  0x2a   :  { %5974 = vmatpush.msk.msrb.mxu2 %vm224_vm0, %v158_v17  ;;  %6125 = vmatpush.msrb.mxu3 %v139_v5  ;;  %v918_v41 = vld [vmem:[#allocation7 + $0x348] sm:$0xff]  ;;  %v6610_v42 = vld [vmem:[%s9721_s0 + $0x48] sm:$0xff]  ;;  %v911_v43 = vld [vmem:[#allocation7 + $0x310] sm:$0xff] }
  0x2b   :  { %584 = vmatpush.msrb.mxu1 %v150_v18  ;;  %520 = vmatpush.msrb.mxu0 %v142_v27  ;;  %v1254_v44 = vld [vmem:[#allocation7 + $0xdc8] sm:$0xff]  ;;  %v904_v48 = vld [vmem:[#allocation7 + $0x2d8] sm:$0xff]  ;;  %v1247_v49 = vld [vmem:[#allocation7 + $0xd90] sm:$0xff] }
  0x2c   :  { %5874 = vmatmul.msk.f32.gmra.mxu0 %vm175_vm1, %v6488_v19  ;;  %6126 = vmatpush.msrb.mxu3 %v132_v9  ;;  %v1030_v45 = vld [vmem:[#allocation7 + $0x6c8] sm:$0xff]  ;;  %v1023_v50 = vld [vmem:[#allocation7 + $0x690] sm:$0xff]  ;;  %v897_v53 = vld [vmem:[#allocation7 + $0x2a0] sm:$0xff] }
  0x2d   :  { %5886 = vmatmul.msk.f32.gmra.mxu3 %vm175_vm1, %v6495_v20  ;;  %5891 = vmatmul.msk.f32.gmra.mxu1 %vm175_vm1, %v6488_v19  ;;  %v1142_v46 = vld [vmem:[#allocation7 + $0xa48] sm:$0xff]  ;;  %v1135_v51 = vld [vmem:[#allocation7 + $0xa10] sm:$0xff]  ;;  %v1240_v54 = vld [vmem:[#allocation7 + $0xd58] sm:$0xff] }
  0x2e   :  { %6127 = vmatpush.msk.msra.mxu3 %vm224_vm0, %v154_v6  ;;  %649 = vmatpush.msrb.mxu2 %v151_v21  ;;  %v6623_v47 = vld [vmem:[%s9721_s0 + $0x50] sm:$0xff]  ;;  %v6636_v52 = vld [vmem:[%s9721_s0 + $0x58] sm:$0xff]  ;;  %v1016_v55 = vld [vmem:[#allocation7 + $0x658] sm:$0xff]  ;;  %s6400_s0 = smov [#allocation13]  }
  0x2f   :  { %585 = vmatpush.msrb.mxu1 %v143_v28  ;;  %521 = vmatpush.msrb.mxu0 %v135_v36  ;;  %v1128_v56 = vld [vmem:[#allocation7 + $0x9d8] sm:$0xff]  ;;  %v890_v57 = vld [vmem:[#allocation7 + $0x268] sm:$0xff]  ;;  %v1233_v58 = vld [vmem:[#allocation7 + $0xd20] sm:$0xff]  ;;  %s5854_s11 = sshll.u32 %s6400_s0, 4  ;;  %s5855_s11 = int_to_ptr.vmem [resolvable:$true] %s5854_s11 }
  0x30   :  { %6128 = vmatpush.msra.mxu3 %v147_v7  ;;  %650 = vmatpush.msrb.mxu2 %v144_v26  ;;  %v1009_v59 = vld [vmem:[#allocation7 + $0x620] sm:$0xff]  ;;  %v883_v61 = vld [vmem:[#allocation7 + $0x230] sm:$0xff]  ;;  %v1226_v62 = vld [vmem:[#allocation7 + $0xce8] sm:$0xff] }
  0x31   :  { %5908 = vmatmul.msk.f32.gmra.mxu2 %vm175_vm1, %v6488_v19  ;;  %586 = vmatpush.msrb.mxu1 %v136_v37  ;;  %v1121_v60 = vld [vmem:[#allocation7 + $0x9a0] sm:$0xff]  ;;  %v1002_v63 = vld [vmem:[#allocation7 + $0x5e8] sm:$0xff]  ;;  %v876_v1 = vld [vmem:[#allocation7 + $0x1f8] sm:$0xff] }
  0x32   :  { %6129 = vmatpush.msra.mxu3 %v140_v12  ;;  %651 = vmatpush.msrb.mxu2 %v137_v35  ;;  %v1114_v0 = vld [vmem:[#allocation7 + $0x968] sm:$0xff]  ;;  %v1219_v2 = vld [vmem:[#allocation7 + $0xcb0] sm:$0xff]  ;;  %v869_v5 = vld [vmem:[#allocation7 + $0x1c0] sm:$0xff] }
  0x33   :  { %1643 = vmatpush.msra.mxu0 %v1030_v45  ;;  %1708 = vmatpush.msra.mxu1 %v1142_v46  ;;  %v995_v3 = vld [vmem:[#allocation7 + $0x5b0] sm:$0xff]  ;;  %v1212_v6 = vld [vmem:[#allocation7 + $0xc78] sm:$0xff]  ;;  %v862_v12 = vld [vmem:[#allocation7 + $0x188] sm:$0xff] }
  0x34   :  { %5875 = vmatmul.msk.f32.gmra.mxu0 %vm175_vm1, %v6508_v22  ;;  %6130 = vmatpush.msra.mxu3 %v133_v15  ;;  %v1107_v4 = vld [vmem:[#allocation7 + $0x930] sm:$0xff]  ;;  %v988_v7 = vld [vmem:[#allocation7 + $0x578] sm:$0xff]  ;;  %v1205_v13 = vld [vmem:[#allocation7 + $0xc40] sm:$0xff] }
  0x35   :  { %5887 = vmatmul.msk.f32.gmra.mxu3 %vm175_vm1, %v6515_v23  ;;  %5892 = vmatmul.msk.f32.gmra.mxu1 %vm175_vm1, %v6508_v22  ;;  %v981_v14 = vld [vmem:[#allocation7 + $0x540] sm:$0xff]  ;;  %v855_v21 = vld [vmem:[#allocation7 + $0x150] sm:$0xff]  ;;  %v960_v45 = vld [vmem:[#allocation7 + $0x498] sm:$0xff] }
  0x36   :  { %1773 = vmatpush.msra.mxu2 %v1254_v44  ;;  %1644 = vmatpush.msra.mxu0 %v1023_v50  ;;  %v1093_v18 = vld [vmem:[#allocation7 + $0x8c0] sm:$0xff]  ;;  %v967_v35 = vld [vmem:[#allocation7 + $0x4d0] sm:$0xff]  ;;  %v1184_v44 = vld [vmem:[#allocation7 + $0xb98] sm:$0xff] }
  0x37   :  { %1709 = vmatpush.msra.mxu1 %v1135_v51  ;;  %v834_v51 = vld [vmem:[#allocation7 + $0xa8] sm:$0xff] }
  0x38   :  { %1774 = vmatpush.msra.mxu2 %v1247_v49  ;;  %1645 = vmatpush.msra.mxu0 %v1016_v55  ;;  %v1072_v49 = vld [vmem:[#allocation7 + $0x818] sm:$0xff] }
  0x39   :  { %5909 = vmatmul.msk.f32.gmra.mxu2 %vm175_vm1, %v6508_v22  ;;  %1710 = vmatpush.msra.mxu1 %v1128_v56 }
  0x3a   :  { %1775 = vmatpush.msra.mxu2 %v1240_v54  ;;  %1646 = vmatpush.msra.mxu0 %v1009_v59  ;;  %v953_v54 = vld [vmem:[#allocation7 + $0x460] sm:$0xff]  ;;  %v827_v59 = vld [vmem:[#allocation7 + $0x70] sm:$0xff] }
  0x3b   :  { %1711 = vmatpush.msra.mxu1 %v1121_v60  ;;  %v1170_v60 = vld [vmem:[#allocation7 + $0xb28] sm:$0xff] }
  0x3c   :  { %5876 = vmatmul.msk.f32.gmra.mxu0 %vm175_vm1, %v6526_v24  ;;  %1776 = vmatpush.msra.mxu2 %v1233_v58 }
  0x3d   :  { %5888 = vmatmul.msk.f32.gmra.mxu3 %vm175_vm1, %v6533_v25  ;;  %5893 = vmatmul.msk.f32.gmra.mxu1 %vm175_vm1, %v6526_v24 }
  0x3e   :  { %1777 = vmatpush.msra.mxu2 %v1226_v62  ;;  %1647 = vmatpush.msra.mxu0 %v1002_v63 }
  0x3f   :  { %1712 = vmatpush.msra.mxu1 %v1114_v0  ;;  %v1058_v0 = vld [vmem:[#allocation7 + $0x7a8] sm:$0xff] }
  0x40   :  { %1778 = vmatpush.msra.mxu2 %v1219_v2  ;;  %1648 = vmatpush.msra.mxu0 %v995_v3  ;;  %v820_v2 = vld [vmem:[#allocation7 + $0x38] sm:$0xff]  ;;  %v1163_v3 = vld [vmem:[#allocation7 + $0xaf0] sm:$0xff] }
  0x41   :  { %5910 = vmatmul.msk.f32.gmra.mxu2 %vm175_vm1, %v6526_v24  ;;  %1713 = vmatpush.msra.mxu1 %v1107_v4  ;;  %v939_v4 = vld [vmem:[#allocation7 + $0x3f0] sm:$0xff] }
  0x42   :  { %1779 = vmatpush.msra.mxu2 %v1212_v6  ;;  %1649 = vmatpush.msra.mxu0 %v988_v7  ;;  %v1051_v7 = vld [vmem:[#allocation7 + $0x770] sm:$0xff] }
  0x44   :  { %5877 = vmatmul.msk.f32.gmra.mxu0 %vm175_vm1, %v6544_v29  ;;  %1780 = vmatpush.msra.mxu2 %v1205_v13  ;;  %v1156_v13 = vld [vmem:[#allocation7 + $0xab8] sm:$0xff] }
  0x45   :  { %5894 = vmatmul.msk.f32.gmra.mxu1 %vm175_vm1, %v6544_v29  ;;  %5902 = vmatmul.msk.f32.vlgmr.msrb.gmra.mxu3 %vm175_vm1, %v6474_v11 }
  0x46   :  { %5923 = vmatpush.msk.msrb.mxu3 %vm224_vm0, %v155_v30  ;;  %1650 = vmatpush.msra.mxu0 %v981_v14  ;;  %v932_v14 = vld [vmem:[#allocation7 + $0x3b8] sm:$0xff] }
  0x48   :  { %454 = vmatpush.msrb.mxu3 %v148_v32  ;;  %v848_v32 = vld [vmem:[#allocation7 + $0x118] sm:$0xff] }
  0x49   :  { %5911 = vmatmul.msk.f32.gmra.mxu2 %vm175_vm1, %v6544_v29 }
  0x4a   :  { %455 = vmatpush.msrb.mxu3 %v141_v34  ;;  %v1191_v34 = vld [vmem:[#allocation7 + $0xbd0] sm:$0xff] }
  0x4c   :  { %5878 = vmatmul.msk.f32.gmra.mxu0 %vm175_vm1, %v6558_v31  ;;  %456 = vmatpush.msrb.mxu3 %v134_v39  ;;  %v1079_v39 = vld [vmem:[#allocation7 + $0x850] sm:$0xff] }
  0x4d   :  { %5895 = vmatmul.msk.f32.gmra.mxu1 %vm175_vm1, %v6558_v31  ;;  %5903 = vmatmul.msk.f32.gmra.mxu3 %vm175_vm1, %v6495_v20 }
  0x51   :  { %5912 = vmatmul.msk.f32.gmra.mxu2 %vm175_vm1, %v6558_v31 }
  0x54   :  { %5879 = vmatmul.msk.f32.gmra.mxu0 %vm175_vm1, %v6571_v33 }
  0x55   :  { %5896 = vmatmul.msk.f32.gmra.mxu1 %vm175_vm1, %v6571_v33  ;;  %5904 = vmatmul.msk.f32.gmra.mxu3 %vm175_vm1, %v6515_v23 }
  0x59   :  { %5913 = vmatmul.msk.f32.gmra.mxu2 %vm175_vm1, %v6571_v33 }
  0x5c   :  { %5880 = vmatmul.msk.f32.gmra.mxu0 %vm175_vm1, %v6584_v38 }
  0x5d   :  { %5897 = vmatmul.msk.f32.gmra.mxu1 %vm175_vm1, %v6584_v38  ;;  %5905 = vmatmul.msk.f32.gmra.mxu3 %vm175_vm1, %v6533_v25 }
  0x61   :  { %5914 = vmatmul.msk.f32.gmra.mxu2 %vm175_vm1, %v6584_v38 }
  0x64   :  { %5881 = vmatmul.msk.f32.gmra.mxu0 %vm175_vm1, %v6597_v40 }
  0x65   :  { %5898 = vmatmul.msk.f32.gmra.mxu1 %vm175_vm1, %v6597_v40  ;;  %5919 = vmatmul.msk.f32.vlgmr.msra.gmra.mxu3 %vm175_vm1, %v6474_v11 }
  0x66   :  { %1578 = vmatpush.msra.mxu3 %v918_v41 }
  0x68   :  { %1579 = vmatpush.msra.mxu3 %v911_v43  ;;  %v841_v43 = vld [vmem:[#allocation7 + $0xe0] sm:$0xff] }
  0x69   :  { %5915 = vmatmul.msk.f32.gmra.mxu2 %vm175_vm1, %v6597_v40 }
  0x6a   :  { %1580 = vmatpush.msra.mxu3 %v904_v48 }
  0x6c   :  { %5882 = vmatmul.msk.f32.gmra.mxu0 %vm175_vm1, %v6610_v42  ;;  %1581 = vmatpush.msra.mxu3 %v897_v53  ;;  %v1177_v53 = vld [vmem:[#allocation7 + $0xb60] sm:$0xff] }
  0x6d   :  { %5899 = vmatmul.msk.f32.gmra.mxu1 %vm175_vm1, %v6610_v42  ;;  %5920 = vmatmul.msk.f32.gmra.mxu3 %vm175_vm1, %v6495_v20 }
  0x6e   :  { %1582 = vmatpush.msra.mxu3 %v890_v57  ;;  %v1065_v57 = vld [vmem:[#allocation7 + $0x7e0] sm:$0xff] }
  0x70   :  { %1583 = vmatpush.msra.mxu3 %v883_v61  ;;  %v946_v61 = vld [vmem:[#allocation7 + $0x428] sm:$0xff] }
  0x71   :  { %5916 = vmatmul.msk.f32.gmra.mxu2 %vm175_vm1, %v6610_v42 }
  0x72   :  { %1584 = vmatpush.msra.mxu3 %v876_v1 }
  0x74   :  { %5883 = vmatmul.msk.f32.gmra.mxu0 %vm175_vm1, %v6623_v47  ;;  %1585 = vmatpush.msra.mxu3 %v869_v5 }
  0x75   :  { %5900 = vmatmul.msk.f32.gmra.mxu1 %vm175_vm1, %v6623_v47  ;;  %5921 = vmatmul.msk.f32.gmra.mxu3 %vm175_vm1, %v6515_v23 }
  0x76   :  { %1586 = vmatpush.msra.mxu3 %v862_v12  ;;  %v813_v12 = vld [vmem:[#allocation7] sm:$0xff] }
  0x78   :  { %1587 = vmatpush.msra.mxu3 %v855_v21  ;;  %v1044_v21 = vld [vmem:[#allocation7 + $0x738] sm:$0xff] }
  0x79   :  { %5917 = vmatmul.msk.f32.gmra.mxu2 %vm175_vm1, %v6623_v47 }
  0x7a   :  { %1588 = vmatpush.msra.mxu3 %v848_v32 }
  0x7c   :  { %5884 = vmatmul.msk.f32.gmra.mxu0 %vm175_vm1, %v6636_v52  ;;  %1589 = vmatpush.msra.mxu3 %v841_v43 }
  0x7d   :  { %5901 = vmatmul.msk.f32.gmra.mxu1 %vm175_vm1, %v6636_v52  ;;  %5922 = vmatmul.msk.f32.gmra.mxu3 %vm175_vm1, %v6533_v25 }
  0x7e   :  { %1590 = vmatpush.msra.mxu3 %v834_v51  ;;  %v1478_v51 = vld [vmem:[#allocation7 + $0x14c8] sm:$0xff] }
  0x80   :  { %1591 = vmatpush.msra.mxu3 %v827_v59 }
  0x81   :  { %5918 = vmatmul.msk.f32.gmra.mxu2 %vm175_vm1, %v6636_v52 }
  0x82   :  { %1592 = vmatpush.msra.mxu3 %v820_v2  ;;  %v6852_v2 = vld [vmem:[#allocation5] sm:$0x7f] }
  0x84   :  { %5941 = vmatmul.msk.f32.vlgmr.msrb.gmra.mxu0 %vm175_vm1, %v6469_v10  ;;  %1593 = vmatpush.msra.mxu3 %v813_v12  ;;  %v6864_v12 = vperm.slane %v6852_v2, 2 }
  0x85   :  { %5924 = vmatmul.msk.f32.vlgmr.msrb.gmra.mxu3 %vm175_vm1, %v6469_v10  ;;  %5958 = vmatmul.msk.f32.vlgmr.msrb.gmra.mxu1 %vm175_vm1, %v6469_v10 }
  0x89   :  { %5975 = vmatmul.msk.f32.vlgmr.msrb.gmra.mxu2 %vm175_vm1, %v6469_v10  ;;  %v1100_v10 = vld [vmem:[#allocation7 + $0x8f8] sm:$0xff] }
  0x8a   :  { %1714 = vmatpush.msra.mxu1 %v1100_v10 }
  0x8c   :  { %5942 = vmatmul.msk.f32.gmra.mxu0 %vm175_vm1, %v6488_v19  ;;  %1715 = vmatpush.msra.mxu1 %v1093_v18 }
  0x8d   :  { %5925 = vmatmul.msk.f32.gmra.mxu3 %vm175_vm1, %v6488_v19  ;;  %5959 = vmatmul.msk.f32.gmra.mxu1 %vm175_vm1, %v6488_v19 }
  0x91   :  { %5976 = vmatmul.msk.f32.gmra.mxu2 %vm175_vm1, %v6488_v19 }
  0x94   :  { %5943 = vmatmul.msk.f32.gmra.mxu0 %vm175_vm1, %v6508_v22 }
  0x95   :  { %5926 = vmatmul.msk.f32.gmra.mxu3 %vm175_vm1, %v6508_v22  ;;  %5960 = vmatmul.msk.f32.gmra.mxu1 %vm175_vm1, %v6508_v22 }
  0x99   :  { %5977 = vmatmul.msk.f32.gmra.mxu2 %vm175_vm1, %v6508_v22  ;;  %v1198_v22 = vld [vmem:[#allocation7 + $0xc08] sm:$0xff] }
  0x9a   :  { %1781 = vmatpush.msra.mxu2 %v1198_v22 }
  0x9c   :  { %5944 = vmatmul.msk.f32.gmra.mxu0 %vm175_vm1, %v6526_v24  ;;  %1782 = vmatpush.msra.mxu2 %v1191_v34  ;;  %v1149_v34 = vld [vmem:[#allocation7 + $0xa80] sm:$0xff] }
  0x9d   :  { %5927 = vmatmul.msk.f32.gmra.mxu3 %vm175_vm1, %v6526_v24  ;;  %5961 = vmatmul.msk.f32.gmra.mxu1 %vm175_vm1, %v6526_v24 }
  0x9e   :  { %1783 = vmatpush.msra.mxu2 %v1184_v44 }
  0xa0   :  { %1784 = vmatpush.msra.mxu2 %v1177_v53 }
  0xa1   :  { %v6678_v8 = vpop.f32.mrf.mxu0  ;;  %5978 = vmatmul.msk.f32.gmra.mxu2 %vm175_vm1, %v6526_v24  ;;  %v974_v24 = vld [vmem:[#allocation7 + $0x508] sm:$0xff] }
  0xa2   :  { %v6682_v9 = vpop.f32.mrf.mxu1  ;;  %1651 = vmatpush.msra.mxu0 %v974_v24  ;;  %1785 = vmatpush.msra.mxu2 %v1170_v60  ;;  %v925_v24 = vld [vmem:[#allocation7 + $0x380] sm:$0xff]  ;;  %v1352_v60 = vld [vmem:[#allocation7 + $0x10d8] sm:$0xff] }
  0xa4   :  { %5945 = vmatmul.msk.f32.gmra.mxu0 %vm175_vm1, %v6544_v29  ;;  %1786 = vmatpush.msra.mxu2 %v1163_v3 }
  0xa5   :  { %5928 = vmatmul.msk.f32.gmra.mxu3 %vm175_vm1, %v6544_v29  ;;  %5962 = vmatmul.msk.f32.gmra.mxu1 %vm175_vm1, %v6544_v29 }
  0xa6   :  { %1652 = vmatpush.msra.mxu0 %v967_v35  ;;  %1787 = vmatpush.msra.mxu2 %v1156_v13 }
  0xa8   :  { %v6690_v15 = vpop.f32.mrf.mxu3  ;;  %1653 = vmatpush.msra.mxu0 %v960_v45  ;;  %1788 = vmatpush.msra.mxu2 %v1149_v34  ;;  %v1359_v45 = vld [vmem:[#allocation7 + $0x1110] sm:$0xff] }
  0xa9   :  { %v6692_v16 = vpop.f32.mrf.mxu0  ;;  %5979 = vmatmul.msk.f32.gmra.mxu2 %vm175_vm1, %v6544_v29  ;;  %v1086_v29 = vld [vmem:[#allocation7 + $0x888] sm:$0xff] }
  0xaa   :  { %v6696_v17 = vpop.f32.mrf.mxu1  ;;  %1716 = vmatpush.msra.mxu1 %v1086_v29  ;;  %1654 = vmatpush.msra.mxu0 %v953_v54  ;;  %v1037_v29 = vld [vmem:[#allocation7 + $0x700] sm:$0xff] }
  0xac   :  { %5946 = vmatmul.msk.f32.gmra.mxu0 %vm175_vm1, %v6558_v31  ;;  %v6700_v19 = vpop.f32.mrf.mxu2  ;;  %1717 = vmatpush.msra.mxu1 %v1079_v39 }
  0xad   :  { %5929 = vmatmul.msk.f32.gmra.mxu3 %vm175_vm1, %v6558_v31  ;;  %5963 = vmatmul.msk.f32.gmra.mxu1 %vm175_vm1, %v6558_v31 }
  0xae   :  { %1718 = vmatpush.msra.mxu1 %v1072_v49  ;;  %1655 = vmatpush.msra.mxu0 %v946_v61  ;;  %v919_v49 = vld [vmem:[#allocation7 + $0x350] sm:$0xff]  ;;  %v912_v61 = vld [vmem:[#allocation7 + $0x318] sm:$0xff] }
  0xaf   :  { %2033 = vmatpush.msrb.mxu2 %v919_v49 }
  0xb0   :  { %v6706_v26 = vpop.f32.mrf.mxu3  ;;  %1719 = vmatpush.msra.mxu1 %v1065_v57  ;;  %1656 = vmatpush.msra.mxu0 %v939_v4  ;;  %v1506_v57 = vld [vmem:[#allocation7 + $0x15a8] sm:$0xff]  ;;  %v6859_v4 = vperm.slane %v6852_v2, 1 }
  0xb1   :  { %v6708_v27 = vpop.f32.mrf.mxu0  ;;  %5980 = vmatmul.msk.f32.gmra.mxu2 %vm175_vm1, %v6558_v31 }
  0xb2   :  { %v6712_v28 = vpop.f32.mrf.mxu1  ;;  %1720 = vmatpush.msra.mxu1 %v1058_v0  ;;  %1657 = vmatpush.msra.mxu0 %v932_v14  ;;  %v1471_v0 = vld [vmem:[#allocation7 + $0x1490] sm:$0xff]  ;;  %v6871_v14 = vperm.slane %v6852_v2, 0 }
  0xb3   :  { %2034 = vmatpush.msrb.mxu2 %v912_v61  ;;  %v1338_v61 = vld [vmem:[#allocation7 + $0x1068] sm:$0xff] }
  0xb4   :  { %5947 = vmatmul.msk.f32.gmra.mxu0 %vm175_vm1, %v6571_v33  ;;  %v6716_v30 = vpop.f32.mrf.mxu2  ;;  %1721 = vmatpush.msra.mxu1 %v1051_v7  ;;  %v264_v34 = vadd.f32 %v6678_v8, %v6871_v14 }
  0xb5   :  { %5930 = vmatmul.msk.f32.gmra.mxu3 %vm175_vm1, %v6571_v33  ;;  %5964 = vmatmul.msk.f32.gmra.mxu1 %vm175_vm1, %v6571_v33 }
  0xb6   :  { %1722 = vmatpush.msra.mxu1 %v1044_v21  ;;  %1658 = vmatpush.msra.mxu0 %v925_v24  ;;  %v1345_v21 = vld [vmem:[#allocation7 + $0x10a0] sm:$0xff] }
  0xb7   :  { %v905_v24 = vld [vmem:[#allocation7 + $0x2e0] sm:$0xff] }
  0xb8   :  { %v6722_v31 = vpop.f32.mrf.mxu3  ;;  %1723 = vmatpush.msra.mxu1 %v1037_v29  ;;  %1903 = vmatpush.msrb.mxu0 %v1478_v51  ;;  %v1464_v29 = vld [vmem:[#allocation7 + $0x1458] sm:$0xff] }
  0xb9   :  { %v6724_v36 = vpop.f32.mrf.mxu0  ;;  %5981 = vmatmul.msk.f32.gmra.mxu2 %vm175_vm1, %v6571_v33 }
  0xba   :  { %v6728_v37 = vpop.f32.mrf.mxu1  ;;  %1980 = vmatpush.msrb.mxu1 %v1506_v57  ;;  %1904 = vmatpush.msrb.mxu0 %v1471_v0  ;;  %v6893_v57 = vmax.f32 %v264_v34, 0.0  ;;  %v898_v0 = vld [vmem:[#allocation7 + $0x2a8] sm:$0xff] }
  0xbb   :  { %2035 = vmatpush.msrb.mxu2 %v905_v24  ;;  %v397_v24 = vadd.f32 %v6716_v30, %v6864_v12 }
  0xbc   :  { %5948 = vmatmul.msk.f32.gmra.mxu0 %vm175_vm1, %v6584_v38  ;;  %v6732_v41 = vpop.f32.mrf.mxu2  ;;  %10039 = vst [vmem:[#allocation20_spill] sm:$0xff] %v6893_v57 }
  0xbd   :  { %5931 = vmatmul.msk.f32.gmra.mxu3 %vm175_vm1, %v6584_v38  ;;  %5965 = vmatmul.msk.f32.gmra.mxu1 %vm175_vm1, %v6584_v38 }
  0xbe   :  { %1905 = vmatpush.msrb.mxu0 %v1464_v29  ;;  %2036 = vmatpush.msrb.mxu2 %v898_v0  ;;  %v891_v0 = vld [vmem:[#allocation7 + $0x270] sm:$0xff] }
  0xc0   :  { %v6738_v33 = vpop.f32.mrf.mxu3  ;;  %2037 = vmatpush.msrb.mxu2 %v891_v0  ;;  %v884_v0 = vld [vmem:[#allocation7 + $0x238] sm:$0xff] }
  0xc1   :  { %v6740_v46 = vpop.f32.mrf.mxu0  ;;  %5982 = vmatmul.msk.f32.gmra.mxu2 %vm175_vm1, %v6584_v38 }
  0xc2   :  { %v6744_v48 = vpop.f32.mrf.mxu1  ;;  %2038 = vmatpush.msrb.mxu2 %v884_v0  ;;  %v877_v0 = vld [vmem:[#allocation7 + $0x200] sm:$0xff] }
  0xc4   :  { %5949 = vmatmul.msk.f32.gmra.mxu0 %vm175_vm1, %v6597_v40  ;;  %v6748_v50 = vpop.f32.mrf.mxu2  ;;  %2039 = vmatpush.msrb.mxu2 %v877_v0  ;;  %v870_v0 = vld [vmem:[#allocation7 + $0x1c8] sm:$0xff] }
  0xc5   :  { %5932 = vmatmul.msk.f32.gmra.mxu3 %vm175_vm1, %v6597_v40  ;;  %5966 = vmatmul.msk.f32.gmra.mxu1 %vm175_vm1, %v6597_v40 }
  0xc6   :  { %2040 = vmatpush.msrb.mxu2 %v870_v0  ;;  %v863_v0 = vld [vmem:[#allocation7 + $0x190] sm:$0xff] }
  0xc8   :  { %v6754_v38 = vpop.f32.mrf.mxu3  ;;  %2041 = vmatpush.msrb.mxu2 %v863_v0  ;;  %v856_v0 = vld [vmem:[#allocation7 + $0x158] sm:$0xff] }
  0xc9   :  { %v6756_v55 = vpop.f32.mrf.mxu0  ;;  %5983 = vmatmul.msk.f32.gmra.mxu2 %vm175_vm1, %v6597_v40 }
  0xca   :  { %v6760_v56 = vpop.f32.mrf.mxu1  ;;  %2042 = vmatpush.msrb.mxu2 %v856_v0  ;;  %v849_v0 = vld [vmem:[#allocation7 + $0x120] sm:$0xff] }
  0xcc   :  { %5950 = vmatmul.msk.f32.gmra.mxu0 %vm175_vm1, %v6610_v42  ;;  %v6764_v58 = vpop.f32.mrf.mxu2  ;;  %2043 = vmatpush.msrb.mxu2 %v849_v0  ;;  %v842_v0 = vld [vmem:[#allocation7 + $0xe8] sm:$0xff] }
  0xcd   :  { %5933 = vmatmul.msk.f32.gmra.mxu3 %vm175_vm1, %v6610_v42  ;;  %5967 = vmatmul.msk.f32.gmra.mxu1 %vm175_vm1, %v6610_v42 }
  0xce   :  { %2044 = vmatpush.msrb.mxu2 %v842_v0  ;;  %v835_v0 = vld [vmem:[#allocation7 + $0xb0] sm:$0xff] }
  0xd0   :  { %v6770_v40 = vpop.f32.mrf.mxu3  ;;  %2045 = vmatpush.msrb.mxu2 %v835_v0  ;;  %v828_v0 = vld [vmem:[#allocation7 + $0x78] sm:$0xff] }
  0xd1   :  { %v6772_v62 = vpop.f32.mrf.mxu0  ;;  %5984 = vmatmul.msk.f32.gmra.mxu2 %vm175_vm1, %v6610_v42 }
  0xd2   :  { %v6776_v63 = vpop.f32.mrf.mxu1  ;;  %2046 = vmatpush.msrb.mxu2 %v828_v0  ;;  %v821_v0 = vld [vmem:[#allocation7 + $0x40] sm:$0xff] }
  0xd4   :  { %5951 = vmatmul.msk.f32.gmra.mxu0 %vm175_vm1, %v6623_v47  ;;  %v6780_v1 = vpop.f32.mrf.mxu2  ;;  %2047 = vmatpush.msrb.mxu2 %v821_v0  ;;  %v1031_v0 = vld [vmem:[#allocation7 + $0x6d0] sm:$0xff] }
  0xd5   :  { %5934 = vmatmul.msk.f32.gmra.mxu3 %vm175_vm1, %v6623_v47  ;;  %5968 = vmatmul.msk.f32.gmra.mxu1 %vm175_vm1, %v6623_v47 }
  0xd8   :  { %v6786_v42 = vpop.f32.mrf.mxu3 }
  0xd9   :  { %v6788_v5 = vpop.f32.mrf.mxu0  ;;  %5985 = vmatmul.msk.f32.gmra.mxu2 %vm175_vm1, %v6623_v47 }
  0xda   :  { %v6792_v6 = vpop.f32.mrf.mxu1 }
  0xdc   :  { %5952 = vmatmul.msk.f32.gmra.mxu0 %vm175_vm1, %v6636_v52  ;;  %v6796_v10 = vpop.f32.mrf.mxu2 }
  0xdd   :  { %5935 = vmatmul.msk.f32.gmra.mxu3 %vm175_vm1, %v6636_v52  ;;  %5969 = vmatmul.msk.f32.gmra.mxu1 %vm175_vm1, %v6636_v52 }
  0xe0   :  { %v6802_v47 = vpop.f32.mrf.mxu3 }
  0xe1   :  { %v6804_v18 = vpop.f32.mrf.mxu0  ;;  %5986 = vmatmul.msk.f32.gmra.mxu2 %vm175_vm1, %v6636_v52  ;;  %v1366_v52 = vld [vmem:[#allocation7 + $0x1148] sm:$0xff] }
  0xe2   :  { %v6808_v22 = vpop.f32.mrf.mxu1  ;;  %1838 = vmatpush.msrb.mxu3 %v1366_v52  ;;  %v394_v52 = vadd.f32 %v6700_v19, %v6864_v12 }
  0xe4   :  { %5953 = vmatmul.msk.f32.gmra.mxu0 %vm175_vm1, %v6474_v11  ;;  %v6812_v32 = vpop.f32.mrf.mxu2  ;;  %1839 = vmatpush.msrb.mxu3 %v1359_v45  ;;  %v6895_v8 = vmax.f32 %v394_v52, 0.0 }
  0xe5   :  { %5936 = vmatmul.msk.f32.gmra.mxu3 %vm175_vm1, %v6474_v11  ;;  %5970 = vmatmul.msk.f32.gmra.mxu1 %vm175_vm1, %v6474_v11 }
  0xe6   :  { %1840 = vmatpush.msrb.mxu3 %v1352_v60  ;;  %10040 = vst [vmem:[#allocation21_spill] sm:$0xff] %v6895_v8  ;;  %v6903_v60 = vperm.slane %v6852_v2, 3 }
  0xe8   :  { %v6818_v35 = vpop.f32.mrf.mxu3  ;;  %1841 = vmatpush.msrb.mxu3 %v1345_v21  ;;  %v267_v21 = vadd.f32 %v6692_v16, %v6871_v14 }
  0xe9   :  { %v6820_v39 = vpop.f32.mrf.mxu0  ;;  %5987 = vmatmul.msk.f32.gmra.mxu2 %vm175_vm1, %v6474_v11 }
  0xea   :  { %v6824_v43 = vpop.f32.mrf.mxu1  ;;  %1842 = vmatpush.msrb.mxu3 %v1338_v61  ;;  %v1331_v61 = vld [vmem:[#allocation7 + $0x1030] sm:$0xff] }
  0xec   :  { %5954 = vmatmul.msk.f32.gmra.mxu0 %vm175_vm1, %v6495_v20  ;;  %v6828_v44 = vpop.f32.mrf.mxu2  ;;  %1843 = vmatpush.msrb.mxu3 %v1331_v61  ;;  %v1324_v61 = vld [vmem:[#allocation7 + $0xff8] sm:$0xff] }
  0xed   :  { %5937 = vmatmul.msk.f32.gmra.mxu3 %vm175_vm1, %v6495_v20  ;;  %5971 = vmatmul.msk.f32.gmra.mxu1 %vm175_vm1, %v6495_v20 }
  0xee   :  { %1844 = vmatpush.msrb.mxu3 %v1324_v61  ;;  %v1317_v61 = vld [vmem:[#allocation7 + $0xfc0] sm:$0xff] }
  0xf0   :  { %v6834_v53 = vpop.f32.mrf.mxu3  ;;  %1845 = vmatpush.msrb.mxu3 %v1317_v61  ;;  %v1310_v61 = vld [vmem:[#allocation7 + $0xf88] sm:$0xff] }
  0xf1   :  { %v6836_v11 = vpop.f32.mrf.mxu0  ;;  %5988 = vmatmul.msk.f32.gmra.mxu2 %vm175_vm1, %v6495_v20 }
  0xf2   :  { %v6840_v54 = vpop.f32.mrf.mxu1  ;;  %1846 = vmatpush.msrb.mxu3 %v1310_v61  ;;  %v1303_v61 = vld [vmem:[#allocation7 + $0xf50] sm:$0xff] }
  0xf4   :  { %5955 = vmatmul.msk.f32.gmra.mxu0 %vm175_vm1, %v6515_v23  ;;  %v6844_v59 = vpop.f32.mrf.mxu2  ;;  %1847 = vmatpush.msrb.mxu3 %v1303_v61  ;;  %v1296_v61 = vld [vmem:[#allocation7 + $0xf18] sm:$0xff] }
  0xf5   :  { %5938 = vmatmul.msk.f32.gmra.mxu3 %vm175_vm1, %v6515_v23  ;;  %5972 = vmatmul.msk.f32.gmra.mxu1 %vm175_vm1, %v6515_v23 }
  0xf6   :  { %1848 = vmatpush.msrb.mxu3 %v1296_v61  ;;  %v1289_v61 = vld [vmem:[#allocation7 + $0xee0] sm:$0xff] }
  0xf8   :  { %v6850_v20 = vpop.f32.mrf.mxu3  ;;  %1849 = vmatpush.msrb.mxu3 %v1289_v61  ;;  %v1282_v61 = vld [vmem:[#allocation7 + $0xea8] sm:$0xff] }
  0xf9   :  { %v6854_v3 = vpop.f32.mrf.mxu0  ;;  %5989 = vmatmul.msk.f32.gmra.mxu2 %vm175_vm1, %v6515_v23  ;;  %v329_v23 = vadd.f32 %v6682_v9, %v6859_v4 }
  0xfa   :  { %v6861_v7 = vpop.f32.mrf.mxu1  ;;  %1850 = vmatpush.msrb.mxu3 %v1282_v61  ;;  %v1275_v61 = vld [vmem:[#allocation7 + $0xe70] sm:$0xff] }
  0xfb   :  { %v6889_v9 = vmax.f32 %v329_v23, 0.0  ;;  %v1457_v23 = vld [vmem:[#allocation7 + $0x1420] sm:$0xff] }
  0xfc   :  { %5956 = vmatmul.msk.f32.gmra.mxu0 %vm175_vm1, %v6533_v25  ;;  %v6868_v13 = vpop.f32.mrf.mxu2  ;;  %1851 = vmatpush.msrb.mxu3 %v1275_v61  ;;  %v1268_v61 = vld [vmem:[#allocation7 + $0xe38] sm:$0xff] }
  0xfd   :  { %5939 = vmatmul.msk.f32.gmra.mxu3 %vm175_vm1, %v6533_v25  ;;  %5973 = vmatmul.msk.f32.gmra.mxu1 %vm175_vm1, %v6533_v25  ;;  %10038 = vst [vmem:[#allocation19_spill] sm:$0xff] %v6889_v9 }
  0xfe   :  { %1906 = vmatpush.msrb.mxu0 %v1457_v23  ;;  %v1450_v23 = vld [vmem:[#allocation7 + $0x13e8] sm:$0xff]  ;;  %1852 = vmatpush.msrb.mxu3 %v1268_v61  ;;  %v1261_v61 = vld [vmem:[#allocation7 + $0xe00] sm:$0xff] }
 0x100   :  { %v6883_v45 = vpop.f32.mrf.mxu3  ;;  %1907 = vmatpush.msrb.mxu0 %v1450_v23  ;;  %v1443_v23 = vld [vmem:[#allocation7 + $0x13b0] sm:$0xff]  ;;  %1853 = vmatpush.msrb.mxu3 %v1261_v61  ;;  %v814_v61 = vld [vmem:[#allocation7 + $0x8] sm:$0xff] }
 0x101   :  { %v6885_v49 = vpop.f32.mrf.mxu0  ;;  %5990 = vmatmul.msk.f32.gmra.mxu2 %vm175_vm1, %v6533_v25  ;;  %v332_v25 = vadd.f32 %v6696_v17, %v6859_v4 }
 0x102   :  { %v6891_v51 = vpop.f32.mrf.mxu1  ;;  %1908 = vmatpush.msrb.mxu0 %v1443_v23  ;;  %v1436_v23 = vld [vmem:[#allocation7 + $0x1378] sm:$0xff]  ;;  %2048 = vmatpush.msrb.mxu2 %v814_v61  ;;  %v1367_v61 = vld [vmem:[#allocation7 + $0x1150] sm:$0xff] }
 0x104   :  { %1659 = vmatmul.f32.vlgmr.msra.gmra.mxu0 %v6889_v9  ;;  %v6898_v19 = vpop.f32.mrf.mxu2  ;;  %v6914_v9 = vmax.f32 %v332_v25, 0.0  ;;  %v335_v25 = vadd.f32 %v6712_v28, %v6859_v4 }
 0x105   :  { %1594 = vmatmul.f32.vlgmr.msra.gmra.mxu3 %v6893_v57  ;;  %1724 = vmatmul.f32.vlgmr.msra.gmra.mxu1 %v6895_v8  ;;  %v6918_v8 = vmax.f32 %v267_v21, 0.0  ;;  %v6920_v57 = vmax.f32 %v397_v24, 0.0  ;;  %v270_v21 = vadd.f32 %v6708_v27, %v6871_v14  ;;  %v400_v24 = vadd.f32 %v6732_v41, %v6864_v12 }
 0x106   :  { %10042 = vst [vmem:[#allocation23_spill] sm:$0xff] %v6914_v9  ;;  %v6939_v28 = vmax.f32 %v335_v25, 0.0  ;;  %v338_v25 = vadd.f32 %v6728_v37, %v6859_v4  ;;  %1909 = vmatpush.msrb.mxu0 %v1436_v23  ;;  %v1429_v23 = vld [vmem:[#allocation7 + $0x1340] sm:$0xff]  ;;  %2098 = vmatpush.msra.mxu3 %v1031_v0  ;;  %v1143_v0 = vld [vmem:[#allocation7 + $0xa50] sm:$0xff] }
 0x107   :  { %10043 = vst [vmem:[#allocation24_spill] sm:$0xff] %v6918_v8 }
 0x108   :  { %v458_v29 = vpop.f32.mrf.mxu3  ;;  %10044 = vst [vmem:[#allocation25_spill] sm:$0xff] %v6920_v57  ;;  %v6964_v37 = vmax.f32 %v338_v25, 0.0  ;;  %v341_v25 = vadd.f32 %v6744_v48, %v6859_v4  ;;  %1910 = vmatpush.msrb.mxu0 %v1429_v23  ;;  %v1422_v23 = vld [vmem:[#allocation7 + $0x1308] sm:$0xff] }
 0x109   :  { %v459_v34 = vadd.f32 %v458_v29, %v6903_v60  ;;  %v6912_v52 = vpop.f32.mrf.mxu0  ;;  %10046 = vst [vmem:[#allocation27_spill] sm:$0xff] %v6939_v28 }
 0x10a   :  { %10041 = vst [vmem:[#allocation22_spill] sm:$0xff] %v6912_v52  ;;  %v6916_v17 = vpop.f32.mrf.mxu1  ;;  %v1499_v52 = vld [vmem:[#allocation7 + $0x1570] sm:$0xff]  ;;  %v6989_v48 = vmax.f32 %v341_v25, 0.0  ;;  %v344_v25 = vadd.f32 %v6760_v56, %v6859_v4  ;;  %1911 = vmatpush.msrb.mxu0 %v1422_v23 }
 0x10b   :  { %v6922_v16 = vmax.f32 %v459_v34, 0.0  ;;  %1981 = vmatpush.msrb.mxu1 %v1499_v52  ;;  %10050 = vst [vmem:[#allocation31_spill] sm:$0xff] %v6964_v37  ;;  %v1415_v23 = vld [vmem:[#allocation7 + $0x12d0] sm:$0xff] }
 0x10c   :  { %1662 = vmatmul.f32.gmra.mxu0 %v6914_v9  ;;  %v6925_v30 = vpop.f32.mrf.mxu2  ;;  %10054 = vst [vmem:[#allocation35_spill] sm:$0xff] %v6989_v48  ;;  %v7014_v56 = vmax.f32 %v344_v25, 0.0  ;;  %v347_v25 = vadd.f32 %v6776_v63, %v6859_v4 }
 0x10d   :  { %10045 = vst [vmem:[#allocation26_spill] sm:$0xff] %v6922_v16  ;;  %1597 = vmatmul.f32.gmra.mxu3 %v6918_v8  ;;  %1727 = vmatmul.f32.gmra.mxu1 %v6920_v57  ;;  %v6945_v8 = vmax.f32 %v400_v24, 0.0  ;;  %v403_v24 = vadd.f32 %v6748_v50, %v6864_v12 }
 0x10e   :  { %1789 = vmatmul.f32.vlgmr.msra.gmra.mxu2 %v6922_v16  ;;  %v6943_v16 = vmax.f32 %v270_v21, 0.0  ;;  %v273_v21 = vadd.f32 %v6724_v36, %v6871_v14  ;;  %10059 = vst [vmem:[#allocation40_spill] sm:$0xff] %v7014_v56  ;;  %v7039_v63 = vmax.f32 %v347_v25, 0.0  ;;  %v350_v25 = vadd.f32 %v6792_v6, %v6859_v4  ;;  %1912 = vmatpush.msrb.mxu0 %v1415_v23  ;;  %v1408_v23 = vld [vmem:[#allocation7 + $0x1298] sm:$0xff] }
 0x10f   :  { %10048 = vst [vmem:[#allocation29_spill] sm:$0xff] %v6945_v8  ;;  %2293 = vmatpush.msra.mxu2 %v1367_v61  ;;  %v1017_v61 = vld [vmem:[#allocation7 + $0x660] sm:$0xff] }
 0x110   :  { %v461_v29 = vpop.f32.mrf.mxu3  ;;  %10047 = vst [vmem:[#allocation28_spill] sm:$0xff] %v6943_v16  ;;  %v7064_v6 = vmax.f32 %v350_v25, 0.0  ;;  %v353_v25 = vadd.f32 %v6808_v22, %v6859_v4  ;;  %1913 = vmatpush.msrb.mxu0 %v1408_v23  ;;  %v1401_v23 = vld [vmem:[#allocation7 + $0x1260] sm:$0xff] }
 0x111   :  { %v462_v34 = vadd.f32 %v461_v29, %v6903_v60  ;;  %v6937_v9 = vpop.f32.mrf.mxu0  ;;  %10063 = vst [vmem:[#allocation44_spill] sm:$0xff] %v7039_v63 }
 0x112   :  { %v6941_v57 = vpop.f32.mrf.mxu1  ;;  %10067 = vst [vmem:[#allocation48_spill] sm:$0xff] %v7064_v6  ;;  %v7089_v22 = vmax.f32 %v353_v25, 0.0  ;;  %v356_v25 = vadd.f32 %v6824_v43, %v6859_v4  ;;  %1914 = vmatpush.msrb.mxu0 %v1401_v23  ;;  %v1394_v23 = vld [vmem:[#allocation7 + $0x1228] sm:$0xff] }
 0x113   :  { %v6947_v27 = vmax.f32 %v462_v34, 0.0 }
 0x114   :  { %1665 = vmatmul.f32.gmra.mxu0 %v6939_v28  ;;  %v6950_v41 = vpop.f32.mrf.mxu2  ;;  %10071 = vst [vmem:[#allocation52_spill] sm:$0xff] %v7089_v22  ;;  %v7114_v43 = vmax.f32 %v356_v25, 0.0  ;;  %v359_v25 = vadd.f32 %v6840_v54, %v6859_v4 }
 0x115   :  { %10049 = vst [vmem:[#allocation30_spill] sm:$0xff] %v6947_v27  ;;  %1600 = vmatmul.f32.gmra.mxu3 %v6943_v16  ;;  %1730 = vmatmul.f32.gmra.mxu1 %v6945_v8  ;;  %v6968_v8 = vmax.f32 %v273_v21, 0.0  ;;  %v276_v21 = vadd.f32 %v6740_v46, %v6871_v14 }
 0x116   :  { %1792 = vmatmul.f32.gmra.mxu2 %v6947_v27  ;;  %v6970_v27 = vmax.f32 %v403_v24, 0.0  ;;  %v406_v24 = vadd.f32 %v6764_v58, %v6864_v12  ;;  %10076 = vst [vmem:[#allocation57_spill] sm:$0xff] %v7114_v43  ;;  %1915 = vmatpush.msrb.mxu0 %v1394_v23  ;;  %v7139_v54 = vmax.f32 %v359_v25, 0.0  ;;  %v362_v25 = vadd.f32 %v6861_v7, %v6859_v4  ;;  %v1387_v23 = vld [vmem:[#allocation7 + $0x11f0] sm:$0xff] }
 0x117   :  { %10051 = vst [vmem:[#allocation32_spill] sm:$0xff] %v6968_v8 }
 0x118   :  { %v464_v52 = vpop.f32.mrf.mxu3  ;;  %10052 = vst [vmem:[#allocation33_spill] sm:$0xff] %v6970_v27  ;;  %1916 = vmatpush.msrb.mxu0 %v1387_v23  ;;  %v7164_v7 = vmax.f32 %v362_v25, 0.0  ;;  %v365_v25 = vadd.f32 %v6754_v38, %v6859_v4  ;;  %v1380_v23 = vld [vmem:[#allocation7 + $0x11b8] sm:$0xff] }
 0x119   :  { %v465_v29 = vadd.f32 %v464_v52, %v6903_v60  ;;  %v6962_v34 = vpop.f32.mrf.mxu0  ;;  %10080 = vst [vmem:[#allocation61_spill] sm:$0xff] %v7139_v54 }
 0x11a   :  { %v6966_v28 = vpop.f32.mrf.mxu1  ;;  %10084 = vst [vmem:[#allocation65_spill] sm:$0xff] %v7164_v7  ;;  %1917 = vmatpush.msrb.mxu0 %v1380_v23  ;;  %v7189_v38 = vmax.f32 %v365_v25, 0.0  ;;  %v368_v25 = vadd.f32 %v6770_v40, %v6859_v4  ;;  %v303_v23 = vadd.f32 %v6706_v26, %v6871_v14 }
 0x11b   :  { %v6972_v36 = vmax.f32 %v465_v29, 0.0 }
 0x11c   :  { %1668 = vmatmul.f32.gmra.mxu0 %v6964_v37  ;;  %v6975_v50 = vpop.f32.mrf.mxu2  ;;  %10088 = vst [vmem:[#allocation69_spill] sm:$0xff] %v7189_v38 }
 0x11d   :  { %10053 = vst [vmem:[#allocation34_spill] sm:$0xff] %v6972_v36  ;;  %1603 = vmatmul.f32.gmra.mxu3 %v6968_v8  ;;  %1733 = vmatmul.f32.gmra.mxu1 %v6970_v27  ;;  %v6995_v8 = vmax.f32 %v406_v24, 0.0  ;;  %v409_v24 = vadd.f32 %v6780_v1, %v6864_v12 }
 0x11e   :  { %1795 = vmatmul.f32.gmra.mxu2 %v6972_v36  ;;  %v6993_v36 = vmax.f32 %v276_v21, 0.0  ;;  %v279_v21 = vadd.f32 %v6756_v55, %v6871_v14 }
 0x11f   :  { %10056 = vst [vmem:[#allocation37_spill] sm:$0xff] %v6995_v8 }
 0x120   :  { %v467_v52 = vpop.f32.mrf.mxu3  ;;  %10055 = vst [vmem:[#allocation36_spill] sm:$0xff] %v6993_v36 }
 0x121   :  { %v468_v29 = vadd.f32 %v467_v52, %v6903_v60  ;;  %v6987_v37 = vpop.f32.mrf.mxu0 }
 0x122   :  { %v6991_v27 = vpop.f32.mrf.mxu1 }
 0x123   :  { %v6997_v46 = vmax.f32 %v468_v29, 0.0 }
 0x124   :  { %1671 = vmatmul.f32.gmra.mxu0 %v6989_v48  ;;  %v7000_v58 = vpop.f32.mrf.mxu2 }
 0x125   :  { %10057 = vst [vmem:[#allocation38_spill] sm:$0xff] %v6997_v46  ;;  %1606 = vmatmul.f32.gmra.mxu3 %v6993_v36  ;;  %1736 = vmatmul.f32.gmra.mxu1 %v6995_v8  ;;  %v7020_v36 = vmax.f32 %v409_v24, 0.0  ;;  %v412_v24 = vadd.f32 %v6796_v10, %v6864_v12 }
 0x126   :  { %1798 = vmatmul.f32.gmra.mxu2 %v6997_v46  ;;  %v7018_v46 = vmax.f32 %v279_v21, 0.0  ;;  %v282_v21 = vadd.f32 %v6772_v62, %v6871_v14 }
 0x127   :  { %10061 = vst [vmem:[#allocation42_spill] sm:$0xff] %v7020_v36 }
 0x128   :  { %v470_v52 = vpop.f32.mrf.mxu3  ;;  %10060 = vst [vmem:[#allocation41_spill] sm:$0xff] %v7018_v46 }
 0x129   :  { %v471_v29 = vadd.f32 %v470_v52, %v6903_v60  ;;  %v7012_v48 = vpop.f32.mrf.mxu0 }
 0x12a   :  { %10058 = vst [vmem:[#allocation39_spill] sm:$0xff] %v7012_v48  ;;  %v7016_v8 = vpop.f32.mrf.mxu1  ;;  %v1492_v48 = vld [vmem:[#allocation7 + $0x1538] sm:$0xff] }
 0x12b   :  { %v7022_v55 = vmax.f32 %v471_v29, 0.0  ;;  %1982 = vmatpush.msrb.mxu1 %v1492_v48 }
 0x12c   :  { %1674 = vmatmul.f32.gmra.mxu0 %v7014_v56  ;;  %v7025_v1 = vpop.f32.mrf.mxu2 }
 0x12d   :  { %10062 = vst [vmem:[#allocation43_spill] sm:$0xff] %v7022_v55  ;;  %1609 = vmatmul.f32.gmra.mxu3 %v7018_v46  ;;  %1739 = vmatmul.f32.gmra.mxu1 %v7020_v36  ;;  %v7045_v46 = vmax.f32 %v412_v24, 0.0  ;;  %v415_v24 = vadd.f32 %v6812_v32, %v6864_v12 }
 0x12e   :  { %1801 = vmatmul.f32.gmra.mxu2 %v7022_v55  ;;  %v7043_v55 = vmax.f32 %v282_v21, 0.0  ;;  %v285_v21 = vadd.f32 %v6788_v5, %v6871_v14 }
 0x12f   :  { %10065 = vst [vmem:[#allocation46_spill] sm:$0xff] %v7045_v46 }
 0x130   :  { %v473_v52 = vpop.f32.mrf.mxu3  ;;  %10064 = vst [vmem:[#allocation45_spill] sm:$0xff] %v7043_v55 }
 0x131   :  { %v474_v29 = vadd.f32 %v473_v52, %v6903_v60  ;;  %v7037_v56 = vpop.f32.mrf.mxu0 }
 0x132   :  { %v7041_v36 = vpop.f32.mrf.mxu1 }
 0x133   :  { %v7047_v62 = vmax.f32 %v474_v29, 0.0 }
 0x134   :  { %1677 = vmatmul.f32.gmra.mxu0 %v7039_v63  ;;  %v7050_v10 = vpop.f32.mrf.mxu2 }
 0x135   :  { %10066 = vst [vmem:[#allocation47_spill] sm:$0xff] %v7047_v62  ;;  %1612 = vmatmul.f32.gmra.mxu3 %v7043_v55  ;;  %1742 = vmatmul.f32.gmra.mxu1 %v7045_v46  ;;  %v7068_v46 = vmax.f32 %v285_v21, 0.0  ;;  %v288_v21 = vadd.f32 %v6804_v18, %v6871_v14 }
 0x136   :  { %1804 = vmatmul.f32.gmra.mxu2 %v7047_v62  ;;  %v7070_v62 = vmax.f32 %v415_v24, 0.0  ;;  %v418_v24 = vadd.f32 %v6828_v44, %v6864_v12 }
 0x137   :  { %10068 = vst [vmem:[#allocation49_spill] sm:$0xff] %v7068_v46 }
 0x138   :  { %v476_v48 = vpop.f32.mrf.mxu3  ;;  %10069 = vst [vmem:[#allocation50_spill] sm:$0xff] %v7070_v62 }
 0x139   :  { %v477_v52 = vadd.f32 %v476_v48, %v6903_v60  ;;  %v7062_v29 = vpop.f32.mrf.mxu0 }
 0x13a   :  { %v7066_v63 = vpop.f32.mrf.mxu1 }
 0x13b   :  { %v7072_v5 = vmax.f32 %v477_v52, 0.0 }
 0x13c   :  { %1680 = vmatmul.f32.gmra.mxu0 %v7064_v6  ;;  %v7075_v32 = vpop.f32.mrf.mxu2 }
 0x13d   :  { %10070 = vst [vmem:[#allocation51_spill] sm:$0xff] %v7072_v5  ;;  %1615 = vmatmul.f32.gmra.mxu3 %v7068_v46  ;;  %1745 = vmatmul.f32.gmra.mxu1 %v7070_v62  ;;  %v7095_v46 = vmax.f32 %v418_v24, 0.0  ;;  %v421_v24 = vadd.f32 %v6844_v59, %v6864_v12 }
 0x13e   :  { %1807 = vmatmul.f32.gmra.mxu2 %v7072_v5  ;;  %v7093_v5 = vmax.f32 %v288_v21, 0.0  ;;  %v291_v21 = vadd.f32 %v6820_v39, %v6871_v14 }
 0x13f   :  { %10073 = vst [vmem:[#allocation54_spill] sm:$0xff] %v7095_v46 }
 0x140   :  { %v479_v48 = vpop.f32.mrf.mxu3  ;;  %10072 = vst [vmem:[#allocation53_spill] sm:$0xff] %v7093_v5 }
 0x141   :  { %v480_v52 = vadd.f32 %v479_v48, %v6903_v60  ;;  %v7087_v6 = vpop.f32.mrf.mxu0 }
 0x142   :  { %v7091_v62 = vpop.f32.mrf.mxu1 }
 0x143   :  { %v7097_v18 = vmax.f32 %v480_v52, 0.0 }
 0x144   :  { %1683 = vmatmul.f32.gmra.mxu0 %v7089_v22  ;;  %v7100_v44 = vpop.f32.mrf.mxu2 }
 0x145   :  { %10074 = vst [vmem:[#allocation55_spill] sm:$0xff] %v7097_v18  ;;  %1618 = vmatmul.f32.gmra.mxu3 %v7093_v5  ;;  %1748 = vmatmul.f32.gmra.mxu1 %v7095_v46  ;;  %v7120_v5 = vmax.f32 %v421_v24, 0.0  ;;  %v424_v24 = vadd.f32 %v6868_v13, %v6864_v12 }
 0x146   :  { %1810 = vmatmul.f32.gmra.mxu2 %v7097_v18  ;;  %v7118_v18 = vmax.f32 %v291_v21, 0.0  ;;  %v294_v21 = vadd.f32 %v6836_v11, %v6871_v14 }
 0x147   :  { %10078 = vst [vmem:[#allocation59_spill] sm:$0xff] %v7120_v5 }
 0x148   :  { %v482_v48 = vpop.f32.mrf.mxu3  ;;  %10077 = vst [vmem:[#allocation58_spill] sm:$0xff] %v7118_v18 }
 0x149   :  { %v483_v52 = vadd.f32 %v482_v48, %v6903_v60  ;;  %v7112_v22 = vpop.f32.mrf.mxu0 }
 0x14a   :  { %10075 = vst [vmem:[#allocation56_spill] sm:$0xff] %v7112_v22  ;;  %v7116_v46 = vpop.f32.mrf.mxu1  ;;  %v1485_v22 = vld [vmem:[#allocation7 + $0x1500] sm:$0xff] }
 0x14b   :  { %v7122_v39 = vmax.f32 %v483_v52, 0.0  ;;  %1983 = vmatpush.msrb.mxu1 %v1485_v22 }
 0x14c   :  { %1686 = vmatmul.f32.gmra.mxu0 %v7114_v43  ;;  %v7125_v59 = vpop.f32.mrf.mxu2 }
 0x14d   :  { %10079 = vst [vmem:[#allocation60_spill] sm:$0xff] %v7122_v39  ;;  %1621 = vmatmul.f32.gmra.mxu3 %v7118_v18  ;;  %1751 = vmatmul.f32.gmra.mxu1 %v7120_v5  ;;  %v7145_v18 = vmax.f32 %v424_v24, 0.0  ;;  %v427_v24 = vadd.f32 %v6898_v19, %v6864_v12 }
 0x14e   :  { %1813 = vmatmul.f32.gmra.mxu2 %v7122_v39  ;;  %v7143_v39 = vmax.f32 %v294_v21, 0.0  ;;  %v297_v21 = vadd.f32 %v6854_v3, %v6871_v14 }
 0x14f   :  { %10082 = vst [vmem:[#allocation63_spill] sm:$0xff] %v7145_v18 }
 0x150   :  { %v485_v48 = vpop.f32.mrf.mxu3  ;;  %10081 = vst [vmem:[#allocation62_spill] sm:$0xff] %v7143_v39 }
 0x151   :  { %v486_v52 = vadd.f32 %v485_v48, %v6903_v60  ;;  %v7137_v43 = vpop.f32.mrf.mxu0 }
 0x152   :  { %v7141_v5 = vpop.f32.mrf.mxu1 }
 0x153   :  { %v7147_v11 = vmax.f32 %v486_v52, 0.0 }
 0x154   :  { %1689 = vmatmul.f32.gmra.mxu0 %v7139_v54  ;;  %v7150_v13 = vpop.f32.mrf.mxu2 }
 0x155   :  { %10083 = vst [vmem:[#allocation64_spill] sm:$0xff] %v7147_v11  ;;  %1624 = vmatmul.f32.gmra.mxu3 %v7143_v39  ;;  %1754 = vmatmul.f32.gmra.mxu1 %v7145_v18  ;;  %v7168_v18 = vmax.f32 %v297_v21, 0.0  ;;  %v300_v21 = vadd.f32 %v6690_v15, %v6871_v14  ;;  %v1373_v39 = vld [vmem:[#allocation7 + $0x1180] sm:$0xff] }
 0x156   :  { %1816 = vmatmul.f32.gmra.mxu2 %v7147_v11  ;;  %v7170_v11 = vmax.f32 %v427_v24, 0.0  ;;  %v430_v24 = vadd.f32 %v6818_v35, %v6864_v12  ;;  %1918 = vmatpush.msrb.mxu0 %v1373_v39  ;;  %v7218_v39 = vmax.f32 %v303_v23, 0.0  ;;  %v306_v23 = vadd.f32 %v6722_v31, %v6871_v14 }
 0x157   :  { %10085 = vst [vmem:[#allocation66_spill] sm:$0xff] %v7168_v18 }
 0x158   :  { %v488_v22 = vpop.f32.mrf.mxu3  ;;  %10086 = vst [vmem:[#allocation67_spill] sm:$0xff] %v7170_v11  ;;  %2163 = vmatpush.msra.mxu0 %v1143_v0  ;;  %v1360_v0 = vld [vmem:[#allocation7 + $0x1118] sm:$0xff] }
 0x159   :  { %v489_v48 = vadd.f32 %v488_v22, %v6903_v60  ;;  %v7162_v52 = vpop.f32.mrf.mxu0  ;;  %10093 = vst [vmem:[#allocation74_spill] sm:$0xff] %v7218_v39  ;;  %2294 = vmatpush.msra.mxu2 %v1360_v0  ;;  %v1248_v0 = vld [vmem:[#allocation7 + $0xd98] sm:$0xff] }
 0x15a   :  { %v7166_v54 = vpop.f32.mrf.mxu1 }
 0x15b   :  { %v7172_v3 = vmax.f32 %v489_v48, 0.0 }
 0x15c   :  { %1692 = vmatmul.f32.gmra.mxu0 %v7164_v7  ;;  %v7175_v19 = vpop.f32.mrf.mxu2 }
 0x15d   :  { %10087 = vst [vmem:[#allocation68_spill] sm:$0xff] %v7172_v3  ;;  %1627 = vmatmul.f32.gmra.mxu3 %v7168_v18  ;;  %1757 = vmatmul.f32.gmra.mxu1 %v7170_v11  ;;  %v7195_v18 = vmax.f32 %v430_v24, 0.0 }
 0x15e   :  { %1819 = vmatmul.f32.gmra.mxu2 %v7172_v3  ;;  %v7193_v3 = vmax.f32 %v300_v21, 0.0  ;;  %v433_v21 = vadd.f32 %v6834_v53, %v6864_v12  ;;  %v371_v53 = vadd.f32 %v6786_v42, %v6859_v4 }
 0x15f   :  { %10090 = vst [vmem:[#allocation71_spill] sm:$0xff] %v7195_v18 }
 0x160   :  { %v491_v22 = vpop.f32.mrf.mxu3  ;;  %10089 = vst [vmem:[#allocation70_spill] sm:$0xff] %v7193_v3  ;;  %v7239_v42 = vmax.f32 %v371_v53, 0.0  ;;  %v309_v53 = vadd.f32 %v6738_v33, %v6871_v14 }
 0x161   :  { %v492_v48 = vadd.f32 %v491_v22, %v6903_v60  ;;  %v7187_v7 = vpop.f32.mrf.mxu0 }
 0x162   :  { %v7191_v11 = vpop.f32.mrf.mxu1  ;;  %10096 = vst [vmem:[#allocation77_spill] sm:$0xff] %v7239_v42  ;;  %v7264_v33 = vmax.f32 %v309_v53, 0.0 }
 0x163   :  { %v7197_v15 = vmax.f32 %v492_v48, 0.0 }
 0x164   :  { %1695 = vmatmul.f32.gmra.mxu0 %v7189_v38  ;;  %v7200_v35 = vpop.f32.mrf.mxu2  ;;  %v7214_v38 = vmax.f32 %v368_v25, 0.0  ;;  %v1024_v25 = vld [vmem:[#allocation7 + $0x698] sm:$0xff]  ;;  %10100 = vst [vmem:[#allocation81_spill] sm:$0xff] %v7264_v33 }
 0x165   :  { %10091 = vst [vmem:[#allocation72_spill] sm:$0xff] %v7197_v15  ;;  %1630 = vmatmul.f32.gmra.mxu3 %v7193_v3  ;;  %1760 = vmatmul.f32.gmra.mxu1 %v7195_v18  ;;  %v7220_v18 = vmax.f32 %v433_v21, 0.0  ;;  %v436_v21 = vadd.f32 %v6850_v20, %v6864_v12  ;;  %v1255_v3 = vld [vmem:[#allocation7 + $0xdd0] sm:$0xff] }
 0x166   :  { %1822 = vmatmul.f32.gmra.mxu2 %v7197_v15  ;;  %10092 = vst [vmem:[#allocation73_spill] sm:$0xff] %v7214_v38  ;;  %2099 = vmatpush.msra.mxu3 %v1024_v25  ;;  %v374_v25 = vadd.f32 %v6802_v47, %v6859_v4  ;;  %v7269_v47 = vperm.slane %v6852_v2, 5 }
 0x167   :  { %10094 = vst [vmem:[#allocation75_spill] sm:$0xff] %v7220_v18  ;;  %2228 = vmatpush.msra.mxu1 %v1255_v3 }
 0x168   :  { %v494_v24 = vpop.f32.mrf.mxu3  ;;  %2100 = vmatpush.msra.mxu3 %v1017_v61  ;;  %v7266_v14 = vmax.f32 %v374_v25, 0.0  ;;  %v589_v25 = vadd.f32 %v6891_v51, %v7269_v47 }
 0x169   :  { %v495_v22 = vadd.f32 %v494_v24, %v6903_v60  ;;  %v7212_v48 = vpop.f32.mrf.mxu0  ;;  %2229 = vmatpush.msra.mxu1 %v1248_v0 }
 0x16a   :  { %v7216_v40 = vpop.f32.mrf.mxu1  ;;  %10101 = vst [vmem:[#allocation82_spill] sm:$0xff] %v7266_v14 }
 0x16b   :  { %v7222_v15 = vmax.f32 %v495_v22, 0.0 }
 0x16c   :  { %1698 = vmatmul.f32.gmra.mxu0 %v7214_v38  ;;  %v7225_v26 = vpop.f32.mrf.mxu2 }
 0x16d   :  { %10095 = vst [vmem:[#allocation76_spill] sm:$0xff] %v7222_v15  ;;  %1633 = vmatmul.f32.gmra.mxu3 %v7218_v39  ;;  %1763 = vmatmul.f32.gmra.mxu1 %v7220_v18  ;;  %v7245_v39 = vmax.f32 %v436_v21, 0.0  ;;  %v439_v21 = vadd.f32 %v6883_v45, %v6864_v12  ;;  %v7276_v12 = vperm.slane %v6852_v2, 4  ;;  %v7279_v45 = vperm.slane %v6852_v2, 6  ;;  %v1353_v2 = vld [vmem:[#allocation7 + $0x10e0] sm:$0xff] }
 0x16e   :  { %1825 = vmatmul.f32.gmra.mxu2 %v7222_v15  ;;  %v7243_v15 = vmax.f32 %v306_v23, 0.0  ;;  %v1136_v23 = vld [vmem:[#allocation7 + $0xa18] sm:$0xff] }
 0x16f   :  { %10098 = vst [vmem:[#allocation79_spill] sm:$0xff] %v7245_v39  ;;  %2164 = vmatpush.msra.mxu0 %v1136_v23  ;;  %v1010_v23 = vld [vmem:[#allocation7 + $0x628] sm:$0xff]  ;;  %2295 = vmatpush.msra.mxu2 %v1353_v2 }
 0x170   :  { %v497_v24 = vpop.f32.mrf.mxu3  ;;  %10097 = vst [vmem:[#allocation78_spill] sm:$0xff] %v7243_v15  ;;  %2101 = vmatpush.msra.mxu3 %v1010_v23  ;;  %v1346_v23 = vld [vmem:[#allocation7 + $0x10a8] sm:$0xff] }
 0x171   :  { %v498_v22 = vadd.f32 %v497_v24, %v6903_v60  ;;  %v7237_v38 = vpop.f32.mrf.mxu0  ;;  %v10108_v2 = vld [vmem:[#allocation22_spill] sm:$0xff]  ;;  %2296 = vmatpush.msra.mxu2 %v1346_v23  ;;  %v996_v23 = vld [vmem:[#allocation7 + $0x5b8] sm:$0xff] }
 0x172   :  { %v7241_v18 = vpop.f32.mrf.mxu1 }
 0x173   :  { %v7247_v31 = vmax.f32 %v498_v22, 0.0 }
 0x174   :  { %1701 = vmatmul.f32.gmra.mxu0 %v7239_v42  ;;  %v7250_v20 = vpop.f32.mrf.mxu2  ;;  %v7273_v42 = vmax.f32 %v439_v21, 0.0  ;;  %v1129_v21 = vld [vmem:[#allocation7 + $0x9e0] sm:$0xff] }
 0x175   :  { %10099 = vst [vmem:[#allocation80_spill] sm:$0xff] %v7247_v31  ;;  %1636 = vmatmul.f32.gmra.mxu3 %v7243_v15  ;;  %1766 = vmatmul.f32.gmra.mxu1 %v7245_v39  ;;  %v7296_v39 = vmax.f32 %v589_v25, 0.0  ;;  %v1241_v15 = vld [vmem:[#allocation7 + $0xd60] sm:$0xff]  ;;  %v1003_v25 = vld [vmem:[#allocation7 + $0x5f0] sm:$0xff] }
 0x176   :  { %1828 = vmatmul.f32.gmra.mxu2 %v7247_v31  ;;  %10102 = vst [vmem:[#allocation83_spill] sm:$0xff] %v7273_v42  ;;  %2165 = vmatpush.msra.mxu0 %v1129_v21  ;;  %v527_v21 = vadd.f32 %v10108_v2, %v7276_v12 }
 0x177   :  { %10104 = vst [vmem:[#allocation85_spill] sm:$0xff] %v7296_v39  ;;  %2230 = vmatpush.msra.mxu1 %v1241_v15  ;;  %v657_v15 = vadd.f32 %v6950_v41, %v7279_v45  ;;  %2102 = vmatpush.msra.mxu3 %v1003_v25  ;;  %v10112_v25 = vld [vmem:[#allocation20_spill] sm:$0xff] }
 0x178   :  { %v500_v3 = vpop.f32.mrf.mxu3 }
 0x179   :  { %v501_v24 = vadd.f32 %v500_v3, %v6903_v60  ;;  %v7262_v22 = vpop.f32.mrf.mxu0  ;;  %v524_v3 = vadd.f32 %v6885_v49, %v7276_v12  ;;  %2103 = vmatpush.msra.mxu3 %v996_v23  ;;  %v989_v23 = vld [vmem:[#allocation7 + $0x580] sm:$0xff] }
 0x17a   :  { %v7271_v4 = vpop.f32.mrf.mxu1 }
 0x17b   :  { %v7281_v61 = vmax.f32 %v501_v24, 0.0  ;;  %v654_v24 = vadd.f32 %v6925_v30, %v7279_v45  ;;  %v7298_v31 = vmax.f32 %v524_v3, 0.0  ;;  %v592_v30 = vadd.f32 %v6916_v17, %v7269_v47  ;;  %2104 = vmatpush.msra.mxu3 %v989_v23  ;;  %v1325_v23 = vld [vmem:[#allocation7 + $0x1000] sm:$0xff] }
 0x17c   :  { %1704 = vmatmul.f32.gmra.mxu0 %v7266_v14  ;;  %v7286_v53 = vpop.f32.mrf.mxu2 }
 0x17d   :  { %10103 = vst [vmem:[#allocation84_spill] sm:$0xff] %v7281_v61  ;;  %1639 = vmatmul.f32.gmra.mxu3 %v7264_v33  ;;  %1769 = vmatmul.f32.gmra.mxu1 %v7273_v42  ;;  %v7300_v33 = vmax.f32 %v654_v24, 0.0 }
 0x17e   :  { %1831 = vmatmul.f32.gmra.mxu2 %v7281_v61  ;;  %v1513_v61 = vld [vmem:[#allocation8] sm:$0x7f]  ;;  %10105 = vst [vmem:[#allocation86_spill] sm:$0xff] %v7298_v31 }
 0x17f   :  { %10106 = vst [vmem:[#allocation87_spill] sm:$0xff] %v7300_v33 }
 0x180   :  { %v503_v0 = vpop.f32.mrf.mxu3 }
 0x181   :  { %v504_v14 = vadd.f32 %v503_v0, %v6903_v60  ;;  %v1660_v42 = vpop.f32.mrf.mxu0  ;;  %v7308_v60 = vperm.slane %v1513_v61, 0  ;;  %v7320_v0 = vmax.f32 %v592_v30, 0.0  ;;  %v595_v30 = vadd.f32 %v6941_v57, %v7269_v47 }
 0x182   :  { %v1725_v51 = vpop.f32.mrf.mxu1 }
 0x183   :  { %v7302_v49 = vmax.f32 %v504_v14, 0.0  ;;  %v1122_v14 = vld [vmem:[#allocation7 + $0x9a8] sm:$0xff]  ;;  %10109 = vst [vmem:[#allocation22_spill] sm:$0xff] %v7320_v0  ;;  %v7338_v57 = vmax.f32 %v595_v30, 0.0  ;;  %v10116_v30 = vld [vmem:[#allocation24_spill] sm:$0xff] }
 0x184   :  { %1919 = vmatmul.f32.vlgmr.msrb.gmra.mxu0 %v7296_v39  ;;  %v7317_v3 = vpop.f32.mrf.mxu2 }
 0x185   :  { %10107 = vst [vmem:[#allocation88_spill] sm:$0xff] %v7302_v49  ;;  %1854 = vmatmul.f32.vlgmr.msrb.gmra.mxu3 %v7298_v31  ;;  %5991 = vmatmul.msk.f32.vlgmr.msrb.gmra.mxu1 %vm1529_vm2, %v7300_v33  ;;  %v7322_v33 = vmax.f32 %v527_v21, 0.0  ;;  %v1234_v31 = vld [vmem:[#allocation7 + $0xd28] sm:$0xff]  ;;  %v1115_v21 = vld [vmem:[#allocation7 + $0x970] sm:$0xff] }
 0x186   :  { %1834 = vmatmul.f32.gmra.mxu2 %v7302_v49  ;;  %2166 = vmatpush.msra.mxu0 %v1122_v14  ;;  %v7324_v49 = vmax.f32 %v657_v15, 0.0  ;;  %v1339_v14 = vld [vmem:[#allocation7 + $0x1070] sm:$0xff]  ;;  %10113 = vst [vmem:[#allocation91_spill] sm:$0xff] %v7338_v57 }
 0x187   :  { %10110 = vst [vmem:[#allocation89_spill] sm:$0xff] %v7322_v33  ;;  %2231 = vmatpush.msra.mxu1 %v1234_v31  ;;  %v660_v31 = vadd.f32 %v6975_v50, %v7279_v45  ;;  %2297 = vmatpush.msra.mxu2 %v1339_v14  ;;  %v1332_v14 = vld [vmem:[#allocation7 + $0x1038] sm:$0xff] }
 0x188   :  { %v1595_v61 = vpop.f32.mrf.mxu3  ;;  %10111 = vst [vmem:[#allocation90_spill] sm:$0xff] %v7324_v49  ;;  %2167 = vmatpush.msra.mxu0 %v1115_v21  ;;  %v1108_v21 = vld [vmem:[#allocation7 + $0x938] sm:$0xff] }
 0x189   :  { %v1596_v24 = vadd.f32 %v1595_v61, %v7308_v60  ;;  %v1663_v17 = vpop.f32.mrf.mxu0  ;;  %2298 = vmatpush.msra.mxu2 %v1332_v14  ;;  %v1101_v14 = vld [vmem:[#allocation7 + $0x900] sm:$0xff] }
 0x18a   :  { %v1728_v39 = vpop.f32.mrf.mxu1  ;;  %2168 = vmatpush.msra.mxu0 %v1108_v21 }
 0x18b   :  { %v1661_v2 = vadd.f32 %v1660_v42, %v1596_v24  ;;  %v530_v42 = vadd.f32 %v6937_v9, %v7276_v12  ;;  %2299 = vmatpush.msra.mxu2 %v1325_v23  ;;  %v1318_v23 = vld [vmem:[#allocation7 + $0xfc8] sm:$0xff] }
 0x18c   :  { %1922 = vmatmul.f32.gmra.mxu0 %v7320_v0 }
 0x18d   :  { %1857 = vmatmul.f32.gmra.mxu3 %v7322_v33  ;;  %5992 = vmatmul.msk.f32.gmra.mxu1 %vm1529_vm2, %v7324_v49  ;;  %v1726_v41 = vadd.f32 %v1725_v51, %v1661_v2  ;;  %v7342_v49 = vmax.f32 %v530_v42, 0.0  ;;  %v1227_v33 = vld [vmem:[#allocation7 + $0xcf0] sm:$0xff] }
 0x18e   :  { %2049 = vmatmul.f32.vlgmr.msrb.gmra.mxu2 %v10112_v25  ;;  %v7344_v25 = vmax.f32 %v660_v31, 0.0  ;;  %2232 = vmatpush.msra.mxu1 %v1227_v33  ;;  %v663_v33 = vadd.f32 %v7000_v58, %v7279_v45 }
 0x18f   :  { %10114 = vst [vmem:[#allocation92_spill] sm:$0xff] %v7342_v49  ;;  %2169 = vmatpush.msra.mxu0 %v1101_v14  ;;  %v1094_v14 = vld [vmem:[#allocation7 + $0x8c8] sm:$0xff]  ;;  %2300 = vmatpush.msra.mxu2 %v1318_v23  ;;  %v1311_v23 = vld [vmem:[#allocation7 + $0xf90] sm:$0xff] }
 0x190   :  { %v1598_v15 = vpop.f32.mrf.mxu3  ;;  %10115 = vst [vmem:[#allocation93_spill] sm:$0xff] %v7344_v25 }
 0x191   :  { %v1599_v51 = vadd.f32 %v1598_v15, %v7308_v60  ;;  %v1790_v61 = vpop.f32.mrf.mxu2  ;;  %v1666_v24 = vpop.f32.mrf.mxu0  ;;  %2170 = vmatpush.msra.mxu0 %v1094_v14  ;;  %v1087_v14 = vld [vmem:[#allocation7 + $0x890] sm:$0xff]  ;;  %2301 = vmatpush.msra.mxu2 %v1311_v23  ;;  %v1304_v23 = vld [vmem:[#allocation7 + $0xf58] sm:$0xff] }
 0x192   :  { %v7340_v2 = vadd.f32 %v1790_v61, %v1726_v41  ;;  %v1731_v0 = vpop.f32.mrf.mxu1  ;;  %v598_v41 = vadd.f32 %v6966_v28, %v7269_v47 }
 0x193   :  { %v1664_v9 = vadd.f32 %v1663_v17, %v1599_v51  ;;  %v533_v17 = vadd.f32 %v6962_v34, %v7276_v12  ;;  %2171 = vmatpush.msra.mxu0 %v1087_v14  ;;  %v1080_v14 = vld [vmem:[#allocation7 + $0x858] sm:$0xff]  ;;  %2302 = vmatpush.msra.mxu2 %v1304_v23  ;;  %v1073_v23 = vld [vmem:[#allocation7 + $0x820] sm:$0xff] }
 0x194   :  { %1925 = vmatmul.f32.gmra.mxu0 %v7338_v57  ;;  %v7358_v28 = vmax.f32 %v598_v41, 0.0  ;;  %v7364_v57 = vmax.f32 %v663_v33, 0.0  ;;  %v982_v41 = vld [vmem:[#allocation7 + $0x548] sm:$0xff] }
 0x195   :  { %1860 = vmatmul.f32.gmra.mxu3 %v7342_v49  ;;  %5993 = vmatmul.msk.f32.gmra.mxu1 %vm1529_vm2, %v7344_v25  ;;  %v1729_v50 = vadd.f32 %v1728_v39, %v1664_v9  ;;  %v7362_v9 = vmax.f32 %v533_v17, 0.0  ;;  %v1220_v25 = vld [vmem:[#allocation7 + $0xcb8] sm:$0xff] }
 0x196   :  { %2052 = vmatmul.f32.gmra.mxu2 %v10116_v30  ;;  %10117 = vst [vmem:[#allocation94_spill] sm:$0xff] %v7358_v28  ;;  %2233 = vmatpush.msra.mxu1 %v1220_v25  ;;  %v666_v25 = vadd.f32 %v7025_v1, %v7279_v45 }
 0x197   :  { %10118 = vst [vmem:[#allocation95_spill] sm:$0xff] %v7362_v9  ;;  %2105 = vmatpush.msra.mxu3 %v982_v41  ;;  %v975_v41 = vld [vmem:[#allocation7 + $0x510] sm:$0xff]  ;;  %2172 = vmatpush.msra.mxu0 %v1080_v14 }
 0x198   :  { %v1601_v42 = vpop.f32.mrf.mxu3  ;;  %10119 = vst [vmem:[#allocation96_spill] sm:$0xff] %v7364_v57 }
 0x199   :  { %v1602_v39 = vadd.f32 %v1601_v42, %v7308_v60  ;;  %v1793_v31 = vpop.f32.mrf.mxu2  ;;  %v1669_v15 = vpop.f32.mrf.mxu0  ;;  %2106 = vmatpush.msra.mxu3 %v975_v41  ;;  %v968_v41 = vld [vmem:[#allocation7 + $0x4d8] sm:$0xff]  ;;  %2173 = vmatpush.msra.mxu0 %v1073_v23  ;;  %v1066_v23 = vld [vmem:[#allocation7 + $0x7e8] sm:$0xff] }
 0x19a   :  { %v7360_v51 = vadd.f32 %v1793_v31, %v1729_v50  ;;  %v1734_v61 = vpop.f32.mrf.mxu1  ;;  %v601_v50 = vadd.f32 %v6991_v27, %v7269_v47 }
 0x19b   :  { %v1667_v34 = vadd.f32 %v1666_v24, %v1602_v39  ;;  %v536_v24 = vadd.f32 %v6987_v37, %v7276_v12  ;;  %2107 = vmatpush.msra.mxu3 %v968_v41  ;;  %v961_v41 = vld [vmem:[#allocation7 + $0x4a0] sm:$0xff]  ;;  %2174 = vmatpush.msra.mxu0 %v1066_v23  ;;  %v1059_v23 = vld [vmem:[#allocation7 + $0x7b0] sm:$0xff] }
 0x19c   :  { %1928 = vmatmul.f32.gmra.mxu0 %v7358_v28  ;;  %v7378_v27 = vmax.f32 %v601_v50, 0.0  ;;  %v1213_v28 = vld [vmem:[#allocation7 + $0xc80] sm:$0xff]  ;;  %v10123_v50 = vld [vmem:[#allocation32_spill] sm:$0xff] }
 0x19d   :  { %1863 = vmatmul.f32.gmra.mxu3 %v7362_v9  ;;  %5994 = vmatmul.msk.f32.gmra.mxu1 %vm1529_vm2, %v7364_v57  ;;  %v1732_v58 = vadd.f32 %v1731_v0, %v1667_v34  ;;  %v7382_v31 = vmax.f32 %v536_v24, 0.0  ;;  %v7384_v34 = vmax.f32 %v666_v25, 0.0 }
 0x19e   :  { %2055 = vmatmul.f32.gmra.mxu2 %v6943_v16  ;;  %10120 = vst [vmem:[#allocation97_spill] sm:$0xff] %v7378_v27  ;;  %2234 = vmatpush.msra.mxu1 %v1213_v28  ;;  %v669_v28 = vadd.f32 %v7050_v10, %v7279_v45 }
 0x19f   :  { %10121 = vst [vmem:[#allocation98_spill] sm:$0xff] %v7382_v31  ;;  %2108 = vmatpush.msra.mxu3 %v961_v41  ;;  %v1297_v41 = vld [vmem:[#allocation7 + $0xf20] sm:$0xff]  ;;  %2175 = vmatpush.msra.mxu0 %v1059_v23  ;;  %v1052_v23 = vld [vmem:[#allocation7 + $0x778] sm:$0xff] }
 0x1a0   :  { %v1604_v21 = vpop.f32.mrf.mxu3  ;;  %10122 = vst [vmem:[#allocation99_spill] sm:$0xff] %v7384_v34  ;;  %2303 = vmatpush.msra.mxu2 %v1297_v41  ;;  %v1290_v41 = vld [vmem:[#allocation7 + $0xee8] sm:$0xff] }
 0x1a1   :  { %v1605_v0 = vadd.f32 %v1604_v21, %v7308_v60  ;;  %v1796_v17 = vpop.f32.mrf.mxu2  ;;  %v1672_v33 = vpop.f32.mrf.mxu0  ;;  %2176 = vmatpush.msra.mxu0 %v1052_v23  ;;  %v1045_v23 = vld [vmem:[#allocation7 + $0x740] sm:$0xff] }
 0x1a2   :  { %v7380_v42 = vadd.f32 %v1796_v17, %v1732_v58  ;;  %v1737_v39 = vpop.f32.mrf.mxu1  ;;  %v604_v58 = vadd.f32 %v7016_v8, %v7269_v47  ;;  %2304 = vmatpush.msra.mxu2 %v1290_v41  ;;  %v1283_v41 = vld [vmem:[#allocation7 + $0xeb0] sm:$0xff] }
 0x1a3   :  { %v1670_v37 = vadd.f32 %v1669_v15, %v1605_v0  ;;  %v10124_v15 = vld [vmem:[#allocation39_spill] sm:$0xff]  ;;  %2177 = vmatpush.msra.mxu0 %v1045_v23 }
 0x1a4   :  { %1931 = vmatmul.f32.gmra.mxu0 %v7378_v27  ;;  %v539_v24 = vadd.f32 %v10124_v15, %v7276_v12  ;;  %v7398_v8 = vmax.f32 %v604_v58, 0.0  ;;  %v10128_v58 = vld [vmem:[#allocation36_spill] sm:$0xff]  ;;  %2305 = vmatpush.msra.mxu2 %v1283_v41  ;;  %v1262_v23 = vld [vmem:[#allocation7 + $0xe08] sm:$0xff] }
 0x1a5   :  { %1866 = vmatmul.f32.gmra.mxu3 %v7382_v31  ;;  %5995 = vmatmul.msk.f32.gmra.mxu1 %vm1529_vm2, %v7384_v34  ;;  %v1735_v1 = vadd.f32 %v1734_v61, %v1670_v37  ;;  %v7404_v34 = vmax.f32 %v669_v28, 0.0  ;;  %v1276_v41 = vld [vmem:[#allocation7 + $0xe78] sm:$0xff] }
 0x1a6   :  { %2058 = vmatmul.f32.gmra.mxu2 %v10123_v50  ;;  %10125 = vst [vmem:[#allocation39_spill] sm:$0xff] %v7398_v8  ;;  %v7402_v27 = vmax.f32 %v539_v24, 0.0  ;;  %v1206_v50 = vld [vmem:[#allocation7 + $0xc48] sm:$0xff] }
 0x1a7   :  { %10127 = vst [vmem:[#allocation101_spill] sm:$0xff] %v7404_v34  ;;  %2235 = vmatpush.msra.mxu1 %v1206_v50  ;;  %v672_v50 = vadd.f32 %v7075_v32, %v7279_v45  ;;  %2306 = vmatpush.msra.mxu2 %v1276_v41  ;;  %v1269_v41 = vld [vmem:[#allocation7 + $0xe40] sm:$0xff] }
 0x1a8   :  { %v1607_v25 = vpop.f32.mrf.mxu3  ;;  %10126 = vst [vmem:[#allocation100_spill] sm:$0xff] %v7402_v27 }
 0x1a9   :  { %v1608_v61 = vadd.f32 %v1607_v25, %v7308_v60  ;;  %v1799_v21 = vpop.f32.mrf.mxu2  ;;  %v1675_v0 = vpop.f32.mrf.mxu0  ;;  %2307 = vmatpush.msra.mxu2 %v1269_v41  ;;  %v10156_v41 = vld [vmem:[#allocation66_spill] sm:$0xff] }
 0x1aa   :  { %v7400_v17 = vadd.f32 %v1799_v21, %v1735_v1  ;;  %v1740_v37 = vpop.f32.mrf.mxu1  ;;  %v607_v1 = vadd.f32 %v7041_v36, %v7269_v47 }
 0x1ab   :  { %v1673_v15 = vadd.f32 %v1672_v33, %v1608_v61  ;;  %v542_v33 = vadd.f32 %v7037_v56, %v7276_v12  ;;  %2308 = vmatpush.msra.mxu2 %v1262_v23  ;;  %v696_v23 = vadd.f32 %v7286_v53, %v7279_v45 }
 0x1ac   :  { %1934 = vmatmul.f32.gmra.mxu0 %v7398_v8  ;;  %v7418_v36 = vmax.f32 %v607_v1, 0.0  ;;  %v7424_v8 = vmax.f32 %v672_v50, 0.0  ;;  %v10132_v1 = vld [vmem:[#allocation41_spill] sm:$0xff] }
 0x1ad   :  { %1869 = vmatmul.f32.gmra.mxu3 %v7402_v27  ;;  %5996 = vmatmul.msk.f32.gmra.mxu1 %vm1529_vm2, %v7404_v34  ;;  %v1738_v10 = vadd.f32 %v1737_v39, %v1673_v15  ;;  %v7422_v15 = vmax.f32 %v542_v33, 0.0  ;;  %v1199_v34 = vld [vmem:[#allocation7 + $0xc10] sm:$0xff] }
 0x1ae   :  { %2061 = vmatmul.f32.gmra.mxu2 %v10128_v58  ;;  %10129 = vst [vmem:[#allocation102_spill] sm:$0xff] %v7418_v36  ;;  %2236 = vmatpush.msra.mxu1 %v1199_v34  ;;  %v675_v34 = vadd.f32 %v7100_v44, %v7279_v45 }
 0x1af   :  { %10130 = vst [vmem:[#allocation103_spill] sm:$0xff] %v7422_v15 }
 0x1b0   :  { %v1610_v24 = vpop.f32.mrf.mxu3  ;;  %10131 = vst [vmem:[#allocation104_spill] sm:$0xff] %v7424_v8 }
 0x1b1   :  { %v1611_v39 = vadd.f32 %v1610_v24, %v7308_v60  ;;  %v1802_v28 = vpop.f32.mrf.mxu2  ;;  %v1678_v25 = vpop.f32.mrf.mxu0 }
 0x1b2   :  { %v7420_v61 = vadd.f32 %v1802_v28, %v1738_v10  ;;  %v1743_v21 = vpop.f32.mrf.mxu1  ;;  %v610_v10 = vadd.f32 %v7066_v63, %v7269_v47 }
 0x1b3   :  { %v1676_v56 = vadd.f32 %v1675_v0, %v1611_v39  ;;  %v545_v0 = vadd.f32 %v7062_v29, %v7276_v12 }
 0x1b4   :  { %1937 = vmatmul.f32.gmra.mxu0 %v7418_v36  ;;  %v7438_v63 = vmax.f32 %v610_v10, 0.0  ;;  %v7444_v36 = vmax.f32 %v675_v34, 0.0  ;;  %v954_v10 = vld [vmem:[#allocation7 + $0x468] sm:$0xff] }
 0x1b5   :  { %1872 = vmatmul.f32.gmra.mxu3 %v7422_v15  ;;  %5997 = vmatmul.msk.f32.gmra.mxu1 %vm1529_vm2, %v7424_v8  ;;  %v1741_v32 = vadd.f32 %v1740_v37, %v1676_v56  ;;  %v7442_v56 = vmax.f32 %v545_v0, 0.0  ;;  %v1192_v8 = vld [vmem:[#allocation7 + $0xbd8] sm:$0xff] }
 0x1b6   :  { %2064 = vmatmul.f32.gmra.mxu2 %v10132_v1  ;;  %10133 = vst [vmem:[#allocation105_spill] sm:$0xff] %v7438_v63  ;;  %2237 = vmatpush.msra.mxu1 %v1192_v8  ;;  %v678_v8 = vadd.f32 %v7125_v59, %v7279_v45 }
 0x1b7   :  { %10134 = vst [vmem:[#allocation106_spill] sm:$0xff] %v7442_v56  ;;  %2109 = vmatpush.msra.mxu3 %v954_v10  ;;  %v947_v10 = vld [vmem:[#allocation7 + $0x430] sm:$0xff] }
 0x1b8   :  { %v1613_v33 = vpop.f32.mrf.mxu3  ;;  %10135 = vst [vmem:[#allocation107_spill] sm:$0xff] %v7444_v36 }
 0x1b9   :  { %v1614_v37 = vadd.f32 %v1613_v33, %v7308_v60  ;;  %v1805_v50 = vpop.f32.mrf.mxu2  ;;  %v1681_v24 = vpop.f32.mrf.mxu0  ;;  %2110 = vmatpush.msra.mxu3 %v947_v10  ;;  %v940_v10 = vld [vmem:[#allocation7 + $0x3f8] sm:$0xff] }
 0x1ba   :  { %v7440_v39 = vadd.f32 %v1805_v50, %v1741_v32  ;;  %v1746_v28 = vpop.f32.mrf.mxu1  ;;  %v613_v32 = vadd.f32 %v7091_v62, %v7269_v47 }
 0x1bb   :  { %v1679_v29 = vadd.f32 %v1678_v25, %v1614_v37  ;;  %v548_v25 = vadd.f32 %v7087_v6, %v7276_v12  ;;  %2111 = vmatpush.msra.mxu3 %v940_v10  ;;  %v933_v10 = vld [vmem:[#allocation7 + $0x3c0] sm:$0xff] }
 0x1bc   :  { %1940 = vmatmul.f32.gmra.mxu0 %v7438_v63  ;;  %v7458_v62 = vmax.f32 %v613_v32, 0.0  ;;  %v1185_v63 = vld [vmem:[#allocation7 + $0xba0] sm:$0xff] }
 0x1bd   :  { %1875 = vmatmul.f32.gmra.mxu3 %v7442_v56  ;;  %5998 = vmatmul.msk.f32.gmra.mxu1 %vm1529_vm2, %v7444_v36  ;;  %v1744_v44 = vadd.f32 %v1743_v21, %v1679_v29  ;;  %v7462_v50 = vmax.f32 %v548_v25, 0.0  ;;  %v7464_v29 = vmax.f32 %v678_v8, 0.0  ;;  %v10139_v32 = vld [vmem:[#allocation49_spill] sm:$0xff] }
 0x1be   :  { %2067 = vmatmul.f32.gmra.mxu2 %v7043_v55  ;;  %10136 = vst [vmem:[#allocation108_spill] sm:$0xff] %v7458_v62  ;;  %2238 = vmatpush.msra.mxu1 %v1185_v63  ;;  %v681_v63 = vadd.f32 %v7150_v13, %v7279_v45 }
 0x1bf   :  { %10137 = vst [vmem:[#allocation109_spill] sm:$0xff] %v7462_v50  ;;  %2112 = vmatpush.msra.mxu3 %v933_v10  ;;  %v926_v10 = vld [vmem:[#allocation7 + $0x388] sm:$0xff] }
 0x1c0   :  { %v1616_v14 = vpop.f32.mrf.mxu3  ;;  %10138 = vst [vmem:[#allocation110_spill] sm:$0xff] %v7464_v29 }
 0x1c1   :  { %v1617_v21 = vadd.f32 %v1616_v14, %v7308_v60  ;;  %v1808_v0 = vpop.f32.mrf.mxu2  ;;  %v1684_v34 = vpop.f32.mrf.mxu0  ;;  %2113 = vmatpush.msra.mxu3 %v926_v10  ;;  %v1150_v10 = vld [vmem:[#allocation7 + $0xa88] sm:$0xff] }
 0x1c2   :  { %v7460_v33 = vadd.f32 %v1808_v0, %v1744_v44  ;;  %v1749_v37 = vpop.f32.mrf.mxu1  ;;  %v616_v44 = vadd.f32 %v7116_v46, %v7269_v47 }
 0x1c3   :  { %v1682_v6 = vadd.f32 %v1681_v24, %v1617_v21  ;;  %v10140_v24 = vld [vmem:[#allocation56_spill] sm:$0xff] }
 0x1c4   :  { %1943 = vmatmul.f32.gmra.mxu0 %v7458_v62  ;;  %v551_v25 = vadd.f32 %v10140_v24, %v7276_v12  ;;  %v7478_v46 = vmax.f32 %v616_v44, 0.0  ;;  %v10144_v44 = vld [vmem:[#allocation53_spill] sm:$0xff] }
 0x1c5   :  { %1878 = vmatmul.f32.gmra.mxu3 %v7462_v50  ;;  %5999 = vmatmul.msk.f32.gmra.mxu1 %vm1529_vm2, %v7464_v29  ;;  %v1747_v59 = vadd.f32 %v1746_v28, %v1682_v6  ;;  %v7484_v29 = vmax.f32 %v681_v63, 0.0 }
 0x1c6   :  { %2070 = vmatmul.f32.gmra.mxu2 %v10139_v32  ;;  %10141 = vst [vmem:[#allocation56_spill] sm:$0xff] %v7478_v46  ;;  %v7482_v62 = vmax.f32 %v551_v25, 0.0  ;;  %v1178_v32 = vld [vmem:[#allocation7 + $0xb68] sm:$0xff] }
 0x1c7   :  { %10143 = vst [vmem:[#allocation112_spill] sm:$0xff] %v7484_v29  ;;  %2239 = vmatpush.msra.mxu1 %v1178_v32  ;;  %v684_v32 = vadd.f32 %v7175_v19, %v7279_v45 }
 0x1c8   :  { %v1619_v8 = vpop.f32.mrf.mxu3  ;;  %10142 = vst [vmem:[#allocation111_spill] sm:$0xff] %v7482_v62 }
 0x1c9   :  { %v1620_v28 = vadd.f32 %v1619_v8, %v7308_v60  ;;  %v1811_v14 = vpop.f32.mrf.mxu2  ;;  %v1687_v21 = vpop.f32.mrf.mxu0 }
 0x1ca   :  { %v7480_v0 = vadd.f32 %v1811_v14, %v1747_v59  ;;  %v1752_v6 = vpop.f32.mrf.mxu1  ;;  %v619_v59 = vadd.f32 %v7141_v5, %v7269_v47 }
 0x1cb   :  { %v1685_v24 = vadd.f32 %v1684_v34, %v1620_v28  ;;  %v554_v34 = vadd.f32 %v7137_v43, %v7276_v12 }
 0x1cc   :  { %1946 = vmatmul.f32.gmra.mxu0 %v7478_v46  ;;  %v7498_v5 = vmax.f32 %v619_v59, 0.0  ;;  %v7504_v46 = vmax.f32 %v684_v32, 0.0  ;;  %v10148_v59 = vld [vmem:[#allocation58_spill] sm:$0xff] }
 0x1cd   :  { %1881 = vmatmul.f32.gmra.mxu3 %v7482_v62  ;;  %6000 = vmatmul.msk.f32.gmra.mxu1 %vm1529_vm2, %v7484_v29  ;;  %v1750_v13 = vadd.f32 %v1749_v37, %v1685_v24  ;;  %v7502_v24 = vmax.f32 %v554_v34, 0.0  ;;  %v1171_v29 = vld [vmem:[#allocation7 + $0xb30] sm:$0xff] }
 0x1ce   :  { %2073 = vmatmul.f32.gmra.mxu2 %v10144_v44  ;;  %10145 = vst [vmem:[#allocation113_spill] sm:$0xff] %v7498_v5  ;;  %2240 = vmatpush.msra.mxu1 %v1171_v29  ;;  %v687_v29 = vadd.f32 %v7200_v35, %v7279_v45 }
 0x1cf   :  { %10146 = vst [vmem:[#allocation114_spill] sm:$0xff] %v7502_v24 }
 0x1d0   :  { %v1622_v25 = vpop.f32.mrf.mxu3  ;;  %10147 = vst [vmem:[#allocation115_spill] sm:$0xff] %v7504_v46 }
 0x1d1   :  { %v1623_v37 = vadd.f32 %v1622_v25, %v7308_v60  ;;  %v1814_v63 = vpop.f32.mrf.mxu2  ;;  %v1690_v8 = vpop.f32.mrf.mxu0 }
 0x1d2   :  { %v7500_v28 = vadd.f32 %v1814_v63, %v1750_v13  ;;  %v1755_v14 = vpop.f32.mrf.mxu1  ;;  %v622_v13 = vadd.f32 %v7166_v54, %v7269_v47 }
 0x1d3   :  { %v1688_v43 = vadd.f32 %v1687_v21, %v1623_v37  ;;  %v557_v21 = vadd.f32 %v7162_v52, %v7276_v12 }
 0x1d4   :  { %1949 = vmatmul.f32.gmra.mxu0 %v7498_v5  ;;  %v7518_v54 = vmax.f32 %v622_v13, 0.0  ;;  %v7524_v5 = vmax.f32 %v687_v29, 0.0  ;;  %v10152_v13 = vld [vmem:[#allocation62_spill] sm:$0xff] }
 0x1d5   :  { %1884 = vmatmul.f32.gmra.mxu3 %v7502_v24  ;;  %6001 = vmatmul.msk.f32.gmra.mxu1 %vm1529_vm2, %v7504_v46  ;;  %v1753_v19 = vadd.f32 %v1752_v6, %v1688_v43  ;;  %v7522_v43 = vmax.f32 %v557_v21, 0.0  ;;  %v1164_v46 = vld [vmem:[#allocation7 + $0xaf8] sm:$0xff] }
 0x1d6   :  { %2076 = vmatmul.f32.gmra.mxu2 %v10148_v59  ;;  %10149 = vst [vmem:[#allocation116_spill] sm:$0xff] %v7518_v54  ;;  %2241 = vmatpush.msra.mxu1 %v1164_v46  ;;  %v690_v46 = vadd.f32 %v7225_v26, %v7279_v45  ;;  %v1038_v26 = vld [vmem:[#allocation7 + $0x708] sm:$0xff] }
 0x1d7   :  { %10150 = vst [vmem:[#allocation117_spill] sm:$0xff] %v7522_v43  ;;  %2178 = vmatpush.msra.mxu0 %v1038_v26 }
 0x1d8   :  { %v1625_v34 = vpop.f32.mrf.mxu3  ;;  %10151 = vst [vmem:[#allocation118_spill] sm:$0xff] %v7524_v5 }
 0x1d9   :  { %v1626_v6 = vadd.f32 %v1625_v34, %v7308_v60  ;;  %v1817_v32 = vpop.f32.mrf.mxu2  ;;  %v1693_v25 = vpop.f32.mrf.mxu0 }
 0x1da   :  { %v7520_v37 = vadd.f32 %v1817_v32, %v1753_v19  ;;  %v1758_v63 = vpop.f32.mrf.mxu1  ;;  %v625_v19 = vadd.f32 %v7191_v11, %v7269_v47 }
 0x1db   :  { %v1691_v52 = vadd.f32 %v1690_v8, %v1626_v6  ;;  %v560_v8 = vadd.f32 %v7187_v7, %v7276_v12  ;;  %v7544_v7 = vmax.f32 %v690_v46, 0.0  ;;  %v693_v46 = vadd.f32 %v7250_v20, %v7279_v45 }
 0x1dc   :  { %1952 = vmatmul.f32.gmra.mxu0 %v7518_v54  ;;  %v7538_v11 = vmax.f32 %v625_v19, 0.0 }
 0x1dd   :  { %1887 = vmatmul.f32.gmra.mxu3 %v7522_v43  ;;  %6002 = vmatmul.msk.f32.gmra.mxu1 %vm1529_vm2, %v7524_v5  ;;  %v1756_v35 = vadd.f32 %v1755_v14, %v1691_v52  ;;  %v1157_v52 = vld [vmem:[#allocation7 + $0xac0] sm:$0xff]  ;;  %v7542_v54 = vmax.f32 %v560_v8, 0.0  ;;  %10155 = vst [vmem:[#allocation121_spill] sm:$0xff] %v7544_v7  ;;  %v1479_v8 = vld [vmem:[#allocation7 + $0x14d0] sm:$0xff] }
 0x1de   :  { %2079 = vmatmul.f32.gmra.mxu2 %v10152_v13  ;;  %10153 = vst [vmem:[#allocation119_spill] sm:$0xff] %v7538_v11  ;;  %2242 = vmatpush.msra.mxu1 %v1157_v52 }
 0x1df   :  { %10154 = vst [vmem:[#allocation120_spill] sm:$0xff] %v7542_v54  ;;  %2358 = vmatpush.msrb.mxu3 %v1479_v8  ;;  %v1032_v8 = vld [vmem:[#allocation7 + $0x6d8] sm:$0xff] }
 0x1e0   :  { %v1628_v21 = vpop.f32.mrf.mxu3  ;;  %2243 = vmatpush.msra.mxu1 %v1150_v10  ;;  %v631_v10 = vadd.f32 %v7241_v18, %v7269_v47  ;;  %2553 = vmatpush.msrb.mxu2 %v1032_v8  ;;  %v1025_v8 = vld [vmem:[#allocation7 + $0x6a0] sm:$0xff] }
 0x1e1   :  { %v1629_v14 = vadd.f32 %v1628_v21, %v7308_v60  ;;  %v1820_v29 = vpop.f32.mrf.mxu2  ;;  %v1696_v34 = vpop.f32.mrf.mxu0 }
 0x1e2   :  { %v7540_v6 = vadd.f32 %v1820_v29, %v1756_v35  ;;  %v1761_v32 = vpop.f32.mrf.mxu1  ;;  %v628_v35 = vadd.f32 %v7216_v40, %v7269_v47  ;;  %v7578_v18 = vmax.f32 %v631_v10, 0.0  ;;  %v10164_v10 = vld [vmem:[#allocation74_spill] sm:$0xff]  ;;  %2554 = vmatpush.msrb.mxu2 %v1025_v8 }
 0x1e3   :  { %v1694_v5 = vadd.f32 %v1693_v25, %v1629_v14  ;;  %v563_v25 = vadd.f32 %v7212_v48, %v7276_v12 }
 0x1e4   :  { %1955 = vmatmul.f32.gmra.mxu0 %v7538_v11  ;;  %v7558_v40 = vmax.f32 %v628_v35, 0.0  ;;  %v7564_v11 = vmax.f32 %v693_v46, 0.0  ;;  %v10160_v35 = vld [vmem:[#allocation70_spill] sm:$0xff]  ;;  %10161 = vst [vmem:[#allocation125_spill] sm:$0xff] %v7578_v18 }
 0x1e5   :  { %1890 = vmatmul.f32.gmra.mxu3 %v7542_v54  ;;  %6003 = vmatmul.msk.f32.gmra.mxu1 %vm1529_vm2, %v7544_v7  ;;  %v1759_v19 = vadd.f32 %v1758_v63, %v1694_v5  ;;  %v7562_v26 = vmax.f32 %v563_v25, 0.0  ;;  %v1507_v25 = vld [vmem:[#allocation7 + $0x15b0] sm:$0xff] }
 0x1e6   :  { %2082 = vmatmul.f32.gmra.mxu2 %v10156_v41  ;;  %10157 = vst [vmem:[#allocation122_spill] sm:$0xff] %v7558_v40  ;;  %2435 = vmatpush.msrb.mxu0 %v1507_v25 }
 0x1e7   :  { %10158 = vst [vmem:[#allocation123_spill] sm:$0xff] %v7562_v26 }
 0x1e8   :  { %v1631_v21 = vpop.f32.mrf.mxu3  ;;  %10159 = vst [vmem:[#allocation124_spill] sm:$0xff] %v7564_v11 }
 0x1e9   :  { %v1632_v5 = vadd.f32 %v1631_v21, %v7308_v60  ;;  %v1823_v63 = vpop.f32.mrf.mxu2  ;;  %v1699_v14 = vpop.f32.mrf.mxu0 }
 0x1ea   :  { %v7560_v29 = vadd.f32 %v1823_v63, %v1759_v19  ;;  %v1764_v52 = vpop.f32.mrf.mxu1  ;;  %v566_v19 = vadd.f32 %v7237_v38, %v7276_v12 }
 0x1eb   :  { %v1697_v48 = vadd.f32 %v1696_v34, %v1632_v5  ;;  %v1472_v34 = vld [vmem:[#allocation7 + $0x1498] sm:$0xff] }
 0x1ec   :  { %1958 = vmatmul.f32.gmra.mxu0 %v7558_v40  ;;  %2359 = vmatpush.msrb.mxu3 %v1472_v34  ;;  %v7582_v38 = vmax.f32 %v566_v19, 0.0  ;;  %v7584_v40 = vmax.f32 %v696_v23, 0.0  ;;  %v1465_v19 = vld [vmem:[#allocation7 + $0x1460] sm:$0xff]  ;;  %v699_v23 = vadd.f32 %v7317_v3, %v7279_v45 }
 0x1ed   :  { %1893 = vmatmul.f32.gmra.mxu3 %v7562_v26  ;;  %6004 = vmatmul.msk.f32.gmra.mxu1 %vm1529_vm2, %v7564_v11  ;;  %v1762_v20 = vadd.f32 %v1761_v32, %v1697_v48  ;;  %v920_v11 = vld [vmem:[#allocation7 + $0x358] sm:$0xff]  ;;  %v10168_v3 = vld [vmem:[#allocation78_spill] sm:$0xff] }
 0x1ee   :  { %2085 = vmatmul.f32.gmra.mxu2 %v10160_v35  ;;  %10162 = vst [vmem:[#allocation126_spill] sm:$0xff] %v7582_v38  ;;  %2488 = vmatpush.msrb.mxu1 %v920_v11 }
 0x1ef   :  { %10163 = vst [vmem:[#allocation127_spill] sm:$0xff] %v7584_v40  ;;  %2360 = vmatpush.msrb.mxu3 %v1465_v19 }
 0x1f0   :  { %v1634_v46 = vpop.f32.mrf.mxu3 }
 0x1f1   :  { %v1635_v21 = vadd.f32 %v1634_v46, %v7308_v60  ;;  %v1826_v32 = vpop.f32.mrf.mxu2  ;;  %v1702_v5 = vpop.f32.mrf.mxu0 }
 0x1f2   :  { %v7580_v63 = vadd.f32 %v1826_v32, %v1762_v20  ;;  %v1767_v48 = vpop.f32.mrf.mxu1  ;;  %v634_v20 = vadd.f32 %v7271_v4, %v7269_v47 }
 0x1f3   :  { %v1700_v53 = vadd.f32 %v1699_v14, %v1635_v21  ;;  %v569_v14 = vadd.f32 %v7262_v22, %v7276_v12  ;;  %v913_v12 = vld [vmem:[#allocation7 + $0x320] sm:$0xff] }
 0x1f4   :  { %1961 = vmatmul.f32.gmra.mxu0 %v7578_v18  ;;  %v7598_v21 = vmax.f32 %v634_v20, 0.0  ;;  %2489 = vmatpush.msrb.mxu1 %v913_v12  ;;  %v1018_v20 = vld [vmem:[#allocation7 + $0x668] sm:$0xff]  ;;  %v10169_v12 = vld [vmem:[#allocation21_spill] sm:$0xff] }
 0x1f5   :  { %1896 = vmatmul.f32.gmra.mxu3 %v7582_v38  ;;  %6005 = vmatmul.msk.f32.gmra.mxu1 %vm1529_vm2, %v7584_v40  ;;  %v1765_v34 = vadd.f32 %v1764_v52, %v1700_v53  ;;  %v7602_v32 = vmax.f32 %v569_v14, 0.0  ;;  %v7604_v53 = vmax.f32 %v699_v23, 0.0  ;;  %v10183_v18 = vld [vmem:[#allocation33_spill] sm:$0xff] }
 0x1f6   :  { %2088 = vmatmul.f32.gmra.mxu2 %v10164_v10  ;;  %10165 = vst [vmem:[#allocation128_spill] sm:$0xff] %v7598_v21 }
 0x1f7   :  { %10166 = vst [vmem:[#allocation129_spill] sm:$0xff] %v7602_v32  ;;  %2555 = vmatpush.msrb.mxu2 %v1018_v20  ;;  %v1451_v20 = vld [vmem:[#allocation7 + $0x13f0] sm:$0xff] }
 0x1f8   :  { %v1637_v11 = vpop.f32.mrf.mxu3  ;;  %10167 = vst [vmem:[#allocation130_spill] sm:$0xff] %v7604_v53 }
 0x1f9   :  { %v1638_v25 = vadd.f32 %v1637_v11, %v7308_v60  ;;  %v1829_v46 = vpop.f32.mrf.mxu2  ;;  %v1705_v52 = vpop.f32.mrf.mxu0 }
 0x1fa   :  { %v7600_v47 = vadd.f32 %v1829_v46, %v1765_v34  ;;  %v1770_v4 = vpop.f32.mrf.mxu1  ;;  %v1458_v34 = vld [vmem:[#allocation7 + $0x1428] sm:$0xff] }
 0x1fb   :  { %v1703_v22 = vadd.f32 %v1702_v5, %v1638_v25  ;;  %2361 = vmatpush.msrb.mxu3 %v1458_v34  ;;  %v906_v46 = vld [vmem:[#allocation7 + $0x2e8] sm:$0xff]  ;;  %v10172_v34 = vld [vmem:[#allocation81_spill] sm:$0xff] }
 0x1fc   :  { %1964 = vmatmul.f32.gmra.mxu0 %v7598_v21  ;;  %2490 = vmatpush.msrb.mxu1 %v906_v46 }
 0x1fd   :  { %1899 = vmatmul.f32.gmra.mxu3 %v7602_v32  ;;  %6006 = vmatmul.msk.f32.gmra.mxu1 %vm1529_vm2, %v7604_v53  ;;  %v1768_v45 = vadd.f32 %v1767_v48, %v1703_v22  ;;  %v10170_v48 = vld [vmem:[#allocation19_spill] sm:$0xff]  ;;  %v10171_v22 = vld [vmem:[#allocation26_spill] sm:$0xff] }
 0x1fe   :  { %2091 = vmatmul.f32.gmra.mxu2 %v10168_v3  ;;  %v1011_v53 = vld [vmem:[#allocation7 + $0x630] sm:$0xff]  ;;  %2362 = vmatpush.msrb.mxu3 %v1451_v20  ;;  %v10173_v3 = vld [vmem:[#allocation25_spill] sm:$0xff] }
 0x1ff   :  { %2556 = vmatpush.msrb.mxu2 %v1011_v53  ;;  %v10177_v53 = vld [vmem:[#allocation86_spill] sm:$0xff]  ;;  %v1444_v20 = vld [vmem:[#allocation7 + $0x13b8] sm:$0xff] }
 0x200   :  { %v1640_v19 = vpop.f32.mrf.mxu3  ;;  %2363 = vmatpush.msrb.mxu3 %v1444_v20  ;;  %v1437_v20 = vld [vmem:[#allocation7 + $0x1380] sm:$0xff] }
 0x201   :  { %v1641_v8 = vadd.f32 %v1640_v19, %v7308_v60  ;;  %v1832_v5 = vpop.f32.mrf.mxu2  ;;  %v1920_v14 = vpop.f32.mrf.mxu0 }
 0x202   :  { %v7612_v23 = vadd.f32 %v1832_v5, %v1768_v45  ;;  %v1985_v11 = vpop.f32.mrf.mxu1  ;;  %2364 = vmatpush.msrb.mxu3 %v1437_v20  ;;  %v1430_v20 = vld [vmem:[#allocation7 + $0x1348] sm:$0xff] }
 0x203   :  { %v1706_v25 = vadd.f32 %v1705_v52, %v1641_v8 }
 0x204   :  { %2179 = vmatmul.f32.vlgmr.msra.gmra.mxu0 %v10169_v12  ;;  %v899_v12 = vld [vmem:[#allocation7 + $0x2b0] sm:$0xff]  ;;  %2365 = vmatpush.msrb.mxu3 %v1430_v20 }
 0x205   :  { %2114 = vmatmul.f32.vlgmr.msra.gmra.mxu3 %v10170_v48  ;;  %2244 = vmatmul.f32.vlgmr.msra.gmra.mxu1 %v10171_v22  ;;  %v1771_v21 = vadd.f32 %v1770_v4, %v1706_v25  ;;  %v10175_v25 = vld [vmem:[#allocation23_spill] sm:$0xff]  ;;  %v10176_v22 = vld [vmem:[#allocation30_spill] sm:$0xff] }
 0x206   :  { %2094 = vmatmul.f32.gmra.mxu2 %v10172_v34  ;;  %2491 = vmatpush.msrb.mxu1 %v899_v12  ;;  %v1004_v34 = vld [vmem:[#allocation7 + $0x5f8] sm:$0xff]  ;;  %v1423_v20 = vld [vmem:[#allocation7 + $0x1310] sm:$0xff] }
 0x207   :  { %2557 = vmatpush.msrb.mxu2 %v1004_v34  ;;  %v10182_v34 = vld [vmem:[#allocation89_spill] sm:$0xff]  ;;  %2366 = vmatpush.msrb.mxu3 %v1423_v20 }
 0x208   :  { %v1855_v60 = vpop.f32.mrf.mxu3  ;;  %v1416_v20 = vld [vmem:[#allocation7 + $0x12d8] sm:$0xff] }
 0x209   :  { %v1835_v45 = vpop.f32.mrf.mxu2  ;;  %v1856_v19 = vadd.f32 %v1855_v60, %v7340_v2  ;;  %v1923_v52 = vpop.f32.mrf.mxu0  ;;  %v1500_v2 = vld [vmem:[#allocation7 + $0x1578] sm:$0xff]  ;;  %2367 = vmatpush.msrb.mxu3 %v1416_v20  ;;  %v1409_v20 = vld [vmem:[#allocation7 + $0x12a0] sm:$0xff] }
 0x20a   :  { %v7619_v8 = vadd.f32 %v1835_v45, %v1771_v21  ;;  %v1988_v5 = vpop.f32.mrf.mxu1  ;;  %2436 = vmatpush.msrb.mxu0 %v1500_v2  ;;  %v997_v2 = vld [vmem:[#allocation7 + $0x5c0] sm:$0xff] }
 0x20b   :  { %v1921_v46 = vadd.f32 %v1920_v14, %v1856_v19  ;;  %v892_v19 = vld [vmem:[#allocation7 + $0x278] sm:$0xff]  ;;  %2558 = vmatpush.msrb.mxu2 %v997_v2  ;;  %v990_v2 = vld [vmem:[#allocation7 + $0x588] sm:$0xff]  ;;  %2368 = vmatpush.msrb.mxu3 %v1409_v20 }
 0x20c   :  { %2182 = vmatmul.f32.gmra.mxu0 %v10173_v3  ;;  %2492 = vmatpush.msrb.mxu1 %v892_v19  ;;  %v10180_v3 = vld [vmem:[#allocation34_spill] sm:$0xff] }
 0x20d   :  { %v7622_v4 = vadd.f32 %v1985_v11, %v1921_v46  ;;  %2117 = vmatmul.f32.gmra.mxu3 %v10175_v25  ;;  %2247 = vmatmul.f32.gmra.mxu1 %v10176_v22  ;;  %v10178_v46 = vld [vmem:[#allocation29_spill] sm:$0xff]  ;;  %v1402_v20 = vld [vmem:[#allocation7 + $0x1268] sm:$0xff] }
 0x20e   :  { %2309 = vmatmul.f32.vlgmr.msra.gmra.mxu2 %v10177_v53  ;;  %v885_v53 = vld [vmem:[#allocation7 + $0x240] sm:$0xff]  ;;  %2369 = vmatpush.msrb.mxu3 %v1402_v20  ;;  %v1395_v20 = vld [vmem:[#allocation7 + $0x1230] sm:$0xff] }
 0x20f   :  { %10174 = vst [vmem:[#allocation131_spill] sm:$0xff] %v7622_v4  ;;  %v10179_v4 = vld [vmem:[#allocation27_spill] sm:$0xff]  ;;  %2493 = vmatpush.msrb.mxu1 %v885_v53  ;;  %2559 = vmatpush.msrb.mxu2 %v990_v2 }
 0x210   :  { %v1858_v21 = vpop.f32.mrf.mxu3  ;;  %v983_v2 = vld [vmem:[#allocation7 + $0x550] sm:$0xff]  ;;  %2370 = vmatpush.msrb.mxu3 %v1395_v20  ;;  %v1388_v20 = vld [vmem:[#allocation7 + $0x11f8] sm:$0xff] }
 0x211   :  { %v1859_v14 = vadd.f32 %v1858_v21, %v7360_v51  ;;  %v7628_v60 = vpop.f32.mrf.mxu2  ;;  %v1926_v12 = vpop.f32.mrf.mxu0  ;;  %2560 = vmatpush.msrb.mxu2 %v983_v2  ;;  %v976_v2 = vld [vmem:[#allocation7 + $0x518] sm:$0xff] }
 0x212   :  { %v1991_v11 = vpop.f32.mrf.mxu1  ;;  %2371 = vmatpush.msrb.mxu3 %v1388_v20  ;;  %v1381_v20 = vld [vmem:[#allocation7 + $0x11c0] sm:$0xff] }
 0x213   :  { %v1924_v45 = vadd.f32 %v1923_v52, %v1859_v14  ;;  %2561 = vmatpush.msrb.mxu2 %v976_v2  ;;  %v969_v2 = vld [vmem:[#allocation7 + $0x4e0] sm:$0xff] }
 0x214   :  { %2185 = vmatmul.f32.gmra.mxu0 %v10178_v46  ;;  %2372 = vmatpush.msrb.mxu3 %v1381_v20  ;;  %v1374_v20 = vld [vmem:[#allocation7 + $0x1188] sm:$0xff] }
 0x215   :  { %2120 = vmatmul.f32.gmra.mxu3 %v10179_v4  ;;  %2250 = vmatmul.f32.gmra.mxu1 %v10180_v3  ;;  %v7633_v22 = vadd.f32 %v1988_v5, %v1924_v45  ;;  %v10184_v5 = vld [vmem:[#allocation31_spill] sm:$0xff]  ;;  %v10185_v45 = vld [vmem:[#allocation38_spill] sm:$0xff] }
 0x216   :  { %2312 = vmatmul.f32.gmra.mxu2 %v10182_v34  ;;  %v878_v3 = vld [vmem:[#allocation7 + $0x208] sm:$0xff]  ;;  %v10187_v34 = vld [vmem:[#allocation37_spill] sm:$0xff]  ;;  %2373 = vmatpush.msrb.mxu3 %v1374_v20 }
 0x217   :  { %10181 = vst [vmem:[#allocation27_spill] sm:$0xff] %v7633_v22  ;;  %2494 = vmatpush.msrb.mxu1 %v878_v3  ;;  %2562 = vmatpush.msrb.mxu2 %v969_v2  ;;  %v962_v2 = vld [vmem:[#allocation7 + $0x4a8] sm:$0xff]  ;;  %v1144_v20 = vld [vmem:[#allocation7 + $0xa58] sm:$0xff] }
 0x218   :  { %v1861_v51 = vpop.f32.mrf.mxu3  ;;  %2618 = vmatpush.msra.mxu3 %v1144_v20  ;;  %v1256_v20 = vld [vmem:[#allocation7 + $0xdd8] sm:$0xff] }
 0x219   :  { %v1862_v21 = vadd.f32 %v1861_v51, %v7380_v42  ;;  %v7637_v52 = vpop.f32.mrf.mxu2  ;;  %v1929_v14 = vpop.f32.mrf.mxu0  ;;  %2563 = vmatpush.msrb.mxu2 %v962_v2  ;;  %v955_v2 = vld [vmem:[#allocation7 + $0x470] sm:$0xff] }
 0x21a   :  { %v1994_v46 = vpop.f32.mrf.mxu1 }
 0x21b   :  { %v1927_v19 = vadd.f32 %v1926_v12, %v1862_v21  ;;  %2564 = vmatpush.msrb.mxu2 %v955_v2  ;;  %v948_v2 = vld [vmem:[#allocation7 + $0x438] sm:$0xff] }
 0x21c   :  { %2188 = vmatmul.f32.gmra.mxu0 %v10183_v18 }
 0x21d   :  { %2123 = vmatmul.f32.gmra.mxu3 %v10184_v5  ;;  %2253 = vmatmul.f32.gmra.mxu1 %v10185_v45  ;;  %v7642_v22 = vadd.f32 %v1991_v11, %v1927_v19  ;;  %v10188_v11 = vld [vmem:[#allocation35_spill] sm:$0xff] }
 0x21e   :  { %2315 = vmatmul.f32.gmra.mxu2 %v7342_v49  ;;  %v10189_v19 = vld [vmem:[#allocation43_spill] sm:$0xff]  ;;  %v10191_v49 = vld [vmem:[#allocation42_spill] sm:$0xff] }
 0x21f   :  { %10186 = vst [vmem:[#allocation31_spill] sm:$0xff] %v7642_v22  ;;  %v871_v45 = vld [vmem:[#allocation7 + $0x1d0] sm:$0xff]  ;;  %2565 = vmatpush.msrb.mxu2 %v948_v2  ;;  %v941_v2 = vld [vmem:[#allocation7 + $0x400] sm:$0xff] }
 0x220   :  { %v1864_v42 = vpop.f32.mrf.mxu3  ;;  %2495 = vmatpush.msrb.mxu1 %v871_v45 }
 0x221   :  { %v1865_v51 = vadd.f32 %v1864_v42, %v7400_v17  ;;  %v7646_v12 = vpop.f32.mrf.mxu2  ;;  %v1932_v21 = vpop.f32.mrf.mxu0  ;;  %2566 = vmatpush.msrb.mxu2 %v941_v2  ;;  %v934_v2 = vld [vmem:[#allocation7 + $0x3c8] sm:$0xff] }
 0x222   :  { %v1997_v18 = vpop.f32.mrf.mxu1 }
 0x223   :  { %v1930_v53 = vadd.f32 %v1929_v14, %v1865_v51  ;;  %2567 = vmatpush.msrb.mxu2 %v934_v2 }
 0x224   :  { %2191 = vmatmul.f32.gmra.mxu0 %v10187_v34 }
 0x225   :  { %2126 = vmatmul.f32.gmra.mxu3 %v10188_v11  ;;  %2256 = vmatmul.f32.gmra.mxu1 %v10189_v19  ;;  %v7651_v22 = vadd.f32 %v1994_v46, %v1930_v53  ;;  %v10192_v46 = vld [vmem:[#allocation40_spill] sm:$0xff]  ;;  %v10193_v53 = vld [vmem:[#allocation47_spill] sm:$0xff] }
 0x226   :  { %2318 = vmatmul.f32.gmra.mxu2 %v7362_v9  ;;  %v864_v9 = vld [vmem:[#allocation7 + $0x198] sm:$0xff] }
 0x227   :  { %10190 = vst [vmem:[#allocation35_spill] sm:$0xff] %v7651_v22  ;;  %2496 = vmatpush.msrb.mxu1 %v864_v9 }
 0x228   :  { %v1867_v17 = vpop.f32.mrf.mxu3 }
 0x229   :  { %v1868_v42 = vadd.f32 %v1867_v17, %v7420_v61  ;;  %v7655_v14 = vpop.f32.mrf.mxu2  ;;  %v1935_v51 = vpop.f32.mrf.mxu0  ;;  %v1493_v61 = vld [vmem:[#allocation7 + $0x1540] sm:$0xff] }
 0x22a   :  { %v2000_v34 = vpop.f32.mrf.mxu1  ;;  %2437 = vmatpush.msrb.mxu0 %v1493_v61 }
 0x22b   :  { %v1933_v3 = vadd.f32 %v1932_v21, %v1868_v42 }
 0x22c   :  { %2194 = vmatmul.f32.gmra.mxu0 %v10191_v49 }
 0x22d   :  { %2129 = vmatmul.f32.gmra.mxu3 %v10192_v46  ;;  %2259 = vmatmul.f32.gmra.mxu1 %v10193_v53  ;;  %v7660_v22 = vadd.f32 %v1997_v18, %v1933_v3  ;;  %v10195_v53 = vld [vmem:[#allocation46_spill] sm:$0xff]  ;;  %v10196_v18 = vld [vmem:[#allocation44_spill] sm:$0xff]  ;;  %v10197_v3 = vld [vmem:[#allocation51_spill] sm:$0xff] }
 0x22e   :  { %2321 = vmatmul.f32.gmra.mxu2 %v7382_v31  ;;  %v10199_v31 = vld [vmem:[#allocation50_spill] sm:$0xff] }
 0x22f   :  { %10194 = vst [vmem:[#allocation132_spill] sm:$0xff] %v7660_v22 }
 0x230   :  { %v1870_v17 = vpop.f32.mrf.mxu3 }
 0x231   :  { %v1871_v21 = vadd.f32 %v1870_v17, %v7440_v39  ;;  %v7664_v42 = vpop.f32.mrf.mxu2  ;;  %v1938_v45 = vpop.f32.mrf.mxu0 }
 0x232   :  { %v2003_v49 = vpop.f32.mrf.mxu1 }
 0x233   :  { %v1936_v19 = vadd.f32 %v1935_v51, %v1871_v21 }
 0x234   :  { %2197 = vmatmul.f32.gmra.mxu0 %v10195_v53  ;;  %v857_v53 = vld [vmem:[#allocation7 + $0x160] sm:$0xff] }
 0x235   :  { %2132 = vmatmul.f32.gmra.mxu3 %v10196_v18  ;;  %2262 = vmatmul.f32.gmra.mxu1 %v10197_v3  ;;  %v7669_v22 = vadd.f32 %v2000_v34, %v1936_v19  ;;  %v10200_v34 = vld [vmem:[#allocation48_spill] sm:$0xff]  ;;  %v10201_v19 = vld [vmem:[#allocation55_spill] sm:$0xff] }
 0x236   :  { %2324 = vmatmul.f32.gmra.mxu2 %v7402_v27  ;;  %2497 = vmatpush.msrb.mxu1 %v857_v53  ;;  %v850_v3 = vld [vmem:[#allocation7 + $0x128] sm:$0xff] }
 0x237   :  { %10198 = vst [vmem:[#allocation133_spill] sm:$0xff] %v7669_v22  ;;  %v10203_v27 = vld [vmem:[#allocation54_spill] sm:$0xff] }
 0x238   :  { %v1873_v39 = vpop.f32.mrf.mxu3  ;;  %2498 = vmatpush.msrb.mxu1 %v850_v3 }
 0x239   :  { %v1874_v61 = vadd.f32 %v1873_v39, %v7460_v33  ;;  %v7673_v51 = vpop.f32.mrf.mxu2  ;;  %v1941_v17 = vpop.f32.mrf.mxu0 }
 0x23a   :  { %v2006_v21 = vpop.f32.mrf.mxu1 }
 0x23b   :  { %v1939_v9 = vadd.f32 %v1938_v45, %v1874_v61 }
 0x23c   :  { %2200 = vmatmul.f32.gmra.mxu0 %v10199_v31 }
 0x23d   :  { %2135 = vmatmul.f32.gmra.mxu3 %v10200_v34  ;;  %2265 = vmatmul.f32.gmra.mxu1 %v10201_v19  ;;  %v7678_v22 = vadd.f32 %v2003_v49, %v1939_v9  ;;  %v10204_v49 = vld [vmem:[#allocation52_spill] sm:$0xff] }
 0x23e   :  { %2327 = vmatmul.f32.gmra.mxu2 %v7422_v15  ;;  %v10205_v9 = vld [vmem:[#allocation60_spill] sm:$0xff]  ;;  %v10207_v15 = vld [vmem:[#allocation59_spill] sm:$0xff] }
 0x23f   :  { %10202 = vst [vmem:[#allocation134_spill] sm:$0xff] %v7678_v22  ;;  %v843_v19 = vld [vmem:[#allocation7 + $0xf0] sm:$0xff] }
 0x240   :  { %v1876_v33 = vpop.f32.mrf.mxu3  ;;  %2499 = vmatpush.msrb.mxu1 %v843_v19 }
 0x241   :  { %v1877_v39 = vadd.f32 %v1876_v33, %v7480_v0  ;;  %v7682_v45 = vpop.f32.mrf.mxu2  ;;  %v1944_v61 = vpop.f32.mrf.mxu0 }
 0x242   :  { %v2009_v31 = vpop.f32.mrf.mxu1 }
 0x243   :  { %v1942_v53 = vadd.f32 %v1941_v17, %v1877_v39 }
 0x244   :  { %2203 = vmatmul.f32.gmra.mxu0 %v10203_v27 }
 0x245   :  { %2138 = vmatmul.f32.gmra.mxu3 %v10204_v49  ;;  %2268 = vmatmul.f32.gmra.mxu1 %v10205_v9  ;;  %v7687_v22 = vadd.f32 %v2006_v21, %v1942_v53  ;;  %v10208_v21 = vld [vmem:[#allocation57_spill] sm:$0xff]  ;;  %v10209_v53 = vld [vmem:[#allocation64_spill] sm:$0xff] }
 0x246   :  { %2330 = vmatmul.f32.gmra.mxu2 %v7442_v56  ;;  %v836_v56 = vld [vmem:[#allocation7 + $0xb8] sm:$0xff] }
 0x247   :  { %10206 = vst [vmem:[#allocation135_spill] sm:$0xff] %v7687_v22  ;;  %2500 = vmatpush.msrb.mxu1 %v836_v56 }
 0x248   :  { %v1879_v0 = vpop.f32.mrf.mxu3 }
 0x249   :  { %v1880_v33 = vadd.f32 %v1879_v0, %v7500_v28  ;;  %v7691_v17 = vpop.f32.mrf.mxu2  ;;  %v1947_v39 = vpop.f32.mrf.mxu0  ;;  %v1486_v28 = vld [vmem:[#allocation7 + $0x1508] sm:$0xff] }
 0x24a   :  { %v2012_v27 = vpop.f32.mrf.mxu1  ;;  %2438 = vmatpush.msrb.mxu0 %v1486_v28 }
 0x24b   :  { %v1945_v3 = vadd.f32 %v1944_v61, %v1880_v33 }
 0x24c   :  { %2206 = vmatmul.f32.gmra.mxu0 %v10207_v15 }
 0x24d   :  { %2141 = vmatmul.f32.gmra.mxu3 %v10208_v21  ;;  %2271 = vmatmul.f32.gmra.mxu1 %v10209_v53  ;;  %v7696_v22 = vadd.f32 %v2009_v31, %v1945_v3  ;;  %v10211_v53 = vld [vmem:[#allocation63_spill] sm:$0xff]  ;;  %v10212_v31 = vld [vmem:[#allocation61_spill] sm:$0xff]  ;;  %v10213_v3 = vld [vmem:[#allocation68_spill] sm:$0xff] }
 0x24e   :  { %2333 = vmatmul.f32.gmra.mxu2 %v7462_v50  ;;  %v10215_v50 = vld [vmem:[#allocation67_spill] sm:$0xff]  ;;  %2683 = vmatpush.msra.mxu0 %v1256_v20 }
 0x24f   :  { %10210 = vst [vmem:[#allocation136_spill] sm:$0xff] %v7696_v22 }
 0x250   :  { %v1882_v0 = vpop.f32.mrf.mxu3 }
 0x251   :  { %v1883_v61 = vadd.f32 %v1882_v0, %v7520_v37  ;;  %v7700_v33 = vpop.f32.mrf.mxu2  ;;  %v1950_v19 = vpop.f32.mrf.mxu0 }
 0x252   :  { %v2015_v15 = vpop.f32.mrf.mxu1 }
 0x253   :  { %v1948_v9 = vadd.f32 %v1947_v39, %v1883_v61 }
 0x254   :  { %2209 = vmatmul.f32.gmra.mxu0 %v10211_v53  ;;  %v829_v53 = vld [vmem:[#allocation7 + $0x80] sm:$0xff] }
 0x255   :  { %2144 = vmatmul.f32.gmra.mxu3 %v10212_v31  ;;  %2274 = vmatmul.f32.gmra.mxu1 %v10213_v3  ;;  %v7705_v22 = vadd.f32 %v2012_v27, %v1948_v9  ;;  %v10216_v27 = vld [vmem:[#allocation65_spill] sm:$0xff]  ;;  %v10217_v9 = vld [vmem:[#allocation72_spill] sm:$0xff] }
 0x256   :  { %2336 = vmatmul.f32.gmra.mxu2 %v7482_v62  ;;  %2501 = vmatpush.msrb.mxu1 %v829_v53  ;;  %v822_v53 = vld [vmem:[#allocation7 + $0x48] sm:$0xff]  ;;  %v815_v62 = vld [vmem:[#allocation7 + $0x10] sm:$0xff] }
 0x257   :  { %10214 = vst [vmem:[#allocation137_spill] sm:$0xff] %v7705_v22 }
 0x258   :  { %v1885_v37 = vpop.f32.mrf.mxu3  ;;  %2502 = vmatpush.msrb.mxu1 %v822_v53 }
 0x259   :  { %v1886_v28 = vadd.f32 %v1885_v37, %v7540_v6  ;;  %v7709_v39 = vpop.f32.mrf.mxu2  ;;  %v1953_v0 = vpop.f32.mrf.mxu0 }
 0x25a   :  { %v2018_v61 = vpop.f32.mrf.mxu1  ;;  %2503 = vmatpush.msrb.mxu1 %v815_v62  ;;  %v1137_v62 = vld [vmem:[#allocation7 + $0xa20] sm:$0xff] }
 0x25b   :  { %v1951_v56 = vadd.f32 %v1950_v19, %v1886_v28  ;;  %2619 = vmatpush.msra.mxu3 %v1137_v62  ;;  %v1130_v62 = vld [vmem:[#allocation7 + $0x9e8] sm:$0xff] }
 0x25c   :  { %2212 = vmatmul.f32.gmra.mxu0 %v10215_v50 }
 0x25d   :  { %2147 = vmatmul.f32.gmra.mxu3 %v10216_v27  ;;  %2277 = vmatmul.f32.gmra.mxu1 %v10217_v9  ;;  %v7714_v22 = vadd.f32 %v2015_v15, %v1951_v56  ;;  %v10219_v9 = vld [vmem:[#allocation71_spill] sm:$0xff]  ;;  %v10220_v15 = vld [vmem:[#allocation69_spill] sm:$0xff]  ;;  %v10221_v56 = vld [vmem:[#allocation76_spill] sm:$0xff] }
 0x25e   :  { %2339 = vmatmul.f32.gmra.mxu2 %v7502_v24  ;;  %v10223_v24 = vld [vmem:[#allocation75_spill] sm:$0xff]  ;;  %2620 = vmatpush.msra.mxu3 %v1130_v62 }
 0x25f   :  { %10218 = vst [vmem:[#allocation138_spill] sm:$0xff] %v7714_v22  ;;  %v1123_v62 = vld [vmem:[#allocation7 + $0x9b0] sm:$0xff] }
 0x260   :  { %v1888_v6 = vpop.f32.mrf.mxu3  ;;  %2621 = vmatpush.msra.mxu3 %v1123_v62  ;;  %v10237_v62 = vld [vmem:[#allocation20_spill] sm:$0xff] }
 0x261   :  { %v1889_v37 = vadd.f32 %v1888_v6, %v7560_v29  ;;  %v7718_v19 = vpop.f32.mrf.mxu2  ;;  %v1956_v28 = vpop.f32.mrf.mxu0  ;;  %v927_v29 = vld [vmem:[#allocation7 + $0x390] sm:$0xff] }
 0x262   :  { %v2021_v50 = vpop.f32.mrf.mxu1  ;;  %2568 = vmatpush.msrb.mxu2 %v927_v29  ;;  %v1480_v29 = vld [vmem:[#allocation7 + $0x14d8] sm:$0xff] }
 0x263   :  { %v1954_v3 = vadd.f32 %v1953_v0, %v1889_v37 }
 0x264   :  { %2215 = vmatmul.f32.gmra.mxu0 %v10219_v9  ;;  %2813 = vmatpush.msra.mxu2 %v1480_v29  ;;  %v1473_v29 = vld [vmem:[#allocation7 + $0x14a0] sm:$0xff] }
 0x265   :  { %2150 = vmatmul.f32.gmra.mxu3 %v10220_v15  ;;  %2280 = vmatmul.f32.gmra.mxu1 %v10221_v56  ;;  %v7723_v22 = vadd.f32 %v2018_v61, %v1954_v3  ;;  %v10224_v56 = vld [vmem:[#allocation73_spill] sm:$0xff]  ;;  %v10225_v3 = vld [vmem:[#allocation80_spill] sm:$0xff] }
 0x266   :  { %2342 = vmatmul.f32.gmra.mxu2 %v7522_v43  ;;  %v1368_v43 = vld [vmem:[#allocation7 + $0x1158] sm:$0xff] }
 0x267   :  { %10222 = vst [vmem:[#allocation139_spill] sm:$0xff] %v7723_v22  ;;  %2748 = vmatpush.msra.mxu1 %v1368_v43  ;;  %2814 = vmatpush.msra.mxu2 %v1473_v29  ;;  %v1466_v29 = vld [vmem:[#allocation7 + $0x1468] sm:$0xff] }
 0x268   :  { %v1891_v2 = vpop.f32.mrf.mxu3 }
 0x269   :  { %v1892_v0 = vadd.f32 %v1891_v2, %v7580_v63  ;;  %v7727_v6 = vpop.f32.mrf.mxu2  ;;  %v1959_v37 = vpop.f32.mrf.mxu0  ;;  %2815 = vmatpush.msra.mxu2 %v1466_v29 }
 0x26a   :  { %v2024_v53 = vpop.f32.mrf.mxu1 }
 0x26b   :  { %v1957_v9 = vadd.f32 %v1956_v28, %v1892_v0 }
 0x26c   :  { %2218 = vmatmul.f32.gmra.mxu0 %v10223_v24 }
 0x26d   :  { %2153 = vmatmul.f32.gmra.mxu3 %v10224_v56  ;;  %2283 = vmatmul.f32.gmra.mxu1 %v10225_v3  ;;  %v7732_v61 = vadd.f32 %v2021_v50, %v1957_v9  ;;  %v10227_v3 = vld [vmem:[#allocation79_spill] sm:$0xff]  ;;  %v10228_v50 = vld [vmem:[#allocation77_spill] sm:$0xff]  ;;  %v10229_v9 = vld [vmem:[#allocation84_spill] sm:$0xff] }
 0x26e   :  { %2345 = vmatmul.f32.gmra.mxu2 %v7542_v54  ;;  %v1361_v54 = vld [vmem:[#allocation7 + $0x1120] sm:$0xff] }
 0x26f   :  { %10226 = vst [vmem:[#allocation140_spill] sm:$0xff] %v7732_v61  ;;  %2749 = vmatpush.msra.mxu1 %v1361_v54 }
 0x270   :  { %v1894_v63 = vpop.f32.mrf.mxu3 }
 0x271   :  { %v1895_v2 = vadd.f32 %v1894_v63, %v7600_v47  ;;  %v7736_v28 = vpop.f32.mrf.mxu2  ;;  %v1962_v0 = vpop.f32.mrf.mxu0  ;;  %v1249_v47 = vld [vmem:[#allocation7 + $0xda0] sm:$0xff] }
 0x272   :  { %v2027_v22 = vpop.f32.mrf.mxu1  ;;  %2684 = vmatpush.msra.mxu0 %v1249_v47 }
 0x273   :  { %v1960_v24 = vadd.f32 %v1959_v37, %v1895_v2 }
 0x274   :  { %2221 = vmatmul.f32.gmra.mxu0 %v10227_v3 }
 0x275   :  { %2156 = vmatmul.f32.gmra.mxu3 %v10228_v50  ;;  %2286 = vmatmul.f32.gmra.mxu1 %v10229_v9  ;;  %v7741_v61 = vadd.f32 %v2024_v53, %v1960_v24  ;;  %v10231_v9 = vld [vmem:[#allocation83_spill] sm:$0xff]  ;;  %v10232_v24 = vld [vmem:[#allocation82_spill] sm:$0xff]  ;;  %v10233_v53 = vld [vmem:[#allocation88_spill] sm:$0xff] }
 0x276   :  { %2348 = vmatmul.f32.gmra.mxu2 %v7562_v26 }
 0x277   :  { %10230 = vst [vmem:[#allocation141_spill] sm:$0xff] %v7741_v61 }
 0x278   :  { %v1897_v20 = vpop.f32.mrf.mxu3 }
 0x279   :  { %v1898_v37 = vadd.f32 %v1897_v20, %v7612_v23  ;;  %v7745_v63 = vpop.f32.mrf.mxu2  ;;  %v1965_v43 = vpop.f32.mrf.mxu0  ;;  %v1242_v23 = vld [vmem:[#allocation7 + $0xd68] sm:$0xff] }
 0x27a   :  { %v2030_v2 = vpop.f32.mrf.mxu1  ;;  %2685 = vmatpush.msra.mxu0 %v1242_v23  ;;  %v1459_v23 = vld [vmem:[#allocation7 + $0x1430] sm:$0xff] }
 0x27b   :  { %v1963_v3 = vadd.f32 %v1962_v0, %v1898_v37  ;;  %2816 = vmatpush.msra.mxu2 %v1459_v23  ;;  %v1452_v23 = vld [vmem:[#allocation7 + $0x13f8] sm:$0xff] }
 0x27c   :  { %2224 = vmatmul.f32.gmra.mxu0 %v10231_v9  ;;  %v6207_v9 = vld [vmem:[#allocation8] sm:$0x7f] }
 0x27d   :  { %2159 = vmatmul.f32.gmra.mxu3 %v10232_v24  ;;  %2289 = vmatmul.f32.gmra.mxu1 %v10233_v53  ;;  %v7750_v61 = vadd.f32 %v2027_v22, %v1963_v3  ;;  %v7756_v26 = vperm.slane %v6207_v9, 1  ;;  %v1354_v3 = vld [vmem:[#allocation7 + $0x10e8] sm:$0xff]  ;;  %v10236_v53 = vld [vmem:[#allocation85_spill] sm:$0xff] }
 0x27e   :  { %2351 = vmatmul.f32.gmra.mxu2 %v7582_v38  ;;  %2750 = vmatpush.msra.mxu1 %v1354_v3 }
 0x27f   :  { %10234 = vst [vmem:[#allocation142_spill] sm:$0xff] %v7750_v61  ;;  %v10235_v61 = vld [vmem:[#allocation87_spill] sm:$0xff]  ;;  %v2051_v9 = vadd.f32 %v7628_v60, %v7756_v26  ;;  %2817 = vmatpush.msra.mxu2 %v1452_v23  ;;  %v1445_v23 = vld [vmem:[#allocation7 + $0x13c0] sm:$0xff] }
 0x280   :  { %v1900_v47 = vpop.f32.mrf.mxu3 }
 0x281   :  { %v1901_v0 = vadd.f32 %v1900_v47, %v7619_v8  ;;  %v7754_v20 = vpop.f32.mrf.mxu2  ;;  %v2180_v54 = vpop.f32.mrf.mxu0  ;;  %v1116_v8 = vld [vmem:[#allocation7 + $0x978] sm:$0xff]  ;;  %v1235_v47 = vld [vmem:[#allocation7 + $0xd30] sm:$0xff]  ;;  %2818 = vmatpush.msra.mxu2 %v1445_v23  ;;  %v1438_v23 = vld [vmem:[#allocation7 + $0x1388] sm:$0xff] }
 0x282   :  { %v2245_v37 = vpop.f32.mrf.mxu1  ;;  %2622 = vmatpush.msra.mxu3 %v1116_v8  ;;  %2686 = vmatpush.msra.mxu0 %v1235_v47  ;;  %v1109_v8 = vld [vmem:[#allocation7 + $0x940] sm:$0xff]  ;;  %v1228_v47 = vld [vmem:[#allocation7 + $0xcf8] sm:$0xff] }
 0x283   :  { %v1966_v22 = vadd.f32 %v1965_v43, %v1901_v0  ;;  %2819 = vmatpush.msra.mxu2 %v1438_v23  ;;  %v1431_v23 = vld [vmem:[#allocation7 + $0x1350] sm:$0xff] }
 0x284   :  { %6007 = vmatmul.msk.f32.vlgmr.msrb.gmra.mxu0 %vm1529_vm2, %v10235_v61  ;;  %2623 = vmatpush.msra.mxu3 %v1109_v8  ;;  %v1102_v8 = vld [vmem:[#allocation7 + $0x908] sm:$0xff] }
 0x285   :  { %2374 = vmatmul.f32.vlgmr.msrb.gmra.mxu3 %v10236_v53  ;;  %2504 = vmatmul.f32.vlgmr.msrb.gmra.mxu1 %v10237_v62  ;;  %v7762_v29 = vadd.f32 %v2030_v2, %v1966_v22  ;;  %v1347_v2 = vld [vmem:[#allocation7 + $0x10b0] sm:$0xff]  ;;  %v10239_v22 = vld [vmem:[#allocation90_spill] sm:$0xff] }
 0x286   :  { %2354 = vmatmul.f32.gmra.mxu2 %v7602_v32  ;;  %2751 = vmatpush.msra.mxu1 %v1347_v2 }
 0x287   :  { %10238 = vst [vmem:[#allocation143_spill] sm:$0xff] %v7762_v29  ;;  %v10240_v29 = vld [vmem:[#allocation22_spill] sm:$0xff]  ;;  %2687 = vmatpush.msra.mxu0 %v1228_v47  ;;  %2624 = vmatpush.msra.mxu3 %v1102_v8  ;;  %v1095_v8 = vld [vmem:[#allocation7 + $0x8d0] sm:$0xff] }
 0x288   :  { %v2115_v43 = vpop.f32.mrf.mxu3  ;;  %v1221_v47 = vld [vmem:[#allocation7 + $0xcc0] sm:$0xff]  ;;  %2820 = vmatpush.msra.mxu2 %v1431_v23  ;;  %v1424_v23 = vld [vmem:[#allocation7 + $0x1318] sm:$0xff] }
 0x289   :  { %v7767_v0 = vpop.f32.mrf.mxu2  ;;  %v2116_v3 = vadd.f32 %v2115_v43, %v2051_v9  ;;  %v2183_v61 = vpop.f32.mrf.mxu0  ;;  %v2054_v9 = vadd.f32 %v7637_v52, %v7756_v26  ;;  %2688 = vmatpush.msra.mxu0 %v1221_v47  ;;  %v1214_v47 = vld [vmem:[#allocation7 + $0xc88] sm:$0xff]  ;;  %2625 = vmatpush.msra.mxu3 %v1095_v8  ;;  %v1088_v8 = vld [vmem:[#allocation7 + $0x898] sm:$0xff] }
 0x28a   :  { %v2248_v38 = vpop.f32.mrf.mxu1  ;;  %2821 = vmatpush.msra.mxu2 %v1424_v23  ;;  %v1417_v23 = vld [vmem:[#allocation7 + $0x12e0] sm:$0xff] }
 0x28b   :  { %v2181_v62 = vadd.f32 %v2180_v54, %v2116_v3  ;;  %2689 = vmatpush.msra.mxu0 %v1214_v47  ;;  %v1207_v47 = vld [vmem:[#allocation7 + $0xc50] sm:$0xff]  ;;  %2626 = vmatpush.msra.mxu3 %v1088_v8  ;;  %v1081_v8 = vld [vmem:[#allocation7 + $0x860] sm:$0xff] }
 0x28c   :  { %6008 = vmatmul.msk.f32.gmra.mxu0 %vm1529_vm2, %v10239_v22  ;;  %2822 = vmatpush.msra.mxu2 %v1417_v23  ;;  %v1410_v23 = vld [vmem:[#allocation7 + $0x12a8] sm:$0xff] }
 0x28d   :  { %2377 = vmatmul.f32.gmra.mxu3 %v10240_v29  ;;  %2507 = vmatmul.f32.gmra.mxu1 %v10116_v30  ;;  %v2246_v60 = vadd.f32 %v2245_v37, %v2181_v62  ;;  %v1340_v37 = vld [vmem:[#allocation7 + $0x1078] sm:$0xff] }
 0x28e   :  { %2569 = vmatmul.f32.vlgmr.msrb.gmra.mxu2 %v10170_v48  ;;  %v10241_v62 = vld [vmem:[#allocation93_spill] sm:$0xff]  ;;  %2752 = vmatpush.msra.mxu1 %v1340_v37  ;;  %v10242_v48 = vld [vmem:[#allocation91_spill] sm:$0xff] }
 0x28f   :  { %2690 = vmatpush.msra.mxu0 %v1207_v47  ;;  %v1200_v47 = vld [vmem:[#allocation7 + $0xc18] sm:$0xff]  ;;  %2627 = vmatpush.msra.mxu3 %v1081_v8  ;;  %v1074_v8 = vld [vmem:[#allocation7 + $0x828] sm:$0xff] }
 0x290   :  { %v2118_v54 = vpop.f32.mrf.mxu3  ;;  %2823 = vmatpush.msra.mxu2 %v1410_v23  ;;  %v1403_v23 = vld [vmem:[#allocation7 + $0x1270] sm:$0xff] }
 0x291   :  { %v2119_v43 = vadd.f32 %v2118_v54, %v2054_v9  ;;  %v2310_v3 = vpop.f32.mrf.mxu2  ;;  %v2186_v2 = vpop.f32.mrf.mxu0  ;;  %2691 = vmatpush.msra.mxu0 %v1200_v47  ;;  %v1193_v47 = vld [vmem:[#allocation7 + $0xbe0] sm:$0xff]  ;;  %2628 = vmatpush.msra.mxu3 %v1074_v8  ;;  %v1067_v8 = vld [vmem:[#allocation7 + $0x7f0] sm:$0xff] }
 0x292   :  { %v7776_v22 = vadd.f32 %v2310_v3, %v2246_v60  ;;  %v2251_v32 = vpop.f32.mrf.mxu1  ;;  %v2057_v60 = vadd.f32 %v7646_v12, %v7756_v26  ;;  %2824 = vmatpush.msra.mxu2 %v1403_v23  ;;  %v1396_v23 = vld [vmem:[#allocation7 + $0x1238] sm:$0xff] }
 0x293   :  { %v2184_v30 = vadd.f32 %v2183_v61, %v2119_v43  ;;  %2692 = vmatpush.msra.mxu0 %v1193_v47  ;;  %v1186_v47 = vld [vmem:[#allocation7 + $0xba8] sm:$0xff]  ;;  %2629 = vmatpush.msra.mxu3 %v1067_v8  ;;  %v1060_v8 = vld [vmem:[#allocation7 + $0x7b8] sm:$0xff] }
 0x294   :  { %6009 = vmatmul.msk.f32.gmra.mxu0 %vm1529_vm2, %v10241_v62  ;;  %2825 = vmatpush.msra.mxu2 %v1396_v23  ;;  %v1389_v23 = vld [vmem:[#allocation7 + $0x1200] sm:$0xff] }
 0x295   :  { %2380 = vmatmul.f32.gmra.mxu3 %v10242_v48  ;;  %2510 = vmatmul.f32.gmra.mxu1 %v6943_v16  ;;  %v2249_v52 = vadd.f32 %v2248_v38, %v2184_v30  ;;  %v1333_v30 = vld [vmem:[#allocation7 + $0x1040] sm:$0xff]  ;;  %v10244_v16 = vld [vmem:[#allocation32_spill] sm:$0xff] }
 0x296   :  { %2572 = vmatmul.f32.gmra.mxu2 %v10175_v25  ;;  %2753 = vmatpush.msra.mxu1 %v1333_v30  ;;  %v10243_v38 = vld [vmem:[#allocation94_spill] sm:$0xff] }
 0x297   :  { %2693 = vmatpush.msra.mxu0 %v1186_v47  ;;  %v1179_v47 = vld [vmem:[#allocation7 + $0xb70] sm:$0xff]  ;;  %2630 = vmatpush.msra.mxu3 %v1060_v8  ;;  %v1053_v8 = vld [vmem:[#allocation7 + $0x780] sm:$0xff] }
 0x298   :  { %v2121_v61 = vpop.f32.mrf.mxu3  ;;  %2826 = vmatpush.msra.mxu2 %v1389_v23  ;;  %v1382_v23 = vld [vmem:[#allocation7 + $0x11c8] sm:$0xff] }
 0x299   :  { %v2122_v9 = vadd.f32 %v2121_v61, %v2057_v60  ;;  %v2313_v54 = vpop.f32.mrf.mxu2  ;;  %v2189_v43 = vpop.f32.mrf.mxu0  ;;  %2694 = vmatpush.msra.mxu0 %v1179_v47  ;;  %v1172_v47 = vld [vmem:[#allocation7 + $0xb38] sm:$0xff]  ;;  %2631 = vmatpush.msra.mxu3 %v1053_v8  ;;  %v1046_v8 = vld [vmem:[#allocation7 + $0x748] sm:$0xff] }
 0x29a   :  { %v7785_v3 = vadd.f32 %v2313_v54, %v2249_v52  ;;  %v2254_v37 = vpop.f32.mrf.mxu1  ;;  %v2060_v52 = vadd.f32 %v7655_v14, %v7756_v26  ;;  %2827 = vmatpush.msra.mxu2 %v1382_v23  ;;  %v2087_v23 = vadd.f32 %v7736_v28, %v7756_v26  ;;  %v921_v28 = vld [vmem:[#allocation7 + $0x360] sm:$0xff] }
 0x29b   :  { %v2187_v62 = vadd.f32 %v2186_v2, %v2122_v9  ;;  %2695 = vmatpush.msra.mxu0 %v1172_v47  ;;  %v1165_v47 = vld [vmem:[#allocation7 + $0xb00] sm:$0xff]  ;;  %2632 = vmatpush.msra.mxu3 %v1046_v8  ;;  %v1039_v8 = vld [vmem:[#allocation7 + $0x710] sm:$0xff] }
 0x29c   :  { %6010 = vmatmul.msk.f32.gmra.mxu0 %vm1529_vm2, %v7364_v57 }
 0x29d   :  { %2383 = vmatmul.f32.gmra.mxu3 %v10243_v38  ;;  %2513 = vmatmul.f32.gmra.mxu1 %v10244_v16  ;;  %v2252_v12 = vadd.f32 %v2251_v32, %v2187_v62  ;;  %v1326_v32 = vld [vmem:[#allocation7 + $0x1008] sm:$0xff]  ;;  %v10246_v16 = vld [vmem:[#allocation97_spill] sm:$0xff] }
 0x29e   :  { %2575 = vmatmul.f32.gmra.mxu2 %v10179_v4  ;;  %v10245_v62 = vld [vmem:[#allocation99_spill] sm:$0xff]  ;;  %2754 = vmatpush.msra.mxu1 %v1326_v32 }
 0x29f   :  { %2696 = vmatpush.msra.mxu0 %v1165_v47  ;;  %v1158_v47 = vld [vmem:[#allocation7 + $0xac8] sm:$0xff]  ;;  %2633 = vmatpush.msra.mxu3 %v1039_v8  ;;  %v1375_v8 = vld [vmem:[#allocation7 + $0x1190] sm:$0xff] }
 0x2a0   :  { %v2124_v2 = vpop.f32.mrf.mxu3  ;;  %2828 = vmatpush.msra.mxu2 %v1375_v8  ;;  %v2090_v8 = vadd.f32 %v7745_v63, %v7756_v26 }
 0x2a1   :  { %v2125_v60 = vadd.f32 %v2124_v2, %v2060_v52  ;;  %v2316_v61 = vpop.f32.mrf.mxu2  ;;  %v2192_v9 = vpop.f32.mrf.mxu0  ;;  %2697 = vmatpush.msra.mxu0 %v1158_v47 }
 0x2a2   :  { %v7794_v54 = vadd.f32 %v2316_v61, %v2252_v12  ;;  %v2257_v30 = vpop.f32.mrf.mxu1  ;;  %v2063_v12 = vadd.f32 %v7664_v42, %v7756_v26 }
 0x2a3   :  { %v2190_v57 = vadd.f32 %v2189_v43, %v2125_v60 }
 0x2a4   :  { %6011 = vmatmul.msk.f32.gmra.mxu0 %vm1529_vm2, %v10245_v62 }
 0x2a5   :  { %2386 = vmatmul.f32.gmra.mxu3 %v10246_v16  ;;  %2516 = vmatmul.f32.gmra.mxu1 %v10128_v58  ;;  %v2255_v14 = vadd.f32 %v2254_v37, %v2190_v57  ;;  %v1319_v57 = vld [vmem:[#allocation7 + $0xfd0] sm:$0xff]  ;;  %v10247_v37 = vld [vmem:[#allocation101_spill] sm:$0xff] }
 0x2a6   :  { %2578 = vmatmul.f32.gmra.mxu2 %v10184_v5  ;;  %2755 = vmatpush.msra.mxu1 %v1319_v57  ;;  %v10248_v58 = vld [vmem:[#allocation39_spill] sm:$0xff] }
 0x2a8   :  { %v2127_v43 = vpop.f32.mrf.mxu3 }
 0x2a9   :  { %v2128_v52 = vadd.f32 %v2127_v43, %v2063_v12  ;;  %v2319_v2 = vpop.f32.mrf.mxu2  ;;  %v2195_v60 = vpop.f32.mrf.mxu0 }
 0x2aa   :  { %v7803_v61 = vadd.f32 %v2319_v2, %v2255_v14  ;;  %v2260_v32 = vpop.f32.mrf.mxu1  ;;  %v2066_v14 = vadd.f32 %v7673_v51, %v7756_v26 }
 0x2ab   :  { %v2193_v62 = vadd.f32 %v2192_v9, %v2128_v52 }
 0x2ac   :  { %6012 = vmatmul.msk.f32.gmra.mxu0 %vm1529_vm2, %v10247_v37 }
 0x2ad   :  { %2389 = vmatmul.f32.gmra.mxu3 %v10248_v58  ;;  %2519 = vmatmul.f32.gmra.mxu1 %v10132_v1  ;;  %v2258_v42 = vadd.f32 %v2257_v30, %v2193_v62  ;;  %v1312_v30 = vld [vmem:[#allocation7 + $0xf98] sm:$0xff]  ;;  %v10250_v1 = vld [vmem:[#allocation102_spill] sm:$0xff] }
 0x2ae   :  { %2581 = vmatmul.f32.gmra.mxu2 %v10188_v11  ;;  %v10249_v62 = vld [vmem:[#allocation104_spill] sm:$0xff]  ;;  %2756 = vmatpush.msra.mxu1 %v1312_v30 }
 0x2b0   :  { %v2130_v9 = vpop.f32.mrf.mxu3 }
 0x2b1   :  { %v2131_v12 = vadd.f32 %v2130_v9, %v2066_v14  ;;  %v2322_v43 = vpop.f32.mrf.mxu2  ;;  %v2198_v52 = vpop.f32.mrf.mxu0 }
 0x2b2   :  { %v7812_v2 = vadd.f32 %v2322_v43, %v2258_v42  ;;  %v2263_v57 = vpop.f32.mrf.mxu1  ;;  %v2069_v42 = vadd.f32 %v7682_v45, %v7756_v26 }
 0x2b3   :  { %v2196_v37 = vadd.f32 %v2195_v60, %v2131_v12 }
 0x2b4   :  { %6013 = vmatmul.msk.f32.gmra.mxu0 %vm1529_vm2, %v10249_v62 }
 0x2b5   :  { %2392 = vmatmul.f32.gmra.mxu3 %v10250_v1  ;;  %2522 = vmatmul.f32.gmra.mxu1 %v7043_v55  ;;  %v2261_v51 = vadd.f32 %v2260_v32, %v2196_v37  ;;  %v1305_v32 = vld [vmem:[#allocation7 + $0xf60] sm:$0xff] }
 0x2b6   :  { %2584 = vmatmul.f32.gmra.mxu2 %v10192_v46  ;;  %2757 = vmatpush.msra.mxu1 %v1305_v32  ;;  %v10251_v37 = vld [vmem:[#allocation105_spill] sm:$0xff] }
 0x2b7   :  { %v10252_v55 = vld [vmem:[#allocation49_spill] sm:$0xff] }
 0x2b8   :  { %v2133_v60 = vpop.f32.mrf.mxu3 }
 0x2b9   :  { %v2134_v14 = vadd.f32 %v2133_v60, %v2069_v42  ;;  %v2325_v9 = vpop.f32.mrf.mxu2  ;;  %v2201_v12 = vpop.f32.mrf.mxu0 }
 0x2ba   :  { %v7821_v43 = vadd.f32 %v2325_v9, %v2261_v51  ;;  %v2266_v30 = vpop.f32.mrf.mxu1  ;;  %v2072_v51 = vadd.f32 %v7691_v17, %v7756_v26 }
 0x2bb   :  { %v2199_v62 = vadd.f32 %v2198_v52, %v2134_v14 }
 0x2bc   :  { %6014 = vmatmul.msk.f32.gmra.mxu0 %vm1529_vm2, %v7444_v36 }
 0x2bd   :  { %2395 = vmatmul.f32.gmra.mxu3 %v10251_v37  ;;  %2525 = vmatmul.f32.gmra.mxu1 %v10252_v55  ;;  %v2264_v45 = vadd.f32 %v2263_v57, %v2199_v62  ;;  %v1298_v57 = vld [vmem:[#allocation7 + $0xf28] sm:$0xff]  ;;  %v10254_v55 = vld [vmem:[#allocation108_spill] sm:$0xff] }
 0x2be   :  { %2587 = vmatmul.f32.gmra.mxu2 %v10196_v18  ;;  %v10253_v62 = vld [vmem:[#allocation110_spill] sm:$0xff]  ;;  %2758 = vmatpush.msra.mxu1 %v1298_v57 }
 0x2c0   :  { %v2136_v52 = vpop.f32.mrf.mxu3 }
 0x2c1   :  { %v2137_v42 = vadd.f32 %v2136_v52, %v2072_v51  ;;  %v2328_v60 = vpop.f32.mrf.mxu2  ;;  %v2204_v14 = vpop.f32.mrf.mxu0 }
 0x2c2   :  { %v7830_v9 = vadd.f32 %v2328_v60, %v2264_v45  ;;  %v2269_v32 = vpop.f32.mrf.mxu1  ;;  %v2075_v45 = vadd.f32 %v7700_v33, %v7756_v26 }
 0x2c3   :  { %v2202_v36 = vadd.f32 %v2201_v12, %v2137_v42 }
 0x2c4   :  { %6015 = vmatmul.msk.f32.gmra.mxu0 %vm1529_vm2, %v10253_v62 }
 0x2c5   :  { %2398 = vmatmul.f32.gmra.mxu3 %v10254_v55  ;;  %2528 = vmatmul.f32.gmra.mxu1 %v10144_v44  ;;  %v2267_v17 = vadd.f32 %v2266_v30, %v2202_v36  ;;  %v1291_v36 = vld [vmem:[#allocation7 + $0xef0] sm:$0xff] }
 0x2c6   :  { %2590 = vmatmul.f32.gmra.mxu2 %v10200_v34  ;;  %v10255_v30 = vld [vmem:[#allocation112_spill] sm:$0xff]  ;;  %2759 = vmatpush.msra.mxu1 %v1291_v36 }
 0x2c7   :  { %v10256_v44 = vld [vmem:[#allocation56_spill] sm:$0xff] }
 0x2c8   :  { %v2139_v12 = vpop.f32.mrf.mxu3 }
 0x2c9   :  { %v2140_v51 = vadd.f32 %v2139_v12, %v2075_v45  ;;  %v2331_v52 = vpop.f32.mrf.mxu2  ;;  %v2207_v42 = vpop.f32.mrf.mxu0 }
 0x2ca   :  { %v7839_v60 = vadd.f32 %v2331_v52, %v2267_v17  ;;  %v2272_v57 = vpop.f32.mrf.mxu1  ;;  %v2078_v17 = vadd.f32 %v7709_v39, %v7756_v26 }
 0x2cb   :  { %v2205_v62 = vadd.f32 %v2204_v14, %v2140_v51 }
 0x2cc   :  { %6016 = vmatmul.msk.f32.gmra.mxu0 %vm1529_vm2, %v10255_v30 }
 0x2cd   :  { %2401 = vmatmul.f32.gmra.mxu3 %v10256_v44  ;;  %2531 = vmatmul.f32.gmra.mxu1 %v10148_v59  ;;  %v2270_v33 = vadd.f32 %v2269_v32, %v2205_v62  ;;  %v1284_v32 = vld [vmem:[#allocation7 + $0xeb8] sm:$0xff]  ;;  %v10257_v62 = vld [vmem:[#allocation115_spill] sm:$0xff] }
 0x2ce   :  { %2593 = vmatmul.f32.gmra.mxu2 %v10204_v49  ;;  %2760 = vmatpush.msra.mxu1 %v1284_v32  ;;  %v10258_v59 = vld [vmem:[#allocation113_spill] sm:$0xff] }
 0x2d0   :  { %v2142_v14 = vpop.f32.mrf.mxu3 }
 0x2d1   :  { %v2143_v45 = vadd.f32 %v2142_v14, %v2078_v17  ;;  %v2334_v12 = vpop.f32.mrf.mxu2  ;;  %v2210_v51 = vpop.f32.mrf.mxu0 }
 0x2d2   :  { %v7848_v52 = vadd.f32 %v2334_v12, %v2270_v33  ;;  %v2275_v36 = vpop.f32.mrf.mxu1  ;;  %v2081_v33 = vadd.f32 %v7718_v19, %v7756_v26 }
 0x2d3   :  { %v2208_v30 = vadd.f32 %v2207_v42, %v2143_v45 }
 0x2d4   :  { %6017 = vmatmul.msk.f32.gmra.mxu0 %vm1529_vm2, %v10257_v62 }
 0x2d5   :  { %2404 = vmatmul.f32.gmra.mxu3 %v10258_v59  ;;  %2534 = vmatmul.f32.gmra.mxu1 %v10152_v13  ;;  %v2273_v39 = vadd.f32 %v2272_v57, %v2208_v30  ;;  %v1277_v57 = vld [vmem:[#allocation7 + $0xe80] sm:$0xff]  ;;  %v10260_v13 = vld [vmem:[#allocation116_spill] sm:$0xff] }
 0x2d6   :  { %2596 = vmatmul.f32.gmra.mxu2 %v10208_v21  ;;  %v10259_v30 = vld [vmem:[#allocation118_spill] sm:$0xff]  ;;  %2761 = vmatpush.msra.mxu1 %v1277_v57 }
 0x2d8   :  { %v2145_v42 = vpop.f32.mrf.mxu3 }
 0x2d9   :  { %v2146_v17 = vadd.f32 %v2145_v42, %v2081_v33  ;;  %v2337_v14 = vpop.f32.mrf.mxu2  ;;  %v2213_v45 = vpop.f32.mrf.mxu0 }
 0x2da   :  { %v7857_v12 = vadd.f32 %v2337_v14, %v2273_v39  ;;  %v2278_v32 = vpop.f32.mrf.mxu1  ;;  %v2084_v39 = vadd.f32 %v7727_v6, %v7756_v26 }
 0x2db   :  { %v2211_v62 = vadd.f32 %v2210_v51, %v2146_v17 }
 0x2dc   :  { %6018 = vmatmul.msk.f32.gmra.mxu0 %vm1529_vm2, %v10259_v30  ;;  %v1270_v30 = vld [vmem:[#allocation7 + $0xe48] sm:$0xff] }
 0x2dd   :  { %2407 = vmatmul.f32.gmra.mxu3 %v10260_v13  ;;  %2537 = vmatmul.f32.gmra.mxu1 %v10156_v41  ;;  %v2276_v19 = vadd.f32 %v2275_v36, %v2211_v62  ;;  %v1151_v62 = vld [vmem:[#allocation7 + $0xa90] sm:$0xff] }
 0x2de   :  { %2599 = vmatmul.f32.gmra.mxu2 %v10212_v31  ;;  %2762 = vmatpush.msra.mxu1 %v1270_v30  ;;  %v1263_v41 = vld [vmem:[#allocation7 + $0xe10] sm:$0xff] }
 0x2df   :  { %v10261_v31 = vld [vmem:[#allocation119_spill] sm:$0xff]  ;;  %2698 = vmatpush.msra.mxu0 %v1151_v62 }
 0x2e0   :  { %v2148_v51 = vpop.f32.mrf.mxu3  ;;  %2763 = vmatpush.msra.mxu1 %v1263_v41  ;;  %v1145_v41 = vld [vmem:[#allocation7 + $0xa60] sm:$0xff] }
 0x2e1   :  { %v2149_v33 = vadd.f32 %v2148_v51, %v2084_v39  ;;  %v2340_v42 = vpop.f32.mrf.mxu2  ;;  %v2216_v17 = vpop.f32.mrf.mxu0  ;;  %3073 = vmatpush.msrb.mxu2 %v1145_v41  ;;  %2943 = vmatpush.msrb.mxu0 %v921_v28  ;;  %v1138_v41 = vld [vmem:[#allocation7 + $0xa28] sm:$0xff] }
 0x2e2   :  { %v7866_v14 = vadd.f32 %v2340_v42, %v2276_v19  ;;  %v2281_v57 = vpop.f32.mrf.mxu1  ;;  %v1508_v19 = vld [vmem:[#allocation7 + $0x15b8] sm:$0xff]  ;;  %v914_v28 = vld [vmem:[#allocation7 + $0x328] sm:$0xff] }
 0x2e3   :  { %v2214_v36 = vadd.f32 %v2213_v45, %v2149_v33  ;;  %2890 = vmatpush.msrb.mxu3 %v1508_v19  ;;  %3074 = vmatpush.msrb.mxu2 %v1138_v41  ;;  %v1131_v41 = vld [vmem:[#allocation7 + $0x9f0] sm:$0xff] }
 0x2e4   :  { %6019 = vmatmul.msk.f32.gmra.mxu0 %vm1529_vm2, %v7544_v7 }
 0x2e5   :  { %2410 = vmatmul.f32.gmra.mxu3 %v10261_v31  ;;  %2540 = vmatmul.f32.gmra.mxu1 %v10160_v35  ;;  %v2279_v6 = vadd.f32 %v2278_v32, %v2214_v36  ;;  %v10262_v32 = vld [vmem:[#allocation124_spill] sm:$0xff]  ;;  %v10263_v36 = vld [vmem:[#allocation122_spill] sm:$0xff] }
 0x2e6   :  { %2602 = vmatmul.f32.gmra.mxu2 %v10216_v27  ;;  %2944 = vmatpush.msrb.mxu0 %v914_v28  ;;  %v907_v28 = vld [vmem:[#allocation7 + $0x2f0] sm:$0xff]  ;;  %v956_v35 = vld [vmem:[#allocation7 + $0x478] sm:$0xff] }
 0x2e7   :  { %3075 = vmatpush.msrb.mxu2 %v1131_v41  ;;  %v1124_v41 = vld [vmem:[#allocation7 + $0x9b8] sm:$0xff]  ;;  %v10307_v27 = vld [vmem:[#allocation111_spill] sm:$0xff] }
 0x2e8   :  { %v2151_v45 = vpop.f32.mrf.mxu3  ;;  %2945 = vmatpush.msrb.mxu0 %v907_v28  ;;  %v900_v28 = vld [vmem:[#allocation7 + $0x2b8] sm:$0xff] }
 0x2e9   :  { %v2152_v30 = vadd.f32 %v2151_v45, %v2087_v23  ;;  %v2343_v47 = vpop.f32.mrf.mxu2  ;;  %v2219_v39 = vpop.f32.mrf.mxu0  ;;  %3076 = vmatpush.msrb.mxu2 %v1124_v41  ;;  %v1117_v41 = vld [vmem:[#allocation7 + $0x980] sm:$0xff] }
 0x2ea   :  { %v7875_v51 = vadd.f32 %v2343_v47, %v2279_v6  ;;  %v2284_v33 = vpop.f32.mrf.mxu1  ;;  %2946 = vmatpush.msrb.mxu0 %v900_v28  ;;  %v893_v28 = vld [vmem:[#allocation7 + $0x280] sm:$0xff] }
 0x2eb   :  { %v2217_v42 = vadd.f32 %v2216_v17, %v2152_v30  ;;  %3077 = vmatpush.msrb.mxu2 %v1117_v41  ;;  %v1110_v41 = vld [vmem:[#allocation7 + $0x948] sm:$0xff] }
 0x2ec   :  { %6020 = vmatmul.msk.f32.gmra.mxu0 %vm1529_vm2, %v10262_v32  ;;  %v1033_v32 = vld [vmem:[#allocation7 + $0x6e0] sm:$0xff] }
 0x2ed   :  { %2413 = vmatmul.f32.gmra.mxu3 %v10263_v36  ;;  %2543 = vmatmul.f32.gmra.mxu1 %v10164_v10  ;;  %v2282_v62 = vadd.f32 %v2281_v57, %v2217_v42  ;;  %v10264_v57 = vld [vmem:[#allocation125_spill] sm:$0xff]  ;;  %v10265_v42 = vld [vmem:[#allocation78_spill] sm:$0xff] }
 0x2ee   :  { %2605 = vmatmul.f32.gmra.mxu2 %v10220_v15  ;;  %3008 = vmatpush.msrb.mxu1 %v1033_v32  ;;  %v1026_v10 = vld [vmem:[#allocation7 + $0x6a8] sm:$0xff] }
 0x2ef   :  { %2947 = vmatpush.msrb.mxu0 %v893_v28  ;;  %v886_v28 = vld [vmem:[#allocation7 + $0x248] sm:$0xff]  ;;  %3078 = vmatpush.msrb.mxu2 %v1110_v41  ;;  %v1103_v41 = vld [vmem:[#allocation7 + $0x910] sm:$0xff] }
 0x2f0   :  { %v2154_v6 = vpop.f32.mrf.mxu3  ;;  %3009 = vmatpush.msrb.mxu1 %v1026_v10 }
 0x2f1   :  { %v2155_v19 = vadd.f32 %v2154_v6, %v2090_v8  ;;  %v2346_v17 = vpop.f32.mrf.mxu2  ;;  %v2222_v23 = vpop.f32.mrf.mxu0  ;;  %2948 = vmatpush.msrb.mxu0 %v886_v28  ;;  %v879_v28 = vld [vmem:[#allocation7 + $0x210] sm:$0xff]  ;;  %3079 = vmatpush.msrb.mxu2 %v1103_v41  ;;  %v1494_v41 = vld [vmem:[#allocation7 + $0x1548] sm:$0xff] }
 0x2f2   :  { %v7884_v45 = vadd.f32 %v2346_v17, %v2282_v62  ;;  %v2287_v30 = vpop.f32.mrf.mxu1  ;;  %v2093_v62 = vadd.f32 %v7754_v20, %v7756_v26 }
 0x2f3   :  { %v2220_v47 = vadd.f32 %v2219_v39, %v2155_v19  ;;  %2949 = vmatpush.msrb.mxu0 %v879_v28  ;;  %v1096_v28 = vld [vmem:[#allocation7 + $0x8d8] sm:$0xff] }
 0x2f4   :  { %6021 = vmatmul.msk.f32.gmra.mxu0 %vm1529_vm2, %v7584_v40  ;;  %3080 = vmatpush.msrb.mxu2 %v1096_v28  ;;  %v865_v28 = vld [vmem:[#allocation7 + $0x1a0] sm:$0xff] }
 0x2f5   :  { %2416 = vmatmul.f32.gmra.mxu3 %v10264_v57  ;;  %2546 = vmatmul.f32.gmra.mxu1 %v10265_v42  ;;  %v2285_v63 = vadd.f32 %v2284_v33, %v2220_v47  ;;  %v10266_v42 = vld [vmem:[#allocation130_spill] sm:$0xff]  ;;  %v10267_v33 = vld [vmem:[#allocation128_spill] sm:$0xff]  ;;  %v10268_v47 = vld [vmem:[#allocation81_spill] sm:$0xff] }
 0x2f6   :  { %2608 = vmatmul.f32.gmra.mxu2 %v10224_v56  ;;  %v10291_v56 = vld [vmem:[#allocation100_spill] sm:$0xff] }
 0x2f8   :  { %v2157_v39 = vpop.f32.mrf.mxu3 }
 0x2f9   :  { %v2158_v8 = vadd.f32 %v2157_v39, %v2093_v62  ;;  %v2349_v6 = vpop.f32.mrf.mxu2  ;;  %v2225_v19 = vpop.f32.mrf.mxu0 }
 0x2fa   :  { %v7893_v17 = vadd.f32 %v2349_v6, %v2285_v63  ;;  %v2290_v32 = vpop.f32.mrf.mxu1  ;;  %v2096_v63 = vadd.f32 %v7767_v0, %v7756_v26  ;;  %v1501_v0 = vld [vmem:[#allocation7 + $0x1580] sm:$0xff] }
 0x2fb   :  { %v2223_v40 = vadd.f32 %v2222_v23, %v2158_v8  ;;  %2891 = vmatpush.msrb.mxu3 %v1501_v0  ;;  %v10275_v0 = vld [vmem:[#allocation89_spill] sm:$0xff] }
 0x2fc   :  { %6022 = vmatmul.msk.f32.gmra.mxu0 %vm1529_vm2, %v10266_v42 }
 0x2fd   :  { %2419 = vmatmul.f32.gmra.mxu3 %v10267_v33  ;;  %2549 = vmatmul.f32.gmra.mxu1 %v10268_v47  ;;  %v2288_v20 = vadd.f32 %v2287_v30, %v2223_v40  ;;  %v1019_v47 = vld [vmem:[#allocation7 + $0x670] sm:$0xff]  ;;  %v10269_v40 = vld [vmem:[#allocation26_spill] sm:$0xff]  ;;  %v10270_v30 = vld [vmem:[#allocation21_spill] sm:$0xff] }
 0x2fe   :  { %2611 = vmatmul.f32.gmra.mxu2 %v10228_v50  ;;  %3010 = vmatpush.msrb.mxu1 %v1019_v47  ;;  %v10271_v50 = vld [vmem:[#allocation86_spill] sm:$0xff] }
 0x2ff   :  { %2892 = vmatpush.msrb.mxu3 %v1494_v41  ;;  %v1089_v41 = vld [vmem:[#allocation7 + $0x8a0] sm:$0xff] }
 0x300   :  { %v2160_v23 = vpop.f32.mrf.mxu3  ;;  %3081 = vmatpush.msrb.mxu2 %v1089_v41  ;;  %v1082_v41 = vld [vmem:[#allocation7 + $0x868] sm:$0xff] }
 0x301   :  { %v2161_v62 = vadd.f32 %v2160_v23, %v2096_v63  ;;  %v2352_v39 = vpop.f32.mrf.mxu2  ;;  %v2440_v8 = vpop.f32.mrf.mxu0 }
 0x302   :  { %v7902_v6 = vadd.f32 %v2352_v39, %v2288_v20  ;;  %v7904_v10 = vpop.f32.mrf.mxu1  ;;  %3082 = vmatpush.msrb.mxu2 %v1082_v41  ;;  %v1075_v41 = vld [vmem:[#allocation7 + $0x830] sm:$0xff] }
 0x303   :  { %v2226_v42 = vadd.f32 %v2225_v19, %v2161_v62 }
 0x304   :  { %2699 = vmatmul.f32.vlgmr.msra.gmra.mxu0 %v10269_v40  ;;  %v10274_v40 = vld [vmem:[#allocation25_spill] sm:$0xff]  ;;  %3083 = vmatpush.msrb.mxu2 %v1075_v41  ;;  %v1487_v41 = vld [vmem:[#allocation7 + $0x1510] sm:$0xff] }
 0x305   :  { %2634 = vmatmul.f32.vlgmr.msra.gmra.mxu3 %v10270_v30  ;;  %2764 = vmatmul.f32.vlgmr.msra.gmra.mxu1 %v10271_v50  ;;  %v2291_v26 = vadd.f32 %v2290_v32, %v2226_v42  ;;  %v1012_v42 = vld [vmem:[#allocation7 + $0x638] sm:$0xff]  ;;  %v10273_v32 = vld [vmem:[#allocation30_spill] sm:$0xff] }
 0x306   :  { %2614 = vmatmul.f32.gmra.mxu2 %v10232_v24  ;;  %3011 = vmatpush.msrb.mxu1 %v1012_v42  ;;  %v1005_v42 = vld [vmem:[#allocation7 + $0x600] sm:$0xff]  ;;  %v984_v24 = vld [vmem:[#allocation7 + $0x558] sm:$0xff] }
 0x307   :  { %2893 = vmatpush.msrb.mxu3 %v1487_v41  ;;  %v1061_v41 = vld [vmem:[#allocation7 + $0x7c0] sm:$0xff] }
 0x308   :  { %v2375_v20 = vpop.f32.mrf.mxu3  ;;  %3012 = vmatpush.msrb.mxu1 %v1005_v42  ;;  %v998_v42 = vld [vmem:[#allocation7 + $0x5c8] sm:$0xff] }
 0x309   :  { %v2355_v63 = vpop.f32.mrf.mxu2  ;;  %v2376_v19 = vadd.f32 %v2375_v20, %v7776_v22  ;;  %v2443_v23 = vpop.f32.mrf.mxu0 }
 0x30a   :  { %v7911_v62 = vadd.f32 %v2355_v63, %v2291_v26  ;;  %v7913_v47 = vpop.f32.mrf.mxu1  ;;  %3013 = vmatpush.msrb.mxu1 %v998_v42  ;;  %v991_v42 = vld [vmem:[#allocation7 + $0x590] sm:$0xff] }
 0x30b   :  { %v7915_v39 = vadd.f32 %v2440_v8, %v2376_v19 }
 0x30c   :  { %2702 = vmatmul.f32.gmra.mxu0 %v10273_v32  ;;  %v10278_v32 = vld [vmem:[#allocation29_spill] sm:$0xff]  ;;  %3014 = vmatpush.msrb.mxu1 %v991_v42 }
 0x30d   :  { %10272 = vst [vmem:[#allocation144_spill] sm:$0xff] %v7915_v39  ;;  %2637 = vmatmul.f32.gmra.mxu3 %v10274_v40  ;;  %2767 = vmatmul.f32.gmra.mxu1 %v10275_v0  ;;  %v10277_v39 = vld [vmem:[#allocation34_spill] sm:$0xff]  ;;  %v10279_v0 = vld [vmem:[#allocation92_spill] sm:$0xff] }
 0x30e   :  { %2829 = vmatmul.f32.vlgmr.msra.gmra.mxu2 %v10236_v53  ;;  %3015 = vmatpush.msrb.mxu1 %v984_v24  ;;  %v977_v24 = vld [vmem:[#allocation7 + $0x520] sm:$0xff] }
 0x310   :  { %v2378_v22 = vpop.f32.mrf.mxu3  ;;  %3016 = vmatpush.msrb.mxu1 %v977_v24  ;;  %v970_v24 = vld [vmem:[#allocation7 + $0x4e8] sm:$0xff] }
 0x311   :  { %v2379_v26 = vadd.f32 %v2378_v22, %v7785_v3  ;;  %v7922_v20 = vpop.f32.mrf.mxu2  ;;  %v2446_v8 = vpop.f32.mrf.mxu0 }
 0x312   :  { %v7924_v63 = vpop.f32.mrf.mxu1  ;;  %3017 = vmatpush.msrb.mxu1 %v970_v24  ;;  %v963_v24 = vld [vmem:[#allocation7 + $0x4b0] sm:$0xff] }
 0x313   :  { %v7926_v19 = vadd.f32 %v2443_v23, %v2379_v26 }
 0x314   :  { %2705 = vmatmul.f32.gmra.mxu0 %v10277_v39  ;;  %v10281_v39 = vld [vmem:[#allocation38_spill] sm:$0xff]  ;;  %3018 = vmatpush.msrb.mxu1 %v963_v24 }
 0x315   :  { %10276 = vst [vmem:[#allocation25_spill] sm:$0xff] %v7926_v19  ;;  %2640 = vmatmul.f32.gmra.mxu3 %v10278_v32  ;;  %2770 = vmatmul.f32.gmra.mxu1 %v10279_v0  ;;  %v10282_v0 = vld [vmem:[#allocation33_spill] sm:$0xff] }
 0x316   :  { %2832 = vmatmul.f32.gmra.mxu2 %v10240_v29  ;;  %v10283_v29 = vld [vmem:[#allocation95_spill] sm:$0xff]  ;;  %3019 = vmatpush.msrb.mxu1 %v956_v35  ;;  %v949_v35 = vld [vmem:[#allocation7 + $0x440] sm:$0xff] }
 0x318   :  { %v2381_v3 = vpop.f32.mrf.mxu3  ;;  %3020 = vmatpush.msrb.mxu1 %v949_v35  ;;  %v942_v35 = vld [vmem:[#allocation7 + $0x408] sm:$0xff] }
 0x319   :  { %v2382_v22 = vadd.f32 %v2381_v3, %v7794_v54  ;;  %v7933_v53 = vpop.f32.mrf.mxu2  ;;  %v2449_v23 = vpop.f32.mrf.mxu0 }
 0x31a   :  { %v7935_v26 = vpop.f32.mrf.mxu1  ;;  %3021 = vmatpush.msrb.mxu1 %v942_v35 }
 0x31b   :  { %v7937_v19 = vadd.f32 %v2446_v8, %v2382_v22 }
 0x31c   :  { %2708 = vmatmul.f32.gmra.mxu0 %v10281_v39  ;;  %v10285_v39 = vld [vmem:[#allocation43_spill] sm:$0xff] }
 0x31d   :  { %10280 = vst [vmem:[#allocation29_spill] sm:$0xff] %v7937_v19  ;;  %2643 = vmatmul.f32.gmra.mxu3 %v10282_v0  ;;  %2773 = vmatmul.f32.gmra.mxu1 %v10283_v29  ;;  %v10286_v29 = vld [vmem:[#allocation37_spill] sm:$0xff] }
 0x31e   :  { %2835 = vmatmul.f32.gmra.mxu2 %v10242_v48  ;;  %v10287_v48 = vld [vmem:[#allocation98_spill] sm:$0xff] }
 0x320   :  { %v2384_v54 = vpop.f32.mrf.mxu3 }
 0x321   :  { %v2385_v3 = vadd.f32 %v2384_v54, %v7803_v61  ;;  %v7944_v50 = vpop.f32.mrf.mxu2  ;;  %v2452_v8 = vpop.f32.mrf.mxu0  ;;  %v872_v61 = vld [vmem:[#allocation7 + $0x1d8] sm:$0xff] }
 0x322   :  { %v7946_v22 = vpop.f32.mrf.mxu1  ;;  %2950 = vmatpush.msrb.mxu0 %v872_v61 }
 0x323   :  { %v7948_v19 = vadd.f32 %v2449_v23, %v2385_v3 }
 0x324   :  { %2711 = vmatmul.f32.gmra.mxu0 %v10285_v39 }
 0x325   :  { %10284 = vst [vmem:[#allocation33_spill] sm:$0xff] %v7948_v19  ;;  %2646 = vmatmul.f32.gmra.mxu3 %v10286_v29  ;;  %2776 = vmatmul.f32.gmra.mxu1 %v10287_v48  ;;  %v10289_v48 = vld [vmem:[#allocation47_spill] sm:$0xff] }
 0x326   :  { %2838 = vmatmul.f32.gmra.mxu2 %v10243_v38  ;;  %v10290_v38 = vld [vmem:[#allocation42_spill] sm:$0xff]  ;;  %2951 = vmatpush.msrb.mxu0 %v865_v28 }
 0x327   :  { %v858_v28 = vld [vmem:[#allocation7 + $0x168] sm:$0xff] }
 0x328   :  { %v2387_v54 = vpop.f32.mrf.mxu3  ;;  %2952 = vmatpush.msrb.mxu0 %v858_v28  ;;  %v851_v28 = vld [vmem:[#allocation7 + $0x130] sm:$0xff] }
 0x329   :  { %v2388_v23 = vadd.f32 %v2387_v54, %v7812_v2  ;;  %v7955_v3 = vpop.f32.mrf.mxu2  ;;  %v2455_v19 = vpop.f32.mrf.mxu0 }
 0x32a   :  { %v7957_v39 = vpop.f32.mrf.mxu1  ;;  %2953 = vmatpush.msrb.mxu0 %v851_v28  ;;  %v1068_v28 = vld [vmem:[#allocation7 + $0x7f8] sm:$0xff] }
 0x32b   :  { %v7959_v42 = vadd.f32 %v2452_v8, %v2388_v23  ;;  %3084 = vmatpush.msrb.mxu2 %v1068_v28  ;;  %v837_v28 = vld [vmem:[#allocation7 + $0xc0] sm:$0xff] }
 0x32c   :  { %2714 = vmatmul.f32.gmra.mxu0 %v10289_v48  ;;  %v10293_v48 = vld [vmem:[#allocation51_spill] sm:$0xff] }
 0x32d   :  { %10288 = vst [vmem:[#allocation145_spill] sm:$0xff] %v7959_v42  ;;  %2649 = vmatmul.f32.gmra.mxu3 %v10290_v38  ;;  %2779 = vmatmul.f32.gmra.mxu1 %v10291_v56  ;;  %v10294_v56 = vld [vmem:[#allocation46_spill] sm:$0xff] }
 0x32e   :  { %2841 = vmatmul.f32.gmra.mxu2 %v10246_v16  ;;  %v10295_v16 = vld [vmem:[#allocation103_spill] sm:$0xff] }
 0x32f   :  { %3085 = vmatpush.msrb.mxu2 %v1061_v41  ;;  %v1054_v41 = vld [vmem:[#allocation7 + $0x788] sm:$0xff] }
 0x330   :  { %v2390_v2 = vpop.f32.mrf.mxu3 }
 0x331   :  { %v2391_v61 = vadd.f32 %v2390_v2, %v7821_v43  ;;  %v7966_v54 = vpop.f32.mrf.mxu2  ;;  %v2458_v8 = vpop.f32.mrf.mxu0  ;;  %3086 = vmatpush.msrb.mxu2 %v1054_v41  ;;  %v1047_v41 = vld [vmem:[#allocation7 + $0x750] sm:$0xff] }
 0x332   :  { %v7968_v23 = vpop.f32.mrf.mxu1 }
 0x333   :  { %v7970_v42 = vadd.f32 %v2455_v19, %v2391_v61  ;;  %3087 = vmatpush.msrb.mxu2 %v1047_v41  ;;  %v10319_v41 = vld [vmem:[#allocation120_spill] sm:$0xff] }
 0x334   :  { %2717 = vmatmul.f32.gmra.mxu0 %v10293_v48  ;;  %v10297_v48 = vld [vmem:[#allocation55_spill] sm:$0xff] }
 0x335   :  { %10292 = vst [vmem:[#allocation146_spill] sm:$0xff] %v7970_v42  ;;  %2652 = vmatmul.f32.gmra.mxu3 %v10294_v56  ;;  %2782 = vmatmul.f32.gmra.mxu1 %v10295_v16  ;;  %v10298_v16 = vld [vmem:[#allocation50_spill] sm:$0xff] }
 0x336   :  { %2844 = vmatmul.f32.gmra.mxu2 %v10248_v58  ;;  %v10299_v58 = vld [vmem:[#allocation106_spill] sm:$0xff] }
 0x338   :  { %v2393_v43 = vpop.f32.mrf.mxu3 }
 0x339   :  { %v2394_v2 = vadd.f32 %v2393_v43, %v7830_v9  ;;  %v7977_v15 = vpop.f32.mrf.mxu2  ;;  %v2461_v19 = vpop.f32.mrf.mxu0 }
 0x33a   :  { %v7979_v61 = vpop.f32.mrf.mxu1 }
 0x33b   :  { %v7981_v42 = vadd.f32 %v2458_v8, %v2394_v2 }
 0x33c   :  { %2720 = vmatmul.f32.gmra.mxu0 %v10297_v48  ;;  %v10301_v48 = vld [vmem:[#allocation60_spill] sm:$0xff] }
 0x33d   :  { %10296 = vst [vmem:[#allocation147_spill] sm:$0xff] %v7981_v42  ;;  %2655 = vmatmul.f32.gmra.mxu3 %v10298_v16  ;;  %2785 = vmatmul.f32.gmra.mxu1 %v10299_v58  ;;  %v10302_v58 = vld [vmem:[#allocation54_spill] sm:$0xff] }
 0x33e   :  { %2847 = vmatmul.f32.gmra.mxu2 %v10250_v1  ;;  %v10303_v1 = vld [vmem:[#allocation109_spill] sm:$0xff] }
 0x340   :  { %v2396_v9 = vpop.f32.mrf.mxu3 }
 0x341   :  { %v2397_v43 = vadd.f32 %v2396_v9, %v7839_v60  ;;  %v7988_v7 = vpop.f32.mrf.mxu2  ;;  %v2464_v8 = vpop.f32.mrf.mxu0  ;;  %v844_v60 = vld [vmem:[#allocation7 + $0xf8] sm:$0xff] }
 0x342   :  { %v7990_v2 = vpop.f32.mrf.mxu1  ;;  %2954 = vmatpush.msrb.mxu0 %v844_v60 }
 0x343   :  { %v7992_v42 = vadd.f32 %v2461_v19, %v2397_v43 }
 0x344   :  { %2723 = vmatmul.f32.gmra.mxu0 %v10301_v48 }
 0x345   :  { %10300 = vst [vmem:[#allocation148_spill] sm:$0xff] %v7992_v42  ;;  %2658 = vmatmul.f32.gmra.mxu3 %v10302_v58  ;;  %2788 = vmatmul.f32.gmra.mxu1 %v10303_v1  ;;  %v10305_v1 = vld [vmem:[#allocation64_spill] sm:$0xff] }
 0x346   :  { %2850 = vmatmul.f32.gmra.mxu2 %v10251_v37  ;;  %v10306_v37 = vld [vmem:[#allocation59_spill] sm:$0xff]  ;;  %2955 = vmatpush.msrb.mxu0 %v837_v28 }
 0x347   :  { %v830_v28 = vld [vmem:[#allocation7 + $0x88] sm:$0xff] }
 0x348   :  { %v2399_v9 = vpop.f32.mrf.mxu3  ;;  %2956 = vmatpush.msrb.mxu0 %v830_v28  ;;  %v823_v28 = vld [vmem:[#allocation7 + $0x50] sm:$0xff] }
 0x349   :  { %v2400_v19 = vadd.f32 %v2399_v9, %v7848_v52  ;;  %v7999_v43 = vpop.f32.mrf.mxu2  ;;  %v2467_v42 = vpop.f32.mrf.mxu0 }
 0x34a   :  { %v8001_v48 = vpop.f32.mrf.mxu1  ;;  %2957 = vmatpush.msrb.mxu0 %v823_v28  ;;  %v1257_v28 = vld [vmem:[#allocation7 + $0xde0] sm:$0xff] }
 0x34b   :  { %v8003_v24 = vadd.f32 %v2464_v8, %v2400_v19  ;;  %3138 = vmatpush.msra.mxu3 %v1257_v28  ;;  %v1369_v28 = vld [vmem:[#allocation7 + $0x1160] sm:$0xff] }
 0x34c   :  { %2726 = vmatmul.f32.gmra.mxu0 %v10305_v1  ;;  %v10309_v1 = vld [vmem:[#allocation68_spill] sm:$0xff] }
 0x34d   :  { %10304 = vst [vmem:[#allocation149_spill] sm:$0xff] %v8003_v24  ;;  %2661 = vmatmul.f32.gmra.mxu3 %v10306_v37  ;;  %2791 = vmatmul.f32.gmra.mxu1 %v10307_v27  ;;  %v10310_v27 = vld [vmem:[#allocation63_spill] sm:$0xff] }
 0x34e   :  { %2853 = vmatmul.f32.gmra.mxu2 %v10254_v55  ;;  %v10311_v55 = vld [vmem:[#allocation114_spill] sm:$0xff] }
 0x350   :  { %v2402_v52 = vpop.f32.mrf.mxu3 }
 0x351   :  { %v2403_v60 = vadd.f32 %v2402_v52, %v7857_v12  ;;  %v8010_v9 = vpop.f32.mrf.mxu2  ;;  %v2470_v8 = vpop.f32.mrf.mxu0 }
 0x352   :  { %v8012_v19 = vpop.f32.mrf.mxu1 }
 0x353   :  { %v8014_v24 = vadd.f32 %v2467_v42, %v2403_v60 }
 0x354   :  { %2729 = vmatmul.f32.gmra.mxu0 %v10309_v1  ;;  %v10313_v1 = vld [vmem:[#allocation72_spill] sm:$0xff] }
 0x355   :  { %10308 = vst [vmem:[#allocation150_spill] sm:$0xff] %v8014_v24  ;;  %2664 = vmatmul.f32.gmra.mxu3 %v10310_v27  ;;  %2794 = vmatmul.f32.gmra.mxu1 %v10311_v55  ;;  %v10314_v55 = vld [vmem:[#allocation67_spill] sm:$0xff] }
 0x356   :  { %2856 = vmatmul.f32.gmra.mxu2 %v10256_v44  ;;  %v10315_v44 = vld [vmem:[#allocation117_spill] sm:$0xff] }
 0x358   :  { %v2405_v12 = vpop.f32.mrf.mxu3 }
 0x359   :  { %v2406_v52 = vadd.f32 %v2405_v12, %v7866_v14  ;;  %v8021_v37 = vpop.f32.mrf.mxu2  ;;  %v2473_v42 = vpop.f32.mrf.mxu0 }
 0x35a   :  { %v8023_v60 = vpop.f32.mrf.mxu1 }
 0x35b   :  { %v8025_v24 = vadd.f32 %v2470_v8, %v2406_v52 }
 0x35c   :  { %2732 = vmatmul.f32.gmra.mxu0 %v10313_v1  ;;  %v816_v1 = vld [vmem:[#allocation7 + $0x18] sm:$0xff] }
 0x35d   :  { %10312 = vst [vmem:[#allocation151_spill] sm:$0xff] %v8025_v24  ;;  %2667 = vmatmul.f32.gmra.mxu3 %v10314_v55  ;;  %2797 = vmatmul.f32.gmra.mxu1 %v10315_v44  ;;  %v935_v24 = vld [vmem:[#allocation7 + $0x3d0] sm:$0xff] }
 0x35e   :  { %2859 = vmatmul.f32.gmra.mxu2 %v10258_v59  ;;  %3022 = vmatpush.msrb.mxu1 %v935_v24  ;;  %v10317_v44 = vld [vmem:[#allocation76_spill] sm:$0xff]  ;;  %v10318_v55 = vld [vmem:[#allocation71_spill] sm:$0xff] }
 0x35f   :  { %v928_v59 = vld [vmem:[#allocation7 + $0x398] sm:$0xff]  ;;  %2958 = vmatpush.msrb.mxu0 %v816_v1  ;;  %v10323_v1 = vld [vmem:[#allocation123_spill] sm:$0xff] }
 0x360   :  { %v2408_v14 = vpop.f32.mrf.mxu3  ;;  %3023 = vmatpush.msrb.mxu1 %v928_v59  ;;  %v1250_v59 = vld [vmem:[#allocation7 + $0xda8] sm:$0xff] }
 0x361   :  { %v2409_v12 = vadd.f32 %v2408_v14, %v7875_v51  ;;  %v8032_v27 = vpop.f32.mrf.mxu2  ;;  %v2476_v8 = vpop.f32.mrf.mxu0  ;;  %v1040_v51 = vld [vmem:[#allocation7 + $0x718] sm:$0xff]  ;;  %3139 = vmatpush.msra.mxu3 %v1250_v59  ;;  %3203 = vmatpush.msra.mxu0 %v1369_v28  ;;  %v1243_v59 = vld [vmem:[#allocation7 + $0xd70] sm:$0xff] }
 0x362   :  { %v8034_v52 = vpop.f32.mrf.mxu1  ;;  %3088 = vmatpush.msrb.mxu2 %v1040_v51  ;;  %v1509_v51 = vld [vmem:[#allocation7 + $0x15c0] sm:$0xff] }
 0x363   :  { %v8036_v35 = vadd.f32 %v2473_v42, %v2409_v12  ;;  %3140 = vmatpush.msra.mxu3 %v1243_v59  ;;  %v1236_v59 = vld [vmem:[#allocation7 + $0xd38] sm:$0xff] }
 0x364   :  { %2735 = vmatmul.f32.gmra.mxu0 %v10317_v44  ;;  %3345 = vmatpush.msra.mxu2 %v1509_v51  ;;  %v1362_v51 = vld [vmem:[#allocation7 + $0x1128] sm:$0xff] }
 0x365   :  { %10316 = vst [vmem:[#allocation152_spill] sm:$0xff] %v8036_v35  ;;  %2670 = vmatmul.f32.gmra.mxu3 %v10318_v55  ;;  %2800 = vmatmul.f32.gmra.mxu1 %v10319_v41  ;;  %v10321_v55 = vld [vmem:[#allocation80_spill] sm:$0xff]  ;;  %v10322_v41 = vld [vmem:[#allocation75_spill] sm:$0xff] }
 0x366   :  { %2862 = vmatmul.f32.gmra.mxu2 %v10260_v13  ;;  %3204 = vmatpush.msra.mxu0 %v1362_v51  ;;  %v1355_v51 = vld [vmem:[#allocation7 + $0x10f0] sm:$0xff] }
 0x367   :  { %3141 = vmatpush.msra.mxu3 %v1236_v59 }
 0x368   :  { %v2411_v14 = vpop.f32.mrf.mxu3  ;;  %3205 = vmatpush.msra.mxu0 %v1355_v51  ;;  %v10336_v51 = vld [vmem:[#allocation87_spill] sm:$0xff] }
 0x369   :  { %v2412_v42 = vadd.f32 %v2411_v14, %v7884_v45  ;;  %v8043_v24 = vpop.f32.mrf.mxu2  ;;  %v2479_v12 = vpop.f32.mrf.mxu0 }
 0x36a   :  { %v8045_v35 = vpop.f32.mrf.mxu1 }
 0x36b   :  { %v8047_v44 = vadd.f32 %v2476_v8, %v2412_v42 }
 0x36c   :  { %2738 = vmatmul.f32.gmra.mxu0 %v10321_v55  ;;  %v1481_v55 = vld [vmem:[#allocation7 + $0x14e0] sm:$0xff] }
 0x36d   :  { %10320 = vst [vmem:[#allocation153_spill] sm:$0xff] %v8047_v44  ;;  %2673 = vmatmul.f32.gmra.mxu3 %v10322_v41  ;;  %2803 = vmatmul.f32.gmra.mxu1 %v10323_v1  ;;  %v10325_v1 = vld [vmem:[#allocation84_spill] sm:$0xff]  ;;  %v10327_v41 = vld [vmem:[#allocation126_spill] sm:$0xff] }
 0x36e   :  { %2865 = vmatmul.f32.gmra.mxu2 %v10261_v31  ;;  %3268 = vmatpush.msra.mxu1 %v1481_v55  ;;  %v10326_v31 = vld [vmem:[#allocation79_spill] sm:$0xff] }
 0x36f   :  { %v1474_v55 = vld [vmem:[#allocation7 + $0x14a8] sm:$0xff] }
 0x370   :  { %v2414_v45 = vpop.f32.mrf.mxu3  ;;  %3269 = vmatpush.msra.mxu1 %v1474_v55 }
 0x371   :  { %v2415_v14 = vadd.f32 %v2414_v45, %v7893_v17  ;;  %v8054_v13 = vpop.f32.mrf.mxu2  ;;  %v2482_v8 = vpop.f32.mrf.mxu0 }
 0x372   :  { %v8056_v42 = vpop.f32.mrf.mxu1 }
 0x373   :  { %v8058_v44 = vadd.f32 %v2479_v12, %v2415_v14 }
 0x374   :  { %2741 = vmatmul.f32.gmra.mxu0 %v10325_v1  ;;  %v10330_v1 = vld [vmem:[#allocation88_spill] sm:$0xff] }
 0x375   :  { %10324 = vst [vmem:[#allocation154_spill] sm:$0xff] %v8058_v44  ;;  %2676 = vmatmul.f32.gmra.mxu3 %v10326_v31  ;;  %2806 = vmatmul.f32.gmra.mxu1 %v10327_v41  ;;  %v10331_v41 = vld [vmem:[#allocation83_spill] sm:$0xff] }
 0x376   :  { %2868 = vmatmul.f32.gmra.mxu2 %v10263_v36  ;;  %v10332_v36 = vld [vmem:[#allocation129_spill] sm:$0xff] }
 0x378   :  { %v2417_v17 = vpop.f32.mrf.mxu3 }
 0x379   :  { %v2418_v28 = vadd.f32 %v2417_v17, %v7902_v6  ;;  %v8065_v45 = vpop.f32.mrf.mxu2  ;;  %v2485_v12 = vpop.f32.mrf.mxu0  ;;  %v6208_v17 = vld [vmem:[#allocation8] sm:$0x7f] }
 0x37a   :  { %v8067_v14 = vpop.f32.mrf.mxu1  ;;  %v8075_v31 = vperm.slane %v6208_v17, 2  ;;  %v10337_v17 = vld [vmem:[#allocation19_spill] sm:$0xff] }
 0x37b   :  { %10328 = vst [vmem:[#allocation155_spill] sm:$0xff] %v8067_v14  ;;  %v8069_v44 = vadd.f32 %v2482_v8, %v2418_v28  ;;  %v1460_v14 = vld [vmem:[#allocation7 + $0x1438] sm:$0xff] }
 0x37c   :  { %2744 = vmatmul.f32.gmra.mxu0 %v10330_v1  ;;  %v2506_v59 = vadd.f32 %v7904_v10, %v8075_v31 }
 0x37d   :  { %10329 = vst [vmem:[#allocation156_spill] sm:$0xff] %v8069_v44  ;;  %2679 = vmatmul.f32.gmra.mxu3 %v10331_v41  ;;  %2809 = vmatmul.f32.gmra.mxu1 %v10332_v36  ;;  %v1467_v41 = vld [vmem:[#allocation7 + $0x1470] sm:$0xff] }
 0x37e   :  { %2871 = vmatmul.f32.gmra.mxu2 %v10264_v57  ;;  %v10335_v36 = vld [vmem:[#allocation20_spill] sm:$0xff]  ;;  %3270 = vmatpush.msra.mxu1 %v1467_v41  ;;  %v2571_v57 = vadd.f32 %v7922_v20, %v2506_v59  ;;  %v1222_v59 = vld [vmem:[#allocation7 + $0xcc8] sm:$0xff] }
 0x380   :  { %v2420_v6 = vpop.f32.mrf.mxu3  ;;  %3271 = vmatpush.msra.mxu1 %v1460_v14 }
 0x381   :  { %v2421_v8 = vadd.f32 %v2420_v6, %v7911_v62  ;;  %v8078_v28 = vpop.f32.mrf.mxu2  ;;  %v2700_v44 = vpop.f32.mrf.mxu0  ;;  %v1229_v62 = vld [vmem:[#allocation7 + $0xd00] sm:$0xff]  ;;  %v1348_v6 = vld [vmem:[#allocation7 + $0x10b8] sm:$0xff] }
 0x382   :  { %10333 = vst [vmem:[#allocation157_spill] sm:$0xff] %v8078_v28  ;;  %v2765_v55 = vpop.f32.mrf.mxu1  ;;  %3142 = vmatpush.msra.mxu3 %v1229_v62  ;;  %3206 = vmatpush.msra.mxu0 %v1348_v6  ;;  %v10338_v28 = vld [vmem:[#allocation24_spill] sm:$0xff]  ;;  %v1341_v62 = vld [vmem:[#allocation7 + $0x1080] sm:$0xff] }
 0x383   :  { %v8080_v1 = vadd.f32 %v2485_v12, %v2421_v8 }
 0x384   :  { %2959 = vmatmul.f32.vlgmr.msrb.gmra.mxu0 %v10335_v36  ;;  %3143 = vmatpush.msra.mxu3 %v1222_v59 }
 0x385   :  { %10334 = vst [vmem:[#allocation158_spill] sm:$0xff] %v8080_v1  ;;  %6023 = vmatmul.msk.f32.vlgmr.msrb.gmra.mxu3 %vm1529_vm2, %v10336_v51  ;;  %3024 = vmatmul.f32.vlgmr.msrb.gmra.mxu1 %v10337_v17  ;;  %v2509_v17 = vadd.f32 %v7913_v47, %v8075_v31 }
 0x386   :  { %2874 = vmatmul.f32.gmra.mxu2 %v10267_v33  ;;  %v10339_v33 = vld [vmem:[#allocation90_spill] sm:$0xff]  ;;  %3207 = vmatpush.msra.mxu0 %v1341_v62 }
 0x388   :  { %v2635_v12 = vpop.f32.mrf.mxu3 }
 0x389   :  { %v8090_v8 = vpop.f32.mrf.mxu2  ;;  %v2636_v41 = vadd.f32 %v2635_v12, %v2571_v57  ;;  %v2703_v1 = vpop.f32.mrf.mxu0  ;;  %v1502_v57 = vld [vmem:[#allocation7 + $0x1588] sm:$0xff] }
 0x38a   :  { %v2768_v36 = vpop.f32.mrf.mxu1  ;;  %3346 = vmatpush.msra.mxu2 %v1502_v57 }
 0x38b   :  { %v2701_v10 = vadd.f32 %v2700_v44, %v2636_v41  ;;  %v2574_v44 = vadd.f32 %v7933_v53, %v2509_v17  ;;  %v1215_v17 = vld [vmem:[#allocation7 + $0xc90] sm:$0xff] }
 0x38c   :  { %2962 = vmatmul.f32.gmra.mxu0 %v10338_v28  ;;  %3144 = vmatpush.msra.mxu3 %v1215_v17 }
 0x38d   :  { %6024 = vmatmul.msk.f32.gmra.mxu3 %vm1529_vm2, %v10339_v33  ;;  %3027 = vmatmul.f32.gmra.mxu1 %v10175_v25  ;;  %v2766_v20 = vadd.f32 %v2765_v55, %v2701_v10  ;;  %v1453_v25 = vld [vmem:[#allocation7 + $0x1400] sm:$0xff]  ;;  %v10340_v55 = vld [vmem:[#allocation28_spill] sm:$0xff]  ;;  %v2512_v10 = vadd.f32 %v7924_v63, %v8075_v31 }
 0x38e   :  { %3089 = vmatmul.f32.vlgmr.msrb.gmra.mxu2 %v10270_v30  ;;  %3272 = vmatpush.msra.mxu1 %v1453_v25  ;;  %v10341_v30 = vld [vmem:[#allocation93_spill] sm:$0xff] }
 0x38f   :  { %v2577_v59 = vadd.f32 %v7944_v50, %v2512_v10  ;;  %v1208_v10 = vld [vmem:[#allocation7 + $0xc58] sm:$0xff] }
 0x390   :  { %v2638_v6 = vpop.f32.mrf.mxu3  ;;  %3145 = vmatpush.msra.mxu3 %v1208_v10 }
 0x391   :  { %v2639_v14 = vadd.f32 %v2638_v6, %v2574_v44  ;;  %v2830_v12 = vpop.f32.mrf.mxu2  ;;  %v2706_v47 = vpop.f32.mrf.mxu0 }
 0x392   :  { %v8100_v41 = vadd.f32 %v2830_v12, %v2766_v20  ;;  %v2771_v28 = vpop.f32.mrf.mxu1  ;;  %v1334_v20 = vld [vmem:[#allocation7 + $0x1048] sm:$0xff]  ;;  %v10342_v12 = vld [vmem:[#allocation32_spill] sm:$0xff] }
 0x393   :  { %v2704_v33 = vadd.f32 %v2703_v1, %v2639_v14  ;;  %3208 = vmatpush.msra.mxu0 %v1334_v20  ;;  %v1446_v14 = vld [vmem:[#allocation7 + $0x13c8] sm:$0xff] }
 0x394   :  { %2965 = vmatmul.f32.gmra.mxu0 %v10340_v55  ;;  %3273 = vmatpush.msra.mxu1 %v1446_v14  ;;  %v1439_v14 = vld [vmem:[#allocation7 + $0x1390] sm:$0xff] }
 0x395   :  { %6025 = vmatmul.msk.f32.gmra.mxu3 %vm1529_vm2, %v10341_v30  ;;  %3030 = vmatmul.f32.gmra.mxu1 %v10179_v4  ;;  %v2769_v53 = vadd.f32 %v2768_v36, %v2704_v33  ;;  %v2515_v36 = vadd.f32 %v7935_v26, %v8075_v31  ;;  %v10343_v33 = vld [vmem:[#allocation96_spill] sm:$0xff] }
 0x396   :  { %3092 = vmatmul.f32.gmra.mxu2 %v10274_v40  ;;  %3274 = vmatpush.msra.mxu1 %v1439_v14  ;;  %v1432_v14 = vld [vmem:[#allocation7 + $0x1358] sm:$0xff] }
 0x397   :  { %v2580_v17 = vadd.f32 %v7955_v3, %v2515_v36  ;;  %v1201_v36 = vld [vmem:[#allocation7 + $0xc20] sm:$0xff] }
 0x398   :  { %v2641_v1 = vpop.f32.mrf.mxu3  ;;  %3146 = vmatpush.msra.mxu3 %v1201_v36  ;;  %3275 = vmatpush.msra.mxu1 %v1432_v14  ;;  %v1313_v36 = vld [vmem:[#allocation7 + $0xfa0] sm:$0xff] }
 0x399   :  { %v2642_v57 = vadd.f32 %v2641_v1, %v2577_v59  ;;  %v2833_v25 = vpop.f32.mrf.mxu2  ;;  %v2709_v62 = vpop.f32.mrf.mxu0 }
 0x39a   :  { %v8110_v44 = vadd.f32 %v2833_v25, %v2769_v53  ;;  %v2774_v63 = vpop.f32.mrf.mxu1  ;;  %v1327_v53 = vld [vmem:[#allocation7 + $0x1010] sm:$0xff] }
 0x39b   :  { %v2707_v6 = vadd.f32 %v2706_v47, %v2642_v57  ;;  %3209 = vmatpush.msra.mxu0 %v1327_v53 }
 0x39c   :  { %2968 = vmatmul.f32.gmra.mxu0 %v10342_v12  ;;  %v10344_v12 = vld [vmem:[#allocation36_spill] sm:$0xff] }
 0x39d   :  { %6026 = vmatmul.msk.f32.gmra.mxu3 %vm1529_vm2, %v10343_v33  ;;  %3033 = vmatmul.f32.gmra.mxu1 %v10184_v5  ;;  %v2772_v50 = vadd.f32 %v2771_v28, %v2707_v6  ;;  %v2518_v28 = vadd.f32 %v7946_v22, %v8075_v31  ;;  %v10345_v6 = vld [vmem:[#allocation99_spill] sm:$0xff] }
 0x39e   :  { %3095 = vmatmul.f32.gmra.mxu2 %v10278_v32 }
 0x39f   :  { %v2583_v10 = vadd.f32 %v7966_v54, %v2518_v28  ;;  %v1194_v28 = vld [vmem:[#allocation7 + $0xbe8] sm:$0xff] }
 0x3a0   :  { %v2644_v47 = vpop.f32.mrf.mxu3  ;;  %3147 = vmatpush.msra.mxu3 %v1194_v28 }
 0x3a1   :  { %v2645_v20 = vadd.f32 %v2644_v47, %v2580_v17  ;;  %v2836_v59 = vpop.f32.mrf.mxu2  ;;  %v2712_v1 = vpop.f32.mrf.mxu0 }
 0x3a2   :  { %v8120_v57 = vadd.f32 %v2836_v59, %v2772_v50  ;;  %v2777_v26 = vpop.f32.mrf.mxu1  ;;  %v1320_v50 = vld [vmem:[#allocation7 + $0xfd8] sm:$0xff] }
 0x3a3   :  { %v2710_v25 = vadd.f32 %v2709_v62, %v2645_v20  ;;  %3210 = vmatpush.msra.mxu0 %v1320_v50 }
 0x3a4   :  { %2971 = vmatmul.f32.gmra.mxu0 %v10344_v12  ;;  %v10346_v12 = vld [vmem:[#allocation41_spill] sm:$0xff] }
 0x3a5   :  { %6027 = vmatmul.msk.f32.gmra.mxu3 %vm1529_vm2, %v10345_v6  ;;  %3036 = vmatmul.f32.gmra.mxu1 %v10188_v11  ;;  %v2775_v3 = vadd.f32 %v2774_v63, %v2710_v25  ;;  %v2521_v63 = vadd.f32 %v7957_v39, %v8075_v31  ;;  %v10347_v25 = vld [vmem:[#allocation101_spill] sm:$0xff] }
 0x3a6   :  { %3098 = vmatmul.f32.gmra.mxu2 %v10282_v0  ;;  %3211 = vmatpush.msra.mxu0 %v1313_v36 }
 0x3a8   :  { %v2647_v62 = vpop.f32.mrf.mxu3 }
 0x3a9   :  { %v2648_v53 = vadd.f32 %v2647_v62, %v2583_v10  ;;  %v2839_v17 = vpop.f32.mrf.mxu2  ;;  %v2715_v47 = vpop.f32.mrf.mxu0 }
 0x3aa   :  { %v8130_v20 = vadd.f32 %v2839_v17, %v2775_v3  ;;  %v2780_v22 = vpop.f32.mrf.mxu1  ;;  %v1495_v3 = vld [vmem:[#allocation7 + $0x1550] sm:$0xff] }
 0x3ab   :  { %v2713_v59 = vadd.f32 %v2712_v1, %v2648_v53  ;;  %v2586_v1 = vadd.f32 %v7977_v15, %v2521_v63  ;;  %3347 = vmatpush.msra.mxu2 %v1495_v3  ;;  %v1187_v63 = vld [vmem:[#allocation7 + $0xbb0] sm:$0xff] }
 0x3ac   :  { %2974 = vmatmul.f32.gmra.mxu0 %v10346_v12  ;;  %v1425_v12 = vld [vmem:[#allocation7 + $0x1320] sm:$0xff]  ;;  %3148 = vmatpush.msra.mxu3 %v1187_v63 }
 0x3ad   :  { %6028 = vmatmul.msk.f32.gmra.mxu3 %vm1529_vm2, %v10347_v25  ;;  %3039 = vmatmul.f32.gmra.mxu1 %v10192_v46  ;;  %v2778_v54 = vadd.f32 %v2777_v26, %v2713_v59  ;;  %v10348_v26 = vld [vmem:[#allocation45_spill] sm:$0xff]  ;;  %v2524_v59 = vadd.f32 %v7968_v23, %v8075_v31  ;;  %v10349_v46 = vld [vmem:[#allocation104_spill] sm:$0xff] }
 0x3ae   :  { %3101 = vmatmul.f32.gmra.mxu2 %v10286_v29  ;;  %3276 = vmatpush.msra.mxu1 %v1425_v12 }
 0x3af   :  { %v2589_v28 = vadd.f32 %v7988_v7, %v2524_v59  ;;  %v1180_v59 = vld [vmem:[#allocation7 + $0xb78] sm:$0xff] }
 0x3b0   :  { %v2650_v50 = vpop.f32.mrf.mxu3  ;;  %3149 = vmatpush.msra.mxu3 %v1180_v59 }
 0x3b1   :  { %v2651_v10 = vadd.f32 %v2650_v50, %v2586_v1  ;;  %v2842_v62 = vpop.f32.mrf.mxu2  ;;  %v2718_v39 = vpop.f32.mrf.mxu0 }
 0x3b2   :  { %v8140_v53 = vadd.f32 %v2842_v62, %v2778_v54  ;;  %v2783_v17 = vpop.f32.mrf.mxu1  ;;  %v1306_v54 = vld [vmem:[#allocation7 + $0xf68] sm:$0xff]  ;;  %v10350_v62 = vld [vmem:[#allocation49_spill] sm:$0xff] }
 0x3b3   :  { %v2716_v14 = vadd.f32 %v2715_v47, %v2651_v10  ;;  %3212 = vmatpush.msra.mxu0 %v1306_v54  ;;  %v1418_v10 = vld [vmem:[#allocation7 + $0x12e8] sm:$0xff] }
 0x3b4   :  { %2977 = vmatmul.f32.gmra.mxu0 %v10348_v26  ;;  %3277 = vmatpush.msra.mxu1 %v1418_v10  ;;  %v1411_v10 = vld [vmem:[#allocation7 + $0x12b0] sm:$0xff] }
 0x3b5   :  { %6029 = vmatmul.msk.f32.gmra.mxu3 %vm1529_vm2, %v10349_v46  ;;  %3042 = vmatmul.f32.gmra.mxu1 %v10196_v18  ;;  %v2781_v15 = vadd.f32 %v2780_v22, %v2716_v14  ;;  %v2527_v22 = vadd.f32 %v7979_v61, %v8075_v31  ;;  %v10351_v14 = vld [vmem:[#allocation107_spill] sm:$0xff]  ;;  %v10411_v18 = vld [vmem:[#allocation102_spill] sm:$0xff] }
 0x3b6   :  { %3104 = vmatmul.f32.gmra.mxu2 %v10290_v38  ;;  %3278 = vmatpush.msra.mxu1 %v1411_v10  ;;  %v1404_v10 = vld [vmem:[#allocation7 + $0x1278] sm:$0xff]  ;;  %v10406_v26 = vld [vmem:[#allocation39_spill] sm:$0xff] }
 0x3b7   :  { %v2592_v63 = vadd.f32 %v7999_v43, %v2527_v22  ;;  %v1173_v22 = vld [vmem:[#allocation7 + $0xb40] sm:$0xff] }
 0x3b8   :  { %v2653_v47 = vpop.f32.mrf.mxu3  ;;  %3150 = vmatpush.msra.mxu3 %v1173_v22  ;;  %3279 = vmatpush.msra.mxu1 %v1404_v10  ;;  %v1285_v22 = vld [vmem:[#allocation7 + $0xec0] sm:$0xff] }
 0x3b9   :  { %v2654_v3 = vadd.f32 %v2653_v47, %v2589_v28  ;;  %v2845_v12 = vpop.f32.mrf.mxu2  ;;  %v2721_v36 = vpop.f32.mrf.mxu0 }
 0x3ba   :  { %v8150_v1 = vadd.f32 %v2845_v12, %v2781_v15  ;;  %v2786_v23 = vpop.f32.mrf.mxu1  ;;  %v1299_v15 = vld [vmem:[#allocation7 + $0xf30] sm:$0xff] }
 0x3bb   :  { %v2719_v50 = vadd.f32 %v2718_v39, %v2654_v3  ;;  %3213 = vmatpush.msra.mxu0 %v1299_v15 }
 0x3bc   :  { %2980 = vmatmul.f32.gmra.mxu0 %v10350_v62  ;;  %v10352_v62 = vld [vmem:[#allocation53_spill] sm:$0xff] }
 0x3bd   :  { %6030 = vmatmul.msk.f32.gmra.mxu3 %vm1529_vm2, %v10351_v14  ;;  %3045 = vmatmul.f32.gmra.mxu1 %v10200_v34  ;;  %v2784_v7 = vadd.f32 %v2783_v17, %v2719_v50  ;;  %v2530_v17 = vadd.f32 %v7990_v2, %v8075_v31  ;;  %v10353_v50 = vld [vmem:[#allocation110_spill] sm:$0xff]  ;;  %v10402_v34 = vld [vmem:[#allocation97_spill] sm:$0xff] }
 0x3be   :  { %3107 = vmatmul.f32.gmra.mxu2 %v10294_v56  ;;  %v10404_v56 = vld [vmem:[#allocation100_spill] sm:$0xff] }
 0x3bf   :  { %v2595_v59 = vadd.f32 %v8010_v9, %v2530_v17  ;;  %v1166_v17 = vld [vmem:[#allocation7 + $0xb08] sm:$0xff] }
 0x3c0   :  { %v2656_v39 = vpop.f32.mrf.mxu3  ;;  %3151 = vmatpush.msra.mxu3 %v1166_v17  ;;  %v10359_v17 = vld [vmem:[#allocation59_spill] sm:$0xff] }
 0x3c1   :  { %v2657_v54 = vadd.f32 %v2656_v39, %v2592_v63  ;;  %v2848_v28 = vpop.f32.mrf.mxu2  ;;  %v2724_v47 = vpop.f32.mrf.mxu0 }
 0x3c2   :  { %v8160_v3 = vadd.f32 %v2848_v28, %v2784_v7  ;;  %v2789_v61 = vpop.f32.mrf.mxu1  ;;  %v1292_v7 = vld [vmem:[#allocation7 + $0xef8] sm:$0xff] }
 0x3c3   :  { %v2722_v12 = vadd.f32 %v2721_v36, %v2657_v54  ;;  %3214 = vmatpush.msra.mxu0 %v1292_v7 }
 0x3c4   :  { %2983 = vmatmul.f32.gmra.mxu0 %v10352_v62  ;;  %v10354_v62 = vld [vmem:[#allocation58_spill] sm:$0xff] }
 0x3c5   :  { %6031 = vmatmul.msk.f32.gmra.mxu3 %vm1529_vm2, %v10353_v50  ;;  %3048 = vmatmul.f32.gmra.mxu1 %v10204_v49  ;;  %v2787_v43 = vadd.f32 %v2786_v23, %v2722_v12  ;;  %v2533_v23 = vadd.f32 %v8001_v48, %v8075_v31  ;;  %v10355_v12 = vld [vmem:[#allocation112_spill] sm:$0xff]  ;;  %v10379_v49 = vld [vmem:[#allocation130_spill] sm:$0xff] }
 0x3c6   :  { %3110 = vmatmul.f32.gmra.mxu2 %v10298_v16  ;;  %3215 = vmatpush.msra.mxu0 %v1285_v22  ;;  %v10400_v16 = vld [vmem:[#allocation98_spill] sm:$0xff] }
 0x3c8   :  { %v2659_v36 = vpop.f32.mrf.mxu3 }
 0x3c9   :  { %v2660_v15 = vadd.f32 %v2659_v36, %v2595_v59  ;;  %v2851_v63 = vpop.f32.mrf.mxu2  ;;  %v2727_v39 = vpop.f32.mrf.mxu0 }
 0x3ca   :  { %v8170_v54 = vadd.f32 %v2851_v63, %v2787_v43  ;;  %v2792_v2 = vpop.f32.mrf.mxu1  ;;  %v1488_v43 = vld [vmem:[#allocation7 + $0x1518] sm:$0xff] }
 0x3cb   :  { %v2725_v28 = vadd.f32 %v2724_v47, %v2660_v15  ;;  %v2598_v47 = vadd.f32 %v8021_v37, %v2533_v23  ;;  %3348 = vmatpush.msra.mxu2 %v1488_v43  ;;  %v10358_v37 = vld [vmem:[#allocation61_spill] sm:$0xff]  ;;  %v1159_v43 = vld [vmem:[#allocation7 + $0xad0] sm:$0xff] }
 0x3cc   :  { %2986 = vmatmul.f32.gmra.mxu0 %v10354_v62  ;;  %v1397_v62 = vld [vmem:[#allocation7 + $0x1240] sm:$0xff]  ;;  %3152 = vmatpush.msra.mxu3 %v1159_v43  ;;  %v10363_v43 = vld [vmem:[#allocation63_spill] sm:$0xff] }
 0x3cd   :  { %6032 = vmatmul.msk.f32.gmra.mxu3 %vm1529_vm2, %v10355_v12  ;;  %3051 = vmatmul.f32.gmra.mxu1 %v10208_v21  ;;  %v2790_v9 = vadd.f32 %v2789_v61, %v2725_v28  ;;  %v10356_v61 = vld [vmem:[#allocation62_spill] sm:$0xff]  ;;  %v2536_v28 = vadd.f32 %v8012_v19, %v8075_v31  ;;  %v10357_v21 = vld [vmem:[#allocation115_spill] sm:$0xff] }
 0x3ce   :  { %3113 = vmatmul.f32.gmra.mxu2 %v10302_v58  ;;  %3280 = vmatpush.msra.mxu1 %v1397_v62  ;;  %v10360_v58 = vld [vmem:[#allocation66_spill] sm:$0xff] }
 0x3cf   :  { %v2601_v22 = vadd.f32 %v8032_v27, %v2536_v28  ;;  %v10362_v27 = vld [vmem:[#allocation65_spill] sm:$0xff] }
 0x3d0   :  { %v2662_v7 = vpop.f32.mrf.mxu3 }
 0x3d1   :  { %v2663_v59 = vadd.f32 %v2662_v7, %v2598_v47  ;;  %v2854_v36 = vpop.f32.mrf.mxu2  ;;  %v2730_v48 = vpop.f32.mrf.mxu0 }
 0x3d2   :  { %v8180_v15 = vadd.f32 %v2854_v36, %v2790_v9  ;;  %v2795_v63 = vpop.f32.mrf.mxu1  ;;  %v1278_v9 = vld [vmem:[#allocation7 + $0xe88] sm:$0xff] }
 0x3d3   :  { %v2728_v10 = vadd.f32 %v2727_v39, %v2663_v59  ;;  %3216 = vmatpush.msra.mxu0 %v1278_v9  ;;  %v1152_v9 = vld [vmem:[#allocation7 + $0xa98] sm:$0xff] }
 0x3d4   :  { %2989 = vmatmul.f32.gmra.mxu0 %v10356_v61  ;;  %v1390_v61 = vld [vmem:[#allocation7 + $0x1208] sm:$0xff]  ;;  %3153 = vmatpush.msra.mxu3 %v1152_v9 }
 0x3d5   :  { %6033 = vmatmul.msk.f32.gmra.mxu3 %vm1529_vm2, %v10357_v21  ;;  %3054 = vmatmul.f32.gmra.mxu1 %v10358_v37  ;;  %v2793_v23 = vadd.f32 %v2792_v2, %v2728_v10  ;;  %v2539_v2 = vadd.f32 %v8023_v60, %v8075_v31  ;;  %v10361_v10 = vld [vmem:[#allocation118_spill] sm:$0xff] }
 0x3d6   :  { %3116 = vmatmul.f32.gmra.mxu2 %v10359_v17  ;;  %3281 = vmatpush.msra.mxu1 %v1390_v61  ;;  %v10368_v17 = vld [vmem:[#allocation74_spill] sm:$0xff] }
 0x3d8   :  { %v2665_v39 = vpop.f32.mrf.mxu3 }
 0x3d9   :  { %v2666_v47 = vadd.f32 %v2665_v39, %v2601_v22  ;;  %v2857_v62 = vpop.f32.mrf.mxu2  ;;  %v2733_v7 = vpop.f32.mrf.mxu0  ;;  %v2604_v22 = vadd.f32 %v8043_v24, %v2539_v2  ;;  %v10365_v24 = vld [vmem:[#allocation121_spill] sm:$0xff] }
 0x3da   :  { %v8190_v59 = vadd.f32 %v2857_v62, %v2793_v23  ;;  %v2798_v19 = vpop.f32.mrf.mxu1  ;;  %v1271_v23 = vld [vmem:[#allocation7 + $0xe50] sm:$0xff]  ;;  %v10366_v2 = vld [vmem:[#allocation69_spill] sm:$0xff] }
 0x3db   :  { %v2731_v36 = vadd.f32 %v2730_v48, %v2666_v47  ;;  %3217 = vmatpush.msra.mxu0 %v1271_v23  ;;  %v10367_v23 = vld [vmem:[#allocation67_spill] sm:$0xff] }
 0x3dc   :  { %2992 = vmatmul.f32.gmra.mxu0 %v10360_v58  ;;  %v1383_v58 = vld [vmem:[#allocation7 + $0x11d0] sm:$0xff] }
 0x3dd   :  { %6034 = vmatmul.msk.f32.gmra.mxu3 %vm1529_vm2, %v10361_v10  ;;  %3057 = vmatmul.f32.gmra.mxu1 %v10362_v27  ;;  %v2796_v28 = vadd.f32 %v2795_v63, %v2731_v36  ;;  %v10364_v27 = vld [vmem:[#allocation70_spill] sm:$0xff]  ;;  %v1264_v63 = vld [vmem:[#allocation7 + $0xe18] sm:$0xff] }
 0x3de   :  { %3119 = vmatmul.f32.gmra.mxu2 %v10363_v43  ;;  %3282 = vmatpush.msra.mxu1 %v1383_v58  ;;  %v1376_v36 = vld [vmem:[#allocation7 + $0x1198] sm:$0xff]  ;;  %v2542_v43 = vadd.f32 %v8034_v52, %v8075_v31 }
 0x3df   :  { %3218 = vmatpush.msra.mxu0 %v1264_v63  ;;  %v10370_v63 = vld [vmem:[#allocation73_spill] sm:$0xff] }
 0x3e0   :  { %v2668_v48 = vpop.f32.mrf.mxu3  ;;  %3283 = vmatpush.msra.mxu1 %v1376_v36  ;;  %v915_v36 = vld [vmem:[#allocation7 + $0x330] sm:$0xff] }
 0x3e1   :  { %v2669_v39 = vadd.f32 %v2668_v48, %v2604_v22  ;;  %v2860_v61 = vpop.f32.mrf.mxu2  ;;  %v2736_v47 = vpop.f32.mrf.mxu0 }
 0x3e2   :  { %v8200_v62 = vadd.f32 %v2860_v61, %v2796_v28  ;;  %v2801_v60 = vpop.f32.mrf.mxu1  ;;  %v922_v28 = vld [vmem:[#allocation7 + $0x368] sm:$0xff] }
 0x3e3   :  { %v2734_v37 = vadd.f32 %v2733_v7, %v2669_v39  ;;  %v2607_v7 = vadd.f32 %v8054_v13, %v2542_v43  ;;  %3398 = vmatpush.msrb.mxu3 %v922_v28  ;;  %v10371_v43 = vld [vmem:[#allocation71_spill] sm:$0xff] }
 0x3e4   :  { %2995 = vmatmul.f32.gmra.mxu0 %v10364_v27  ;;  %v1258_v28 = vld [vmem:[#allocation7 + $0xde8] sm:$0xff] }
 0x3e5   :  { %6035 = vmatmul.msk.f32.gmra.mxu3 %vm1529_vm2, %v10365_v24  ;;  %3060 = vmatmul.f32.gmra.mxu1 %v10366_v2  ;;  %v2799_v9 = vadd.f32 %v2798_v19, %v2734_v37  ;;  %v2545_v37 = vadd.f32 %v8045_v35, %v8075_v31  ;;  %v10369_v19 = vld [vmem:[#allocation124_spill] sm:$0xff] }
 0x3e6   :  { %3122 = vmatmul.f32.gmra.mxu2 %v10367_v23  ;;  %3399 = vmatpush.msrb.mxu3 %v915_v36  ;;  %v10375_v36 = vld [vmem:[#allocation75_spill] sm:$0xff] }
 0x3e7   :  { %3593 = vmatpush.msrb.mxu2 %v1258_v28  ;;  %v908_v28 = vld [vmem:[#allocation7 + $0x2f8] sm:$0xff] }
 0x3e8   :  { %v2671_v58 = vpop.f32.mrf.mxu3  ;;  %3400 = vmatpush.msrb.mxu3 %v908_v28 }
 0x3e9   :  { %v2672_v22 = vadd.f32 %v2671_v58, %v2607_v7  ;;  %v2863_v48 = vpop.f32.mrf.mxu2  ;;  %v2739_v39 = vpop.f32.mrf.mxu0  ;;  %v1034_v7 = vld [vmem:[#allocation7 + $0x6e8] sm:$0xff] }
 0x3ea   :  { %v8210_v61 = vadd.f32 %v2863_v48, %v2799_v9  ;;  %v2804_v52 = vpop.f32.mrf.mxu1  ;;  %v2610_v9 = vadd.f32 %v8065_v45, %v2545_v37  ;;  %3463 = vmatpush.msrb.mxu0 %v1034_v7  ;;  %v10374_v45 = vld [vmem:[#allocation77_spill] sm:$0xff]  ;;  %v1027_v7 = vld [vmem:[#allocation7 + $0x6b0] sm:$0xff] }
 0x3eb   :  { %v2737_v27 = vadd.f32 %v2736_v47, %v2672_v22 }
 0x3ec   :  { %2998 = vmatmul.f32.gmra.mxu0 %v10368_v17 }
 0x3ed   :  { %6036 = vmatmul.msk.f32.gmra.mxu3 %vm1529_vm2, %v10369_v19  ;;  %3063 = vmatmul.f32.gmra.mxu1 %v10370_v63  ;;  %v2802_v13 = vadd.f32 %v2801_v60, %v2737_v27  ;;  %v1146_v63 = vld [vmem:[#allocation7 + $0xa68] sm:$0xff]  ;;  %v2548_v60 = vadd.f32 %v8056_v42, %v8075_v31 }
 0x3ee   :  { %3125 = vmatmul.f32.gmra.mxu2 %v10371_v43  ;;  %v10372_v27 = vld [vmem:[#allocation78_spill] sm:$0xff]  ;;  %3528 = vmatpush.msrb.mxu1 %v1146_v63  ;;  %v10373_v43 = vld [vmem:[#allocation127_spill] sm:$0xff] }
 0x3ef   :  { %3464 = vmatpush.msrb.mxu0 %v1027_v7  ;;  %v901_v7 = vld [vmem:[#allocation7 + $0x2c0] sm:$0xff] }
 0x3f0   :  { %v2674_v47 = vpop.f32.mrf.mxu3  ;;  %3401 = vmatpush.msrb.mxu3 %v901_v7  ;;  %v10385_v7 = vld [vmem:[#allocation83_spill] sm:$0xff] }
 0x3f1   :  { %v2675_v58 = vadd.f32 %v2674_v47, %v2610_v9  ;;  %v2866_v22 = vpop.f32.mrf.mxu2  ;;  %v2742_v35 = vpop.f32.mrf.mxu0  ;;  %v10376_v9 = vld [vmem:[#allocation157_spill] sm:$0xff] }
 0x3f2   :  { %v8220_v48 = vadd.f32 %v2866_v22, %v2802_v13  ;;  %v2807_v17 = vpop.f32.mrf.mxu1  ;;  %v1251_v13 = vld [vmem:[#allocation7 + $0xdb0] sm:$0xff] }
 0x3f3   :  { %v2740_v2 = vadd.f32 %v2739_v39, %v2675_v58  ;;  %v2613_v39 = vadd.f32 %v10376_v9, %v2548_v60  ;;  %3594 = vmatpush.msrb.mxu2 %v1251_v13  ;;  %v10380_v60 = vld [vmem:[#allocation82_spill] sm:$0xff]  ;;  %v10381_v13 = vld [vmem:[#allocation79_spill] sm:$0xff]  ;;  %v1020_v9 = vld [vmem:[#allocation7 + $0x678] sm:$0xff] }
 0x3f4   :  { %3001 = vmatmul.f32.gmra.mxu0 %v10372_v27 }
 0x3f5   :  { %6037 = vmatmul.msk.f32.gmra.mxu3 %vm1529_vm2, %v10373_v43  ;;  %3066 = vmatmul.f32.gmra.mxu1 %v10374_v45  ;;  %v2805_v37 = vadd.f32 %v2804_v52, %v2740_v2  ;;  %v1139_v45 = vld [vmem:[#allocation7 + $0xa30] sm:$0xff]  ;;  %v10377_v2 = vld [vmem:[#allocation81_spill] sm:$0xff] }
 0x3f6   :  { %3128 = vmatmul.f32.gmra.mxu2 %v10375_v36  ;;  %3529 = vmatpush.msrb.mxu1 %v1139_v45  ;;  %v10378_v52 = vld [vmem:[#allocation155_spill] sm:$0xff] }
 0x3f7   :  { %v2551_v36 = vadd.f32 %v10378_v52, %v8075_v31  ;;  %3465 = vmatpush.msrb.mxu0 %v1020_v9  ;;  %v10382_v52 = vld [vmem:[#allocation86_spill] sm:$0xff] }
 0x3f8   :  { %v2677_v47 = vpop.f32.mrf.mxu3  ;;  %v1237_v9 = vld [vmem:[#allocation7 + $0xd40] sm:$0xff] }
 0x3f9   :  { %v2678_v63 = vadd.f32 %v2677_v47, %v2613_v39  ;;  %v2869_v58 = vpop.f32.mrf.mxu2  ;;  %v2745_v42 = vpop.f32.mrf.mxu0 }
 0x3fa   :  { %v8230_v22 = vadd.f32 %v2869_v58, %v2805_v37  ;;  %v2810_v27 = vpop.f32.mrf.mxu1  ;;  %v1244_v37 = vld [vmem:[#allocation7 + $0xd78] sm:$0xff] }
 0x3fb   :  { %v2743_v23 = vadd.f32 %v2742_v35, %v2678_v63  ;;  %v2616_v35 = vadd.f32 %v8090_v8, %v2551_v36  ;;  %3595 = vmatpush.msrb.mxu2 %v1244_v37  ;;  %v10384_v8 = vld [vmem:[#allocation85_spill] sm:$0xff]  ;;  %v894_v37 = vld [vmem:[#allocation7 + $0x288] sm:$0xff] }
 0x3fc   :  { %3004 = vmatmul.f32.gmra.mxu0 %v10377_v2  ;;  %v10383_v2 = vld [vmem:[#allocation26_spill] sm:$0xff]  ;;  %3402 = vmatpush.msrb.mxu3 %v894_v37 }
 0x3fd   :  { %6038 = vmatmul.msk.f32.gmra.mxu3 %vm1529_vm2, %v10379_v49  ;;  %3069 = vmatmul.f32.gmra.mxu1 %v10380_v60  ;;  %v2808_v28 = vadd.f32 %v2807_v17, %v2743_v23  ;;  %v1132_v23 = vld [vmem:[#allocation7 + $0x9f8] sm:$0xff]  ;;  %v10389_v37 = vld [vmem:[#allocation22_spill] sm:$0xff]  ;;  %v10396_v60 = vld [vmem:[#allocation95_spill] sm:$0xff] }
 0x3fe   :  { %3131 = vmatmul.f32.gmra.mxu2 %v10381_v13  ;;  %3530 = vmatpush.msrb.mxu1 %v1132_v23  ;;  %v10398_v13 = vld [vmem:[#allocation94_spill] sm:$0xff] }
 0x3ff   :  { %3596 = vmatpush.msrb.mxu2 %v1237_v9  ;;  %v887_v9 = vld [vmem:[#allocation7 + $0x250] sm:$0xff] }
 0x400   :  { %v2680_v39 = vpop.f32.mrf.mxu3  ;;  %3403 = vmatpush.msrb.mxu3 %v887_v9  ;;  %v10394_v9 = vld [vmem:[#allocation90_spill] sm:$0xff] }
 0x401   :  { %v2681_v45 = vadd.f32 %v2680_v39, %v2616_v35  ;;  %v2872_v47 = vpop.f32.mrf.mxu2  ;;  %v8240_v31 = vpop.f32.mrf.mxu0  ;;  %v1013_v35 = vld [vmem:[#allocation7 + $0x640] sm:$0xff] }
 0x402   :  { %v8242_v63 = vadd.f32 %v2872_v47, %v2808_v28  ;;  %v8244_v58 = vpop.f32.mrf.mxu1  ;;  %3466 = vmatpush.msrb.mxu0 %v1013_v35  ;;  %v1006_v35 = vld [vmem:[#allocation7 + $0x608] sm:$0xff] }
 0x403   :  { %v2746_v17 = vadd.f32 %v2745_v42, %v2681_v45 }
 0x404   :  { %3219 = vmatmul.f32.vlgmr.msra.gmra.mxu0 %v10382_v52  ;;  %v10388_v52 = vld [vmem:[#allocation30_spill] sm:$0xff] }
 0x405   :  { %3154 = vmatmul.f32.vlgmr.msra.gmra.mxu3 %v10383_v2  ;;  %3284 = vmatmul.f32.vlgmr.msra.gmra.mxu1 %v10384_v8  ;;  %v2811_v36 = vadd.f32 %v2810_v27, %v2746_v17  ;;  %v1125_v27 = vld [vmem:[#allocation7 + $0x9c0] sm:$0xff]  ;;  %v10393_v8 = vld [vmem:[#allocation91_spill] sm:$0xff] }
 0x406   :  { %3134 = vmatmul.f32.gmra.mxu2 %v10385_v7  ;;  %v10387_v17 = vld [vmem:[#allocation89_spill] sm:$0xff]  ;;  %3531 = vmatpush.msrb.mxu1 %v1125_v27 }
 0x407   :  { %3467 = vmatpush.msrb.mxu0 %v1006_v35  ;;  %v999_v35 = vld [vmem:[#allocation7 + $0x5d0] sm:$0xff] }
 0x408   :  { %v2895_v28 = vpop.f32.mrf.mxu3 }
 0x409   :  { %v2875_v39 = vpop.f32.mrf.mxu2  ;;  %v8251_v42 = vadd.f32 %v2895_v28, %v8100_v41  ;;  %v8253_v45 = vpop.f32.mrf.mxu0  ;;  %v1230_v41 = vld [vmem:[#allocation7 + $0xd08] sm:$0xff]  ;;  %3468 = vmatpush.msrb.mxu0 %v999_v35 }
 0x40a   :  { %v8255_v47 = vadd.f32 %v2875_v39, %v2811_v36  ;;  %v8257_v23 = vpop.f32.mrf.mxu1  ;;  %3597 = vmatpush.msrb.mxu2 %v1230_v41  ;;  %v880_v41 = vld [vmem:[#allocation7 + $0x218] sm:$0xff] }
 0x40b   :  { %10386 = vst [vmem:[#allocation157_spill] sm:$0xff] %v8251_v42  ;;  %3404 = vmatpush.msrb.mxu3 %v880_v41  ;;  %v873_v41 = vld [vmem:[#allocation7 + $0x1e0] sm:$0xff] }
 0x40c   :  { %3222 = vmatmul.f32.gmra.mxu0 %v10387_v17  ;;  %v1118_v17 = vld [vmem:[#allocation7 + $0x988] sm:$0xff] }
 0x40d   :  { %3157 = vmatmul.f32.gmra.mxu3 %v10388_v52  ;;  %3287 = vmatmul.f32.gmra.mxu1 %v10389_v37  ;;  %v10391_v37 = vld [vmem:[#allocation92_spill] sm:$0xff] }
 0x40e   :  { %6039 = vmatmul.msk.f32.vlgmr.msra.gmra.mxu2 %vm1529_vm2, %v10336_v51  ;;  %3532 = vmatpush.msrb.mxu1 %v1118_v17  ;;  %v10392_v51 = vld [vmem:[#allocation34_spill] sm:$0xff] }
 0x40f   :  { %3405 = vmatpush.msrb.mxu3 %v873_v41  ;;  %v866_v41 = vld [vmem:[#allocation7 + $0x1a8] sm:$0xff] }
 0x410   :  { %v2898_v36 = vpop.f32.mrf.mxu3 }
 0x411   :  { %v8265_v28 = vadd.f32 %v2898_v36, %v8110_v44  ;;  %v8267_v39 = vpop.f32.mrf.mxu2  ;;  %v8269_v27 = vpop.f32.mrf.mxu0  ;;  %v1223_v44 = vld [vmem:[#allocation7 + $0xcd0] sm:$0xff]  ;;  %3406 = vmatpush.msrb.mxu3 %v866_v41 }
 0x412   :  { %v8271_v42 = vpop.f32.mrf.mxu1  ;;  %3598 = vmatpush.msrb.mxu2 %v1223_v44  ;;  %v992_v44 = vld [vmem:[#allocation7 + $0x598] sm:$0xff]  ;;  %v859_v41 = vld [vmem:[#allocation7 + $0x170] sm:$0xff] }
 0x413   :  { %10390 = vst [vmem:[#allocation155_spill] sm:$0xff] %v8265_v28  ;;  %3469 = vmatpush.msrb.mxu0 %v992_v44  ;;  %3407 = vmatpush.msrb.mxu3 %v859_v41  ;;  %v852_v41 = vld [vmem:[#allocation7 + $0x138] sm:$0xff] }
 0x414   :  { %3225 = vmatmul.f32.gmra.mxu0 %v10391_v37 }
 0x415   :  { %3160 = vmatmul.f32.gmra.mxu3 %v10392_v51  ;;  %3290 = vmatmul.f32.gmra.mxu1 %v10393_v8  ;;  %v1111_v8 = vld [vmem:[#allocation7 + $0x950] sm:$0xff] }
 0x416   :  { %6040 = vmatmul.msk.f32.gmra.mxu2 %vm1529_vm2, %v10394_v9  ;;  %3533 = vmatpush.msrb.mxu1 %v1111_v8  ;;  %v10397_v9 = vld [vmem:[#allocation38_spill] sm:$0xff] }
 0x417   :  { %3408 = vmatpush.msrb.mxu3 %v852_v41  ;;  %v845_v41 = vld [vmem:[#allocation7 + $0x100] sm:$0xff] }
 0x418   :  { %v2901_v36 = vpop.f32.mrf.mxu3 }
 0x419   :  { %v8279_v28 = vadd.f32 %v2901_v36, %v8120_v57  ;;  %v8281_v7 = vpop.f32.mrf.mxu2  ;;  %v8283_v17 = vpop.f32.mrf.mxu0  ;;  %v1216_v57 = vld [vmem:[#allocation7 + $0xc98] sm:$0xff]  ;;  %3409 = vmatpush.msrb.mxu3 %v845_v41  ;;  %v838_v41 = vld [vmem:[#allocation7 + $0xc8] sm:$0xff] }
 0x41a   :  { %v8285_v37 = vpop.f32.mrf.mxu1  ;;  %3599 = vmatpush.msrb.mxu2 %v1216_v57  ;;  %v985_v57 = vld [vmem:[#allocation7 + $0x560] sm:$0xff] }
 0x41b   :  { %10395 = vst [vmem:[#allocation26_spill] sm:$0xff] %v8279_v28  ;;  %3470 = vmatpush.msrb.mxu0 %v985_v57  ;;  %3410 = vmatpush.msrb.mxu3 %v838_v41  ;;  %v831_v41 = vld [vmem:[#allocation7 + $0x90] sm:$0xff] }
 0x41c   :  { %3228 = vmatmul.f32.gmra.mxu0 %v10396_v60 }
 0x41d   :  { %3163 = vmatmul.f32.gmra.mxu3 %v10397_v9  ;;  %3293 = vmatmul.f32.gmra.mxu1 %v10398_v13  ;;  %v1104_v13 = vld [vmem:[#allocation7 + $0x918] sm:$0xff] }
 0x41e   :  { %6041 = vmatmul.msk.f32.gmra.mxu2 %vm1529_vm2, %v10341_v30  ;;  %3534 = vmatpush.msrb.mxu1 %v1104_v13  ;;  %v10401_v30 = vld [vmem:[#allocation43_spill] sm:$0xff] }
 0x41f   :  { %3411 = vmatpush.msrb.mxu3 %v831_v41  ;;  %v824_v41 = vld [vmem:[#allocation7 + $0x58] sm:$0xff] }
 0x420   :  { %v2904_v35 = vpop.f32.mrf.mxu3 }
 0x421   :  { %v8293_v36 = vadd.f32 %v2904_v35, %v8130_v20  ;;  %v8295_v28 = vpop.f32.mrf.mxu2  ;;  %v8297_v8 = vpop.f32.mrf.mxu0  ;;  %v1209_v20 = vld [vmem:[#allocation7 + $0xc60] sm:$0xff]  ;;  %3412 = vmatpush.msrb.mxu3 %v824_v41 }
 0x422   :  { %v8299_v60 = vpop.f32.mrf.mxu1  ;;  %3600 = vmatpush.msrb.mxu2 %v1209_v20  ;;  %v978_v20 = vld [vmem:[#allocation7 + $0x528] sm:$0xff]  ;;  %v817_v41 = vld [vmem:[#allocation7 + $0x20] sm:$0xff] }
 0x423   :  { %10399 = vst [vmem:[#allocation30_spill] sm:$0xff] %v8293_v36  ;;  %3471 = vmatpush.msrb.mxu0 %v978_v20  ;;  %3413 = vmatpush.msrb.mxu3 %v817_v41  ;;  %v10441_v41 = vld [vmem:[#allocation119_spill] sm:$0xff] }
 0x424   :  { %3231 = vmatmul.f32.gmra.mxu0 %v10400_v16 }
 0x425   :  { %3166 = vmatmul.f32.gmra.mxu3 %v10401_v30  ;;  %3296 = vmatmul.f32.gmra.mxu1 %v10402_v34  ;;  %v1097_v34 = vld [vmem:[#allocation7 + $0x8e0] sm:$0xff] }
 0x426   :  { %6042 = vmatmul.msk.f32.gmra.mxu2 %vm1529_vm2, %v10343_v33  ;;  %3535 = vmatpush.msrb.mxu1 %v1097_v34  ;;  %v10405_v33 = vld [vmem:[#allocation47_spill] sm:$0xff] }
 0x428   :  { %v2907_v44 = vpop.f32.mrf.mxu3 }
 0x429   :  { %v8307_v35 = vadd.f32 %v2907_v44, %v8140_v53  ;;  %v8309_v36 = vpop.f32.mrf.mxu2  ;;  %v8311_v13 = vpop.f32.mrf.mxu0  ;;  %v1202_v53 = vld [vmem:[#allocation7 + $0xc28] sm:$0xff] }
 0x42a   :  { %v8313_v16 = vpop.f32.mrf.mxu1  ;;  %3601 = vmatpush.msrb.mxu2 %v1202_v53  ;;  %v971_v53 = vld [vmem:[#allocation7 + $0x4f0] sm:$0xff] }
 0x42b   :  { %10403 = vst [vmem:[#allocation34_spill] sm:$0xff] %v8307_v35  ;;  %3472 = vmatpush.msrb.mxu0 %v971_v53 }
 0x42c   :  { %3234 = vmatmul.f32.gmra.mxu0 %v10404_v56 }
 0x42d   :  { %3169 = vmatmul.f32.gmra.mxu3 %v10405_v33  ;;  %3299 = vmatmul.f32.gmra.mxu1 %v10406_v26  ;;  %v1090_v26 = vld [vmem:[#allocation7 + $0x8a8] sm:$0xff] }
 0x42e   :  { %6043 = vmatmul.msk.f32.gmra.mxu2 %vm1529_vm2, %v10345_v6  ;;  %v10409_v33 = vld [vmem:[#allocation103_spill] sm:$0xff]  ;;  %3536 = vmatpush.msrb.mxu1 %v1090_v26 }
 0x42f   :  { %v10410_v6 = vld [vmem:[#allocation51_spill] sm:$0xff] }
 0x430   :  { %v2910_v57 = vpop.f32.mrf.mxu3 }
 0x431   :  { %v8321_v44 = vadd.f32 %v2910_v57, %v8150_v1  ;;  %v8323_v35 = vpop.f32.mrf.mxu2  ;;  %v8325_v34 = vpop.f32.mrf.mxu0  ;;  %v1195_v1 = vld [vmem:[#allocation7 + $0xbf0] sm:$0xff] }
 0x432   :  { %v8327_v56 = vpop.f32.mrf.mxu1  ;;  %3602 = vmatpush.msrb.mxu2 %v1195_v1  ;;  %v964_v1 = vld [vmem:[#allocation7 + $0x4b8] sm:$0xff] }
 0x433   :  { %10407 = vst [vmem:[#allocation38_spill] sm:$0xff] %v8321_v44  ;;  %3473 = vmatpush.msrb.mxu0 %v964_v1 }
 0x434   :  { %10408 = vst [vmem:[#allocation159_spill] sm:$0xff] %v8327_v56  ;;  %3237 = vmatmul.f32.gmra.mxu0 %v10409_v33  ;;  %v10416_v56 = vld [vmem:[#allocation105_spill] sm:$0xff] }
 0x435   :  { %3172 = vmatmul.f32.gmra.mxu3 %v10410_v6  ;;  %3302 = vmatmul.f32.gmra.mxu1 %v10411_v18  ;;  %v1083_v18 = vld [vmem:[#allocation7 + $0x870] sm:$0xff]  ;;  %v10414_v6 = vld [vmem:[#allocation106_spill] sm:$0xff] }
 0x436   :  { %6044 = vmatmul.msk.f32.gmra.mxu2 %vm1529_vm2, %v10347_v25  ;;  %3537 = vmatpush.msrb.mxu1 %v1083_v18  ;;  %v10415_v25 = vld [vmem:[#allocation55_spill] sm:$0xff] }
 0x438   :  { %v2913_v20 = vpop.f32.mrf.mxu3 }
 0x439   :  { %v8335_v57 = vadd.f32 %v2913_v20, %v8160_v3  ;;  %v8337_v44 = vpop.f32.mrf.mxu2  ;;  %v8339_v26 = vpop.f32.mrf.mxu0  ;;  %v1188_v3 = vld [vmem:[#allocation7 + $0xbb8] sm:$0xff] }
 0x43a   :  { %v8341_v33 = vpop.f32.mrf.mxu1  ;;  %3603 = vmatpush.msrb.mxu2 %v1188_v3  ;;  %v957_v3 = vld [vmem:[#allocation7 + $0x480] sm:$0xff] }
 0x43b   :  { %10412 = vst [vmem:[#allocation160_spill] sm:$0xff] %v8335_v57  ;;  %3474 = vmatpush.msrb.mxu0 %v957_v3 }
 0x43c   :  { %10413 = vst [vmem:[#allocation161_spill] sm:$0xff] %v8341_v33  ;;  %3240 = vmatmul.f32.gmra.mxu0 %v10414_v6  ;;  %v10421_v33 = vld [vmem:[#allocation108_spill] sm:$0xff] }
 0x43d   :  { %3175 = vmatmul.f32.gmra.mxu3 %v10415_v25  ;;  %3305 = vmatmul.f32.gmra.mxu1 %v10416_v56  ;;  %v1076_v56 = vld [vmem:[#allocation7 + $0x838] sm:$0xff] }
 0x43e   :  { %6045 = vmatmul.msk.f32.gmra.mxu2 %vm1529_vm2, %v10349_v46  ;;  %v10419_v25 = vld [vmem:[#allocation109_spill] sm:$0xff]  ;;  %3538 = vmatpush.msrb.mxu1 %v1076_v56  ;;  %v10420_v46 = vld [vmem:[#allocation60_spill] sm:$0xff] }
 0x440   :  { %v2916_v53 = vpop.f32.mrf.mxu3 }
 0x441   :  { %v8349_v20 = vadd.f32 %v2916_v53, %v8170_v54  ;;  %v8351_v57 = vpop.f32.mrf.mxu2  ;;  %v8353_v18 = vpop.f32.mrf.mxu0  ;;  %v1181_v54 = vld [vmem:[#allocation7 + $0xb80] sm:$0xff] }
 0x442   :  { %v8355_v6 = vpop.f32.mrf.mxu1  ;;  %3604 = vmatpush.msrb.mxu2 %v1181_v54  ;;  %v950_v54 = vld [vmem:[#allocation7 + $0x448] sm:$0xff] }
 0x443   :  { %10417 = vst [vmem:[#allocation162_spill] sm:$0xff] %v8349_v20  ;;  %3475 = vmatpush.msrb.mxu0 %v950_v54 }
 0x444   :  { %10418 = vst [vmem:[#allocation163_spill] sm:$0xff] %v8355_v6  ;;  %3243 = vmatmul.f32.gmra.mxu0 %v10419_v25  ;;  %v10426_v6 = vld [vmem:[#allocation56_spill] sm:$0xff] }
 0x445   :  { %3178 = vmatmul.f32.gmra.mxu3 %v10420_v46  ;;  %3308 = vmatmul.f32.gmra.mxu1 %v10421_v33  ;;  %v1069_v33 = vld [vmem:[#allocation7 + $0x800] sm:$0xff]  ;;  %v10424_v46 = vld [vmem:[#allocation111_spill] sm:$0xff] }
 0x446   :  { %6046 = vmatmul.msk.f32.gmra.mxu2 %vm1529_vm2, %v10351_v14  ;;  %3539 = vmatpush.msrb.mxu1 %v1069_v33  ;;  %v10425_v14 = vld [vmem:[#allocation64_spill] sm:$0xff] }
 0x448   :  { %v2919_v1 = vpop.f32.mrf.mxu3 }
 0x449   :  { %v8363_v53 = vadd.f32 %v2919_v1, %v8180_v15  ;;  %v8365_v20 = vpop.f32.mrf.mxu2  ;;  %v8367_v56 = vpop.f32.mrf.mxu0  ;;  %v1174_v15 = vld [vmem:[#allocation7 + $0xb48] sm:$0xff] }
 0x44a   :  { %v8369_v25 = vpop.f32.mrf.mxu1  ;;  %3605 = vmatpush.msrb.mxu2 %v1174_v15  ;;  %v943_v15 = vld [vmem:[#allocation7 + $0x410] sm:$0xff] }
 0x44b   :  { %10422 = vst [vmem:[#allocation164_spill] sm:$0xff] %v8363_v53  ;;  %3476 = vmatpush.msrb.mxu0 %v943_v15 }
 0x44c   :  { %10423 = vst [vmem:[#allocation165_spill] sm:$0xff] %v8369_v25  ;;  %3246 = vmatmul.f32.gmra.mxu0 %v10424_v46  ;;  %v10431_v25 = vld [vmem:[#allocation113_spill] sm:$0xff] }
 0x44d   :  { %3181 = vmatmul.f32.gmra.mxu3 %v10425_v14  ;;  %3311 = vmatmul.f32.gmra.mxu1 %v10426_v6  ;;  %v1062_v6 = vld [vmem:[#allocation7 + $0x7c8] sm:$0xff] }
 0x44e   :  { %6047 = vmatmul.msk.f32.gmra.mxu2 %vm1529_vm2, %v10353_v50  ;;  %v10429_v14 = vld [vmem:[#allocation114_spill] sm:$0xff]  ;;  %3540 = vmatpush.msrb.mxu1 %v1062_v6  ;;  %v10430_v50 = vld [vmem:[#allocation68_spill] sm:$0xff] }
 0x450   :  { %v2922_v3 = vpop.f32.mrf.mxu3 }
 0x451   :  { %v8377_v1 = vadd.f32 %v2922_v3, %v8190_v59  ;;  %v8379_v53 = vpop.f32.mrf.mxu2  ;;  %v8381_v33 = vpop.f32.mrf.mxu0  ;;  %v1167_v59 = vld [vmem:[#allocation7 + $0xb10] sm:$0xff] }
 0x452   :  { %v8383_v46 = vpop.f32.mrf.mxu1  ;;  %3606 = vmatpush.msrb.mxu2 %v1167_v59  ;;  %v936_v59 = vld [vmem:[#allocation7 + $0x3d8] sm:$0xff] }
 0x453   :  { %10427 = vst [vmem:[#allocation166_spill] sm:$0xff] %v8377_v1  ;;  %3477 = vmatpush.msrb.mxu0 %v936_v59 }
 0x454   :  { %10428 = vst [vmem:[#allocation167_spill] sm:$0xff] %v8383_v46  ;;  %3249 = vmatmul.f32.gmra.mxu0 %v10429_v14  ;;  %v10437_v46 = vld [vmem:[#allocation116_spill] sm:$0xff] }
 0x455   :  { %3184 = vmatmul.f32.gmra.mxu3 %v10430_v50  ;;  %3314 = vmatmul.f32.gmra.mxu1 %v10431_v25  ;;  %v1055_v25 = vld [vmem:[#allocation7 + $0x790] sm:$0xff]  ;;  %v10435_v50 = vld [vmem:[#allocation117_spill] sm:$0xff] }
 0x456   :  { %6048 = vmatmul.msk.f32.gmra.mxu2 %vm1529_vm2, %v10355_v12  ;;  %3541 = vmatpush.msrb.mxu1 %v1055_v25  ;;  %v10436_v12 = vld [vmem:[#allocation72_spill] sm:$0xff] }
 0x458   :  { %v2925_v54 = vpop.f32.mrf.mxu3 }
 0x459   :  { %v8391_v3 = vadd.f32 %v2925_v54, %v8200_v62  ;;  %v8393_v1 = vpop.f32.mrf.mxu2  ;;  %v8395_v6 = vpop.f32.mrf.mxu0  ;;  %v1160_v62 = vld [vmem:[#allocation7 + $0xad8] sm:$0xff] }
 0x45a   :  { %10433 = vst [vmem:[#allocation169_spill] sm:$0xff] %v8395_v6  ;;  %v8397_v14 = vpop.f32.mrf.mxu1  ;;  %3607 = vmatpush.msrb.mxu2 %v1160_v62  ;;  %v10440_v6 = vld [vmem:[#allocation76_spill] sm:$0xff]  ;;  %v1370_v62 = vld [vmem:[#allocation7 + $0x1168] sm:$0xff] }
 0x45b   :  { %10432 = vst [vmem:[#allocation168_spill] sm:$0xff] %v8391_v3  ;;  %3658 = vmatpush.msra.mxu3 %v1370_v62  ;;  %v1482_v62 = vld [vmem:[#allocation7 + $0x14e8] sm:$0xff] }
 0x45c   :  { %10434 = vst [vmem:[#allocation170_spill] sm:$0xff] %v8397_v14  ;;  %3252 = vmatmul.f32.gmra.mxu0 %v10435_v50  ;;  %v1041_v14 = vld [vmem:[#allocation7 + $0x720] sm:$0xff] }
 0x45d   :  { %3187 = vmatmul.f32.gmra.mxu3 %v10436_v12  ;;  %3317 = vmatmul.f32.gmra.mxu1 %v10437_v46  ;;  %v1048_v46 = vld [vmem:[#allocation7 + $0x758] sm:$0xff]  ;;  %v929_v12 = vld [vmem:[#allocation7 + $0x3a0] sm:$0xff] }
 0x45e   :  { %6049 = vmatmul.msk.f32.gmra.mxu2 %vm1529_vm2, %v10357_v21  ;;  %3542 = vmatpush.msrb.mxu1 %v1048_v46  ;;  %v10439_v21 = vld [vmem:[#allocation120_spill] sm:$0xff] }
 0x45f   :  { %3478 = vmatpush.msrb.mxu0 %v929_v12  ;;  %v10446_v12 = vld [vmem:[#allocation122_spill] sm:$0xff] }
 0x460   :  { %v2928_v15 = vpop.f32.mrf.mxu3  ;;  %3543 = vmatpush.msrb.mxu1 %v1041_v14  ;;  %v1363_v14 = vld [vmem:[#allocation7 + $0x1130] sm:$0xff] }
 0x461   :  { %v8405_v54 = vadd.f32 %v2928_v15, %v8210_v61  ;;  %v8407_v3 = vpop.f32.mrf.mxu2  ;;  %v8409_v25 = vpop.f32.mrf.mxu0  ;;  %v1153_v61 = vld [vmem:[#allocation7 + $0xaa0] sm:$0xff]  ;;  %3659 = vmatpush.msra.mxu3 %v1363_v14  ;;  %3723 = vmatpush.msra.mxu0 %v1482_v62  ;;  %v1356_v14 = vld [vmem:[#allocation7 + $0x10f8] sm:$0xff] }
 0x462   :  { %v8411_v50 = vpop.f32.mrf.mxu1  ;;  %3608 = vmatpush.msrb.mxu2 %v1153_v61  ;;  %v923_v61 = vld [vmem:[#allocation7 + $0x370] sm:$0xff] }
 0x463   :  { %10438 = vst [vmem:[#allocation171_spill] sm:$0xff] %v8405_v54  ;;  %3660 = vmatpush.msra.mxu3 %v1356_v14  ;;  %v10458_v14 = vld [vmem:[#allocation88_spill] sm:$0xff] }
 0x464   :  { %3255 = vmatmul.f32.gmra.mxu0 %v10439_v21  ;;  %3853 = vmatpush.msra.mxu2 %v923_v61  ;;  %v1475_v61 = vld [vmem:[#allocation7 + $0x14b0] sm:$0xff] }
 0x465   :  { %3190 = vmatmul.f32.gmra.mxu3 %v10440_v6  ;;  %3320 = vmatmul.f32.gmra.mxu1 %v10441_v41  ;;  %v10444_v41 = vld [vmem:[#allocation123_spill] sm:$0xff]  ;;  %v10445_v6 = vld [vmem:[#allocation80_spill] sm:$0xff] }
 0x466   :  { %6050 = vmatmul.msk.f32.gmra.mxu2 %vm1529_vm2, %v10361_v10  ;;  %3724 = vmatpush.msra.mxu0 %v1475_v61  ;;  %v909_v61 = vld [vmem:[#allocation7 + $0x300] sm:$0xff] }
 0x468   :  { %v2931_v59 = vpop.f32.mrf.mxu3 }
 0x469   :  { %v8419_v46 = vadd.f32 %v2931_v59, %v8220_v48  ;;  %v8421_v15 = vpop.f32.mrf.mxu2  ;;  %v8423_v54 = vpop.f32.mrf.mxu0 }
 0x46a   :  { %v8425_v21 = vpop.f32.mrf.mxu1 }
 0x46b   :  { %10442 = vst [vmem:[#allocation172_spill] sm:$0xff] %v8419_v46 }
 0x46c   :  { %10443 = vst [vmem:[#allocation173_spill] sm:$0xff] %v8425_v21  ;;  %3258 = vmatmul.f32.gmra.mxu0 %v10444_v41  ;;  %v10452_v21 = vld [vmem:[#allocation125_spill] sm:$0xff] }
 0x46d   :  { %3193 = vmatmul.f32.gmra.mxu3 %v10445_v6  ;;  %3323 = vmatmul.f32.gmra.mxu1 %v10446_v12  ;;  %v10450_v12 = vld [vmem:[#allocation126_spill] sm:$0xff] }
 0x46e   :  { %6051 = vmatmul.msk.f32.gmra.mxu2 %vm1529_vm2, %v10365_v24  ;;  %v1510_v6 = vld [vmem:[#allocation7 + $0x15c8] sm:$0xff]  ;;  %v10451_v24 = vld [vmem:[#allocation84_spill] sm:$0xff] }
 0x46f   :  { %3800 = vmatpush.msra.mxu1 %v1510_v6 }
 0x470   :  { %v2934_v48 = vpop.f32.mrf.mxu3 }
 0x471   :  { %v8433_v59 = vadd.f32 %v2934_v48, %v8230_v22  ;;  %v8435_v46 = vpop.f32.mrf.mxu2  ;;  %v8437_v41 = vpop.f32.mrf.mxu0  ;;  %v916_v22 = vld [vmem:[#allocation7 + $0x338] sm:$0xff] }
 0x472   :  { %10448 = vst [vmem:[#allocation175_spill] sm:$0xff] %v8437_v41  ;;  %v8439_v10 = vpop.f32.mrf.mxu1  ;;  %3854 = vmatpush.msra.mxu2 %v916_v22  ;;  %v10459_v22 = vld [vmem:[#allocation128_spill] sm:$0xff] }
 0x473   :  { %10447 = vst [vmem:[#allocation174_spill] sm:$0xff] %v8433_v59  ;;  %v10466_v41 = vld [vmem:[#allocation24_spill] sm:$0xff] }
 0x474   :  { %10449 = vst [vmem:[#allocation176_spill] sm:$0xff] %v8439_v10  ;;  %3261 = vmatmul.f32.gmra.mxu0 %v10450_v12  ;;  %3855 = vmatpush.msra.mxu2 %v909_v61  ;;  %v10463_v10 = vld [vmem:[#allocation20_spill] sm:$0xff]  ;;  %v1342_v61 = vld [vmem:[#allocation7 + $0x1088] sm:$0xff] }
 0x475   :  { %3196 = vmatmul.f32.gmra.mxu3 %v10451_v24  ;;  %3326 = vmatmul.f32.gmra.mxu1 %v10452_v21  ;;  %v10456_v21 = vld [vmem:[#allocation129_spill] sm:$0xff] }
 0x476   :  { %6052 = vmatmul.msk.f32.gmra.mxu2 %vm1529_vm2, %v10369_v19  ;;  %v8456_v19 = vld [vmem:[#allocation8] sm:$0x7f] }
 0x477   :  { %10457 = vst [vmem:[#allocation180_spill] sm:$0xff] %v8456_v19  ;;  %v8459_v6 = vperm.slane %v8456_v19, 3 }
 0x478   :  { %v2937_v62 = vpop.f32.mrf.mxu3 }
 0x479   :  { %v8447_v48 = vadd.f32 %v2937_v62, %v8242_v63  ;;  %v8449_v59 = vpop.f32.mrf.mxu2  ;;  %v8451_v12 = vpop.f32.mrf.mxu0  ;;  %v1349_v63 = vld [vmem:[#allocation7 + $0x10c0] sm:$0xff]  ;;  %v1468_v62 = vld [vmem:[#allocation7 + $0x1478] sm:$0xff] }
 0x47a   :  { %10454 = vst [vmem:[#allocation178_spill] sm:$0xff] %v8451_v12  ;;  %v8453_v24 = vpop.f32.mrf.mxu1  ;;  %3661 = vmatpush.msra.mxu3 %v1349_v63  ;;  %3725 = vmatpush.msra.mxu0 %v1468_v62  ;;  %v10462_v12 = vld [vmem:[#allocation19_spill] sm:$0xff]  ;;  %v10464_v63 = vld [vmem:[#allocation21_spill] sm:$0xff] }
 0x47b   :  { %10453 = vst [vmem:[#allocation177_spill] sm:$0xff] %v8447_v48  ;;  %v1461_v62 = vld [vmem:[#allocation7 + $0x1440] sm:$0xff] }
 0x47c   :  { %10455 = vst [vmem:[#allocation179_spill] sm:$0xff] %v8453_v24  ;;  %3264 = vmatmul.f32.gmra.mxu0 %v10456_v21  ;;  %v2961_v21 = vadd.f32 %v8240_v31, %v8459_v6  ;;  %v902_v31 = vld [vmem:[#allocation7 + $0x2c8] sm:$0xff]  ;;  %3662 = vmatpush.msra.mxu3 %v1342_v61  ;;  %v895_v61 = vld [vmem:[#allocation7 + $0x290] sm:$0xff] }
 0x47d   :  { %3199 = vmatmul.f32.gmra.mxu3 %v10458_v14  ;;  %3329 = vmatmul.f32.gmra.mxu1 %v10459_v22 }
 0x47e   :  { %6053 = vmatmul.msk.f32.gmra.mxu2 %vm1529_vm2, %v10373_v43  ;;  %v3026_v43 = vadd.f32 %v8244_v58, %v2961_v21  ;;  %3726 = vmatpush.msra.mxu0 %v1461_v62 }
 0x47f   :  { %3856 = vmatpush.msra.mxu2 %v902_v31 }
 0x480   :  { %v2940_v48 = vpop.f32.mrf.mxu3 }
 0x481   :  { %v8468_v19 = vadd.f32 %v2940_v48, %v8255_v47  ;;  %v8470_v24 = vpop.f32.mrf.mxu2  ;;  %v3220_v14 = vpop.f32.mrf.mxu0  ;;  %v3091_v47 = vadd.f32 %v8267_v39, %v3026_v43  ;;  %v1335_v39 = vld [vmem:[#allocation7 + $0x1050] sm:$0xff]  ;;  %3857 = vmatpush.msra.mxu2 %v895_v61 }
 0x482   :  { %10461 = vst [vmem:[#allocation182_spill] sm:$0xff] %v8470_v24  ;;  %v3285_v22 = vpop.f32.mrf.mxu1  ;;  %v10465_v24 = vld [vmem:[#allocation23_spill] sm:$0xff]  ;;  %3663 = vmatpush.msra.mxu3 %v1335_v39 }
 0x483   :  { %10460 = vst [vmem:[#allocation181_spill] sm:$0xff] %v8468_v19  ;;  %v2964_v19 = vadd.f32 %v8253_v45, %v8459_v6  ;;  %v1454_v45 = vld [vmem:[#allocation7 + $0x1408] sm:$0xff]  ;;  %v1447_v39 = vld [vmem:[#allocation7 + $0x13d0] sm:$0xff] }
 0x484   :  { %3479 = vmatmul.f32.vlgmr.msrb.gmra.mxu0 %v10462_v12 }
 0x485   :  { %3414 = vmatmul.f32.vlgmr.msrb.gmra.mxu3 %v10463_v10  ;;  %3544 = vmatmul.f32.vlgmr.msrb.gmra.mxu1 %v10464_v63 }
 0x486   :  { %6054 = vmatmul.msk.f32.gmra.mxu2 %vm1529_vm2, %v10379_v49  ;;  %v3029_v49 = vadd.f32 %v8257_v23, %v2964_v19  ;;  %3727 = vmatpush.msra.mxu0 %v1454_v45 }
 0x488   :  { %v3155_v48 = vpop.f32.mrf.mxu3  ;;  %v3094_v31 = vadd.f32 %v8281_v7, %v3029_v49  ;;  %v1328_v7 = vld [vmem:[#allocation7 + $0x1018] sm:$0xff]  ;;  %3728 = vmatpush.msra.mxu0 %v1447_v39 }
 0x489   :  { %v8481_v21 = vpop.f32.mrf.mxu2  ;;  %v3156_v58 = vadd.f32 %v3155_v48, %v3091_v47  ;;  %v3223_v12 = vpop.f32.mrf.mxu0  ;;  %3664 = vmatpush.msra.mxu3 %v1328_v7 }
 0x48a   :  { %v3288_v63 = vpop.f32.mrf.mxu1 }
 0x48b   :  { %v3221_v10 = vadd.f32 %v3220_v14, %v3156_v58  ;;  %v2967_v14 = vadd.f32 %v8269_v27, %v8459_v6  ;;  %v1503_v58 = vld [vmem:[#allocation7 + $0x1590] sm:$0xff]  ;;  %v888_v27 = vld [vmem:[#allocation7 + $0x258] sm:$0xff] }
 0x48c   :  { %3482 = vmatmul.f32.gmra.mxu0 %v10465_v24  ;;  %3801 = vmatpush.msra.mxu1 %v1503_v58 }
 0x48d   :  { %3417 = vmatmul.f32.gmra.mxu3 %v10466_v41  ;;  %3547 = vmatmul.f32.gmra.mxu1 %v10274_v40  ;;  %v3286_v43 = vadd.f32 %v3285_v22, %v3221_v10  ;;  %v3032_v24 = vadd.f32 %v8271_v42, %v2967_v14  ;;  %v2970_v42 = vadd.f32 %v8283_v17, %v8459_v6  ;;  %v881_v17 = vld [vmem:[#allocation7 + $0x220] sm:$0xff] }
 0x48e   :  { %3609 = vmatmul.f32.vlgmr.msrb.gmra.mxu2 %v10383_v2 }
 0x48f   :  { %3858 = vmatpush.msra.mxu2 %v888_v27 }
 0x490   :  { %v3158_v62 = vpop.f32.mrf.mxu3 }
 0x491   :  { %v3159_v19 = vadd.f32 %v3158_v62, %v3094_v31  ;;  %v3350_v23 = vpop.f32.mrf.mxu2  ;;  %v3226_v47 = vpop.f32.mrf.mxu0  ;;  %3859 = vmatpush.msra.mxu2 %v881_v17 }
 0x492   :  { %v8491_v48 = vadd.f32 %v3350_v23, %v3286_v43  ;;  %v3291_v10 = vpop.f32.mrf.mxu1  ;;  %v3097_v43 = vadd.f32 %v8295_v28, %v3032_v24  ;;  %v10469_v23 = vld [vmem:[#allocation32_spill] sm:$0xff]  ;;  %v1321_v28 = vld [vmem:[#allocation7 + $0xfe0] sm:$0xff] }
 0x493   :  { %v3224_v22 = vadd.f32 %v3223_v12, %v3159_v19  ;;  %v3035_v19 = vadd.f32 %v8285_v37, %v2970_v42  ;;  %3665 = vmatpush.msra.mxu3 %v1321_v28  ;;  %v10471_v42 = vld [vmem:[#allocation36_spill] sm:$0xff] }
 0x494   :  { %10467 = vst [vmem:[#allocation183_spill] sm:$0xff] %v8491_v48  ;;  %3485 = vmatmul.f32.gmra.mxu0 %v10179_v4  ;;  %v10496_v48 = vld [vmem:[#allocation58_spill] sm:$0xff] }
 0x495   :  { %3420 = vmatmul.f32.gmra.mxu3 %v10340_v55  ;;  %3550 = vmatmul.f32.gmra.mxu1 %v10278_v32  ;;  %v3289_v49 = vadd.f32 %v3288_v63, %v3224_v22  ;;  %v1440_v22 = vld [vmem:[#allocation7 + $0x1398] sm:$0xff]  ;;  %v3100_v58 = vadd.f32 %v8309_v36, %v3035_v19 }
 0x496   :  { %3612 = vmatmul.f32.gmra.mxu2 %v10388_v52  ;;  %3729 = vmatpush.msra.mxu0 %v1440_v22 }
 0x498   :  { %v3161_v12 = vpop.f32.mrf.mxu3 }
 0x499   :  { %v3162_v61 = vadd.f32 %v3161_v12, %v3097_v43  ;;  %v3353_v45 = vpop.f32.mrf.mxu2  ;;  %v3229_v31 = vpop.f32.mrf.mxu0 }
 0x49a   :  { %v8501_v62 = vadd.f32 %v3353_v45, %v3289_v49  ;;  %v3294_v63 = vpop.f32.mrf.mxu1  ;;  %v1433_v45 = vld [vmem:[#allocation7 + $0x1360] sm:$0xff] }
 0x49b   :  { %v3227_v14 = vadd.f32 %v3226_v47, %v3162_v61  ;;  %v2973_v47 = vadd.f32 %v8297_v8, %v8459_v6  ;;  %v1314_v61 = vld [vmem:[#allocation7 + $0xfa8] sm:$0xff]  ;;  %3730 = vmatpush.msra.mxu0 %v1433_v45 }
 0x49c   :  { %10468 = vst [vmem:[#allocation184_spill] sm:$0xff] %v8501_v62  ;;  %3488 = vmatmul.f32.gmra.mxu0 %v10184_v5  ;;  %v874_v8 = vld [vmem:[#allocation7 + $0x1e8] sm:$0xff]  ;;  %3666 = vmatpush.msra.mxu3 %v1314_v61 }
 0x49d   :  { %3423 = vmatmul.f32.gmra.mxu3 %v10469_v23  ;;  %3553 = vmatmul.f32.gmra.mxu1 %v10282_v0  ;;  %v3292_v24 = vadd.f32 %v3291_v10, %v3227_v14  ;;  %v3038_v12 = vadd.f32 %v8299_v60, %v2973_v47  ;;  %v10474_v47 = vld [vmem:[#allocation41_spill] sm:$0xff] }
 0x49e   :  { %3615 = vmatmul.f32.gmra.mxu2 %v10392_v51 }
 0x49f   :  { %v3103_v14 = vadd.f32 %v8323_v35, %v3038_v12  ;;  %3860 = vmatpush.msra.mxu2 %v874_v8 }
 0x4a0   :  { %v3164_v49 = vpop.f32.mrf.mxu3 }
 0x4a1   :  { %v3165_v37 = vadd.f32 %v3164_v49, %v3100_v58  ;;  %v3356_v7 = vpop.f32.mrf.mxu2  ;;  %v3232_v27 = vpop.f32.mrf.mxu0  ;;  %v10473_v58 = vld [vmem:[#allocation40_spill] sm:$0xff] }
 0x4a2   :  { %v8511_v39 = vadd.f32 %v3356_v7, %v3292_v24  ;;  %v3297_v10 = vpop.f32.mrf.mxu1  ;;  %v1426_v7 = vld [vmem:[#allocation7 + $0x1328] sm:$0xff] }
 0x4a3   :  { %v3230_v43 = vadd.f32 %v3229_v31, %v3165_v37  ;;  %v2976_v31 = vadd.f32 %v8311_v13, %v8459_v6  ;;  %v1307_v37 = vld [vmem:[#allocation7 + $0xf70] sm:$0xff]  ;;  %3731 = vmatpush.msra.mxu0 %v1426_v7  ;;  %v2982_v7 = vadd.f32 %v8339_v26, %v8459_v6  ;;  %v853_v26 = vld [vmem:[#allocation7 + $0x140] sm:$0xff] }
 0x4a4   :  { %10470 = vst [vmem:[#allocation185_spill] sm:$0xff] %v8511_v39  ;;  %3491 = vmatmul.f32.gmra.mxu0 %v10188_v11  ;;  %v867_v13 = vld [vmem:[#allocation7 + $0x1b0] sm:$0xff]  ;;  %3667 = vmatpush.msra.mxu3 %v1307_v37  ;;  %v860_v37 = vld [vmem:[#allocation7 + $0x178] sm:$0xff] }
 0x4a5   :  { %3426 = vmatmul.f32.gmra.mxu3 %v10471_v42  ;;  %3556 = vmatmul.f32.gmra.mxu1 %v10286_v29  ;;  %v3295_v36 = vadd.f32 %v3294_v63, %v3230_v43  ;;  %v3041_v49 = vadd.f32 %v8313_v16, %v2976_v31  ;;  %v10477_v31 = vld [vmem:[#allocation159_spill] sm:$0xff]  ;;  %v10490_v39 = vld [vmem:[#allocation53_spill] sm:$0xff] }
 0x4a6   :  { %3618 = vmatmul.f32.gmra.mxu2 %v10397_v9 }
 0x4a7   :  { %v3106_v43 = vadd.f32 %v8337_v44, %v3041_v49  ;;  %3861 = vmatpush.msra.mxu2 %v867_v13  ;;  %v10478_v44 = vld [vmem:[#allocation45_spill] sm:$0xff]  ;;  %v10480_v49 = vld [vmem:[#allocation47_spill] sm:$0xff] }
 0x4a8   :  { %v3167_v19 = vpop.f32.mrf.mxu3  ;;  %v1419_v13 = vld [vmem:[#allocation7 + $0x12f0] sm:$0xff] }
 0x4a9   :  { %v3168_v60 = vadd.f32 %v3167_v19, %v3103_v14  ;;  %v3359_v24 = vpop.f32.mrf.mxu2  ;;  %v3235_v28 = vpop.f32.mrf.mxu0  ;;  %v10476_v14 = vld [vmem:[#allocation44_spill] sm:$0xff]  ;;  %3862 = vmatpush.msra.mxu2 %v860_v37  ;;  %3732 = vmatpush.msra.mxu0 %v1419_v13  ;;  %v1293_v37 = vld [vmem:[#allocation7 + $0xf00] sm:$0xff] }
 0x4aa   :  { %v8521_v17 = vadd.f32 %v3359_v24, %v3295_v36  ;;  %v3300_v63 = vpop.f32.mrf.mxu1  ;;  %v1496_v19 = vld [vmem:[#allocation7 + $0x1558] sm:$0xff]  ;;  %v10479_v24 = vld [vmem:[#allocation46_spill] sm:$0xff] }
 0x4ab   :  { %v3233_v22 = vadd.f32 %v3232_v27, %v3168_v60  ;;  %v2979_v27 = vadd.f32 %v8325_v34, %v8459_v6  ;;  %3802 = vmatpush.msra.mxu1 %v1496_v19  ;;  %v1300_v34 = vld [vmem:[#allocation7 + $0xf38] sm:$0xff]  ;;  %3863 = vmatpush.msra.mxu2 %v853_v26  ;;  %v1286_v26 = vld [vmem:[#allocation7 + $0xec8] sm:$0xff] }
 0x4ac   :  { %10472 = vst [vmem:[#allocation186_spill] sm:$0xff] %v8521_v17  ;;  %3494 = vmatmul.f32.gmra.mxu0 %v10473_v58  ;;  %3668 = vmatpush.msra.mxu3 %v1300_v34  ;;  %v10483_v19 = vld [vmem:[#allocation161_spill] sm:$0xff]  ;;  %v10486_v34 = vld [vmem:[#allocation51_spill] sm:$0xff] }
 0x4ad   :  { %3429 = vmatmul.f32.gmra.mxu3 %v10474_v47  ;;  %3559 = vmatmul.f32.gmra.mxu1 %v10290_v38  ;;  %v3298_v35 = vadd.f32 %v3297_v10, %v3233_v22  ;;  %v3044_v60 = vadd.f32 %v10477_v31, %v2979_v27  ;;  %v3047_v31 = vadd.f32 %v10483_v19, %v2982_v7  ;;  %v1412_v13 = vld [vmem:[#allocation7 + $0x12b8] sm:$0xff] }
 0x4ae   :  { %3621 = vmatmul.f32.gmra.mxu2 %v10401_v30  ;;  %3669 = vmatpush.msra.mxu3 %v1293_v37  ;;  %v10488_v19 = vld [vmem:[#allocation52_spill] sm:$0xff]  ;;  %v10492_v37 = vld [vmem:[#allocation55_spill] sm:$0xff] }
 0x4af   :  { %3733 = vmatpush.msra.mxu0 %v1412_v13  ;;  %v1405_v13 = vld [vmem:[#allocation7 + $0x1280] sm:$0xff] }
 0x4b0   :  { %v3170_v12 = vpop.f32.mrf.mxu3  ;;  %3670 = vmatpush.msra.mxu3 %v1286_v26  ;;  %v10498_v26 = vld [vmem:[#allocation60_spill] sm:$0xff] }
 0x4b1   :  { %v3171_v16 = vadd.f32 %v3170_v12, %v3106_v43  ;;  %v3362_v36 = vpop.f32.mrf.mxu2  ;;  %v3238_v61 = vpop.f32.mrf.mxu0  ;;  %3734 = vmatpush.msra.mxu0 %v1405_v13  ;;  %v1398_v13 = vld [vmem:[#allocation7 + $0x1248] sm:$0xff] }
 0x4b2   :  { %v8531_v8 = vadd.f32 %v3362_v36, %v3298_v35  ;;  %v3303_v10 = vpop.f32.mrf.mxu1  ;;  %v3109_v35 = vadd.f32 %v8351_v57, %v3044_v60  ;;  %v10485_v57 = vld [vmem:[#allocation50_spill] sm:$0xff] }
 0x4b3   :  { %v3236_v45 = vadd.f32 %v3235_v28, %v3171_v16  ;;  %3735 = vmatpush.msra.mxu0 %v1398_v13  ;;  %v832_v13 = vld [vmem:[#allocation7 + $0x98] sm:$0xff] }
 0x4b4   :  { %10475 = vst [vmem:[#allocation40_spill] sm:$0xff] %v8531_v8  ;;  %3497 = vmatmul.f32.gmra.mxu0 %v10476_v14  ;;  %v10484_v8 = vld [vmem:[#allocation49_spill] sm:$0xff] }
 0x4b5   :  { %3432 = vmatmul.f32.gmra.mxu3 %v10478_v44  ;;  %3562 = vmatmul.f32.gmra.mxu1 %v10479_v24  ;;  %v3301_v22 = vadd.f32 %v3300_v63, %v3236_v45  ;;  %v10482_v45 = vld [vmem:[#allocation48_spill] sm:$0xff] }
 0x4b6   :  { %3624 = vmatmul.f32.gmra.mxu2 %v10480_v49 }
 0x4b8   :  { %v3173_v28 = vpop.f32.mrf.mxu3 }
 0x4b9   :  { %v3174_v43 = vadd.f32 %v3173_v28, %v3109_v35  ;;  %v3365_v12 = vpop.f32.mrf.mxu2  ;;  %v3241_v27 = vpop.f32.mrf.mxu0  ;;  %v3112_v35 = vadd.f32 %v8365_v20, %v3047_v31  ;;  %v10491_v20 = vld [vmem:[#allocation54_spill] sm:$0xff] }
 0x4ba   :  { %v8541_v16 = vadd.f32 %v3365_v12, %v3301_v22  ;;  %v3306_v63 = vpop.f32.mrf.mxu1 }
 0x4bb   :  { %v3239_v36 = vadd.f32 %v3238_v61, %v3174_v43  ;;  %v2985_v61 = vadd.f32 %v8353_v18, %v8459_v6  ;;  %v846_v18 = vld [vmem:[#allocation7 + $0x108] sm:$0xff] }
 0x4bc   :  { %10481 = vst [vmem:[#allocation44_spill] sm:$0xff] %v8541_v16  ;;  %3500 = vmatmul.f32.gmra.mxu0 %v10482_v45  ;;  %v10489_v16 = vld [vmem:[#allocation163_spill] sm:$0xff]  ;;  %3864 = vmatpush.msra.mxu2 %v846_v18 }
 0x4bd   :  { %3435 = vmatmul.f32.gmra.mxu3 %v10484_v8  ;;  %3565 = vmatmul.f32.gmra.mxu1 %v10485_v57  ;;  %v3304_v60 = vadd.f32 %v3303_v10, %v3239_v36  ;;  %v3050_v17 = vadd.f32 %v10489_v16, %v2985_v61  ;;  %v1279_v18 = vld [vmem:[#allocation7 + $0xe90] sm:$0xff] }
 0x4be   :  { %3627 = vmatmul.f32.gmra.mxu2 %v10486_v34  ;;  %3671 = vmatpush.msra.mxu3 %v1279_v18 }
 0x4c0   :  { %v3176_v22 = vpop.f32.mrf.mxu3 }
 0x4c1   :  { %v3177_v28 = vadd.f32 %v3176_v22, %v3112_v35  ;;  %v3368_v7 = vpop.f32.mrf.mxu2  ;;  %v3244_v43 = vpop.f32.mrf.mxu0  ;;  %v3115_v35 = vadd.f32 %v8379_v53, %v3050_v17  ;;  %v10497_v53 = vld [vmem:[#allocation59_spill] sm:$0xff] }
 0x4c2   :  { %v8551_v12 = vadd.f32 %v3368_v7, %v3304_v60  ;;  %v3309_v10 = vpop.f32.mrf.mxu1 }
 0x4c3   :  { %v3242_v36 = vadd.f32 %v3241_v27, %v3177_v28  ;;  %v2988_v27 = vadd.f32 %v8367_v56, %v8459_v6  ;;  %v839_v56 = vld [vmem:[#allocation7 + $0xd0] sm:$0xff] }
 0x4c4   :  { %10487 = vst [vmem:[#allocation159_spill] sm:$0xff] %v8551_v12  ;;  %3503 = vmatmul.f32.gmra.mxu0 %v10488_v19  ;;  %v10495_v12 = vld [vmem:[#allocation165_spill] sm:$0xff]  ;;  %3865 = vmatpush.msra.mxu2 %v839_v56  ;;  %v10504_v56 = vld [vmem:[#allocation64_spill] sm:$0xff] }
 0x4c5   :  { %3438 = vmatmul.f32.gmra.mxu3 %v10490_v39  ;;  %3568 = vmatmul.f32.gmra.mxu1 %v10491_v20  ;;  %v3307_v31 = vadd.f32 %v3306_v63, %v3242_v36  ;;  %v10494_v36 = vld [vmem:[#allocation57_spill] sm:$0xff]  ;;  %v3053_v62 = vadd.f32 %v10495_v12, %v2988_v27 }
 0x4c6   :  { %3630 = vmatmul.f32.gmra.mxu2 %v10492_v37 }
 0x4c7   :  { %3866 = vmatpush.msra.mxu2 %v832_v13  ;;  %v1265_v13 = vld [vmem:[#allocation7 + $0xe20] sm:$0xff] }
 0x4c8   :  { %v3179_v60 = vpop.f32.mrf.mxu3 }
 0x4c9   :  { %v3180_v16 = vadd.f32 %v3179_v60, %v3115_v35  ;;  %v3371_v22 = vpop.f32.mrf.mxu2  ;;  %v3247_v61 = vpop.f32.mrf.mxu0  ;;  %v3118_v35 = vadd.f32 %v8393_v1, %v3053_v62  ;;  %v10502_v1 = vld [vmem:[#allocation62_spill] sm:$0xff]  ;;  %v10503_v62 = vld [vmem:[#allocation63_spill] sm:$0xff] }
 0x4ca   :  { %v8561_v28 = vadd.f32 %v3371_v22, %v3307_v31  ;;  %v3312_v63 = vpop.f32.mrf.mxu1 }
 0x4cb   :  { %v3245_v7 = vadd.f32 %v3244_v43, %v3180_v16  ;;  %v2991_v43 = vadd.f32 %v8381_v33, %v8459_v6  ;;  %v1272_v33 = vld [vmem:[#allocation7 + $0xe58] sm:$0xff] }
 0x4cc   :  { %10493 = vst [vmem:[#allocation48_spill] sm:$0xff] %v8561_v28  ;;  %3506 = vmatmul.f32.gmra.mxu0 %v10494_v36  ;;  %v1489_v28 = vld [vmem:[#allocation7 + $0x1520] sm:$0xff]  ;;  %v10501_v36 = vld [vmem:[#allocation167_spill] sm:$0xff]  ;;  %3672 = vmatpush.msra.mxu3 %v1272_v33  ;;  %v10511_v33 = vld [vmem:[#allocation68_spill] sm:$0xff] }
 0x4cd   :  { %3441 = vmatmul.f32.gmra.mxu3 %v10496_v48  ;;  %3571 = vmatmul.f32.gmra.mxu1 %v10497_v53  ;;  %v3310_v17 = vadd.f32 %v3309_v10, %v3245_v7  ;;  %v10500_v7 = vld [vmem:[#allocation61_spill] sm:$0xff]  ;;  %v3056_v53 = vadd.f32 %v10501_v36, %v2991_v43 }
 0x4ce   :  { %3633 = vmatmul.f32.gmra.mxu2 %v10498_v26  ;;  %3803 = vmatpush.msra.mxu1 %v1489_v28  ;;  %v10507_v28 = vld [vmem:[#allocation65_spill] sm:$0xff] }
 0x4cf   :  { %3673 = vmatpush.msra.mxu3 %v1265_v13  ;;  %v1196_v26 = vld [vmem:[#allocation7 + $0xbf8] sm:$0xff] }
 0x4d0   :  { %v3182_v31 = vpop.f32.mrf.mxu3 }
 0x4d1   :  { %v3183_v12 = vadd.f32 %v3182_v31, %v3118_v35  ;;  %v3374_v60 = vpop.f32.mrf.mxu2  ;;  %v3250_v27 = vpop.f32.mrf.mxu0  ;;  %v1391_v35 = vld [vmem:[#allocation7 + $0x1210] sm:$0xff]  ;;  %v10505_v31 = vld [vmem:[#allocation169_spill] sm:$0xff] }
 0x4d2   :  { %v8571_v16 = vadd.f32 %v3374_v60, %v3310_v17  ;;  %v3315_v10 = vpop.f32.mrf.mxu1  ;;  %v3121_v17 = vadd.f32 %v8407_v3, %v3056_v53  ;;  %3736 = vmatpush.msra.mxu0 %v1391_v35  ;;  %v2994_v36 = vadd.f32 %v10505_v31, %v8459_v6  ;;  %v10510_v3 = vld [vmem:[#allocation67_spill] sm:$0xff]  ;;  %v825_v35 = vld [vmem:[#allocation7 + $0x60] sm:$0xff] }
 0x4d3   :  { %v3248_v22 = vadd.f32 %v3247_v61, %v3183_v12  ;;  %3867 = vmatpush.msra.mxu2 %v825_v35  ;;  %v10516_v35 = vld [vmem:[#allocation72_spill] sm:$0xff] }
 0x4d4   :  { %10499 = vst [vmem:[#allocation161_spill] sm:$0xff] %v8571_v16  ;;  %3509 = vmatmul.f32.gmra.mxu0 %v10500_v7  ;;  %v10508_v7 = vld [vmem:[#allocation170_spill] sm:$0xff] }
 0x4d5   :  { %3444 = vmatmul.f32.gmra.mxu3 %v10502_v1  ;;  %3574 = vmatmul.f32.gmra.mxu1 %v10503_v62  ;;  %v3313_v18 = vadd.f32 %v3312_v63, %v3248_v22  ;;  %v3059_v62 = vadd.f32 %v10508_v7, %v2994_v36 }
 0x4d6   :  { %3636 = vmatmul.f32.gmra.mxu2 %v10504_v56  ;;  %v10509_v56 = vld [vmem:[#allocation66_spill] sm:$0xff] }
 0x4d8   :  { %v3185_v61 = vpop.f32.mrf.mxu3 }
 0x4d9   :  { %v3186_v43 = vadd.f32 %v3185_v61, %v3121_v17  ;;  %v3377_v12 = vpop.f32.mrf.mxu2  ;;  %v3253_v60 = vpop.f32.mrf.mxu0  ;;  %v1384_v17 = vld [vmem:[#allocation7 + $0x11d8] sm:$0xff]  ;;  %v3124_v61 = vadd.f32 %v8421_v15, %v3059_v62  ;;  %v10514_v15 = vld [vmem:[#allocation70_spill] sm:$0xff]  ;;  %v10515_v62 = vld [vmem:[#allocation71_spill] sm:$0xff] }
 0x4da   :  { %v8581_v16 = vadd.f32 %v3377_v12, %v3313_v18  ;;  %v3318_v63 = vpop.f32.mrf.mxu1  ;;  %3737 = vmatpush.msra.mxu0 %v1384_v17  ;;  %v1035_v17 = vld [vmem:[#allocation7 + $0x6f0] sm:$0xff] }
 0x4db   :  { %v3251_v22 = vadd.f32 %v3250_v27, %v3186_v43  ;;  %v2997_v27 = vadd.f32 %v8409_v25, %v8459_v6  ;;  %v818_v25 = vld [vmem:[#allocation7 + $0x28] sm:$0xff]  ;;  %3918 = vmatpush.msrb.mxu3 %v1035_v17  ;;  %v1028_v17 = vld [vmem:[#allocation7 + $0x6b8] sm:$0xff] }
 0x4dc   :  { %10506 = vst [vmem:[#allocation52_spill] sm:$0xff] %v8581_v16  ;;  %3512 = vmatmul.f32.gmra.mxu0 %v10507_v28  ;;  %v1377_v16 = vld [vmem:[#allocation7 + $0x11a0] sm:$0xff]  ;;  %3868 = vmatpush.msra.mxu2 %v818_v25  ;;  %v10522_v25 = vld [vmem:[#allocation76_spill] sm:$0xff] }
 0x4dd   :  { %3447 = vmatmul.f32.gmra.mxu3 %v10509_v56  ;;  %3577 = vmatmul.f32.gmra.mxu1 %v10510_v3  ;;  %v3316_v53 = vadd.f32 %v3315_v10, %v3251_v22  ;;  %v10513_v22 = vld [vmem:[#allocation69_spill] sm:$0xff]  ;;  %v3062_v28 = vadd.f32 %v8411_v50, %v2997_v27  ;;  %v1210_v3 = vld [vmem:[#allocation7 + $0xc68] sm:$0xff] }
 0x4de   :  { %3639 = vmatmul.f32.gmra.mxu2 %v10511_v33  ;;  %3738 = vmatpush.msra.mxu0 %v1377_v16  ;;  %v10519_v16 = vld [vmem:[#allocation173_spill] sm:$0xff]  ;;  %v1203_v33 = vld [vmem:[#allocation7 + $0xc30] sm:$0xff] }
 0x4df   :  { %3919 = vmatpush.msrb.mxu3 %v1028_v17  ;;  %v10528_v17 = vld [vmem:[#allocation79_spill] sm:$0xff] }
 0x4e0   :  { %v3188_v18 = vpop.f32.mrf.mxu3 }
 0x4e1   :  { %v3189_v7 = vadd.f32 %v3188_v18, %v3124_v61  ;;  %v3380_v31 = vpop.f32.mrf.mxu2  ;;  %v3256_v36 = vpop.f32.mrf.mxu0  ;;  %v3000_v61 = vadd.f32 %v8423_v54, %v8459_v6  ;;  %v1371_v54 = vld [vmem:[#allocation7 + $0x1170] sm:$0xff] }
 0x4e2   :  { %v8591_v43 = vadd.f32 %v3380_v31, %v3316_v53  ;;  %v3321_v10 = vpop.f32.mrf.mxu1  ;;  %v3127_v53 = vadd.f32 %v8435_v46, %v3062_v28  ;;  %v10521_v46 = vld [vmem:[#allocation75_spill] sm:$0xff]  ;;  %4113 = vmatpush.msrb.mxu2 %v1371_v54 }
 0x4e3   :  { %v3254_v12 = vadd.f32 %v3253_v60, %v3189_v7 }
 0x4e4   :  { %10512 = vst [vmem:[#allocation163_spill] sm:$0xff] %v8591_v43  ;;  %3515 = vmatmul.f32.gmra.mxu0 %v10513_v22  ;;  %v3065_v43 = vadd.f32 %v10519_v16, %v3000_v61  ;;  %v10520_v22 = vld [vmem:[#allocation74_spill] sm:$0xff] }
 0x4e5   :  { %3450 = vmatmul.f32.gmra.mxu3 %v10514_v15  ;;  %3580 = vmatmul.f32.gmra.mxu1 %v10515_v62  ;;  %v3319_v13 = vadd.f32 %v3318_v63, %v3254_v12  ;;  %v10518_v12 = vld [vmem:[#allocation73_spill] sm:$0xff]  ;;  %v10534_v62 = vld [vmem:[#allocation179_spill] sm:$0xff] }
 0x4e6   :  { %3642 = vmatmul.f32.gmra.mxu2 %v10516_v35  ;;  %v1217_v35 = vld [vmem:[#allocation7 + $0xca0] sm:$0xff] }
 0x4e8   :  { %v3191_v60 = vpop.f32.mrf.mxu3 }
 0x4e9   :  { %v3192_v18 = vadd.f32 %v3191_v60, %v3127_v53  ;;  %v3383_v50 = vpop.f32.mrf.mxu2  ;;  %v3259_v27 = vpop.f32.mrf.mxu0  ;;  %v1147_v53 = vld [vmem:[#allocation7 + $0xa70] sm:$0xff]  ;;  %v3130_v60 = vadd.f32 %v8449_v59, %v3065_v43  ;;  %v10527_v43 = vld [vmem:[#allocation78_spill] sm:$0xff] }
 0x4ea   :  { %v8601_v7 = vadd.f32 %v3383_v50, %v3319_v13  ;;  %v3324_v31 = vpop.f32.mrf.mxu1  ;;  %3983 = vmatpush.msrb.mxu0 %v1147_v53  ;;  %v10529_v53 = vld [vmem:[#allocation80_spill] sm:$0xff] }
 0x4eb   :  { %v3257_v63 = vadd.f32 %v3256_v36, %v3192_v18  ;;  %v10523_v36 = vld [vmem:[#allocation175_spill] sm:$0xff] }
 0x4ec   :  { %10517 = vst [vmem:[#allocation165_spill] sm:$0xff] %v8601_v7  ;;  %3518 = vmatmul.f32.gmra.mxu0 %v10518_v12  ;;  %v3003_v18 = vadd.f32 %v10523_v36, %v8459_v6  ;;  %v1259_v12 = vld [vmem:[#allocation7 + $0xdf0] sm:$0xff]  ;;  %v1140_v36 = vld [vmem:[#allocation7 + $0xa38] sm:$0xff] }
 0x4ed   :  { %3453 = vmatmul.f32.gmra.mxu3 %v10520_v22  ;;  %3583 = vmatmul.f32.gmra.mxu1 %v10521_v46  ;;  %v3322_v28 = vadd.f32 %v3321_v10, %v3257_v63  ;;  %v10525_v46 = vld [vmem:[#allocation77_spill] sm:$0xff] }
 0x4ee   :  { %3645 = vmatmul.f32.gmra.mxu2 %v10522_v25  ;;  %4048 = vmatpush.msrb.mxu1 %v1259_v12  ;;  %v10526_v25 = vld [vmem:[#allocation176_spill] sm:$0xff]  ;;  %v10531_v12 = vld [vmem:[#allocation178_spill] sm:$0xff] }
 0x4ef   :  { %v3068_v59 = vadd.f32 %v10526_v25, %v3003_v18  ;;  %3984 = vmatpush.msrb.mxu0 %v1140_v36 }
 0x4f0   :  { %v3194_v13 = vpop.f32.mrf.mxu3 }
 0x4f1   :  { %v3195_v61 = vadd.f32 %v3194_v13, %v3130_v60  ;;  %v3386_v50 = vpop.f32.mrf.mxu2  ;;  %v3262_v16 = vpop.f32.mrf.mxu0  ;;  %v1021_v60 = vld [vmem:[#allocation7 + $0x680] sm:$0xff]  ;;  %v1364_v13 = vld [vmem:[#allocation7 + $0x1138] sm:$0xff] }
 0x4f2   :  { %v8611_v7 = vadd.f32 %v3386_v50, %v3322_v28  ;;  %v3327_v10 = vpop.f32.mrf.mxu1  ;;  %v10530_v28 = vld [vmem:[#allocation182_spill] sm:$0xff]  ;;  %3920 = vmatpush.msrb.mxu3 %v1021_v60  ;;  %4114 = vmatpush.msrb.mxu2 %v1364_v13  ;;  %v10535_v60 = vld [vmem:[#allocation81_spill] sm:$0xff]  ;;  %v10536_v13 = vld [vmem:[#allocation83_spill] sm:$0xff] }
 0x4f3   :  { %v3260_v63 = vadd.f32 %v3259_v27, %v3195_v61  ;;  %v3133_v50 = vadd.f32 %v10530_v28, %v3068_v59  ;;  %v3006_v61 = vadd.f32 %v10531_v12, %v8459_v6  ;;  %v10537_v28 = vld [vmem:[#allocation84_spill] sm:$0xff]  ;;  %v1014_v6 = vld [vmem:[#allocation7 + $0x648] sm:$0xff] }
 0x4f4   :  { %10524 = vst [vmem:[#allocation167_spill] sm:$0xff] %v8611_v7  ;;  %3521 = vmatmul.f32.gmra.mxu0 %v10525_v46  ;;  %3921 = vmatpush.msrb.mxu3 %v1014_v6 }
 0x4f5   :  { %3456 = vmatmul.f32.gmra.mxu3 %v10527_v43  ;;  %3586 = vmatmul.f32.gmra.mxu1 %v10528_v17  ;;  %v3325_v54 = vadd.f32 %v3324_v31, %v3260_v63  ;;  %v1252_v17 = vld [vmem:[#allocation7 + $0xdb8] sm:$0xff]  ;;  %v3071_v59 = vadd.f32 %v10534_v62, %v3006_v61 }
 0x4f6   :  { %3648 = vmatmul.f32.gmra.mxu2 %v10529_v53  ;;  %v10533_v53 = vld [vmem:[#allocation82_spill] sm:$0xff]  ;;  %4049 = vmatpush.msrb.mxu1 %v1252_v17 }
 0x4f8   :  { %v3197_v27 = vpop.f32.mrf.mxu3 }
 0x4f9   :  { %v3198_v25 = vadd.f32 %v3197_v27, %v3133_v50  ;;  %v3389_v18 = vpop.f32.mrf.mxu2  ;;  %v3265_v7 = vpop.f32.mrf.mxu0  ;;  %v1357_v50 = vld [vmem:[#allocation7 + $0x1100] sm:$0xff] }
 0x4fa   :  { %v8621_v46 = vadd.f32 %v3389_v18, %v3325_v54  ;;  %v3330_v31 = vpop.f32.mrf.mxu1  ;;  %v1133_v27 = vld [vmem:[#allocation7 + $0xa00] sm:$0xff]  ;;  %v3136_v54 = vadd.f32 %v8481_v21, %v3071_v59  ;;  %4115 = vmatpush.msrb.mxu2 %v1357_v50  ;;  %v10542_v59 = vld [vmem:[#allocation180_spill] sm:$0xff] }
 0x4fb   :  { %v3263_v63 = vadd.f32 %v3262_v16, %v3198_v25  ;;  %3985 = vmatpush.msrb.mxu0 %v1133_v27  ;;  %v8636_v6 = vperm.slane %v10542_v59, 4  ;;  %v10543_v50 = vld [vmem:[#allocation88_spill] sm:$0xff]  ;;  %v10545_v59 = vld [vmem:[#allocation22_spill] sm:$0xff] }
 0x4fc   :  { %10532 = vst [vmem:[#allocation169_spill] sm:$0xff] %v8621_v46  ;;  %3524 = vmatmul.f32.gmra.mxu0 %v10533_v53  ;;  %v1245_v46 = vld [vmem:[#allocation7 + $0xd80] sm:$0xff]  ;;  %v10541_v53 = vld [vmem:[#allocation87_spill] sm:$0xff] }
 0x4fd   :  { %3459 = vmatmul.f32.gmra.mxu3 %v10535_v60  ;;  %3589 = vmatmul.f32.gmra.mxu1 %v10536_v13  ;;  %v3328_v36 = vadd.f32 %v3327_v10, %v3263_v63  ;;  %v10539_v10 = vld [vmem:[#allocation85_spill] sm:$0xff]  ;;  %v10540_v63 = vld [vmem:[#allocation86_spill] sm:$0xff]  ;;  %v1007_v27 = vld [vmem:[#allocation7 + $0x610] sm:$0xff] }
 0x4fe   :  { %3651 = vmatmul.f32.gmra.mxu2 %v10537_v28  ;;  %4050 = vmatpush.msrb.mxu1 %v1245_v46  ;;  %v1231_v13 = vld [vmem:[#allocation7 + $0xd10] sm:$0xff]  ;;  %v1224_v28 = vld [vmem:[#allocation7 + $0xcd8] sm:$0xff] }
 0x4ff   :  { %3922 = vmatpush.msrb.mxu3 %v1007_v27 }
 0x500   :  { %v3200_v16 = vpop.f32.mrf.mxu3 }
 0x501   :  { %v3201_v12 = vadd.f32 %v3200_v16, %v3136_v54  ;;  %v3392_v17 = vpop.f32.mrf.mxu2  ;;  %v3480_v25 = vpop.f32.mrf.mxu0  ;;  %v1126_v54 = vld [vmem:[#allocation7 + $0x9c8] sm:$0xff] }
 0x502   :  { %v8629_v62 = vadd.f32 %v3392_v17, %v3328_v36  ;;  %v3545_v61 = vpop.f32.mrf.mxu1  ;;  %v1350_v36 = vld [vmem:[#allocation7 + $0x10c8] sm:$0xff]  ;;  %3986 = vmatpush.msrb.mxu0 %v1126_v54  ;;  %v1000_v54 = vld [vmem:[#allocation7 + $0x5d8] sm:$0xff] }
 0x503   :  { %v3266_v18 = vadd.f32 %v3265_v7, %v3201_v12  ;;  %4116 = vmatpush.msrb.mxu2 %v1350_v36  ;;  %v10548_v36 = vld [vmem:[#allocation20_spill] sm:$0xff]  ;;  %3923 = vmatpush.msrb.mxu3 %v1000_v54  ;;  %v993_v54 = vld [vmem:[#allocation7 + $0x5a0] sm:$0xff] }
 0x504   :  { %10538 = vst [vmem:[#allocation170_spill] sm:$0xff] %v8629_v62  ;;  %3739 = vmatmul.f32.vlgmr.msra.gmra.mxu0 %v10539_v10  ;;  %v10546_v10 = vld [vmem:[#allocation89_spill] sm:$0xff] }
 0x505   :  { %3674 = vmatmul.f32.vlgmr.msra.gmra.mxu3 %v10540_v63  ;;  %6055 = vmatmul.msk.f32.vlgmr.msra.gmra.mxu1 %vm1529_vm2, %v10541_v53  ;;  %v3331_v21 = vadd.f32 %v3330_v31, %v3266_v18  ;;  %v1238_v18 = vld [vmem:[#allocation7 + $0xd48] sm:$0xff] }
 0x506   :  { %3654 = vmatmul.f32.gmra.mxu2 %v10543_v50  ;;  %4051 = vmatpush.msrb.mxu1 %v1238_v18  ;;  %v10547_v53 = vld [vmem:[#allocation90_spill] sm:$0xff]  ;;  %v1343_v50 = vld [vmem:[#allocation7 + $0x1090] sm:$0xff] }
 0x507   :  { %4117 = vmatpush.msrb.mxu2 %v1343_v50  ;;  %3924 = vmatpush.msrb.mxu3 %v993_v54 }
 0x508   :  { %v3415_v7 = vpop.f32.mrf.mxu3  ;;  %4052 = vmatpush.msrb.mxu1 %v1231_v13 }
 0x509   :  { %v3395_v16 = vpop.f32.mrf.mxu2  ;;  %v3416_v46 = vadd.f32 %v3415_v7, %v8636_v6  ;;  %v3483_v12 = vpop.f32.mrf.mxu0  ;;  %v1119_v7 = vld [vmem:[#allocation7 + $0x990] sm:$0xff] }
 0x50a   :  { %v8640_v17 = vadd.f32 %v3395_v16, %v3331_v21  ;;  %v3548_v62 = vpop.f32.mrf.mxu1  ;;  %3987 = vmatpush.msrb.mxu0 %v1119_v7  ;;  %v1336_v7 = vld [vmem:[#allocation7 + $0x1058] sm:$0xff]  ;;  %4053 = vmatpush.msrb.mxu1 %v1224_v28 }
 0x50b   :  { %v3481_v31 = vadd.f32 %v3480_v25, %v3416_v46  ;;  %4118 = vmatpush.msrb.mxu2 %v1336_v7  ;;  %v986_v7 = vld [vmem:[#allocation7 + $0x568] sm:$0xff] }
 0x50c   :  { %10544 = vst [vmem:[#allocation173_spill] sm:$0xff] %v8640_v17  ;;  %3742 = vmatmul.f32.gmra.mxu0 %v10545_v59  ;;  %3925 = vmatpush.msrb.mxu3 %v986_v7 }
 0x50d   :  { %3677 = vmatmul.f32.gmra.mxu3 %v10546_v10  ;;  %6056 = vmatmul.msk.f32.gmra.mxu1 %vm1529_vm2, %v10547_v53  ;;  %v3546_v27 = vadd.f32 %v3545_v61, %v3481_v31  ;;  %v10549_v53 = vld [vmem:[#allocation91_spill] sm:$0xff]  ;;  %v10550_v61 = vld [vmem:[#allocation92_spill] sm:$0xff]  ;;  %v10551_v31 = vld [vmem:[#allocation93_spill] sm:$0xff] }
 0x50e   :  { %3869 = vmatmul.f32.vlgmr.msra.gmra.mxu2 %v10548_v36  ;;  %4054 = vmatpush.msrb.mxu1 %v1217_v35 }
 0x510   :  { %v3418_v21 = vpop.f32.mrf.mxu3  ;;  %4055 = vmatpush.msrb.mxu1 %v1210_v3 }
 0x511   :  { %v3419_v25 = vadd.f32 %v3418_v21, %v8636_v6  ;;  %v3610_v16 = vpop.f32.mrf.mxu2  ;;  %v3486_v46 = vpop.f32.mrf.mxu0  ;;  %v1112_v21 = vld [vmem:[#allocation7 + $0x958] sm:$0xff] }
 0x512   :  { %v8648_v18 = vadd.f32 %v3610_v16, %v3546_v27  ;;  %v3551_v17 = vpop.f32.mrf.mxu1  ;;  %3988 = vmatpush.msrb.mxu0 %v1112_v21  ;;  %v1329_v21 = vld [vmem:[#allocation7 + $0x1020] sm:$0xff]  ;;  %4056 = vmatpush.msrb.mxu1 %v1203_v33 }
 0x513   :  { %v3484_v59 = vadd.f32 %v3483_v12, %v3419_v25  ;;  %4119 = vmatpush.msrb.mxu2 %v1329_v21  ;;  %v979_v21 = vld [vmem:[#allocation7 + $0x530] sm:$0xff] }
 0x514   :  { %3745 = vmatmul.f32.gmra.mxu0 %v10549_v53  ;;  %3926 = vmatpush.msrb.mxu3 %v979_v21 }
 0x515   :  { %3680 = vmatmul.f32.gmra.mxu3 %v10550_v61  ;;  %6057 = vmatmul.msk.f32.gmra.mxu1 %vm1529_vm2, %v10551_v31  ;;  %v3549_v50 = vadd.f32 %v3548_v62, %v3484_v59  ;;  %v10552_v31 = vld [vmem:[#allocation94_spill] sm:$0xff]  ;;  %v10553_v62 = vld [vmem:[#allocation95_spill] sm:$0xff]  ;;  %v10554_v59 = vld [vmem:[#allocation96_spill] sm:$0xff] }
 0x516   :  { %3872 = vmatmul.f32.gmra.mxu2 %v10466_v41  ;;  %4057 = vmatpush.msrb.mxu1 %v1196_v26 }
 0x518   :  { %v3421_v27 = vpop.f32.mrf.mxu3 }
 0x519   :  { %v3422_v12 = vadd.f32 %v3421_v27, %v8636_v6  ;;  %v3613_v25 = vpop.f32.mrf.mxu2  ;;  %v3489_v16 = vpop.f32.mrf.mxu0  ;;  %v1105_v27 = vld [vmem:[#allocation7 + $0x920] sm:$0xff] }
 0x51a   :  { %v8656_v13 = vadd.f32 %v3613_v25, %v3549_v50  ;;  %v3554_v53 = vpop.f32.mrf.mxu1  ;;  %3989 = vmatpush.msrb.mxu0 %v1105_v27  ;;  %v1322_v27 = vld [vmem:[#allocation7 + $0xfe8] sm:$0xff] }
 0x51b   :  { %v3487_v36 = vadd.f32 %v3486_v46, %v3422_v12  ;;  %4120 = vmatpush.msrb.mxu2 %v1322_v27  ;;  %v972_v27 = vld [vmem:[#allocation7 + $0x4f8] sm:$0xff] }
 0x51c   :  { %3748 = vmatmul.f32.gmra.mxu0 %v10552_v31  ;;  %3927 = vmatpush.msrb.mxu3 %v972_v27 }
 0x51d   :  { %3683 = vmatmul.f32.gmra.mxu3 %v10553_v62  ;;  %6058 = vmatmul.msk.f32.gmra.mxu1 %vm1529_vm2, %v10554_v59  ;;  %v3552_v54 = vadd.f32 %v3551_v17, %v3487_v36  ;;  %v10555_v59 = vld [vmem:[#allocation97_spill] sm:$0xff]  ;;  %v10556_v17 = vld [vmem:[#allocation98_spill] sm:$0xff]  ;;  %v10557_v36 = vld [vmem:[#allocation99_spill] sm:$0xff] }
 0x51e   :  { %3875 = vmatmul.f32.gmra.mxu2 %v10340_v55 }
 0x520   :  { %v3424_v50 = vpop.f32.mrf.mxu3 }
 0x521   :  { %v3425_v46 = vadd.f32 %v3424_v50, %v8636_v6  ;;  %v3616_v12 = vpop.f32.mrf.mxu2  ;;  %v3492_v25 = vpop.f32.mrf.mxu0  ;;  %v1098_v50 = vld [vmem:[#allocation7 + $0x8e8] sm:$0xff] }
 0x522   :  { %v8664_v28 = vadd.f32 %v3616_v12, %v3552_v54  ;;  %v3557_v31 = vpop.f32.mrf.mxu1  ;;  %3990 = vmatpush.msrb.mxu0 %v1098_v50  ;;  %v1315_v50 = vld [vmem:[#allocation7 + $0xfb0] sm:$0xff] }
 0x523   :  { %v3490_v41 = vadd.f32 %v3489_v16, %v3425_v46  ;;  %4121 = vmatpush.msrb.mxu2 %v1315_v50  ;;  %v965_v50 = vld [vmem:[#allocation7 + $0x4c0] sm:$0xff] }
 0x524   :  { %3751 = vmatmul.f32.gmra.mxu0 %v10555_v59  ;;  %3928 = vmatpush.msrb.mxu3 %v965_v50 }
 0x525   :  { %3686 = vmatmul.f32.gmra.mxu3 %v10556_v17  ;;  %6059 = vmatmul.msk.f32.gmra.mxu1 %vm1529_vm2, %v10557_v36  ;;  %v3555_v7 = vadd.f32 %v3554_v53, %v3490_v41  ;;  %v10558_v36 = vld [vmem:[#allocation39_spill] sm:$0xff]  ;;  %v10559_v41 = vld [vmem:[#allocation100_spill] sm:$0xff]  ;;  %v10560_v53 = vld [vmem:[#allocation101_spill] sm:$0xff] }
 0x526   :  { %3878 = vmatmul.f32.gmra.mxu2 %v10469_v23 }
 0x528   :  { %v3427_v54 = vpop.f32.mrf.mxu3 }
 0x529   :  { %v3428_v16 = vadd.f32 %v3427_v54, %v8636_v6  ;;  %v3619_v46 = vpop.f32.mrf.mxu2  ;;  %v3495_v12 = vpop.f32.mrf.mxu0  ;;  %v1091_v54 = vld [vmem:[#allocation7 + $0x8b0] sm:$0xff] }
 0x52a   :  { %v8672_v35 = vadd.f32 %v3619_v46, %v3555_v7  ;;  %v3560_v59 = vpop.f32.mrf.mxu1  ;;  %3991 = vmatpush.msrb.mxu0 %v1091_v54  ;;  %v1308_v54 = vld [vmem:[#allocation7 + $0xf78] sm:$0xff] }
 0x52b   :  { %v3493_v55 = vadd.f32 %v3492_v25, %v3428_v16  ;;  %4122 = vmatpush.msrb.mxu2 %v1308_v54  ;;  %v958_v54 = vld [vmem:[#allocation7 + $0x488] sm:$0xff] }
 0x52c   :  { %3754 = vmatmul.f32.gmra.mxu0 %v10558_v36  ;;  %3929 = vmatpush.msrb.mxu3 %v958_v54 }
 0x52d   :  { %3689 = vmatmul.f32.gmra.mxu3 %v10559_v41  ;;  %6060 = vmatmul.msk.f32.gmra.mxu1 %vm1529_vm2, %v10560_v53  ;;  %v3558_v21 = vadd.f32 %v3557_v31, %v3493_v55  ;;  %v10561_v53 = vld [vmem:[#allocation102_spill] sm:$0xff]  ;;  %v10562_v55 = vld [vmem:[#allocation103_spill] sm:$0xff]  ;;  %v10563_v31 = vld [vmem:[#allocation104_spill] sm:$0xff] }
 0x52e   :  { %3881 = vmatmul.f32.gmra.mxu2 %v10471_v42 }
 0x530   :  { %v3430_v7 = vpop.f32.mrf.mxu3 }
 0x531   :  { %v3431_v25 = vadd.f32 %v3430_v7, %v8636_v6  ;;  %v3622_v16 = vpop.f32.mrf.mxu2  ;;  %v3498_v46 = vpop.f32.mrf.mxu0  ;;  %v1084_v7 = vld [vmem:[#allocation7 + $0x878] sm:$0xff] }
 0x532   :  { %v8680_v3 = vadd.f32 %v3622_v16, %v3558_v21  ;;  %v3563_v36 = vpop.f32.mrf.mxu1  ;;  %3992 = vmatpush.msrb.mxu0 %v1084_v7  ;;  %v1301_v7 = vld [vmem:[#allocation7 + $0xf40] sm:$0xff] }
 0x533   :  { %v3496_v23 = vadd.f32 %v3495_v12, %v3431_v25  ;;  %4123 = vmatpush.msrb.mxu2 %v1301_v7  ;;  %v951_v7 = vld [vmem:[#allocation7 + $0x450] sm:$0xff] }
 0x534   :  { %3757 = vmatmul.f32.gmra.mxu0 %v10561_v53  ;;  %3930 = vmatpush.msrb.mxu3 %v951_v7 }
 0x535   :  { %3692 = vmatmul.f32.gmra.mxu3 %v10562_v55  ;;  %6061 = vmatmul.msk.f32.gmra.mxu1 %vm1529_vm2, %v10563_v31  ;;  %v3561_v27 = vadd.f32 %v3560_v59, %v3496_v23  ;;  %v10564_v31 = vld [vmem:[#allocation105_spill] sm:$0xff]  ;;  %v10565_v23 = vld [vmem:[#allocation106_spill] sm:$0xff]  ;;  %v10566_v59 = vld [vmem:[#allocation107_spill] sm:$0xff] }
 0x536   :  { %3884 = vmatmul.f32.gmra.mxu2 %v10474_v47 }
 0x538   :  { %v3433_v21 = vpop.f32.mrf.mxu3 }
 0x539   :  { %v3434_v12 = vadd.f32 %v3433_v21, %v8636_v6  ;;  %v3625_v25 = vpop.f32.mrf.mxu2  ;;  %v3501_v16 = vpop.f32.mrf.mxu0  ;;  %v1077_v21 = vld [vmem:[#allocation7 + $0x840] sm:$0xff] }
 0x53a   :  { %v8688_v33 = vadd.f32 %v3625_v25, %v3561_v27  ;;  %v3566_v53 = vpop.f32.mrf.mxu1  ;;  %3993 = vmatpush.msrb.mxu0 %v1077_v21  ;;  %v1294_v21 = vld [vmem:[#allocation7 + $0xf08] sm:$0xff] }
 0x53b   :  { %v3499_v42 = vadd.f32 %v3498_v46, %v3434_v12  ;;  %4124 = vmatpush.msrb.mxu2 %v1294_v21  ;;  %v944_v21 = vld [vmem:[#allocation7 + $0x418] sm:$0xff] }
 0x53c   :  { %3760 = vmatmul.f32.gmra.mxu0 %v10564_v31  ;;  %3931 = vmatpush.msrb.mxu3 %v944_v21 }
 0x53d   :  { %3695 = vmatmul.f32.gmra.mxu3 %v10565_v23  ;;  %6062 = vmatmul.msk.f32.gmra.mxu1 %vm1529_vm2, %v10566_v59  ;;  %v3564_v50 = vadd.f32 %v3563_v36, %v3499_v42  ;;  %v1189_v23 = vld [vmem:[#allocation7 + $0xbc0] sm:$0xff]  ;;  %v10567_v59 = vld [vmem:[#allocation108_spill] sm:$0xff] }
 0x53e   :  { %3887 = vmatmul.f32.gmra.mxu2 %v10478_v44  ;;  %4058 = vmatpush.msrb.mxu1 %v1189_v23  ;;  %v10568_v42 = vld [vmem:[#allocation109_spill] sm:$0xff]  ;;  %v10569_v36 = vld [vmem:[#allocation110_spill] sm:$0xff] }
 0x540   :  { %v3436_v27 = vpop.f32.mrf.mxu3 }
 0x541   :  { %v3437_v46 = vadd.f32 %v3436_v27, %v8636_v6  ;;  %v3628_v12 = vpop.f32.mrf.mxu2  ;;  %v3504_v25 = vpop.f32.mrf.mxu0  ;;  %v1070_v27 = vld [vmem:[#allocation7 + $0x808] sm:$0xff] }
 0x542   :  { %v8696_v26 = vadd.f32 %v3628_v12, %v3564_v50  ;;  %v3569_v31 = vpop.f32.mrf.mxu1  ;;  %3994 = vmatpush.msrb.mxu0 %v1070_v27  ;;  %v1287_v27 = vld [vmem:[#allocation7 + $0xed0] sm:$0xff] }
 0x543   :  { %v3502_v47 = vadd.f32 %v3501_v16, %v3437_v46  ;;  %4125 = vmatpush.msrb.mxu2 %v1287_v27  ;;  %v937_v27 = vld [vmem:[#allocation7 + $0x3e0] sm:$0xff] }
 0x544   :  { %3763 = vmatmul.f32.gmra.mxu0 %v10567_v59  ;;  %3932 = vmatpush.msrb.mxu3 %v937_v27 }
 0x545   :  { %3698 = vmatmul.f32.gmra.mxu3 %v10568_v42  ;;  %6063 = vmatmul.msk.f32.gmra.mxu1 %vm1529_vm2, %v10569_v36  ;;  %v3567_v54 = vadd.f32 %v3566_v53, %v3502_v47  ;;  %v1182_v42 = vld [vmem:[#allocation7 + $0xb88] sm:$0xff]  ;;  %v10570_v36 = vld [vmem:[#allocation56_spill] sm:$0xff] }
 0x546   :  { %3890 = vmatmul.f32.gmra.mxu2 %v10484_v8  ;;  %4059 = vmatpush.msrb.mxu1 %v1182_v42  ;;  %v10571_v47 = vld [vmem:[#allocation111_spill] sm:$0xff]  ;;  %v10572_v53 = vld [vmem:[#allocation112_spill] sm:$0xff] }
 0x548   :  { %v3439_v50 = vpop.f32.mrf.mxu3 }
 0x549   :  { %v3440_v16 = vadd.f32 %v3439_v50, %v8636_v6  ;;  %v3631_v46 = vpop.f32.mrf.mxu2  ;;  %v3507_v12 = vpop.f32.mrf.mxu0  ;;  %v1063_v50 = vld [vmem:[#allocation7 + $0x7d0] sm:$0xff] }
 0x54a   :  { %v8704_v23 = vadd.f32 %v3631_v46, %v3567_v54  ;;  %v3572_v59 = vpop.f32.mrf.mxu1  ;;  %3995 = vmatpush.msrb.mxu0 %v1063_v50  ;;  %v1280_v50 = vld [vmem:[#allocation7 + $0xe98] sm:$0xff] }
 0x54b   :  { %v3505_v44 = vadd.f32 %v3504_v25, %v3440_v16  ;;  %4126 = vmatpush.msrb.mxu2 %v1280_v50  ;;  %v930_v50 = vld [vmem:[#allocation7 + $0x3a8] sm:$0xff] }
 0x54c   :  { %3766 = vmatmul.f32.gmra.mxu0 %v10570_v36  ;;  %3933 = vmatpush.msrb.mxu3 %v930_v50  ;;  %v10582_v50 = vld [vmem:[#allocation121_spill] sm:$0xff] }
 0x54d   :  { %3701 = vmatmul.f32.gmra.mxu3 %v10571_v47  ;;  %6064 = vmatmul.msk.f32.gmra.mxu1 %vm1529_vm2, %v10572_v53  ;;  %v3570_v7 = vadd.f32 %v3569_v31, %v3505_v44  ;;  %v1175_v47 = vld [vmem:[#allocation7 + $0xb50] sm:$0xff]  ;;  %v10573_v53 = vld [vmem:[#allocation113_spill] sm:$0xff]  ;;  %v10574_v44 = vld [vmem:[#allocation114_spill] sm:$0xff] }
 0x54e   :  { %3893 = vmatmul.f32.gmra.mxu2 %v10490_v39  ;;  %4060 = vmatpush.msrb.mxu1 %v1175_v47  ;;  %v10575_v31 = vld [vmem:[#allocation115_spill] sm:$0xff] }
 0x550   :  { %v3442_v54 = vpop.f32.mrf.mxu3 }
 0x551   :  { %v3443_v25 = vadd.f32 %v3442_v54, %v8636_v6  ;;  %v3634_v16 = vpop.f32.mrf.mxu2  ;;  %v3510_v46 = vpop.f32.mrf.mxu0  ;;  %v1056_v54 = vld [vmem:[#allocation7 + $0x798] sm:$0xff] }
 0x552   :  { %v8712_v42 = vadd.f32 %v3634_v16, %v3570_v7  ;;  %v3575_v36 = vpop.f32.mrf.mxu1  ;;  %3996 = vmatpush.msrb.mxu0 %v1056_v54  ;;  %v1273_v54 = vld [vmem:[#allocation7 + $0xe60] sm:$0xff] }
 0x553   :  { %v3508_v8 = vadd.f32 %v3507_v12, %v3443_v25  ;;  %4127 = vmatpush.msrb.mxu2 %v1273_v54 }
 0x554   :  { %3769 = vmatmul.f32.gmra.mxu0 %v10573_v53 }
 0x555   :  { %3704 = vmatmul.f32.gmra.mxu3 %v10574_v44  ;;  %6065 = vmatmul.msk.f32.gmra.mxu1 %vm1529_vm2, %v10575_v31  ;;  %v3573_v21 = vadd.f32 %v3572_v59, %v3508_v8  ;;  %v1168_v44 = vld [vmem:[#allocation7 + $0xb18] sm:$0xff]  ;;  %v10578_v59 = vld [vmem:[#allocation118_spill] sm:$0xff] }
 0x556   :  { %3896 = vmatmul.f32.gmra.mxu2 %v10496_v48  ;;  %v10576_v31 = vld [vmem:[#allocation116_spill] sm:$0xff]  ;;  %4061 = vmatpush.msrb.mxu1 %v1168_v44  ;;  %v10577_v8 = vld [vmem:[#allocation117_spill] sm:$0xff] }
 0x557   :  { %v1161_v48 = vld [vmem:[#allocation7 + $0xae0] sm:$0xff] }
 0x558   :  { %v3445_v7 = vpop.f32.mrf.mxu3  ;;  %4062 = vmatpush.msrb.mxu1 %v1161_v48 }
 0x559   :  { %v3446_v12 = vadd.f32 %v3445_v7, %v8636_v6  ;;  %v3637_v25 = vpop.f32.mrf.mxu2  ;;  %v3513_v16 = vpop.f32.mrf.mxu0  ;;  %v1049_v7 = vld [vmem:[#allocation7 + $0x760] sm:$0xff] }
 0x55a   :  { %v8720_v47 = vadd.f32 %v3637_v25, %v3573_v21  ;;  %v3578_v53 = vpop.f32.mrf.mxu1  ;;  %3997 = vmatpush.msrb.mxu0 %v1049_v7  ;;  %v1266_v7 = vld [vmem:[#allocation7 + $0xe28] sm:$0xff] }
 0x55b   :  { %v3511_v39 = vadd.f32 %v3510_v46, %v3446_v12  ;;  %4128 = vmatpush.msrb.mxu2 %v1266_v7  ;;  %v1036_v7 = vld [vmem:[#allocation7 + $0x6f8] sm:$0xff] }
 0x55c   :  { %3772 = vmatmul.f32.gmra.mxu0 %v10576_v31 }
 0x55d   :  { %3707 = vmatmul.f32.gmra.mxu3 %v10577_v8  ;;  %6066 = vmatmul.msk.f32.gmra.mxu1 %vm1529_vm2, %v10578_v59  ;;  %v3576_v27 = vadd.f32 %v3575_v36, %v3511_v39  ;;  %v1042_v39 = vld [vmem:[#allocation7 + $0x728] sm:$0xff] }
 0x55e   :  { %3899 = vmatmul.f32.gmra.mxu2 %v10502_v1  ;;  %v10580_v36 = vld [vmem:[#allocation119_spill] sm:$0xff]  ;;  %v10581_v1 = vld [vmem:[#allocation120_spill] sm:$0xff]  ;;  %3998 = vmatpush.msrb.mxu0 %v1042_v39 }
 0x55f   :  { %v1154_v59 = vld [vmem:[#allocation7 + $0xaa8] sm:$0xff]  ;;  %4373 = vmatpush.msra.mxu2 %v1036_v7  ;;  %v1469_v7 = vld [vmem:[#allocation7 + $0x1480] sm:$0xff] }
 0x560   :  { %v3448_v21 = vpop.f32.mrf.mxu3  ;;  %4063 = vmatpush.msrb.mxu1 %v1154_v59  ;;  %v1476_v59 = vld [vmem:[#allocation7 + $0x14b8] sm:$0xff] }
 0x561   :  { %v3449_v46 = vadd.f32 %v3448_v21, %v8636_v6  ;;  %v3640_v12 = vpop.f32.mrf.mxu2  ;;  %v3516_v25 = vpop.f32.mrf.mxu0 }
 0x562   :  { %v8728_v44 = vadd.f32 %v3640_v12, %v3576_v27  ;;  %v3581_v31 = vpop.f32.mrf.mxu1  ;;  %v1483_v27 = vld [vmem:[#allocation7 + $0x14f0] sm:$0xff] }
 0x563   :  { %v3514_v8 = vadd.f32 %v3513_v16, %v3449_v46  ;;  %4178 = vmatpush.msra.mxu3 %v1483_v27  ;;  %v1511_v27 = vld [vmem:[#allocation7 + $0x15d0] sm:$0xff] }
 0x564   :  { %10579 = vst [vmem:[#allocation175_spill] sm:$0xff] %v8728_v44  ;;  %3775 = vmatmul.f32.gmra.mxu0 %v10580_v36  ;;  %v10583_v44 = vld [vmem:[#allocation122_spill] sm:$0xff] }
 0x565   :  { %3710 = vmatmul.f32.gmra.mxu3 %v10581_v1  ;;  %6067 = vmatmul.msk.f32.gmra.mxu1 %vm1529_vm2, %v10582_v50  ;;  %v3579_v54 = vadd.f32 %v3578_v53, %v3514_v8  ;;  %v10584_v53 = vld [vmem:[#allocation123_spill] sm:$0xff]  ;;  %v10585_v8 = vld [vmem:[#allocation124_spill] sm:$0xff] }
 0x566   :  { %3902 = vmatmul.f32.gmra.mxu2 %v10509_v56  ;;  %4179 = vmatpush.msra.mxu3 %v1476_v59  ;;  %v924_v56 = vld [vmem:[#allocation7 + $0x378] sm:$0xff] }
 0x567   :  { %4255 = vmatpush.msra.mxu0 %v1511_v27  ;;  %4308 = vmatpush.msra.mxu1 %v924_v56 }
 0x568   :  { %v3451_v21 = vpop.f32.mrf.mxu3  ;;  %4180 = vmatpush.msra.mxu3 %v1469_v7 }
 0x569   :  { %v3452_v48 = vadd.f32 %v3451_v21, %v8636_v6  ;;  %v3643_v16 = vpop.f32.mrf.mxu2  ;;  %v3519_v46 = vpop.f32.mrf.mxu0 }
 0x56a   :  { %v8736_v12 = vadd.f32 %v3643_v16, %v3579_v54  ;;  %v3584_v36 = vpop.f32.mrf.mxu1 }
 0x56b   :  { %v3517_v1 = vadd.f32 %v3516_v25, %v3452_v48 }
 0x56c   :  { %3778 = vmatmul.f32.gmra.mxu0 %v10583_v44 }
 0x56d   :  { %3713 = vmatmul.f32.gmra.mxu3 %v10584_v53  ;;  %6068 = vmatmul.msk.f32.gmra.mxu1 %vm1529_vm2, %v10585_v8  ;;  %v3582_v39 = vadd.f32 %v3581_v31, %v3517_v1  ;;  %v10586_v8 = vld [vmem:[#allocation125_spill] sm:$0xff]  ;;  %v10587_v1 = vld [vmem:[#allocation126_spill] sm:$0xff]  ;;  %v10588_v31 = vld [vmem:[#allocation127_spill] sm:$0xff] }
 0x56e   :  { %3905 = vmatmul.f32.gmra.mxu2 %v10514_v15  ;;  %v917_v15 = vld [vmem:[#allocation7 + $0x340] sm:$0xff] }
 0x56f   :  { %4309 = vmatpush.msra.mxu1 %v917_v15 }
 0x570   :  { %v3454_v21 = vpop.f32.mrf.mxu3 }
 0x571   :  { %v3455_v54 = vadd.f32 %v3454_v21, %v8636_v6  ;;  %v3646_v16 = vpop.f32.mrf.mxu2  ;;  %v3522_v25 = vpop.f32.mrf.mxu0  ;;  %v1029_v21 = vld [vmem:[#allocation7 + $0x6c0] sm:$0xff] }
 0x572   :  { %v8744_v48 = vadd.f32 %v3646_v16, %v3582_v39  ;;  %v3587_v44 = vpop.f32.mrf.mxu1  ;;  %4374 = vmatpush.msra.mxu2 %v1029_v21  ;;  %v1462_v21 = vld [vmem:[#allocation7 + $0x1448] sm:$0xff] }
 0x573   :  { %v3520_v50 = vadd.f32 %v3519_v46, %v3455_v54  ;;  %4181 = vmatpush.msra.mxu3 %v1462_v21  ;;  %v1455_v21 = vld [vmem:[#allocation7 + $0x1410] sm:$0xff] }
 0x574   :  { %3781 = vmatmul.f32.gmra.mxu0 %v10586_v8 }
 0x575   :  { %3716 = vmatmul.f32.gmra.mxu3 %v10587_v1  ;;  %6069 = vmatmul.msk.f32.gmra.mxu1 %vm1529_vm2, %v10588_v31  ;;  %v3585_v59 = vadd.f32 %v3584_v36, %v3520_v50  ;;  %v10589_v1 = vld [vmem:[#allocation128_spill] sm:$0xff]  ;;  %v10590_v36 = vld [vmem:[#allocation129_spill] sm:$0xff]  ;;  %v10591_v50 = vld [vmem:[#allocation130_spill] sm:$0xff] }
 0x576   :  { %3908 = vmatmul.f32.gmra.mxu2 %v10520_v22  ;;  %v910_v22 = vld [vmem:[#allocation7 + $0x308] sm:$0xff]  ;;  %4182 = vmatpush.msra.mxu3 %v1455_v21  ;;  %v1448_v21 = vld [vmem:[#allocation7 + $0x13d8] sm:$0xff] }
 0x577   :  { %4310 = vmatpush.msra.mxu1 %v910_v22 }
 0x578   :  { %v3457_v39 = vpop.f32.mrf.mxu3  ;;  %4183 = vmatpush.msra.mxu3 %v1448_v21  ;;  %v1441_v21 = vld [vmem:[#allocation7 + $0x13a0] sm:$0xff] }
 0x579   :  { %v3458_v27 = vadd.f32 %v3457_v39, %v8636_v6  ;;  %v3649_v46 = vpop.f32.mrf.mxu2  ;;  %v3525_v54 = vpop.f32.mrf.mxu0  ;;  %v1022_v39 = vld [vmem:[#allocation7 + $0x688] sm:$0xff] }
 0x57a   :  { %v8752_v16 = vadd.f32 %v3649_v46, %v3585_v59  ;;  %v3590_v56 = vpop.f32.mrf.mxu1  ;;  %4375 = vmatpush.msra.mxu2 %v1022_v39  ;;  %v1015_v39 = vld [vmem:[#allocation7 + $0x650] sm:$0xff]  ;;  %4184 = vmatpush.msra.mxu3 %v1441_v21  ;;  %v994_v21 = vld [vmem:[#allocation7 + $0x5a8] sm:$0xff] }
 0x57b   :  { %v3523_v8 = vadd.f32 %v3522_v25, %v3458_v27 }
 0x57c   :  { %3784 = vmatmul.f32.gmra.mxu0 %v10589_v1  ;;  %4376 = vmatpush.msra.mxu2 %v1015_v39  ;;  %v1008_v39 = vld [vmem:[#allocation7 + $0x618] sm:$0xff] }
 0x57d   :  { %3719 = vmatmul.f32.gmra.mxu3 %v10590_v36  ;;  %6070 = vmatmul.msk.f32.gmra.mxu1 %vm1529_vm2, %v10591_v50  ;;  %v3588_v7 = vadd.f32 %v3587_v44, %v3523_v8  ;;  %v10592_v36 = vld [vmem:[#allocation21_spill] sm:$0xff]  ;;  %v10593_v44 = vld [vmem:[#allocation19_spill] sm:$0xff] }
 0x57e   :  { %3911 = vmatmul.f32.gmra.mxu2 %v10527_v43 }
 0x57f   :  { %4377 = vmatpush.msra.mxu2 %v1008_v39  ;;  %v1001_v39 = vld [vmem:[#allocation7 + $0x5e0] sm:$0xff] }
 0x580   :  { %v3460_v59 = vpop.f32.mrf.mxu3 }
 0x581   :  { %v3461_v46 = vadd.f32 %v3460_v59, %v8636_v6  ;;  %v3652_v25 = vpop.f32.mrf.mxu2  ;;  %v3740_v27 = vpop.f32.mrf.mxu0  ;;  %4378 = vmatpush.msra.mxu2 %v1001_v39 }
 0x582   :  { %v8760_v31 = vadd.f32 %v3652_v25, %v3588_v7  ;;  %v3805_v15 = vpop.f32.mrf.mxu1 }
 0x583   :  { %v3526_v1 = vadd.f32 %v3525_v54, %v3461_v46  ;;  %4379 = vmatpush.msra.mxu2 %v994_v21 }
 0x584   :  { %3999 = vmatmul.f32.vlgmr.msrb.gmra.mxu0 %v10592_v36  ;;  %v903_v36 = vld [vmem:[#allocation7 + $0x2d0] sm:$0xff] }
 0x585   :  { %3934 = vmatmul.f32.vlgmr.msrb.gmra.mxu3 %v10593_v44  ;;  %4064 = vmatmul.f32.vlgmr.msrb.gmra.mxu1 %v10383_v2  ;;  %v3591_v8 = vadd.f32 %v3590_v56, %v3526_v1  ;;  %v10595_v56 = vld [vmem:[#allocation23_spill] sm:$0xff] }
 0x586   :  { %3914 = vmatmul.f32.gmra.mxu2 %v10535_v60  ;;  %4311 = vmatpush.msra.mxu1 %v903_v36 }
 0x588   :  { %v3675_v6 = vpop.f32.mrf.mxu3 }
 0x589   :  { %v3655_v7 = vpop.f32.mrf.mxu2  ;;  %v3676_v59 = vadd.f32 %v3675_v6, %v8648_v18  ;;  %v3743_v54 = vpop.f32.mrf.mxu0  ;;  %v1504_v18 = vld [vmem:[#allocation7 + $0x1598] sm:$0xff] }
 0x58a   :  { %v8767_v46 = vadd.f32 %v3655_v7, %v3591_v8  ;;  %v3808_v25 = vpop.f32.mrf.mxu1  ;;  %4256 = vmatpush.msra.mxu0 %v1504_v18 }
 0x58b   :  { %v3741_v22 = vadd.f32 %v3740_v27, %v3676_v59  ;;  %v896_v59 = vld [vmem:[#allocation7 + $0x298] sm:$0xff] }
 0x58c   :  { %4002 = vmatmul.f32.gmra.mxu0 %v10274_v40  ;;  %4312 = vmatpush.msra.mxu1 %v896_v59 }
 0x58d   :  { %v8770_v1 = vadd.f32 %v3805_v15, %v3741_v22  ;;  %3937 = vmatmul.f32.gmra.mxu3 %v10595_v56  ;;  %4067 = vmatmul.f32.gmra.mxu1 %v10388_v52 }
 0x58e   :  { %4129 = vmatmul.f32.vlgmr.msrb.gmra.mxu2 %v10540_v63 }
 0x58f   :  { %10594 = vst [vmem:[#allocation176_spill] sm:$0xff] %v8770_v1  ;;  %v889_v1 = vld [vmem:[#allocation7 + $0x260] sm:$0xff] }
 0x590   :  { %v3678_v8 = vpop.f32.mrf.mxu3  ;;  %4313 = vmatpush.msra.mxu1 %v889_v1 }
 0x591   :  { %v3679_v27 = vadd.f32 %v3678_v8, %v8656_v13  ;;  %v8776_v6 = vpop.f32.mrf.mxu2  ;;  %v3746_v36 = vpop.f32.mrf.mxu0 }
 0x592   :  { %v3811_v15 = vpop.f32.mrf.mxu1 }
 0x593   :  { %v3744_v7 = vadd.f32 %v3743_v54, %v3679_v27 }
 0x594   :  { %4005 = vmatmul.f32.gmra.mxu0 %v10278_v32 }
 0x595   :  { %3940 = vmatmul.f32.gmra.mxu3 %v10179_v4  ;;  %4070 = vmatmul.f32.gmra.mxu1 %v10392_v51  ;;  %v8781_v22 = vadd.f32 %v3808_v25, %v3744_v7  ;;  %v1434_v7 = vld [vmem:[#allocation7 + $0x1368] sm:$0xff] }
 0x596   :  { %4132 = vmatmul.f32.gmra.mxu2 %v10546_v10  ;;  %4185 = vmatpush.msra.mxu3 %v1434_v7  ;;  %v987_v7 = vld [vmem:[#allocation7 + $0x570] sm:$0xff] }
 0x597   :  { %10596 = vst [vmem:[#allocation78_spill] sm:$0xff] %v8781_v22  ;;  %v882_v22 = vld [vmem:[#allocation7 + $0x228] sm:$0xff]  ;;  %4380 = vmatpush.msra.mxu2 %v987_v7 }
 0x598   :  { %v3681_v13 = vpop.f32.mrf.mxu3  ;;  %4314 = vmatpush.msra.mxu1 %v882_v22 }
 0x599   :  { %v3682_v18 = vadd.f32 %v3681_v13, %v8664_v28  ;;  %v8785_v54 = vpop.f32.mrf.mxu2  ;;  %v3749_v8 = vpop.f32.mrf.mxu0 }
 0x59a   :  { %v3814_v27 = vpop.f32.mrf.mxu1 }
 0x59b   :  { %v3747_v59 = vadd.f32 %v3746_v36, %v3682_v18 }
 0x59c   :  { %4008 = vmatmul.f32.gmra.mxu0 %v10282_v0 }
 0x59d   :  { %3943 = vmatmul.f32.gmra.mxu3 %v10184_v5  ;;  %4073 = vmatmul.f32.gmra.mxu1 %v10397_v9  ;;  %v8790_v25 = vadd.f32 %v3811_v15, %v3747_v59  ;;  %v1427_v59 = vld [vmem:[#allocation7 + $0x1330] sm:$0xff] }
 0x59e   :  { %4135 = vmatmul.f32.gmra.mxu2 %v10550_v61  ;;  %4186 = vmatpush.msra.mxu3 %v1427_v59  ;;  %v980_v59 = vld [vmem:[#allocation7 + $0x538] sm:$0xff] }
 0x59f   :  { %10597 = vst [vmem:[#allocation182_spill] sm:$0xff] %v8790_v25  ;;  %v875_v25 = vld [vmem:[#allocation7 + $0x1f0] sm:$0xff]  ;;  %4381 = vmatpush.msra.mxu2 %v980_v59 }
 0x5a0   :  { %v3684_v28 = vpop.f32.mrf.mxu3  ;;  %4315 = vmatpush.msra.mxu1 %v875_v25 }
 0x5a1   :  { %v3685_v39 = vadd.f32 %v3684_v28, %v8672_v35  ;;  %v8794_v36 = vpop.f32.mrf.mxu2  ;;  %v3752_v13 = vpop.f32.mrf.mxu0 }
 0x5a2   :  { %v3817_v18 = vpop.f32.mrf.mxu1 }
 0x5a3   :  { %v3750_v1 = vadd.f32 %v3749_v8, %v3685_v39 }
 0x5a4   :  { %4011 = vmatmul.f32.gmra.mxu0 %v10286_v29 }
 0x5a5   :  { %3946 = vmatmul.f32.gmra.mxu3 %v10188_v11  ;;  %4076 = vmatmul.f32.gmra.mxu1 %v10401_v30  ;;  %v8799_v15 = vadd.f32 %v3814_v27, %v3750_v1  ;;  %v1420_v1 = vld [vmem:[#allocation7 + $0x12f8] sm:$0xff] }
 0x5a6   :  { %4138 = vmatmul.f32.gmra.mxu2 %v10553_v62  ;;  %4187 = vmatpush.msra.mxu3 %v1420_v1  ;;  %v973_v1 = vld [vmem:[#allocation7 + $0x500] sm:$0xff]  ;;  %v10650_v62 = vld [vmem:[#allocation28_spill] sm:$0xff] }
 0x5a7   :  { %10598 = vst [vmem:[#allocation178_spill] sm:$0xff] %v8799_v15  ;;  %4382 = vmatpush.msra.mxu2 %v973_v1 }
 0x5a8   :  { %v3687_v35 = vpop.f32.mrf.mxu3 }
 0x5a9   :  { %v3688_v21 = vadd.f32 %v3687_v35, %v8680_v3  ;;  %v8803_v8 = vpop.f32.mrf.mxu2  ;;  %v3755_v28 = vpop.f32.mrf.mxu0  ;;  %v1497_v3 = vld [vmem:[#allocation7 + $0x1560] sm:$0xff] }
 0x5aa   :  { %v3820_v39 = vpop.f32.mrf.mxu1  ;;  %4257 = vmatpush.msra.mxu0 %v1497_v3 }
 0x5ab   :  { %v3753_v22 = vadd.f32 %v3752_v13, %v3688_v21 }
 0x5ac   :  { %4014 = vmatmul.f32.gmra.mxu0 %v10290_v38  ;;  %v868_v38 = vld [vmem:[#allocation7 + $0x1b8] sm:$0xff] }
 0x5ad   :  { %3949 = vmatmul.f32.gmra.mxu3 %v10473_v58  ;;  %4079 = vmatmul.f32.gmra.mxu1 %v10480_v49  ;;  %v8808_v27 = vadd.f32 %v3817_v18, %v3753_v22  ;;  %v1413_v22 = vld [vmem:[#allocation7 + $0x12c0] sm:$0xff]  ;;  %v1372_v49 = vld [vmem:[#allocation7 + $0x1178] sm:$0xff] }
 0x5ae   :  { %4141 = vmatmul.f32.gmra.mxu2 %v10556_v17  ;;  %4316 = vmatpush.msra.mxu1 %v868_v38 }
 0x5af   :  { %10599 = vst [vmem:[#allocation179_spill] sm:$0xff] %v8808_v27  ;;  %4188 = vmatpush.msra.mxu3 %v1413_v22  ;;  %v966_v22 = vld [vmem:[#allocation7 + $0x4c8] sm:$0xff] }
 0x5b0   :  { %v3690_v7 = vpop.f32.mrf.mxu3  ;;  %4383 = vmatpush.msra.mxu2 %v966_v22  ;;  %v1399_v22 = vld [vmem:[#allocation7 + $0x1250] sm:$0xff] }
 0x5b1   :  { %v3691_v13 = vadd.f32 %v3690_v7, %v8688_v33  ;;  %v8812_v35 = vpop.f32.mrf.mxu2  ;;  %v3758_v25 = vpop.f32.mrf.mxu0 }
 0x5b2   :  { %v3823_v21 = vpop.f32.mrf.mxu1 }
 0x5b3   :  { %v3756_v15 = vadd.f32 %v3755_v28, %v3691_v13  ;;  %v861_v13 = vld [vmem:[#allocation7 + $0x180] sm:$0xff] }
 0x5b4   :  { %4017 = vmatmul.f32.gmra.mxu0 %v10479_v24  ;;  %4317 = vmatpush.msra.mxu1 %v861_v13  ;;  %v10616_v24 = vld [vmem:[#allocation67_spill] sm:$0xff] }
 0x5b5   :  { %3952 = vmatmul.f32.gmra.mxu3 %v10476_v14  ;;  %4082 = vmatmul.f32.gmra.mxu1 %v10486_v34  ;;  %v8817_v18 = vadd.f32 %v3820_v39, %v3756_v15  ;;  %v1406_v39 = vld [vmem:[#allocation7 + $0x1288] sm:$0xff]  ;;  %v819_v34 = vld [vmem:[#allocation7 + $0x30] sm:$0xff] }
 0x5b6   :  { %4144 = vmatmul.f32.gmra.mxu2 %v10559_v41  ;;  %4189 = vmatpush.msra.mxu3 %v1406_v39  ;;  %v10604_v39 = vld [vmem:[#allocation106_spill] sm:$0xff]  ;;  %v10626_v41 = vld [vmem:[#allocation75_spill] sm:$0xff] }
 0x5b7   :  { %10600 = vst [vmem:[#allocation81_spill] sm:$0xff] %v8817_v18  ;;  %v854_v18 = vld [vmem:[#allocation7 + $0x148] sm:$0xff] }
 0x5b8   :  { %v3693_v33 = vpop.f32.mrf.mxu3  ;;  %4318 = vmatpush.msra.mxu1 %v854_v18  ;;  %4190 = vmatpush.msra.mxu3 %v1399_v22  ;;  %v10609_v22 = vld [vmem:[#allocation109_spill] sm:$0xff] }
 0x5b9   :  { %v3694_v59 = vadd.f32 %v3693_v33, %v8696_v26  ;;  %v8821_v28 = vpop.f32.mrf.mxu2  ;;  %v3761_v3 = vpop.f32.mrf.mxu0 }
 0x5ba   :  { %v3826_v7 = vpop.f32.mrf.mxu1 }
 0x5bb   :  { %v3759_v38 = vadd.f32 %v3758_v25, %v3694_v59 }
 0x5bc   :  { %4020 = vmatmul.f32.gmra.mxu0 %v10485_v57  ;;  %v10605_v57 = vld [vmem:[#allocation59_spill] sm:$0xff] }
 0x5bd   :  { %3955 = vmatmul.f32.gmra.mxu3 %v10482_v45  ;;  %4085 = vmatmul.f32.gmra.mxu1 %v10492_v37  ;;  %v8826_v15 = vadd.f32 %v3823_v21, %v3759_v38  ;;  %v10602_v21 = vld [vmem:[#allocation60_spill] sm:$0xff] }
 0x5be   :  { %4147 = vmatmul.f32.gmra.mxu2 %v10562_v55  ;;  %v840_v37 = vld [vmem:[#allocation7 + $0xd8] sm:$0xff]  ;;  %v833_v55 = vld [vmem:[#allocation7 + $0xa0] sm:$0xff] }
 0x5bf   :  { %10601 = vst [vmem:[#allocation86_spill] sm:$0xff] %v8826_v15  ;;  %v959_v15 = vld [vmem:[#allocation7 + $0x490] sm:$0xff] }
 0x5c0   :  { %v3696_v26 = vpop.f32.mrf.mxu3  ;;  %4384 = vmatpush.msra.mxu2 %v959_v15  ;;  %v1392_v15 = vld [vmem:[#allocation7 + $0x1218] sm:$0xff] }
 0x5c1   :  { %v3697_v1 = vadd.f32 %v3696_v26, %v8704_v23  ;;  %v8830_v25 = vpop.f32.mrf.mxu2  ;;  %v3764_v33 = vpop.f32.mrf.mxu0  ;;  %4191 = vmatpush.msra.mxu3 %v1392_v15  ;;  %v1385_v15 = vld [vmem:[#allocation7 + $0x11e0] sm:$0xff] }
 0x5c2   :  { %v3829_v59 = vpop.f32.mrf.mxu1 }
 0x5c3   :  { %v3762_v13 = vadd.f32 %v3761_v3, %v3697_v1  ;;  %4192 = vmatpush.msra.mxu3 %v1385_v15  ;;  %v10620_v15 = vld [vmem:[#allocation114_spill] sm:$0xff] }
 0x5c4   :  { %4023 = vmatmul.f32.gmra.mxu0 %v10491_v20  ;;  %v847_v20 = vld [vmem:[#allocation7 + $0x110] sm:$0xff] }
 0x5c5   :  { %3958 = vmatmul.f32.gmra.mxu3 %v10488_v19  ;;  %4088 = vmatmul.f32.gmra.mxu1 %v10602_v21  ;;  %v8835_v38 = vadd.f32 %v3826_v7, %v3762_v13  ;;  %v10606_v7 = vld [vmem:[#allocation57_spill] sm:$0xff]  ;;  %v10607_v13 = vld [vmem:[#allocation64_spill] sm:$0xff] }
 0x5c6   :  { %4150 = vmatmul.f32.gmra.mxu2 %v10604_v39  ;;  %4319 = vmatpush.msra.mxu1 %v847_v20  ;;  %v952_v21 = vld [vmem:[#allocation7 + $0x458] sm:$0xff] }
 0x5c7   :  { %10603 = vst [vmem:[#allocation180_spill] sm:$0xff] %v8835_v38  ;;  %4385 = vmatpush.msra.mxu2 %v952_v21  ;;  %v10614_v21 = vld [vmem:[#allocation111_spill] sm:$0xff] }
 0x5c8   :  { %v3699_v23 = vpop.f32.mrf.mxu3  ;;  %4320 = vmatpush.msra.mxu1 %v840_v37 }
 0x5c9   :  { %v3700_v26 = vadd.f32 %v3699_v23, %v8712_v42  ;;  %v8839_v3 = vpop.f32.mrf.mxu2  ;;  %v3767_v1 = vpop.f32.mrf.mxu0  ;;  %v1490_v42 = vld [vmem:[#allocation7 + $0x1528] sm:$0xff] }
 0x5ca   :  { %v3832_v27 = vpop.f32.mrf.mxu1  ;;  %4258 = vmatpush.msra.mxu0 %v1490_v42  ;;  %v945_v42 = vld [vmem:[#allocation7 + $0x420] sm:$0xff]  ;;  %4321 = vmatpush.msra.mxu1 %v833_v55  ;;  %v826_v55 = vld [vmem:[#allocation7 + $0x68] sm:$0xff] }
 0x5cb   :  { %v3765_v18 = vadd.f32 %v3764_v33, %v3700_v26  ;;  %4386 = vmatpush.msra.mxu2 %v945_v42  ;;  %v1378_v42 = vld [vmem:[#allocation7 + $0x11a8] sm:$0xff] }
 0x5cc   :  { %4026 = vmatmul.f32.gmra.mxu0 %v10605_v57  ;;  %4193 = vmatpush.msra.mxu3 %v1378_v42  ;;  %v1148_v42 = vld [vmem:[#allocation7 + $0xa78] sm:$0xff] }
 0x5cd   :  { %3961 = vmatmul.f32.gmra.mxu3 %v10606_v7  ;;  %4091 = vmatmul.f32.gmra.mxu1 %v10607_v13  ;;  %v8844_v38 = vadd.f32 %v3829_v59, %v3765_v18  ;;  %v10610_v13 = vld [vmem:[#allocation63_spill] sm:$0xff]  ;;  %v10611_v59 = vld [vmem:[#allocation61_spill] sm:$0xff]  ;;  %v10612_v18 = vld [vmem:[#allocation68_spill] sm:$0xff] }
 0x5ce   :  { %4153 = vmatmul.f32.gmra.mxu2 %v10609_v22  ;;  %4322 = vmatpush.msra.mxu1 %v826_v55 }
 0x5cf   :  { %10608 = vst [vmem:[#allocation89_spill] sm:$0xff] %v8844_v38  ;;  %4438 = vmatpush.msrb.mxu3 %v1148_v42  ;;  %v1484_v42 = vld [vmem:[#allocation7 + $0x14f8] sm:$0xff] }
 0x5d0   :  { %v3702_v23 = vpop.f32.mrf.mxu3  ;;  %4323 = vmatpush.msra.mxu1 %v819_v34  ;;  %v10630_v34 = vld [vmem:[#allocation120_spill] sm:$0xff] }
 0x5d1   :  { %v3703_v33 = vadd.f32 %v3702_v23, %v8720_v47  ;;  %v8848_v26 = vpop.f32.mrf.mxu2  ;;  %v3770_v20 = vpop.f32.mrf.mxu0  ;;  %v10615_v23 = vld [vmem:[#allocation175_spill] sm:$0xff] }
 0x5d2   :  { %v3835_v57 = vpop.f32.mrf.mxu1  ;;  %4568 = vmatpush.msrb.mxu1 %v1372_v49 }
 0x5d3   :  { %v3768_v39 = vadd.f32 %v3767_v1, %v3703_v33 }
 0x5d4   :  { %4029 = vmatmul.f32.gmra.mxu0 %v10610_v13 }
 0x5d5   :  { %3964 = vmatmul.f32.gmra.mxu3 %v10611_v59  ;;  %4094 = vmatmul.f32.gmra.mxu1 %v10612_v18  ;;  %v8853_v38 = vadd.f32 %v3832_v27, %v3768_v39  ;;  %v10617_v27 = vld [vmem:[#allocation65_spill] sm:$0xff]  ;;  %v10618_v39 = vld [vmem:[#allocation72_spill] sm:$0xff]  ;;  %v938_v18 = vld [vmem:[#allocation7 + $0x3e8] sm:$0xff] }
 0x5d6   :  { %4156 = vmatmul.f32.gmra.mxu2 %v10614_v21 }
 0x5d7   :  { %10613 = vst [vmem:[#allocation92_spill] sm:$0xff] %v8853_v38  ;;  %4387 = vmatpush.msra.mxu2 %v938_v18  ;;  %v10625_v18 = vld [vmem:[#allocation117_spill] sm:$0xff] }
 0x5d8   :  { %v3705_v47 = vpop.f32.mrf.mxu3 }
 0x5d9   :  { %v3706_v22 = vadd.f32 %v3705_v47, %v10615_v23  ;;  %v8857_v1 = vpop.f32.mrf.mxu2  ;;  %v3773_v33 = vpop.f32.mrf.mxu0 }
 0x5da   :  { %v3838_v13 = vpop.f32.mrf.mxu1 }
 0x5db   :  { %v3771_v37 = vadd.f32 %v3770_v20, %v3706_v22 }
 0x5dc   :  { %4032 = vmatmul.f32.gmra.mxu0 %v10616_v24 }
 0x5dd   :  { %3967 = vmatmul.f32.gmra.mxu3 %v10617_v27  ;;  %4097 = vmatmul.f32.gmra.mxu1 %v10618_v39  ;;  %v8862_v38 = vadd.f32 %v3835_v57, %v3771_v37  ;;  %v10621_v39 = vld [vmem:[#allocation71_spill] sm:$0xff]  ;;  %v10622_v57 = vld [vmem:[#allocation69_spill] sm:$0xff]  ;;  %v10623_v37 = vld [vmem:[#allocation76_spill] sm:$0xff] }
 0x5de   :  { %4159 = vmatmul.f32.gmra.mxu2 %v10620_v15 }
 0x5df   :  { %10619 = vst [vmem:[#allocation130_spill] sm:$0xff] %v8862_v38 }
 0x5e0   :  { %v3708_v47 = vpop.f32.mrf.mxu3 }
 0x5e1   :  { %v3709_v23 = vadd.f32 %v3708_v47, %v8736_v12  ;;  %v8866_v22 = vpop.f32.mrf.mxu2  ;;  %v3776_v20 = vpop.f32.mrf.mxu0  ;;  %v931_v12 = vld [vmem:[#allocation7 + $0x3b0] sm:$0xff] }
 0x5e2   :  { %v3841_v24 = vpop.f32.mrf.mxu1  ;;  %4388 = vmatpush.msra.mxu2 %v931_v12  ;;  %v1141_v12 = vld [vmem:[#allocation7 + $0xa40] sm:$0xff] }
 0x5e3   :  { %v3774_v21 = vadd.f32 %v3773_v33, %v3709_v23  ;;  %4439 = vmatpush.msrb.mxu3 %v1141_v12  ;;  %v1477_v12 = vld [vmem:[#allocation7 + $0x14c0] sm:$0xff] }
 0x5e4   :  { %4035 = vmatmul.f32.gmra.mxu0 %v10621_v39  ;;  %4633 = vmatpush.msrb.mxu2 %v1484_v42 }
 0x5e5   :  { %3970 = vmatmul.f32.gmra.mxu3 %v10622_v57  ;;  %4100 = vmatmul.f32.gmra.mxu1 %v10623_v37  ;;  %v8871_v38 = vadd.f32 %v3838_v13, %v3774_v21  ;;  %v10627_v37 = vld [vmem:[#allocation73_spill] sm:$0xff]  ;;  %v10628_v13 = vld [vmem:[#allocation80_spill] sm:$0xff] }
 0x5e6   :  { %4162 = vmatmul.f32.gmra.mxu2 %v10625_v18 }
 0x5e7   :  { %10624 = vst [vmem:[#allocation19_spill] sm:$0xff] %v8871_v38  ;;  %v1260_v38 = vld [vmem:[#allocation7 + $0xdf8] sm:$0xff]  ;;  %4634 = vmatpush.msrb.mxu2 %v1477_v12  ;;  %v1127_v12 = vld [vmem:[#allocation7 + $0x9d0] sm:$0xff] }
 0x5e8   :  { %v3711_v47 = vpop.f32.mrf.mxu3  ;;  %4503 = vmatpush.msrb.mxu0 %v1260_v38  ;;  %v1134_v38 = vld [vmem:[#allocation7 + $0xa08] sm:$0xff] }
 0x5e9   :  { %v3712_v33 = vadd.f32 %v3711_v47, %v8744_v48  ;;  %v8875_v23 = vpop.f32.mrf.mxu2  ;;  %v3779_v55 = vpop.f32.mrf.mxu0  ;;  %4440 = vmatpush.msrb.mxu3 %v1134_v38  ;;  %v10639_v38 = vld [vmem:[#allocation126_spill] sm:$0xff] }
 0x5ea   :  { %v3844_v39 = vpop.f32.mrf.mxu1 }
 0x5eb   :  { %v3777_v15 = vadd.f32 %v3776_v20, %v3712_v33  ;;  %4441 = vmatpush.msrb.mxu3 %v1127_v12  ;;  %v10642_v12 = vld [vmem:[#allocation20_spill] sm:$0xff] }
 0x5ec   :  { %4038 = vmatmul.f32.gmra.mxu0 %v10626_v41 }
 0x5ed   :  { %3973 = vmatmul.f32.gmra.mxu3 %v10627_v37  ;;  %4103 = vmatmul.f32.gmra.mxu1 %v10628_v13  ;;  %v8880_v21 = vadd.f32 %v3841_v24, %v3777_v15  ;;  %v10631_v13 = vld [vmem:[#allocation79_spill] sm:$0xff]  ;;  %v10632_v24 = vld [vmem:[#allocation77_spill] sm:$0xff]  ;;  %v10633_v15 = vld [vmem:[#allocation84_spill] sm:$0xff] }
 0x5ee   :  { %4165 = vmatmul.f32.gmra.mxu2 %v10630_v34  ;;  %v1365_v34 = vld [vmem:[#allocation7 + $0x1140] sm:$0xff] }
 0x5ef   :  { %10629 = vst [vmem:[#allocation23_spill] sm:$0xff] %v8880_v21  ;;  %4569 = vmatpush.msrb.mxu1 %v1365_v34 }
 0x5f0   :  { %v3714_v48 = vpop.f32.mrf.mxu3 }
 0x5f1   :  { %v3715_v47 = vadd.f32 %v3714_v48, %v8752_v16  ;;  %v8884_v20 = vpop.f32.mrf.mxu2  ;;  %v3782_v33 = vpop.f32.mrf.mxu0  ;;  %v1253_v16 = vld [vmem:[#allocation7 + $0xdc0] sm:$0xff] }
 0x5f2   :  { %v3847_v41 = vpop.f32.mrf.mxu1  ;;  %4504 = vmatpush.msrb.mxu0 %v1253_v16  ;;  %v1470_v16 = vld [vmem:[#allocation7 + $0x1488] sm:$0xff] }
 0x5f3   :  { %v3780_v18 = vadd.f32 %v3779_v55, %v3715_v47  ;;  %4635 = vmatpush.msrb.mxu2 %v1470_v16 }
 0x5f4   :  { %4041 = vmatmul.f32.gmra.mxu0 %v10631_v13 }
 0x5f5   :  { %3976 = vmatmul.f32.gmra.mxu3 %v10632_v24  ;;  %4106 = vmatmul.f32.gmra.mxu1 %v10633_v15  ;;  %v8889_v21 = vadd.f32 %v3844_v39, %v3780_v18  ;;  %v10635_v15 = vld [vmem:[#allocation83_spill] sm:$0xff]  ;;  %v10636_v39 = vld [vmem:[#allocation82_spill] sm:$0xff]  ;;  %v10637_v18 = vld [vmem:[#allocation88_spill] sm:$0xff] }
 0x5f6   :  { %4168 = vmatmul.f32.gmra.mxu2 %v10584_v53  ;;  %v6210_v53 = vld [vmem:[#allocation8] sm:$0x7f] }
 0x5f7   :  { %10634 = vst [vmem:[#allocation57_spill] sm:$0xff] %v8889_v21  ;;  %v8904_v17 = vperm.slane %v6210_v53, 5 }
 0x5f8   :  { %v3717_v42 = vpop.f32.mrf.mxu3 }
 0x5f9   :  { %v3718_v55 = vadd.f32 %v3717_v42, %v8760_v31  ;;  %v8893_v48 = vpop.f32.mrf.mxu2  ;;  %v3785_v49 = vpop.f32.mrf.mxu0  ;;  %v1246_v31 = vld [vmem:[#allocation7 + $0xd88] sm:$0xff]  ;;  %v3871_v53 = vadd.f32 %v8776_v6, %v8904_v17 }
 0x5fa   :  { %v3850_v47 = vpop.f32.mrf.mxu1  ;;  %4505 = vmatpush.msrb.mxu0 %v1246_v31  ;;  %v1120_v31 = vld [vmem:[#allocation7 + $0x998] sm:$0xff] }
 0x5fb   :  { %v3783_v13 = vadd.f32 %v3782_v33, %v3718_v55  ;;  %4442 = vmatpush.msrb.mxu3 %v1120_v31  ;;  %v1113_v31 = vld [vmem:[#allocation7 + $0x960] sm:$0xff] }
 0x5fc   :  { %4044 = vmatmul.f32.gmra.mxu0 %v10635_v15 }
 0x5fd   :  { %3979 = vmatmul.f32.gmra.mxu3 %v10636_v39  ;;  %4109 = vmatmul.f32.gmra.mxu1 %v10637_v18  ;;  %v8898_v21 = vadd.f32 %v3847_v41, %v3783_v13  ;;  %v1358_v13 = vld [vmem:[#allocation7 + $0x1108] sm:$0xff]  ;;  %v10641_v18 = vld [vmem:[#allocation85_spill] sm:$0xff] }
 0x5fe   :  { %4171 = vmatmul.f32.gmra.mxu2 %v10639_v38  ;;  %4570 = vmatpush.msrb.mxu1 %v1358_v13  ;;  %v1239_v38 = vld [vmem:[#allocation7 + $0xd50] sm:$0xff] }
 0x5ff   :  { %10638 = vst [vmem:[#allocation61_spill] sm:$0xff] %v8898_v21  ;;  %v10640_v21 = vld [vmem:[#allocation87_spill] sm:$0xff]  ;;  %4506 = vmatpush.msrb.mxu0 %v1239_v38  ;;  %v1456_v38 = vld [vmem:[#allocation7 + $0x1418] sm:$0xff]  ;;  %4443 = vmatpush.msrb.mxu3 %v1113_v31 }
 0x600   :  { %v3720_v42 = vpop.f32.mrf.mxu3  ;;  %v1106_v31 = vld [vmem:[#allocation7 + $0x928] sm:$0xff] }
 0x601   :  { %v3721_v33 = vadd.f32 %v3720_v42, %v8767_v46  ;;  %v8902_v55 = vpop.f32.mrf.mxu2  ;;  %v4000_v34 = vpop.f32.mrf.mxu0  ;;  %v10644_v46 = vld [vmem:[#allocation129_spill] sm:$0xff]  ;;  %v1463_v42 = vld [vmem:[#allocation7 + $0x1450] sm:$0xff]  ;;  %4444 = vmatpush.msrb.mxu3 %v1106_v31 }
 0x602   :  { %v4065_v15 = vpop.f32.mrf.mxu1  ;;  %4636 = vmatpush.msrb.mxu2 %v1463_v42  ;;  %v1232_v42 = vld [vmem:[#allocation7 + $0xd18] sm:$0xff]  ;;  %v1099_v31 = vld [vmem:[#allocation7 + $0x8f0] sm:$0xff] }
 0x603   :  { %v3786_v41 = vadd.f32 %v3785_v49, %v3721_v33  ;;  %4507 = vmatpush.msrb.mxu0 %v1232_v42  ;;  %v1225_v42 = vld [vmem:[#allocation7 + $0xce0] sm:$0xff]  ;;  %4445 = vmatpush.msrb.mxu3 %v1099_v31  ;;  %v1092_v31 = vld [vmem:[#allocation7 + $0x8b8] sm:$0xff] }
 0x604   :  { %6071 = vmatmul.msk.f32.vlgmr.msra.gmra.mxu0 %vm1529_vm2, %v10640_v21  ;;  %4637 = vmatpush.msrb.mxu2 %v1456_v38  ;;  %v1449_v38 = vld [vmem:[#allocation7 + $0x13e0] sm:$0xff] }
 0x605   :  { %4194 = vmatmul.f32.vlgmr.msra.gmra.mxu3 %v10641_v18  ;;  %4324 = vmatmul.f32.vlgmr.msra.gmra.mxu1 %v10642_v12  ;;  %v8910_v16 = vadd.f32 %v3850_v47, %v3786_v41  ;;  %v1351_v47 = vld [vmem:[#allocation7 + $0x10d0] sm:$0xff]  ;;  %v10645_v41 = vld [vmem:[#allocation90_spill] sm:$0xff] }
 0x606   :  { %4174 = vmatmul.f32.gmra.mxu2 %v10644_v46  ;;  %4571 = vmatpush.msrb.mxu1 %v1351_v47  ;;  %v10647_v46 = vld [vmem:[#allocation24_spill] sm:$0xff] }
 0x607   :  { %10643 = vst [vmem:[#allocation175_spill] sm:$0xff] %v8910_v16  ;;  %v10646_v16 = vld [vmem:[#allocation22_spill] sm:$0xff]  ;;  %4638 = vmatpush.msrb.mxu2 %v1449_v38  ;;  %4508 = vmatpush.msrb.mxu0 %v1225_v42 }
 0x608   :  { %v3935_v49 = vpop.f32.mrf.mxu3  ;;  %v1442_v38 = vld [vmem:[#allocation7 + $0x13a8] sm:$0xff]  ;;  %4446 = vmatpush.msrb.mxu3 %v1092_v31  ;;  %v1085_v31 = vld [vmem:[#allocation7 + $0x880] sm:$0xff] }
 0x609   :  { %v8915_v33 = vpop.f32.mrf.mxu2  ;;  %v3936_v13 = vadd.f32 %v3935_v49, %v3871_v53  ;;  %v4003_v21 = vpop.f32.mrf.mxu0  ;;  %v3874_v53 = vadd.f32 %v8785_v54, %v8904_v17  ;;  %v1218_v42 = vld [vmem:[#allocation7 + $0xca8] sm:$0xff]  ;;  %4639 = vmatpush.msrb.mxu2 %v1442_v38  ;;  %v1435_v38 = vld [vmem:[#allocation7 + $0x1370] sm:$0xff] }
 0x60a   :  { %v4068_v29 = vpop.f32.mrf.mxu1  ;;  %4509 = vmatpush.msrb.mxu0 %v1218_v42  ;;  %v1211_v42 = vld [vmem:[#allocation7 + $0xc70] sm:$0xff]  ;;  %4447 = vmatpush.msrb.mxu3 %v1085_v31  ;;  %v1078_v31 = vld [vmem:[#allocation7 + $0x848] sm:$0xff] }
 0x60b   :  { %v4001_v12 = vadd.f32 %v4000_v34, %v3936_v13  ;;  %4640 = vmatpush.msrb.mxu2 %v1435_v38  ;;  %v1428_v38 = vld [vmem:[#allocation7 + $0x1338] sm:$0xff] }
 0x60c   :  { %6072 = vmatmul.msk.f32.gmra.mxu0 %vm1529_vm2, %v10645_v41  ;;  %4448 = vmatpush.msrb.mxu3 %v1078_v31  ;;  %v1071_v31 = vld [vmem:[#allocation7 + $0x810] sm:$0xff] }
 0x60d   :  { %4197 = vmatmul.f32.gmra.mxu3 %v10646_v16  ;;  %4327 = vmatmul.f32.gmra.mxu1 %v10647_v46  ;;  %v4066_v6 = vadd.f32 %v4065_v15, %v4001_v12  ;;  %v1344_v15 = vld [vmem:[#allocation7 + $0x1098] sm:$0xff] }
 0x60e   :  { %4389 = vmatmul.f32.vlgmr.msra.gmra.mxu2 %v10593_v44  ;;  %v10648_v12 = vld [vmem:[#allocation93_spill] sm:$0xff]  ;;  %4572 = vmatpush.msrb.mxu1 %v1344_v15  ;;  %v10649_v44 = vld [vmem:[#allocation91_spill] sm:$0xff] }
 0x60f   :  { %4510 = vmatpush.msrb.mxu0 %v1211_v42  ;;  %v1204_v42 = vld [vmem:[#allocation7 + $0xc38] sm:$0xff]  ;;  %4641 = vmatpush.msrb.mxu2 %v1428_v38  ;;  %v1421_v38 = vld [vmem:[#allocation7 + $0x1300] sm:$0xff] }
 0x610   :  { %v3938_v34 = vpop.f32.mrf.mxu3  ;;  %4449 = vmatpush.msrb.mxu3 %v1071_v31  ;;  %v1064_v31 = vld [vmem:[#allocation7 + $0x7d8] sm:$0xff] }
 0x611   :  { %v3939_v49 = vadd.f32 %v3938_v34, %v3874_v53  ;;  %v4130_v13 = vpop.f32.mrf.mxu2  ;;  %v4006_v47 = vpop.f32.mrf.mxu0  ;;  %4511 = vmatpush.msrb.mxu0 %v1204_v42  ;;  %v1197_v42 = vld [vmem:[#allocation7 + $0xc00] sm:$0xff]  ;;  %4642 = vmatpush.msrb.mxu2 %v1421_v38  ;;  %v1414_v38 = vld [vmem:[#allocation7 + $0x12c8] sm:$0xff] }
 0x612   :  { %v8924_v41 = vadd.f32 %v4130_v13, %v4066_v6  ;;  %v4071_v30 = vpop.f32.mrf.mxu1  ;;  %v3877_v6 = vadd.f32 %v8794_v36, %v8904_v17  ;;  %4450 = vmatpush.msrb.mxu3 %v1064_v31  ;;  %v1057_v31 = vld [vmem:[#allocation7 + $0x7a0] sm:$0xff] }
 0x613   :  { %v4004_v46 = vadd.f32 %v4003_v21, %v3939_v49  ;;  %4512 = vmatpush.msrb.mxu0 %v1197_v42  ;;  %v1190_v42 = vld [vmem:[#allocation7 + $0xbc8] sm:$0xff]  ;;  %4643 = vmatpush.msrb.mxu2 %v1414_v38  ;;  %v1407_v38 = vld [vmem:[#allocation7 + $0x1290] sm:$0xff] }
 0x614   :  { %6073 = vmatmul.msk.f32.gmra.mxu0 %vm1529_vm2, %v10648_v12  ;;  %v10653_v12 = vld [vmem:[#allocation32_spill] sm:$0xff]  ;;  %4451 = vmatpush.msrb.mxu3 %v1057_v31  ;;  %v1050_v31 = vld [vmem:[#allocation7 + $0x768] sm:$0xff] }
 0x615   :  { %4200 = vmatmul.f32.gmra.mxu3 %v10649_v44  ;;  %4330 = vmatmul.f32.gmra.mxu1 %v10650_v62  ;;  %v4069_v54 = vadd.f32 %v4068_v29, %v4004_v46  ;;  %v1337_v29 = vld [vmem:[#allocation7 + $0x1060] sm:$0xff]  ;;  %v10651_v46 = vld [vmem:[#allocation96_spill] sm:$0xff] }
 0x616   :  { %4392 = vmatmul.f32.gmra.mxu2 %v10595_v56  ;;  %4573 = vmatpush.msrb.mxu1 %v1337_v29  ;;  %v10652_v56 = vld [vmem:[#allocation94_spill] sm:$0xff] }
 0x617   :  { %4513 = vmatpush.msrb.mxu0 %v1190_v42  ;;  %v1183_v42 = vld [vmem:[#allocation7 + $0xb90] sm:$0xff]  ;;  %4644 = vmatpush.msrb.mxu2 %v1407_v38  ;;  %v1400_v38 = vld [vmem:[#allocation7 + $0x1258] sm:$0xff] }
 0x618   :  { %v3941_v21 = vpop.f32.mrf.mxu3  ;;  %4452 = vmatpush.msrb.mxu3 %v1050_v31  ;;  %v1043_v31 = vld [vmem:[#allocation7 + $0x730] sm:$0xff] }
 0x619   :  { %v3942_v53 = vadd.f32 %v3941_v21, %v3877_v6  ;;  %v4133_v34 = vpop.f32.mrf.mxu2  ;;  %v4009_v49 = vpop.f32.mrf.mxu0  ;;  %4514 = vmatpush.msrb.mxu0 %v1183_v42  ;;  %v1176_v42 = vld [vmem:[#allocation7 + $0xb58] sm:$0xff]  ;;  %4645 = vmatpush.msrb.mxu2 %v1400_v38  ;;  %v1393_v38 = vld [vmem:[#allocation7 + $0x1220] sm:$0xff] }
 0x61a   :  { %v8933_v13 = vadd.f32 %v4133_v34, %v4069_v54  ;;  %v4074_v15 = vpop.f32.mrf.mxu1  ;;  %v3880_v54 = vadd.f32 %v8803_v8, %v8904_v17  ;;  %4453 = vmatpush.msrb.mxu3 %v1043_v31 }
 0x61b   :  { %v4007_v62 = vadd.f32 %v4006_v47, %v3942_v53  ;;  %4515 = vmatpush.msrb.mxu0 %v1176_v42  ;;  %v1169_v42 = vld [vmem:[#allocation7 + $0xb20] sm:$0xff]  ;;  %4646 = vmatpush.msrb.mxu2 %v1393_v38  ;;  %v1386_v38 = vld [vmem:[#allocation7 + $0x11e8] sm:$0xff] }
 0x61c   :  { %6074 = vmatmul.msk.f32.gmra.mxu0 %vm1529_vm2, %v10651_v46  ;;  %v10656_v46 = vld [vmem:[#allocation36_spill] sm:$0xff] }
 0x61d   :  { %4203 = vmatmul.f32.gmra.mxu3 %v10652_v56  ;;  %4333 = vmatmul.f32.gmra.mxu1 %v10653_v12  ;;  %v4072_v36 = vadd.f32 %v4071_v30, %v4007_v62  ;;  %v1330_v30 = vld [vmem:[#allocation7 + $0x1028] sm:$0xff] }
 0x61e   :  { %4395 = vmatmul.f32.gmra.mxu2 %v10179_v4  ;;  %v10654_v62 = vld [vmem:[#allocation99_spill] sm:$0xff]  ;;  %4574 = vmatpush.msrb.mxu1 %v1330_v30  ;;  %v10655_v4 = vld [vmem:[#allocation97_spill] sm:$0xff] }
 0x61f   :  { %4516 = vmatpush.msrb.mxu0 %v1169_v42  ;;  %v1162_v42 = vld [vmem:[#allocation7 + $0xae8] sm:$0xff]  ;;  %4647 = vmatpush.msrb.mxu2 %v1386_v38  ;;  %v1379_v38 = vld [vmem:[#allocation7 + $0x11b0] sm:$0xff] }
 0x620   :  { %v3944_v47 = vpop.f32.mrf.mxu3 }
 0x621   :  { %v3945_v6 = vadd.f32 %v3944_v47, %v3880_v54  ;;  %v4136_v21 = vpop.f32.mrf.mxu2  ;;  %v4012_v53 = vpop.f32.mrf.mxu0  ;;  %4517 = vmatpush.msrb.mxu0 %v1162_v42  ;;  %v3907_v42 = vadd.f32 %v8884_v20, %v8904_v17  ;;  %4648 = vmatpush.msrb.mxu2 %v1379_v38  ;;  %v4922_v20 = vld [vmem:[#allocation10 + $0x178] sm:$0xff]  ;;  %v3910_v38 = vadd.f32 %v8893_v48, %v8904_v17 }
 0x622   :  { %v8942_v34 = vadd.f32 %v4136_v21, %v4072_v36  ;;  %v4077_v29 = vpop.f32.mrf.mxu1  ;;  %v3883_v36 = vadd.f32 %v8812_v35, %v8904_v17 }
 0x623   :  { %v4010_v12 = vadd.f32 %v4009_v49, %v3945_v6  ;;  %5157 = vmatpush.msra.mxu2 %v4922_v20 }
 0x624   :  { %6075 = vmatmul.msk.f32.gmra.mxu0 %vm1529_vm2, %v10654_v62  ;;  %v10659_v62 = vld [vmem:[#allocation41_spill] sm:$0xff] }
 0x625   :  { %4206 = vmatmul.f32.gmra.mxu3 %v10655_v4  ;;  %4336 = vmatmul.f32.gmra.mxu1 %v10656_v46  ;;  %v4075_v8 = vadd.f32 %v4074_v15, %v4010_v12  ;;  %v1323_v15 = vld [vmem:[#allocation7 + $0xff0] sm:$0xff]  ;;  %v10657_v12 = vld [vmem:[#allocation101_spill] sm:$0xff] }
 0x626   :  { %4398 = vmatmul.f32.gmra.mxu2 %v10184_v5  ;;  %4575 = vmatpush.msrb.mxu1 %v1323_v15  ;;  %v10658_v5 = vld [vmem:[#allocation39_spill] sm:$0xff] }
 0x628   :  { %v3947_v49 = vpop.f32.mrf.mxu3 }
 0x629   :  { %v3948_v54 = vadd.f32 %v3947_v49, %v3883_v36  ;;  %v4139_v47 = vpop.f32.mrf.mxu2  ;;  %v4015_v6 = vpop.f32.mrf.mxu0 }
 0x62a   :  { %v8951_v21 = vadd.f32 %v4139_v47, %v4075_v8  ;;  %v4080_v30 = vpop.f32.mrf.mxu1  ;;  %v3886_v8 = vadd.f32 %v8821_v28, %v8904_v17 }
 0x62b   :  { %v4013_v46 = vadd.f32 %v4012_v53, %v3948_v54 }
 0x62c   :  { %6076 = vmatmul.msk.f32.gmra.mxu0 %vm1529_vm2, %v10657_v12  ;;  %v10662_v12 = vld [vmem:[#allocation45_spill] sm:$0xff] }
 0x62d   :  { %4209 = vmatmul.f32.gmra.mxu3 %v10658_v5  ;;  %4339 = vmatmul.f32.gmra.mxu1 %v10659_v62  ;;  %v4078_v35 = vadd.f32 %v4077_v29, %v4013_v46  ;;  %v1316_v29 = vld [vmem:[#allocation7 + $0xfb8] sm:$0xff] }
 0x62e   :  { %4401 = vmatmul.f32.gmra.mxu2 %v10188_v11  ;;  %v10660_v46 = vld [vmem:[#allocation104_spill] sm:$0xff]  ;;  %4576 = vmatpush.msrb.mxu1 %v1316_v29  ;;  %v10661_v11 = vld [vmem:[#allocation102_spill] sm:$0xff] }
 0x630   :  { %v3950_v53 = vpop.f32.mrf.mxu3 }
 0x631   :  { %v3951_v36 = vadd.f32 %v3950_v53, %v3886_v8  ;;  %v4142_v49 = vpop.f32.mrf.mxu2  ;;  %v4018_v54 = vpop.f32.mrf.mxu0 }
 0x632   :  { %v8960_v47 = vadd.f32 %v4142_v49, %v4078_v35  ;;  %v4083_v15 = vpop.f32.mrf.mxu1  ;;  %v3889_v35 = vadd.f32 %v8830_v25, %v8904_v17 }
 0x633   :  { %v4016_v62 = vadd.f32 %v4015_v6, %v3951_v36 }
 0x634   :  { %6077 = vmatmul.msk.f32.gmra.mxu0 %vm1529_vm2, %v10660_v46  ;;  %v10665_v46 = vld [vmem:[#allocation49_spill] sm:$0xff] }
 0x635   :  { %4212 = vmatmul.f32.gmra.mxu3 %v10661_v11  ;;  %4342 = vmatmul.f32.gmra.mxu1 %v10662_v12  ;;  %v4081_v28 = vadd.f32 %v4080_v30, %v4016_v62  ;;  %v1309_v30 = vld [vmem:[#allocation7 + $0xf80] sm:$0xff]  ;;  %v10663_v62 = vld [vmem:[#allocation107_spill] sm:$0xff] }
 0x636   :  { %4404 = vmatmul.f32.gmra.mxu2 %v10473_v58  ;;  %4577 = vmatpush.msrb.mxu1 %v1309_v30  ;;  %v10664_v58 = vld [vmem:[#allocation105_spill] sm:$0xff] }
 0x638   :  { %v3953_v6 = vpop.f32.mrf.mxu3 }
 0x639   :  { %v3954_v8 = vadd.f32 %v3953_v6, %v3889_v35  ;;  %v4145_v53 = vpop.f32.mrf.mxu2  ;;  %v4021_v36 = vpop.f32.mrf.mxu0 }
 0x63a   :  { %v8969_v49 = vadd.f32 %v4145_v53, %v4081_v28  ;;  %v4086_v29 = vpop.f32.mrf.mxu1  ;;  %v3892_v28 = vadd.f32 %v8839_v3, %v8904_v17 }
 0x63b   :  { %v4019_v12 = vadd.f32 %v4018_v54, %v3954_v8 }
 0x63c   :  { %6078 = vmatmul.msk.f32.gmra.mxu0 %vm1529_vm2, %v10663_v62  ;;  %v10668_v62 = vld [vmem:[#allocation53_spill] sm:$0xff] }
 0x63d   :  { %4215 = vmatmul.f32.gmra.mxu3 %v10664_v58  ;;  %4345 = vmatmul.f32.gmra.mxu1 %v10665_v46  ;;  %v4084_v25 = vadd.f32 %v4083_v15, %v4019_v12  ;;  %v1302_v15 = vld [vmem:[#allocation7 + $0xf48] sm:$0xff] }
 0x63e   :  { %4407 = vmatmul.f32.gmra.mxu2 %v10476_v14  ;;  %v10666_v12 = vld [vmem:[#allocation110_spill] sm:$0xff]  ;;  %4578 = vmatpush.msrb.mxu1 %v1302_v15  ;;  %v10667_v14 = vld [vmem:[#allocation108_spill] sm:$0xff] }
 0x640   :  { %v3956_v54 = vpop.f32.mrf.mxu3 }
 0x641   :  { %v3957_v35 = vadd.f32 %v3956_v54, %v3892_v28  ;;  %v4148_v6 = vpop.f32.mrf.mxu2  ;;  %v4024_v8 = vpop.f32.mrf.mxu0 }
 0x642   :  { %v8978_v53 = vadd.f32 %v4148_v6, %v4084_v25  ;;  %v4089_v30 = vpop.f32.mrf.mxu1  ;;  %v3895_v25 = vadd.f32 %v8848_v26, %v8904_v17 }
 0x643   :  { %v4022_v46 = vadd.f32 %v4021_v36, %v3957_v35 }
 0x644   :  { %6079 = vmatmul.msk.f32.gmra.mxu0 %vm1529_vm2, %v10666_v12  ;;  %v10671_v12 = vld [vmem:[#allocation58_spill] sm:$0xff] }
 0x645   :  { %4218 = vmatmul.f32.gmra.mxu3 %v10667_v14  ;;  %4348 = vmatmul.f32.gmra.mxu1 %v10668_v62  ;;  %v4087_v3 = vadd.f32 %v4086_v29, %v4022_v46  ;;  %v1295_v29 = vld [vmem:[#allocation7 + $0xf10] sm:$0xff] }
 0x646   :  { %4410 = vmatmul.f32.gmra.mxu2 %v10482_v45  ;;  %v10669_v46 = vld [vmem:[#allocation112_spill] sm:$0xff]  ;;  %4579 = vmatpush.msrb.mxu1 %v1295_v29 }
 0x647   :  { %v10670_v45 = vld [vmem:[#allocation56_spill] sm:$0xff] }
 0x648   :  { %v3959_v36 = vpop.f32.mrf.mxu3 }
 0x649   :  { %v3960_v28 = vadd.f32 %v3959_v36, %v3895_v25  ;;  %v4151_v54 = vpop.f32.mrf.mxu2  ;;  %v4027_v35 = vpop.f32.mrf.mxu0 }
 0x64a   :  { %v8987_v6 = vadd.f32 %v4151_v54, %v4087_v3  ;;  %v4092_v15 = vpop.f32.mrf.mxu1  ;;  %v3898_v3 = vadd.f32 %v8857_v1, %v8904_v17 }
 0x64b   :  { %v4025_v62 = vadd.f32 %v4024_v8, %v3960_v28 }
 0x64c   :  { %6080 = vmatmul.msk.f32.gmra.mxu0 %vm1529_vm2, %v10669_v46  ;;  %v10674_v46 = vld [vmem:[#allocation62_spill] sm:$0xff] }
 0x64d   :  { %4221 = vmatmul.f32.gmra.mxu3 %v10670_v45  ;;  %4351 = vmatmul.f32.gmra.mxu1 %v10671_v12  ;;  %v4090_v26 = vadd.f32 %v4089_v30, %v4025_v62  ;;  %v1288_v30 = vld [vmem:[#allocation7 + $0xed8] sm:$0xff]  ;;  %v10672_v62 = vld [vmem:[#allocation115_spill] sm:$0xff] }
 0x64e   :  { %4413 = vmatmul.f32.gmra.mxu2 %v10488_v19  ;;  %4580 = vmatpush.msrb.mxu1 %v1288_v30  ;;  %v10673_v19 = vld [vmem:[#allocation113_spill] sm:$0xff] }
 0x650   :  { %v3962_v8 = vpop.f32.mrf.mxu3 }
 0x651   :  { %v3963_v25 = vadd.f32 %v3962_v8, %v3898_v3  ;;  %v4154_v36 = vpop.f32.mrf.mxu2  ;;  %v4030_v28 = vpop.f32.mrf.mxu0 }
 0x652   :  { %v8996_v54 = vadd.f32 %v4154_v36, %v4090_v26  ;;  %v4095_v29 = vpop.f32.mrf.mxu1  ;;  %v3901_v26 = vadd.f32 %v8866_v22, %v8904_v17 }
 0x653   :  { %v4028_v12 = vadd.f32 %v4027_v35, %v3963_v25 }
 0x654   :  { %6081 = vmatmul.msk.f32.gmra.mxu0 %vm1529_vm2, %v10672_v62  ;;  %v10677_v62 = vld [vmem:[#allocation66_spill] sm:$0xff] }
 0x655   :  { %4224 = vmatmul.f32.gmra.mxu3 %v10673_v19  ;;  %4354 = vmatmul.f32.gmra.mxu1 %v10674_v46  ;;  %v4093_v1 = vadd.f32 %v4092_v15, %v4028_v12  ;;  %v1281_v15 = vld [vmem:[#allocation7 + $0xea0] sm:$0xff] }
 0x656   :  { %4416 = vmatmul.f32.gmra.mxu2 %v10606_v7  ;;  %v10675_v12 = vld [vmem:[#allocation118_spill] sm:$0xff]  ;;  %4581 = vmatpush.msrb.mxu1 %v1281_v15  ;;  %v10676_v7 = vld [vmem:[#allocation116_spill] sm:$0xff] }
 0x658   :  { %v3965_v35 = vpop.f32.mrf.mxu3 }
 0x659   :  { %v3966_v3 = vadd.f32 %v3965_v35, %v3901_v26  ;;  %v4157_v8 = vpop.f32.mrf.mxu2  ;;  %v4033_v25 = vpop.f32.mrf.mxu0 }
 0x65a   :  { %v9005_v36 = vadd.f32 %v4157_v8, %v4093_v1  ;;  %v4098_v30 = vpop.f32.mrf.mxu1  ;;  %v3904_v1 = vadd.f32 %v8875_v23, %v8904_v17  ;;  %v10680_v23 = vld [vmem:[#allocation70_spill] sm:$0xff] }
 0x65b   :  { %v4031_v46 = vadd.f32 %v4030_v28, %v3966_v3 }
 0x65c   :  { %6082 = vmatmul.msk.f32.gmra.mxu0 %vm1529_vm2, %v10675_v12  ;;  %v1267_v12 = vld [vmem:[#allocation7 + $0xe30] sm:$0xff] }
 0x65d   :  { %4227 = vmatmul.f32.gmra.mxu3 %v10676_v7  ;;  %4357 = vmatmul.f32.gmra.mxu1 %v10677_v62  ;;  %v4096_v22 = vadd.f32 %v4095_v29, %v4031_v46  ;;  %v1274_v62 = vld [vmem:[#allocation7 + $0xe68] sm:$0xff]  ;;  %v10678_v46 = vld [vmem:[#allocation121_spill] sm:$0xff] }
 0x65e   :  { %4419 = vmatmul.f32.gmra.mxu2 %v10611_v59  ;;  %4582 = vmatpush.msrb.mxu1 %v1274_v62  ;;  %v1155_v59 = vld [vmem:[#allocation7 + $0xab0] sm:$0xff] }
 0x65f   :  { %v10679_v7 = vld [vmem:[#allocation119_spill] sm:$0xff]  ;;  %4518 = vmatpush.msrb.mxu0 %v1155_v59 }
 0x660   :  { %v3968_v28 = vpop.f32.mrf.mxu3  ;;  %4583 = vmatpush.msrb.mxu1 %v1267_v12  ;;  %v4890_v12 = vld [vmem:[#allocation10 + $0x78] sm:$0xff] }
 0x661   :  { %v3969_v26 = vadd.f32 %v3968_v28, %v3904_v1  ;;  %v4160_v35 = vpop.f32.mrf.mxu2  ;;  %v4036_v3 = vpop.f32.mrf.mxu0  ;;  %5027 = vmatpush.msra.mxu0 %v4890_v12 }
 0x662   :  { %v9014_v8 = vadd.f32 %v4160_v35, %v4096_v22  ;;  %v4101_v15 = vpop.f32.mrf.mxu1  ;;  %v1512_v22 = vld [vmem:[#allocation7 + $0x15d8] sm:$0xff] }
 0x663   :  { %v4034_v29 = vadd.f32 %v4033_v25, %v3969_v26  ;;  %4710 = vmatpush.msra.mxu3 %v1512_v22 }
 0x664   :  { %6083 = vmatmul.msk.f32.gmra.mxu0 %vm1529_vm2, %v10678_v46 }
 0x665   :  { %4230 = vmatmul.f32.gmra.mxu3 %v10679_v7  ;;  %4360 = vmatmul.f32.gmra.mxu1 %v10680_v23  ;;  %v4099_v31 = vadd.f32 %v4098_v30, %v4034_v29  ;;  %v10681_v30 = vld [vmem:[#allocation124_spill] sm:$0xff]  ;;  %v10683_v29 = vld [vmem:[#allocation74_spill] sm:$0xff] }
 0x666   :  { %4422 = vmatmul.f32.gmra.mxu2 %v10617_v27  ;;  %v10682_v27 = vld [vmem:[#allocation122_spill] sm:$0xff] }
 0x668   :  { %v3971_v25 = vpop.f32.mrf.mxu3 }
 0x669   :  { %v3972_v1 = vadd.f32 %v3971_v25, %v3907_v42  ;;  %v4163_v28 = vpop.f32.mrf.mxu2  ;;  %v4039_v26 = vpop.f32.mrf.mxu0 }
 0x66a   :  { %v9023_v35 = vadd.f32 %v4163_v28, %v4099_v31  ;;  %v4104_v62 = vpop.f32.mrf.mxu1 }
 0x66b   :  { %v4037_v23 = vadd.f32 %v4036_v3, %v3972_v1 }
 0x66c   :  { %6084 = vmatmul.msk.f32.gmra.mxu0 %vm1529_vm2, %v10681_v30  ;;  %v4906_v30 = vld [vmem:[#allocation10 + $0xf8] sm:$0xff] }
 0x66d   :  { %4233 = vmatmul.f32.gmra.mxu3 %v10682_v27  ;;  %4363 = vmatmul.f32.gmra.mxu1 %v10683_v29  ;;  %v4102_v59 = vadd.f32 %v4101_v15, %v4037_v23  ;;  %v10684_v29 = vld [vmem:[#allocation127_spill] sm:$0xff]  ;;  %v4921_v15 = vld [vmem:[#allocation10 + $0x170] sm:$0xff] }
 0x66e   :  { %4425 = vmatmul.f32.gmra.mxu2 %v10622_v57  ;;  %5092 = vmatpush.msra.mxu1 %v4906_v30  ;;  %v10685_v57 = vld [vmem:[#allocation125_spill] sm:$0xff] }
 0x66f   :  { %v4889_v23 = vld [vmem:[#allocation10 + $0x70] sm:$0xff]  ;;  %5158 = vmatpush.msra.mxu2 %v4921_v15 }
 0x670   :  { %v3974_v31 = vpop.f32.mrf.mxu3  ;;  %5028 = vmatpush.msra.mxu0 %v4889_v23 }
 0x671   :  { %v3975_v22 = vadd.f32 %v3974_v31, %v3910_v38  ;;  %v4166_v3 = vpop.f32.mrf.mxu2  ;;  %v4042_v42 = vpop.f32.mrf.mxu0 }
 0x672   :  { %v9032_v25 = vadd.f32 %v4166_v3, %v4102_v59  ;;  %v4107_v1 = vpop.f32.mrf.mxu1  ;;  %v3913_v59 = vadd.f32 %v8902_v55, %v8904_v17  ;;  %v4905_v3 = vld [vmem:[#allocation10 + $0xf0] sm:$0xff]  ;;  %v4920_v55 = vld [vmem:[#allocation10 + $0x168] sm:$0xff] }
 0x673   :  { %v4040_v28 = vadd.f32 %v4039_v26, %v3975_v22  ;;  %5093 = vmatpush.msra.mxu1 %v4905_v3  ;;  %5159 = vmatpush.msra.mxu2 %v4920_v55 }
 0x674   :  { %6085 = vmatmul.msk.f32.gmra.mxu0 %vm1529_vm2, %v10684_v29 }
 0x675   :  { %4236 = vmatmul.f32.gmra.mxu3 %v10685_v57  ;;  %4366 = vmatmul.f32.gmra.mxu1 %v10527_v43  ;;  %v4105_v48 = vadd.f32 %v4104_v62, %v4040_v28  ;;  %v10686_v43 = vld [vmem:[#allocation128_spill] sm:$0xff]  ;;  %v3916_v28 = vadd.f32 %v8915_v33, %v8904_v17  ;;  %v1505_v33 = vld [vmem:[#allocation7 + $0x15a0] sm:$0xff] }
 0x676   :  { %4428 = vmatmul.f32.gmra.mxu2 %v10627_v37  ;;  %v4888_v62 = vld [vmem:[#allocation10 + $0x68] sm:$0xff]  ;;  %4711 = vmatpush.msra.mxu3 %v1505_v33 }
 0x677   :  { %5029 = vmatpush.msra.mxu0 %v4888_v62 }
 0x678   :  { %v3977_v26 = vpop.f32.mrf.mxu3 }
 0x679   :  { %v3978_v20 = vadd.f32 %v3977_v26, %v3913_v59  ;;  %v4169_v12 = vpop.f32.mrf.mxu2  ;;  %v4045_v38 = vpop.f32.mrf.mxu0 }
 0x67a   :  { %v9041_v31 = vadd.f32 %v4169_v12, %v4105_v48  ;;  %v4110_v30 = vpop.f32.mrf.mxu1  ;;  %v4887_v12 = vld [vmem:[#allocation10 + $0x60] sm:$0xff] }
 0x67b   :  { %v4043_v22 = vadd.f32 %v4042_v42, %v3978_v20  ;;  %5030 = vmatpush.msra.mxu0 %v4887_v12 }
 0x67c   :  { %6086 = vmatmul.msk.f32.gmra.mxu0 %vm1529_vm2, %v10591_v50 }
 0x67d   :  { %4239 = vmatmul.f32.gmra.mxu3 %v10686_v43  ;;  %4369 = vmatmul.f32.gmra.mxu1 %v10535_v60  ;;  %v4108_v37 = vadd.f32 %v4107_v1, %v4043_v22  ;;  %v4904_v60 = vld [vmem:[#allocation10 + $0xe8] sm:$0xff]  ;;  %v4919_v1 = vld [vmem:[#allocation10 + $0x160] sm:$0xff] }
 0x67e   :  { %4431 = vmatmul.f32.gmra.mxu2 %v10632_v24  ;;  %5094 = vmatpush.msra.mxu1 %v4904_v60  ;;  %v10687_v24 = vld [vmem:[#allocation21_spill] sm:$0xff] }
 0x67f   :  { %5160 = vmatpush.msra.mxu2 %v4919_v1 }
 0x680   :  { %v3980_v42 = vpop.f32.mrf.mxu3 }
 0x681   :  { %v3981_v48 = vadd.f32 %v3980_v42, %v3916_v28  ;;  %v4172_v15 = vpop.f32.mrf.mxu2  ;;  %v4260_v23 = vpop.f32.mrf.mxu0 }
 0x682   :  { %v9050_v59 = vadd.f32 %v4172_v15, %v4108_v37  ;;  %v9052_v26 = vpop.f32.mrf.mxu1 }
 0x683   :  { %v4046_v20 = vadd.f32 %v4045_v38, %v3981_v48 }
 0x684   :  { %4519 = vmatmul.f32.vlgmr.msrb.gmra.mxu0 %v10383_v2 }
 0x685   :  { %4454 = vmatmul.f32.vlgmr.msrb.gmra.mxu3 %v10687_v24  ;;  %4584 = vmatmul.f32.vlgmr.msrb.gmra.mxu1 %v10540_v63  ;;  %v4111_v17 = vadd.f32 %v4110_v30, %v4046_v20  ;;  %v4903_v63 = vld [vmem:[#allocation10 + $0xe0] sm:$0xff]  ;;  %v4886_v30 = vld [vmem:[#allocation10 + $0x58] sm:$0xff] }
 0x686   :  { %4434 = vmatmul.f32.gmra.mxu2 %v10636_v39  ;;  %5095 = vmatpush.msra.mxu1 %v4903_v63  ;;  %v4918_v39 = vld [vmem:[#allocation10 + $0x158] sm:$0xff]  ;;  %v4915_v63 = vld [vmem:[#allocation10 + $0x140] sm:$0xff] }
 0x687   :  { %5161 = vmatpush.msra.mxu2 %v4918_v39  ;;  %5031 = vmatpush.msra.mxu0 %v4886_v30 }
 0x688   :  { %v4195_v22 = vpop.f32.mrf.mxu3 }
 0x689   :  { %v4175_v3 = vpop.f32.mrf.mxu2  ;;  %v4196_v38 = vadd.f32 %v4195_v22, %v8924_v41  ;;  %v4263_v37 = vpop.f32.mrf.mxu0 }
 0x68a   :  { %v9059_v2 = vadd.f32 %v4175_v3, %v4111_v17  ;;  %v9061_v55 = vpop.f32.mrf.mxu1  ;;  %v4901_v17 = vld [vmem:[#allocation10 + $0xd0] sm:$0xff]  ;;  %v4900_v3 = vld [vmem:[#allocation10 + $0xc8] sm:$0xff] }
 0x68b   :  { %v9063_v62 = vadd.f32 %v4260_v23, %v4196_v38  ;;  %v4902_v23 = vld [vmem:[#allocation10 + $0xd8] sm:$0xff] }
 0x68c   :  { %4522 = vmatmul.f32.gmra.mxu0 %v10388_v52  ;;  %5096 = vmatpush.msra.mxu1 %v4902_v23  ;;  %v10690_v38 = vld [vmem:[#allocation37_spill] sm:$0xff] }
 0x68d   :  { %4457 = vmatmul.f32.gmra.mxu3 %v10274_v40  ;;  %4587 = vmatmul.f32.gmra.mxu1 %v10546_v10  ;;  %v4917_v40 = vld [vmem:[#allocation10 + $0x150] sm:$0xff] }
 0x68e   :  { %4649 = vmatmul.f32.vlgmr.msrb.gmra.mxu2 %v10641_v18  ;;  %v4885_v10 = vld [vmem:[#allocation10 + $0x50] sm:$0xff]  ;;  %5097 = vmatpush.msra.mxu1 %v4901_v17 }
 0x68f   :  { %5162 = vmatpush.msra.mxu2 %v4917_v40  ;;  %5032 = vmatpush.msra.mxu0 %v4885_v10  ;;  %v4899_v40 = vld [vmem:[#allocation10 + $0xc0] sm:$0xff] }
 0x690   :  { %v4198_v41 = vpop.f32.mrf.mxu3  ;;  %5098 = vmatpush.msra.mxu1 %v4900_v3  ;;  %v10692_v10 = vld [vmem:[#allocation47_spill] sm:$0xff]  ;;  %v10696_v3 = vld [vmem:[#allocation46_spill] sm:$0xff] }
 0x691   :  { %v4199_v28 = vadd.f32 %v4198_v41, %v8933_v13  ;;  %v9070_v42 = vpop.f32.mrf.mxu2  ;;  %v4266_v48 = vpop.f32.mrf.mxu0 }
 0x692   :  { %v9072_v15 = vpop.f32.mrf.mxu1  ;;  %5099 = vmatpush.msra.mxu1 %v4899_v40  ;;  %v10699_v40 = vld [vmem:[#allocation50_spill] sm:$0xff] }
 0x693   :  { %v9074_v52 = vadd.f32 %v4263_v37, %v4199_v28  ;;  %v1498_v37 = vld [vmem:[#allocation7 + $0x1568] sm:$0xff] }
 0x694   :  { %4525 = vmatmul.f32.gmra.mxu0 %v10392_v51  ;;  %4712 = vmatpush.msra.mxu3 %v1498_v37 }
 0x695   :  { %4460 = vmatmul.f32.gmra.mxu3 %v10278_v32  ;;  %4590 = vmatmul.f32.gmra.mxu1 %v10550_v61  ;;  %v10688_v32 = vld [vmem:[#allocation95_spill] sm:$0xff] }
 0x696   :  { %4652 = vmatmul.f32.gmra.mxu2 %v10646_v16  ;;  %v4916_v61 = vld [vmem:[#allocation10 + $0x148] sm:$0xff] }
 0x697   :  { %v4884_v16 = vld [vmem:[#allocation10 + $0x48] sm:$0xff]  ;;  %5163 = vmatpush.msra.mxu2 %v4916_v61 }
 0x698   :  { %v4201_v18 = vpop.f32.mrf.mxu3  ;;  %5033 = vmatpush.msra.mxu0 %v4884_v16 }
 0x699   :  { %v4202_v13 = vadd.f32 %v4201_v18, %v8942_v34  ;;  %v9081_v20 = vpop.f32.mrf.mxu2  ;;  %v4269_v60 = vpop.f32.mrf.mxu0  ;;  %5164 = vmatpush.msra.mxu2 %v4915_v63  ;;  %v10694_v18 = vld [vmem:[#allocation100_spill] sm:$0xff] }
 0x69a   :  { %v9083_v24 = vpop.f32.mrf.mxu1 }
 0x69b   :  { %v9085_v51 = vadd.f32 %v4266_v48, %v4202_v13  ;;  %v4914_v13 = vld [vmem:[#allocation10 + $0x138] sm:$0xff] }
 0x69c   :  { %4528 = vmatmul.f32.gmra.mxu0 %v10397_v9  ;;  %5165 = vmatpush.msra.mxu2 %v4914_v13 }
 0x69d   :  { %4463 = vmatmul.f32.gmra.mxu3 %v10282_v0  ;;  %4593 = vmatmul.f32.gmra.mxu1 %v10688_v32  ;;  %v10689_v0 = vld [vmem:[#allocation43_spill] sm:$0xff] }
 0x69e   :  { %4655 = vmatmul.f32.gmra.mxu2 %v10649_v44  ;;  %v10691_v44 = vld [vmem:[#allocation98_spill] sm:$0xff] }
 0x6a0   :  { %v4204_v34 = vpop.f32.mrf.mxu3 }
 0x6a1   :  { %v4205_v33 = vadd.f32 %v4204_v34, %v8951_v21  ;;  %v9092_v1 = vpop.f32.mrf.mxu2  ;;  %v4272_v12 = vpop.f32.mrf.mxu0  ;;  %v4883_v21 = vld [vmem:[#allocation10 + $0x40] sm:$0xff] }
 0x6a2   :  { %v9094_v22 = vpop.f32.mrf.mxu1  ;;  %5034 = vmatpush.msra.mxu0 %v4883_v21 }
 0x6a3   :  { %v9096_v9 = vadd.f32 %v4269_v60, %v4205_v33  ;;  %v4882_v60 = vld [vmem:[#allocation10 + $0x38] sm:$0xff] }
 0x6a4   :  { %4531 = vmatmul.f32.gmra.mxu0 %v10689_v0  ;;  %v4898_v33 = vld [vmem:[#allocation10 + $0xb8] sm:$0xff]  ;;  %v4913_v0 = vld [vmem:[#allocation10 + $0x130] sm:$0xff] }
 0x6a5   :  { %4466 = vmatmul.f32.gmra.mxu3 %v10690_v38  ;;  %4596 = vmatmul.f32.gmra.mxu1 %v10691_v44  ;;  %v4881_v38 = vld [vmem:[#allocation10 + $0x30] sm:$0xff] }
 0x6a6   :  { %4658 = vmatmul.f32.gmra.mxu2 %v10652_v56  ;;  %v10693_v56 = vld [vmem:[#allocation42_spill] sm:$0xff]  ;;  %5035 = vmatpush.msra.mxu0 %v4882_v60 }
 0x6a7   :  { %5100 = vmatpush.msra.mxu1 %v4898_v33  ;;  %5166 = vmatpush.msra.mxu2 %v4913_v0  ;;  %v10701_v33 = vld [vmem:[#allocation60_spill] sm:$0xff] }
 0x6a8   :  { %v4207_v39 = vpop.f32.mrf.mxu3  ;;  %5036 = vmatpush.msra.mxu0 %v4881_v38 }
 0x6a9   :  { %v4208_v30 = vadd.f32 %v4207_v39, %v8960_v47  ;;  %v9103_v41 = vpop.f32.mrf.mxu2  ;;  %v4275_v28 = vpop.f32.mrf.mxu0 }
 0x6aa   :  { %v9105_v48 = vpop.f32.mrf.mxu1 }
 0x6ab   :  { %v9107_v23 = vadd.f32 %v4272_v12, %v4208_v30  ;;  %v10695_v12 = vld [vmem:[#allocation51_spill] sm:$0xff]  ;;  %v4897_v30 = vld [vmem:[#allocation10 + $0xb0] sm:$0xff] }
 0x6ac   :  { %4534 = vmatmul.f32.gmra.mxu0 %v10692_v10  ;;  %5101 = vmatpush.msra.mxu1 %v4897_v30  ;;  %v4912_v10 = vld [vmem:[#allocation10 + $0x128] sm:$0xff] }
 0x6ad   :  { %4469 = vmatmul.f32.gmra.mxu3 %v10693_v56  ;;  %4599 = vmatmul.f32.gmra.mxu1 %v10694_v18  ;;  %v4880_v56 = vld [vmem:[#allocation10 + $0x28] sm:$0xff] }
 0x6ae   :  { %4661 = vmatmul.f32.gmra.mxu2 %v10655_v4  ;;  %v10697_v4 = vld [vmem:[#allocation103_spill] sm:$0xff]  ;;  %5037 = vmatpush.msra.mxu0 %v4880_v56  ;;  %v4878_v56 = vld [vmem:[#allocation10 + $0x18] sm:$0xff] }
 0x6af   :  { %5167 = vmatpush.msra.mxu2 %v4912_v10  ;;  %v4910_v10 = vld [vmem:[#allocation10 + $0x118] sm:$0xff] }
 0x6b0   :  { %v4210_v47 = vpop.f32.mrf.mxu3 }
 0x6b1   :  { %v4211_v17 = vadd.f32 %v4210_v47, %v8969_v49  ;;  %v9114_v32 = vpop.f32.mrf.mxu2  ;;  %v4278_v61 = vpop.f32.mrf.mxu0 }
 0x6b2   :  { %v9116_v16 = vpop.f32.mrf.mxu1 }
 0x6b3   :  { %v9118_v34 = vadd.f32 %v4275_v28, %v4211_v17  ;;  %v10698_v28 = vld [vmem:[#allocation55_spill] sm:$0xff] }
 0x6b4   :  { %4537 = vmatmul.f32.gmra.mxu0 %v10695_v12  ;;  %v10702_v12 = vld [vmem:[#allocation54_spill] sm:$0xff] }
 0x6b5   :  { %4472 = vmatmul.f32.gmra.mxu3 %v10696_v3  ;;  %4602 = vmatmul.f32.gmra.mxu1 %v10697_v4  ;;  %v1491_v3 = vld [vmem:[#allocation7 + $0x1530] sm:$0xff]  ;;  %v4911_v4 = vld [vmem:[#allocation10 + $0x120] sm:$0xff] }
 0x6b6   :  { %4664 = vmatmul.f32.gmra.mxu2 %v10658_v5  ;;  %v10700_v5 = vld [vmem:[#allocation106_spill] sm:$0xff]  ;;  %4713 = vmatpush.msra.mxu3 %v1491_v3  ;;  %v10709_v3 = vld [vmem:[#allocation63_spill] sm:$0xff] }
 0x6b7   :  { %5168 = vmatpush.msra.mxu2 %v4911_v4  ;;  %v4909_v4 = vld [vmem:[#allocation10 + $0x110] sm:$0xff] }
 0x6b8   :  { %v4213_v49 = vpop.f32.mrf.mxu3 }
 0x6b9   :  { %v4214_v44 = vadd.f32 %v4213_v49, %v8978_v53  ;;  %v9125_v37 = vpop.f32.mrf.mxu2  ;;  %v4281_v63 = vpop.f32.mrf.mxu0  ;;  %5169 = vmatpush.msra.mxu2 %v4910_v10  ;;  %v10713_v10 = vld [vmem:[#allocation67_spill] sm:$0xff] }
 0x6ba   :  { %v9127_v21 = vpop.f32.mrf.mxu1 }
 0x6bb   :  { %v9129_v39 = vadd.f32 %v4278_v61, %v4214_v44  ;;  %v4896_v61 = vld [vmem:[#allocation10 + $0xa8] sm:$0xff]  ;;  %5170 = vmatpush.msra.mxu2 %v4909_v4  ;;  %v4875_v4 = vld [vmem:[#allocation10] sm:$0xff] }
 0x6bc   :  { %4540 = vmatmul.f32.gmra.mxu0 %v10698_v28  ;;  %5102 = vmatpush.msra.mxu1 %v4896_v61  ;;  %v4895_v28 = vld [vmem:[#allocation10 + $0xa0] sm:$0xff] }
 0x6bd   :  { %4475 = vmatmul.f32.gmra.mxu3 %v10699_v40  ;;  %4605 = vmatmul.f32.gmra.mxu1 %v10700_v5  ;;  %v10704_v40 = vld [vmem:[#allocation64_spill] sm:$0xff]  ;;  %v10706_v5 = vld [vmem:[#allocation111_spill] sm:$0xff] }
 0x6be   :  { %4667 = vmatmul.f32.gmra.mxu2 %v10661_v11  ;;  %v10703_v11 = vld [vmem:[#allocation109_spill] sm:$0xff]  ;;  %5103 = vmatpush.msra.mxu1 %v4895_v28 }
 0x6c0   :  { %v4216_v53 = vpop.f32.mrf.mxu3 }
 0x6c1   :  { %v4217_v18 = vadd.f32 %v4216_v53, %v8987_v6  ;;  %v9136_v13 = vpop.f32.mrf.mxu2  ;;  %v4284_v60 = vpop.f32.mrf.mxu0  ;;  %v4879_v6 = vld [vmem:[#allocation10 + $0x20] sm:$0xff] }
 0x6c2   :  { %v9138_v47 = vpop.f32.mrf.mxu1  ;;  %5038 = vmatpush.msra.mxu0 %v4879_v6  ;;  %v4877_v6 = vld [vmem:[#allocation10 + $0x10] sm:$0xff] }
 0x6c3   :  { %v9140_v17 = vadd.f32 %v4281_v63, %v4217_v18 }
 0x6c4   :  { %4543 = vmatmul.f32.gmra.mxu0 %v10701_v33 }
 0x6c5   :  { %4478 = vmatmul.f32.gmra.mxu3 %v10702_v12  ;;  %4608 = vmatmul.f32.gmra.mxu1 %v10703_v11  ;;  %v4894_v12 = vld [vmem:[#allocation10 + $0x98] sm:$0xff]  ;;  %v10708_v11 = vld [vmem:[#allocation68_spill] sm:$0xff] }
 0x6c6   :  { %4670 = vmatmul.f32.gmra.mxu2 %v10664_v58  ;;  %v10705_v58 = vld [vmem:[#allocation59_spill] sm:$0xff]  ;;  %5039 = vmatpush.msra.mxu0 %v4878_v56 }
 0x6c7   :  { %5104 = vmatpush.msra.mxu1 %v4894_v12  ;;  %v4908_v56 = vld [vmem:[#allocation10 + $0x108] sm:$0xff] }
 0x6c8   :  { %v4219_v0 = vpop.f32.mrf.mxu3  ;;  %5040 = vmatpush.msra.mxu0 %v4877_v6  ;;  %5171 = vmatpush.msra.mxu2 %v4908_v56  ;;  %v10716_v6 = vld [vmem:[#allocation76_spill] sm:$0xff] }
 0x6c9   :  { %v4220_v38 = vadd.f32 %v4219_v0, %v8996_v54  ;;  %v9147_v49 = vpop.f32.mrf.mxu2  ;;  %v4287_v44 = vpop.f32.mrf.mxu0 }
 0x6ca   :  { %v9149_v63 = vpop.f32.mrf.mxu1 }
 0x6cb   :  { %v9151_v30 = vadd.f32 %v4284_v60, %v4220_v38 }
 0x6cc   :  { %4546 = vmatmul.f32.gmra.mxu0 %v10704_v40 }
 0x6cd   :  { %4481 = vmatmul.f32.gmra.mxu3 %v10705_v58  ;;  %4611 = vmatmul.f32.gmra.mxu1 %v10706_v5  ;;  %v4893_v58 = vld [vmem:[#allocation10 + $0x90] sm:$0xff] }
 0x6ce   :  { %4673 = vmatmul.f32.gmra.mxu2 %v10667_v14  ;;  %v10710_v14 = vld [vmem:[#allocation114_spill] sm:$0xff]  ;;  %v10712_v5 = vld [vmem:[#allocation72_spill] sm:$0xff]  ;;  %5105 = vmatpush.msra.mxu1 %v4893_v58 }
 0x6cf   :  { %v10719_v58 = vld [vmem:[#allocation116_spill] sm:$0xff] }
 0x6d0   :  { %v4222_v54 = vpop.f32.mrf.mxu3 }
 0x6d1   :  { %v4223_v53 = vadd.f32 %v4222_v54, %v9005_v36  ;;  %v9158_v18 = vpop.f32.mrf.mxu2  ;;  %v4290_v60 = vpop.f32.mrf.mxu0  ;;  %v4876_v54 = vld [vmem:[#allocation10 + $0x8] sm:$0xff] }
 0x6d2   :  { %v9160_v61 = vpop.f32.mrf.mxu1  ;;  %5041 = vmatpush.msra.mxu0 %v4876_v54 }
 0x6d3   :  { %v9162_v33 = vadd.f32 %v4287_v44, %v4223_v53 }
 0x6d4   :  { %4549 = vmatmul.f32.gmra.mxu0 %v10708_v11 }
 0x6d5   :  { %10707 = vst [vmem:[#allocation65_spill] sm:$0xff] %v9162_v33  ;;  %4484 = vmatmul.f32.gmra.mxu3 %v10709_v3  ;;  %4614 = vmatmul.f32.gmra.mxu1 %v10710_v14  ;;  %v4892_v3 = vld [vmem:[#allocation10 + $0x88] sm:$0xff] }
 0x6d6   :  { %4676 = vmatmul.f32.gmra.mxu2 %v10670_v45  ;;  %v10714_v45 = vld [vmem:[#allocation117_spill] sm:$0xff]  ;;  %5106 = vmatpush.msra.mxu1 %v4892_v3  ;;  %v10722_v3 = vld [vmem:[#allocation75_spill] sm:$0xff] }
 0x6d7   :  { %5042 = vmatpush.msra.mxu0 %v4875_v4  ;;  %v10723_v4 = vld [vmem:[#allocation123_spill] sm:$0xff] }
 0x6d8   :  { %v4225_v36 = vpop.f32.mrf.mxu3 }
 0x6d9   :  { %v4226_v0 = vadd.f32 %v4225_v36, %v9014_v8  ;;  %v9169_v38 = vpop.f32.mrf.mxu2  ;;  %v4293_v44 = vpop.f32.mrf.mxu0  ;;  %v10717_v36 = vld [vmem:[#allocation71_spill] sm:$0xff] }
 0x6da   :  { %v9171_v28 = vpop.f32.mrf.mxu1 }
 0x6db   :  { %v9173_v40 = vadd.f32 %v4290_v60, %v4226_v0  ;;  %v10718_v0 = vld [vmem:[#allocation120_spill] sm:$0xff] }
 0x6dc   :  { %4552 = vmatmul.f32.gmra.mxu0 %v10712_v5  ;;  %v4938_v5 = vld [vmem:[#allocation10 + $0x1f8] sm:$0xff] }
 0x6dd   :  { %10711 = vst [vmem:[#allocation69_spill] sm:$0xff] %v9173_v40  ;;  %4487 = vmatmul.f32.gmra.mxu3 %v10713_v10  ;;  %4617 = vmatmul.f32.gmra.mxu1 %v10714_v45  ;;  %v10742_v40 = vld [vmem:[#allocation155_spill] sm:$0xff] }
 0x6de   :  { %4679 = vmatmul.f32.gmra.mxu2 %v10673_v19  ;;  %v4891_v19 = vld [vmem:[#allocation10 + $0x80] sm:$0xff]  ;;  %5222 = vmatpush.msrb.mxu3 %v4938_v5  ;;  %v4772_v33 = vmax.f32 %v10742_v40, 0.0 }
 0x6df   :  { %5107 = vmatpush.msra.mxu1 %v4891_v19  ;;  %v4937_v19 = vld [vmem:[#allocation10 + $0x1f0] sm:$0xff] }
 0x6e0   :  { %v4228_v8 = vpop.f32.mrf.mxu3  ;;  %5223 = vmatpush.msrb.mxu3 %v4937_v19 }
 0x6e1   :  { %v4229_v53 = vadd.f32 %v4228_v8, %v9023_v35  ;;  %v9180_v12 = vpop.f32.mrf.mxu2  ;;  %v4296_v60 = vpop.f32.mrf.mxu0  ;;  %v4907_v35 = vld [vmem:[#allocation10 + $0x100] sm:$0xff] }
 0x6e2   :  { %v9182_v11 = vpop.f32.mrf.mxu1  ;;  %5172 = vmatpush.msra.mxu2 %v4907_v35 }
 0x6e3   :  { %v9184_v14 = vadd.f32 %v4293_v44, %v4229_v53  ;;  %v10721_v53 = vld [vmem:[#allocation80_spill] sm:$0xff] }
 0x6e4   :  { %4555 = vmatmul.f32.gmra.mxu0 %v10716_v6  ;;  %v4974_v6 = vld [vmem:[#allocation10 + $0x318] sm:$0xff] }
 0x6e5   :  { %10715 = vst [vmem:[#allocation73_spill] sm:$0xff] %v9184_v14  ;;  %4490 = vmatmul.f32.gmra.mxu3 %v10717_v36  ;;  %4620 = vmatmul.f32.gmra.mxu1 %v10718_v0  ;;  %v4954_v36 = vld [vmem:[#allocation10 + $0x278] sm:$0xff] }
 0x6e6   :  { %4682 = vmatmul.f32.gmra.mxu2 %v10719_v58  ;;  %5287 = vmatpush.msrb.mxu0 %v4954_v36  ;;  %v10738_v14 = vld [vmem:[#allocation157_spill] sm:$0xff] }
 0x6e7   :  { %5429 = vmatpush.msrb.mxu2 %v4974_v6 }
 0x6e8   :  { %v4231_v10 = vpop.f32.mrf.mxu3 }
 0x6e9   :  { %v4232_v44 = vadd.f32 %v4231_v10, %v9032_v25  ;;  %v9191_v45 = vpop.f32.mrf.mxu2  ;;  %v4299_v56 = vpop.f32.mrf.mxu0  ;;  %v4970_v10 = vld [vmem:[#allocation10 + $0x2f8] sm:$0xff] }
 0x6ea   :  { %v9193_v54 = vpop.f32.mrf.mxu1  ;;  %5352 = vmatpush.msrb.mxu1 %v4970_v10  ;;  %v10729_v10 = vld [vmem:[#allocation88_spill] sm:$0xff] }
 0x6eb   :  { %v9195_v8 = vadd.f32 %v4296_v60, %v4232_v44  ;;  %v10725_v44 = vld [vmem:[#allocation84_spill] sm:$0xff] }
 0x6ec   :  { %4558 = vmatmul.f32.gmra.mxu0 %v10721_v53  ;;  %v10727_v53 = vld [vmem:[#allocation126_spill] sm:$0xff] }
 0x6ed   :  { %10720 = vst [vmem:[#allocation77_spill] sm:$0xff] %v9195_v8  ;;  %4493 = vmatmul.f32.gmra.mxu3 %v10722_v3  ;;  %4623 = vmatmul.f32.gmra.mxu1 %v10723_v4  ;;  %v4936_v3 = vld [vmem:[#allocation10 + $0x1e8] sm:$0xff]  ;;  %v4953_v4 = vld [vmem:[#allocation10 + $0x270] sm:$0xff] }
 0x6ee   :  { %4685 = vmatmul.f32.gmra.mxu2 %v10679_v7  ;;  %v10726_v7 = vld [vmem:[#allocation79_spill] sm:$0xff]  ;;  %5224 = vmatpush.msrb.mxu3 %v4936_v3  ;;  %v6211_v3 = vld [vmem:[#allocation8] sm:$0x7f] }
 0x6ef   :  { %5288 = vmatpush.msrb.mxu0 %v4953_v4  ;;  %v9223_v4 = vperm.slane %v6211_v3, 6  ;;  %v10737_v8 = vld [vmem:[#allocation25_spill] sm:$0xff] }
 0x6f0   :  { %v4234_v25 = vpop.f32.mrf.mxu3 }
 0x6f1   :  { %v4235_v0 = vadd.f32 %v4234_v25, %v9041_v31  ;;  %v9202_v58 = vpop.f32.mrf.mxu2  ;;  %v4302_v60 = vpop.f32.mrf.mxu0 }
 0x6f2   :  { %v9204_v35 = vpop.f32.mrf.mxu1 }
 0x6f3   :  { %v9206_v5 = vadd.f32 %v4299_v56, %v4235_v0  ;;  %v4969_v0 = vld [vmem:[#allocation10 + $0x2f0] sm:$0xff] }
 0x6f4   :  { %4561 = vmatmul.f32.gmra.mxu0 %v10725_v44  ;;  %5353 = vmatpush.msrb.mxu1 %v4969_v0  ;;  %v10730_v44 = vld [vmem:[#allocation83_spill] sm:$0xff] }
 0x6f5   :  { %10724 = vst [vmem:[#allocation82_spill] sm:$0xff] %v9206_v5  ;;  %4496 = vmatmul.f32.gmra.mxu3 %v10726_v7  ;;  %4626 = vmatmul.f32.gmra.mxu1 %v10727_v53  ;;  %v4935_v7 = vld [vmem:[#allocation10 + $0x1e0] sm:$0xff]  ;;  %v4952_v53 = vld [vmem:[#allocation10 + $0x268] sm:$0xff] }
 0x6f6   :  { %4688 = vmatmul.f32.gmra.mxu2 %v10682_v27  ;;  %v10731_v27 = vld [vmem:[#allocation129_spill] sm:$0xff]  ;;  %5225 = vmatpush.msrb.mxu3 %v4935_v7  ;;  %v10732_v0 = vld [vmem:[#allocation131_spill] sm:$0xff]  ;;  %v4326_v7 = vadd.f32 %v9052_v26, %v9223_v4 }
 0x6f7   :  { %5289 = vmatpush.msrb.mxu0 %v4952_v53  ;;  %v10735_v53 = vld [vmem:[#allocation87_spill] sm:$0xff] }
 0x6f8   :  { %v4237_v31 = vpop.f32.mrf.mxu3  ;;  %v4391_v3 = vadd.f32 %v9070_v42, %v4326_v7  ;;  %v4329_v42 = vadd.f32 %v9061_v55, %v9223_v4  ;;  %v10739_v7 = vld [vmem:[#allocation90_spill] sm:$0xff] }
 0x6f9   :  { %v4238_v6 = vadd.f32 %v4237_v31, %v9050_v59  ;;  %v9213_v19 = vpop.f32.mrf.mxu2  ;;  %v4305_v56 = vpop.f32.mrf.mxu0 }
 0x6fa   :  { %v9215_v36 = vpop.f32.mrf.mxu1 }
 0x6fb   :  { %v9217_v25 = vadd.f32 %v4302_v60, %v4238_v6 }
 0x6fc   :  { %4564 = vmatmul.f32.gmra.mxu0 %v10729_v10  ;;  %v4763_v10 = vmax.f32 %v10732_v0, 0.0 }
 0x6fd   :  { %10728 = vst [vmem:[#allocation85_spill] sm:$0xff] %v9217_v25  ;;  %4499 = vmatmul.f32.gmra.mxu3 %v10730_v44  ;;  %4629 = vmatmul.f32.gmra.mxu1 %v10731_v27  ;;  %v10733_v25 = vld [vmem:[#allocation144_spill] sm:$0xff] }
 0x6fe   :  { %4691 = vmatmul.f32.gmra.mxu2 %v10685_v57  ;;  %v4764_v27 = vmax.f32 %v10733_v25, 0.0  ;;  %v4968_v57 = vld [vmem:[#allocation10 + $0x2e8] sm:$0xff] }
 0x6ff   :  { %5354 = vmatpush.msrb.mxu1 %v4968_v57  ;;  %v10736_v57 = vld [vmem:[#allocation27_spill] sm:$0xff] }
 0x700   :  { %v4240_v59 = vpop.f32.mrf.mxu3  ;;  %v4770_v26 = vmax.f32 %v10736_v57, 0.0 }
 0x701   :  { %v4241_v60 = vadd.f32 %v4240_v59, %v9059_v2  ;;  %v9226_v31 = vpop.f32.mrf.mxu2  ;;  %v4520_v6 = vpop.f32.mrf.mxu0  ;;  %v4934_v2 = vld [vmem:[#allocation10 + $0x1d8] sm:$0xff]  ;;  %v4951_v59 = vld [vmem:[#allocation10 + $0x260] sm:$0xff] }
 0x702   :  { %v4585_v44 = vpop.f32.mrf.mxu1  ;;  %5226 = vmatpush.msrb.mxu3 %v4934_v2  ;;  %5290 = vmatpush.msrb.mxu0 %v4951_v59  ;;  %v4973_v59 = vld [vmem:[#allocation10 + $0x310] sm:$0xff] }
 0x703   :  { %v9230_v5 = vadd.f32 %v4305_v56, %v4241_v60  ;;  %5430 = vmatpush.msrb.mxu2 %v4973_v59  ;;  %v4932_v59 = vld [vmem:[#allocation10 + $0x1c8] sm:$0xff] }
 0x704   :  { %5043 = vmatmul.f32.vlgmr.msra.gmra.mxu0 %v4763_v10 }
 0x705   :  { %10734 = vst [vmem:[#allocation20_spill] sm:$0xff] %v9230_v5  ;;  %6087 = vmatmul.msk.f32.vlgmr.msra.gmra.mxu3 %vm1529_vm2, %v10735_v53  ;;  %5108 = vmatmul.f32.vlgmr.msra.gmra.mxu1 %v4764_v27  ;;  %v4771_v53 = vmax.f32 %v10737_v8, 0.0  ;;  %v4967_v27 = vld [vmem:[#allocation10 + $0x2e0] sm:$0xff] }
 0x706   :  { %4694 = vmatmul.f32.gmra.mxu2 %v10686_v43  ;;  %v4765_v43 = vmax.f32 %v10738_v14, 0.0  ;;  %5355 = vmatpush.msrb.mxu1 %v4967_v27  ;;  %v10740_v27 = vld [vmem:[#allocation31_spill] sm:$0xff] }
 0x708   :  { %v4455_v56 = vpop.f32.mrf.mxu3 }
 0x709   :  { %v9238_v25 = vpop.f32.mrf.mxu2  ;;  %v4456_v60 = vadd.f32 %v4455_v56, %v4391_v3  ;;  %v4523_v0 = vpop.f32.mrf.mxu0  ;;  %v4933_v3 = vld [vmem:[#allocation10 + $0x1d0] sm:$0xff]  ;;  %v4950_v56 = vld [vmem:[#allocation10 + $0x258] sm:$0xff] }
 0x70a   :  { %v4588_v10 = vpop.f32.mrf.mxu1  ;;  %5227 = vmatpush.msrb.mxu3 %v4933_v3  ;;  %5291 = vmatpush.msrb.mxu0 %v4950_v56  ;;  %v4949_v3 = vld [vmem:[#allocation10 + $0x250] sm:$0xff] }
 0x70b   :  { %v4521_v5 = vadd.f32 %v4520_v6, %v4456_v60  ;;  %v4394_v6 = vadd.f32 %v9081_v20, %v4329_v42  ;;  %v4332_v20 = vadd.f32 %v9072_v15, %v9223_v4  ;;  %v10743_v42 = vld [vmem:[#allocation93_spill] sm:$0xff]  ;;  %v10744_v15 = vld [vmem:[#allocation35_spill] sm:$0xff] }
 0x70c   :  { %5046 = vmatmul.f32.gmra.mxu0 %v4770_v26  ;;  %5228 = vmatpush.msrb.mxu3 %v4932_v59 }
 0x70d   :  { %6088 = vmatmul.msk.f32.gmra.mxu3 %vm1529_vm2, %v10739_v7  ;;  %5111 = vmatmul.f32.gmra.mxu1 %v4771_v53  ;;  %v4586_v2 = vadd.f32 %v4585_v44, %v4521_v5  ;;  %v4777_v7 = vmax.f32 %v10740_v27, 0.0  ;;  %v10741_v5 = vld [vmem:[#allocation29_spill] sm:$0xff]  ;;  %v4784_v27 = vmax.f32 %v10744_v15, 0.0 }
 0x70e   :  { %5173 = vmatmul.f32.vlgmr.msra.gmra.mxu2 %v4765_v43  ;;  %v4778_v44 = vmax.f32 %v10741_v5, 0.0  ;;  %v4966_v43 = vld [vmem:[#allocation10 + $0x2d8] sm:$0xff]  ;;  %5292 = vmatpush.msrb.mxu0 %v4949_v3 }
 0x70f   :  { %5356 = vmatpush.msrb.mxu1 %v4966_v43  ;;  %v10745_v5 = vld [vmem:[#allocation33_spill] sm:$0xff]  ;;  %v10747_v43 = vld [vmem:[#allocation96_spill] sm:$0xff] }
 0x710   :  { %v4458_v8 = vpop.f32.mrf.mxu3 }
 0x711   :  { %v4459_v14 = vadd.f32 %v4458_v8, %v4394_v6  ;;  %v4650_v60 = vpop.f32.mrf.mxu2  ;;  %v4526_v57 = vpop.f32.mrf.mxu0 }
 0x712   :  { %v9248_v26 = vadd.f32 %v4650_v60, %v4586_v2  ;;  %v4591_v55 = vpop.f32.mrf.mxu1 }
 0x713   :  { %v4524_v53 = vadd.f32 %v4523_v0, %v4459_v14  ;;  %v4397_v0 = vadd.f32 %v9092_v1, %v4332_v20  ;;  %v4335_v1 = vadd.f32 %v9083_v24, %v9223_v4  ;;  %v10748_v24 = vld [vmem:[#allocation132_spill] sm:$0xff] }
 0x714   :  { %5049 = vmatmul.f32.gmra.mxu0 %v4777_v7  ;;  %v4791_v15 = vmax.f32 %v10748_v24, 0.0 }
 0x715   :  { %6089 = vmatmul.msk.f32.gmra.mxu3 %vm1529_vm2, %v10743_v42  ;;  %5114 = vmatmul.f32.gmra.mxu1 %v4778_v44  ;;  %v4589_v2 = vadd.f32 %v4588_v10, %v4524_v53  ;;  %v4785_v44 = vmax.f32 %v10745_v5, 0.0  ;;  %v4965_v10 = vld [vmem:[#allocation10 + $0x2d0] sm:$0xff]  ;;  %v4931_v42 = vld [vmem:[#allocation10 + $0x1c0] sm:$0xff] }
 0x716   :  { %5176 = vmatmul.f32.gmra.mxu2 %v4772_v33  ;;  %v10746_v33 = vld [vmem:[#allocation26_spill] sm:$0xff]  ;;  %5357 = vmatpush.msrb.mxu1 %v4965_v10  ;;  %v10749_v5 = vld [vmem:[#allocation145_spill] sm:$0xff] }
 0x717   :  { %v4779_v53 = vmax.f32 %v10746_v33, 0.0  ;;  %5229 = vmatpush.msrb.mxu3 %v4931_v42  ;;  %v10751_v33 = vld [vmem:[#allocation99_spill] sm:$0xff] }
 0x718   :  { %v4461_v56 = vpop.f32.mrf.mxu3 }
 0x719   :  { %v4462_v6 = vadd.f32 %v4461_v56, %v4397_v0  ;;  %v4653_v40 = vpop.f32.mrf.mxu2  ;;  %v4529_v8 = vpop.f32.mrf.mxu0 }
 0x71a   :  { %v9258_v14 = vadd.f32 %v4653_v40, %v4589_v2  ;;  %v4594_v60 = vpop.f32.mrf.mxu1  ;;  %v4948_v2 = vld [vmem:[#allocation10 + $0x248] sm:$0xff] }
 0x71b   :  { %v4527_v7 = vadd.f32 %v4526_v57, %v4462_v6  ;;  %v4400_v57 = vadd.f32 %v9103_v41, %v4335_v1  ;;  %5293 = vmatpush.msrb.mxu0 %v4948_v2  ;;  %v4338_v41 = vadd.f32 %v9094_v22, %v9223_v4  ;;  %v4930_v1 = vld [vmem:[#allocation10 + $0x1b8] sm:$0xff] }
 0x71c   :  { %5052 = vmatmul.f32.gmra.mxu0 %v4784_v27  ;;  %5230 = vmatpush.msrb.mxu3 %v4930_v1  ;;  %v10752_v22 = vld [vmem:[#allocation133_spill] sm:$0xff] }
 0x71d   :  { %6090 = vmatmul.msk.f32.gmra.mxu3 %vm1529_vm2, %v10747_v43  ;;  %5117 = vmatmul.f32.gmra.mxu1 %v4785_v44  ;;  %v4592_v20 = vadd.f32 %v4591_v55, %v4527_v7  ;;  %v4792_v44 = vmax.f32 %v10749_v5, 0.0  ;;  %v4964_v55 = vld [vmem:[#allocation10 + $0x2c8] sm:$0xff]  ;;  %v10750_v7 = vld [vmem:[#allocation30_spill] sm:$0xff] }
 0x71e   :  { %5179 = vmatmul.f32.gmra.mxu2 %v4779_v53  ;;  %v4786_v10 = vmax.f32 %v10750_v7, 0.0  ;;  %5358 = vmatpush.msrb.mxu1 %v4964_v55  ;;  %v4947_v43 = vld [vmem:[#allocation10 + $0x240] sm:$0xff]  ;;  %v10755_v55 = vld [vmem:[#allocation101_spill] sm:$0xff] }
 0x71f   :  { %5294 = vmatpush.msrb.mxu0 %v4947_v43 }
 0x720   :  { %v4464_v59 = vpop.f32.mrf.mxu3 }
 0x721   :  { %v4465_v3 = vadd.f32 %v4464_v59, %v4400_v57  ;;  %v4656_v0 = vpop.f32.mrf.mxu2  ;;  %v4532_v56 = vpop.f32.mrf.mxu0 }
 0x722   :  { %v9268_v6 = vadd.f32 %v4656_v0, %v4592_v20  ;;  %v4597_v40 = vpop.f32.mrf.mxu1  ;;  %v4798_v0 = vmax.f32 %v10752_v22, 0.0 }
 0x723   :  { %v4530_v27 = vadd.f32 %v4529_v8, %v4465_v3  ;;  %v4403_v8 = vadd.f32 %v9114_v32, %v4338_v41  ;;  %v4341_v32 = vadd.f32 %v9105_v48, %v9223_v4  ;;  %v4929_v41 = vld [vmem:[#allocation10 + $0x1b0] sm:$0xff] }
 0x724   :  { %5055 = vmatmul.f32.gmra.mxu0 %v4791_v15  ;;  %v10753_v15 = vld [vmem:[#allocation146_spill] sm:$0xff]  ;;  %5231 = vmatpush.msrb.mxu3 %v4929_v41 }
 0x725   :  { %6091 = vmatmul.msk.f32.gmra.mxu3 %vm1529_vm2, %v10751_v33  ;;  %5120 = vmatmul.f32.gmra.mxu1 %v4792_v44  ;;  %v4595_v53 = vadd.f32 %v4594_v60, %v4530_v27  ;;  %v4799_v5 = vmax.f32 %v10753_v15, 0.0  ;;  %v4963_v60 = vld [vmem:[#allocation10 + $0x2c0] sm:$0xff]  ;;  %v4946_v33 = vld [vmem:[#allocation10 + $0x238] sm:$0xff] }
 0x726   :  { %5182 = vmatmul.f32.gmra.mxu2 %v4786_v10  ;;  %v10754_v27 = vld [vmem:[#allocation34_spill] sm:$0xff]  ;;  %5359 = vmatpush.msrb.mxu1 %v4963_v60  ;;  %v4972_v10 = vld [vmem:[#allocation10 + $0x308] sm:$0xff] }
 0x727   :  { %v4793_v44 = vmax.f32 %v10754_v27, 0.0  ;;  %5431 = vmatpush.msrb.mxu2 %v4972_v10  ;;  %5295 = vmatpush.msrb.mxu0 %v4946_v33  ;;  %v10758_v15 = vld [vmem:[#allocation38_spill] sm:$0xff]  ;;  %v10759_v60 = vld [vmem:[#allocation104_spill] sm:$0xff] }
 0x728   :  { %v4467_v20 = vpop.f32.mrf.mxu3 }
 0x729   :  { %v4468_v42 = vadd.f32 %v4467_v20, %v4403_v8  ;;  %v4659_v2 = vpop.f32.mrf.mxu2  ;;  %v4535_v57 = vpop.f32.mrf.mxu0 }
 0x72a   :  { %v9278_v59 = vadd.f32 %v4659_v2, %v4595_v53  ;;  %v4600_v3 = vpop.f32.mrf.mxu1 }
 0x72b   :  { %v4533_v24 = vadd.f32 %v4532_v56, %v4468_v42  ;;  %v4406_v56 = vadd.f32 %v9125_v37, %v4341_v32  ;;  %v10756_v42 = vld [vmem:[#allocation134_spill] sm:$0xff]  ;;  %v4344_v37 = vadd.f32 %v9116_v16, %v9223_v4  ;;  %v4945_v32 = vld [vmem:[#allocation10 + $0x230] sm:$0xff]  ;;  %v10760_v16 = vld [vmem:[#allocation135_spill] sm:$0xff] }
 0x72c   :  { %5058 = vmatmul.f32.gmra.mxu0 %v4798_v0  ;;  %v4805_v2 = vmax.f32 %v10756_v42, 0.0 }
 0x72d   :  { %6092 = vmatmul.msk.f32.gmra.mxu3 %vm1529_vm2, %v10755_v55  ;;  %5123 = vmatmul.f32.gmra.mxu1 %v4799_v5  ;;  %v4598_v7 = vadd.f32 %v4597_v40, %v4533_v24  ;;  %v10757_v40 = vld [vmem:[#allocation147_spill] sm:$0xff]  ;;  %v4962_v24 = vld [vmem:[#allocation10 + $0x2b8] sm:$0xff]  ;;  %v4800_v5 = vmax.f32 %v10758_v15, 0.0 }
 0x72e   :  { %5185 = vmatmul.f32.gmra.mxu2 %v4793_v44  ;;  %v4806_v0 = vmax.f32 %v10757_v40, 0.0  ;;  %5360 = vmatpush.msrb.mxu1 %v4962_v24  ;;  %v4928_v44 = vld [vmem:[#allocation10 + $0x1a8] sm:$0xff]  ;;  %v4927_v24 = vld [vmem:[#allocation10 + $0x1a0] sm:$0xff] }
 0x72f   :  { %5232 = vmatpush.msrb.mxu3 %v4928_v44  ;;  %5296 = vmatpush.msrb.mxu0 %v4945_v32  ;;  %v10763_v40 = vld [vmem:[#allocation107_spill] sm:$0xff] }
 0x730   :  { %v4470_v53 = vpop.f32.mrf.mxu3  ;;  %v4944_v15 = vld [vmem:[#allocation10 + $0x228] sm:$0xff] }
 0x731   :  { %v4471_v1 = vadd.f32 %v4470_v53, %v4406_v56  ;;  %v4662_v43 = vpop.f32.mrf.mxu2  ;;  %v4538_v8 = vpop.f32.mrf.mxu0  ;;  %v4812_v53 = vmax.f32 %v10760_v16, 0.0  ;;  %5233 = vmatpush.msrb.mxu3 %v4927_v24  ;;  %5297 = vmatpush.msrb.mxu0 %v4944_v15  ;;  %v10766_v16 = vld [vmem:[#allocation162_spill] sm:$0xff] }
 0x732   :  { %v9288_v20 = vadd.f32 %v4662_v43, %v4598_v7  ;;  %v4603_v48 = vpop.f32.mrf.mxu1  ;;  %v10761_v43 = vld [vmem:[#allocation148_spill] sm:$0xff] }
 0x733   :  { %v4536_v22 = vadd.f32 %v4535_v57, %v4471_v1  ;;  %v4409_v57 = vadd.f32 %v9136_v13, %v4344_v37  ;;  %v4813_v42 = vmax.f32 %v10761_v43, 0.0  ;;  %v4347_v13 = vadd.f32 %v9127_v21, %v9223_v4  ;;  %v10764_v21 = vld [vmem:[#allocation136_spill] sm:$0xff] }
 0x734   :  { %5061 = vmatmul.f32.gmra.mxu0 %v4805_v2  ;;  %v10762_v2 = vld [vmem:[#allocation160_spill] sm:$0xff] }
 0x735   :  { %6093 = vmatmul.msk.f32.gmra.mxu3 %vm1529_vm2, %v10759_v60  ;;  %5126 = vmatmul.f32.gmra.mxu1 %v4806_v0  ;;  %v4601_v27 = vadd.f32 %v4600_v3, %v4536_v22  ;;  %v4961_v3 = vld [vmem:[#allocation10 + $0x2b0] sm:$0xff]  ;;  %v4807_v22 = vmax.f32 %v10762_v2, 0.0 }
 0x736   :  { %5188 = vmatmul.f32.gmra.mxu2 %v4800_v5  ;;  %5361 = vmatpush.msrb.mxu1 %v4961_v3  ;;  %v4943_v3 = vld [vmem:[#allocation10 + $0x220] sm:$0xff] }
 0x737   :  { %5298 = vmatpush.msrb.mxu0 %v4943_v3 }
 0x738   :  { %v4473_v55 = vpop.f32.mrf.mxu3 }
 0x739   :  { %v4474_v7 = vadd.f32 %v4473_v55, %v4409_v57  ;;  %v4665_v10 = vpop.f32.mrf.mxu2  ;;  %v4541_v41 = vpop.f32.mrf.mxu0  ;;  %v4819_v57 = vmax.f32 %v10764_v21, 0.0 }
 0x73a   :  { %v9298_v33 = vadd.f32 %v4665_v10, %v4601_v27  ;;  %v4606_v56 = vpop.f32.mrf.mxu1 }
 0x73b   :  { %v4539_v1 = vadd.f32 %v4538_v8, %v4474_v7  ;;  %v4412_v8 = vadd.f32 %v9147_v49, %v4347_v13  ;;  %v10765_v7 = vld [vmem:[#allocation149_spill] sm:$0xff]  ;;  %v4350_v49 = vadd.f32 %v9138_v47, %v9223_v4 }
 0x73c   :  { %5064 = vmatmul.f32.gmra.mxu0 %v4812_v53  ;;  %v4820_v10 = vmax.f32 %v10765_v7, 0.0  ;;  %v4814_v53 = vmax.f32 %v10766_v16, 0.0  ;;  %v10768_v47 = vld [vmem:[#allocation137_spill] sm:$0xff]  ;;  %v4971_v7 = vld [vmem:[#allocation10 + $0x300] sm:$0xff] }
 0x73d   :  { %6094 = vmatmul.msk.f32.gmra.mxu3 %vm1529_vm2, %v10763_v40  ;;  %5129 = vmatmul.f32.gmra.mxu1 %v4813_v42  ;;  %v4604_v0 = vadd.f32 %v4603_v48, %v4539_v1  ;;  %v4960_v48 = vld [vmem:[#allocation10 + $0x2a8] sm:$0xff]  ;;  %v10767_v1 = vld [vmem:[#allocation110_spill] sm:$0xff]  ;;  %v4826_v15 = vmax.f32 %v10768_v47, 0.0 }
 0x73e   :  { %5191 = vmatmul.f32.gmra.mxu2 %v4807_v22  ;;  %5362 = vmatpush.msrb.mxu1 %v4960_v48  ;;  %v4926_v42 = vld [vmem:[#allocation10 + $0x198] sm:$0xff] }
 0x73f   :  { %5234 = vmatpush.msrb.mxu3 %v4926_v42  ;;  %v4942_v48 = vld [vmem:[#allocation10 + $0x218] sm:$0xff]  ;;  %5432 = vmatpush.msrb.mxu2 %v4971_v7 }
 0x740   :  { %v4476_v5 = vpop.f32.mrf.mxu3  ;;  %5299 = vmatpush.msrb.mxu0 %v4942_v48  ;;  %v10772_v42 = vld [vmem:[#allocation138_spill] sm:$0xff]  ;;  %v10777_v48 = vld [vmem:[#allocation152_spill] sm:$0xff] }
 0x741   :  { %v4477_v37 = vadd.f32 %v4476_v5, %v4412_v8  ;;  %v4668_v60 = vpop.f32.mrf.mxu2  ;;  %v4544_v27 = vpop.f32.mrf.mxu0  ;;  %v10769_v5 = vld [vmem:[#allocation150_spill] sm:$0xff]  ;;  %v4833_v3 = vmax.f32 %v10772_v42, 0.0 }
 0x742   :  { %v9308_v44 = vadd.f32 %v4668_v60, %v4604_v0  ;;  %v4609_v32 = vpop.f32.mrf.mxu1  ;;  %v10770_v60 = vld [vmem:[#allocation164_spill] sm:$0xff] }
 0x743   :  { %v4542_v55 = vadd.f32 %v4541_v41, %v4477_v37  ;;  %v4415_v41 = vadd.f32 %v9158_v18, %v4350_v49  ;;  %v4827_v37 = vmax.f32 %v10769_v5, 0.0  ;;  %v4821_v21 = vmax.f32 %v10770_v60, 0.0  ;;  %v4924_v5 = vld [vmem:[#allocation10 + $0x188] sm:$0xff] }
 0x744   :  { %5067 = vmatmul.f32.gmra.mxu0 %v4819_v57  ;;  %v4353_v18 = vadd.f32 %v9149_v63, %v9223_v4  ;;  %v10771_v57 = vld [vmem:[#allocation112_spill] sm:$0xff] }
 0x745   :  { %6095 = vmatmul.msk.f32.gmra.mxu3 %vm1529_vm2, %v10767_v1  ;;  %5132 = vmatmul.f32.gmra.mxu1 %v4820_v10  ;;  %v4607_v43 = vadd.f32 %v4606_v56, %v4542_v55  ;;  %v4959_v56 = vld [vmem:[#allocation10 + $0x2a0] sm:$0xff]  ;;  %v4925_v10 = vld [vmem:[#allocation10 + $0x190] sm:$0xff] }
 0x746   :  { %5194 = vmatmul.f32.gmra.mxu2 %v4814_v53  ;;  %5363 = vmatpush.msrb.mxu1 %v4959_v56 }
 0x747   :  { %5235 = vmatpush.msrb.mxu3 %v4925_v10 }
 0x748   :  { %v4479_v2 = vpop.f32.mrf.mxu3 }
 0x749   :  { %v4480_v22 = vadd.f32 %v4479_v2, %v4415_v41  ;;  %v4671_v13 = vpop.f32.mrf.mxu2  ;;  %v4547_v40 = vpop.f32.mrf.mxu0  ;;  %5236 = vmatpush.msrb.mxu3 %v4924_v5 }
 0x74a   :  { %v9318_v0 = vadd.f32 %v4671_v13, %v4607_v43  ;;  %v4612_v24 = vpop.f32.mrf.mxu1  ;;  %v10774_v13 = vld [vmem:[#allocation166_spill] sm:$0xff] }
 0x74b   :  { %v4545_v8 = vadd.f32 %v4544_v27, %v4480_v22  ;;  %v4418_v27 = vadd.f32 %v9169_v38, %v4353_v18  ;;  %v4958_v22 = vld [vmem:[#allocation10 + $0x298] sm:$0xff]  ;;  %v4828_v47 = vmax.f32 %v10774_v13, 0.0  ;;  %v4356_v38 = vadd.f32 %v9160_v61, %v9223_v4  ;;  %v10776_v61 = vld [vmem:[#allocation139_spill] sm:$0xff] }
 0x74c   :  { %5070 = vmatmul.f32.gmra.mxu0 %v4826_v15  ;;  %5364 = vmatpush.msrb.mxu1 %v4958_v22  ;;  %v10775_v15 = vld [vmem:[#allocation115_spill] sm:$0xff]  ;;  %v4840_v7 = vmax.f32 %v10776_v61, 0.0 }
 0x74d   :  { %6096 = vmatmul.msk.f32.gmra.mxu3 %vm1529_vm2, %v10771_v57  ;;  %5135 = vmatmul.f32.gmra.mxu1 %v4827_v37  ;;  %v4610_v55 = vadd.f32 %v4609_v32, %v4545_v8  ;;  %v10773_v32 = vld [vmem:[#allocation151_spill] sm:$0xff]  ;;  %v4941_v37 = vld [vmem:[#allocation10 + $0x210] sm:$0xff] }
 0x74e   :  { %5197 = vmatmul.f32.gmra.mxu2 %v4821_v21  ;;  %v4834_v2 = vmax.f32 %v10773_v32, 0.0  ;;  %5300 = vmatpush.msrb.mxu0 %v4941_v37  ;;  %v10781_v37 = vld [vmem:[#allocation153_spill] sm:$0xff] }
 0x750   :  { %v4482_v16 = vpop.f32.mrf.mxu3 }
 0x751   :  { %v4483_v53 = vadd.f32 %v4482_v16, %v4418_v27  ;;  %v4674_v49 = vpop.f32.mrf.mxu2  ;;  %v4550_v1 = vpop.f32.mrf.mxu0  ;;  %v4841_v27 = vmax.f32 %v10777_v48, 0.0  ;;  %v10778_v16 = vld [vmem:[#allocation168_spill] sm:$0xff] }
 0x752   :  { %v9328_v43 = vadd.f32 %v4674_v49, %v4610_v55  ;;  %v4615_v63 = vpop.f32.mrf.mxu1  ;;  %v10779_v49 = vld [vmem:[#allocation118_spill] sm:$0xff] }
 0x753   :  { %v4548_v41 = vadd.f32 %v4547_v40, %v4483_v53  ;;  %v4421_v40 = vadd.f32 %v9180_v12, %v4356_v38  ;;  %v4835_v53 = vmax.f32 %v10778_v16, 0.0  ;;  %v4359_v12 = vadd.f32 %v9171_v28, %v9223_v4  ;;  %v10780_v28 = vld [vmem:[#allocation140_spill] sm:$0xff] }
 0x754   :  { %5073 = vmatmul.f32.gmra.mxu0 %v4833_v3  ;;  %v4923_v3 = vld [vmem:[#allocation10 + $0x180] sm:$0xff] }
 0x755   :  { %6097 = vmatmul.msk.f32.gmra.mxu3 %vm1529_vm2, %v10775_v15  ;;  %5138 = vmatmul.f32.gmra.mxu1 %v4834_v2  ;;  %v4613_v8 = vadd.f32 %v4612_v24, %v4548_v41  ;;  %v4957_v24 = vld [vmem:[#allocation10 + $0x290] sm:$0xff]  ;;  %v4940_v41 = vld [vmem:[#allocation10 + $0x208] sm:$0xff]  ;;  %v4847_v15 = vmax.f32 %v10780_v28, 0.0 }
 0x756   :  { %5200 = vmatmul.f32.gmra.mxu2 %v4828_v47  ;;  %5365 = vmatpush.msrb.mxu1 %v4957_v24 }
 0x757   :  { %5237 = vmatpush.msrb.mxu3 %v4923_v3  ;;  %5301 = vmatpush.msrb.mxu0 %v4940_v41 }
 0x758   :  { %v4485_v56 = vpop.f32.mrf.mxu3 }
 0x759   :  { %v4486_v60 = vadd.f32 %v4485_v56, %v4421_v40  ;;  %v4677_v21 = vpop.f32.mrf.mxu2  ;;  %v4553_v18 = vpop.f32.mrf.mxu0  ;;  %v10782_v40 = vld [vmem:[#allocation171_spill] sm:$0xff] }
 0x75a   :  { %v9338_v57 = vadd.f32 %v4677_v21, %v4613_v8  ;;  %v4618_v55 = vpop.f32.mrf.mxu1  ;;  %v4956_v8 = vld [vmem:[#allocation10 + $0x288] sm:$0xff]  ;;  %v4842_v56 = vmax.f32 %v10782_v40, 0.0  ;;  %v4362_v21 = vadd.f32 %v9182_v11, %v9223_v4  ;;  %v10789_v40 = vld [vmem:[#allocation174_spill] sm:$0xff] }
 0x75b   :  { %v4551_v10 = vadd.f32 %v4550_v1, %v4486_v60  ;;  %v4424_v1 = vadd.f32 %v9191_v45, %v4359_v12  ;;  %5366 = vmatpush.msrb.mxu1 %v4956_v8  ;;  %v4939_v45 = vld [vmem:[#allocation10 + $0x200] sm:$0xff] }
 0x75c   :  { %5076 = vmatmul.f32.gmra.mxu0 %v4840_v7  ;;  %v4955_v60 = vld [vmem:[#allocation10 + $0x280] sm:$0xff] }
 0x75d   :  { %6098 = vmatmul.msk.f32.gmra.mxu3 %vm1529_vm2, %v10779_v49  ;;  %5141 = vmatmul.f32.gmra.mxu1 %v4841_v27  ;;  %v4616_v42 = vadd.f32 %v4615_v63, %v4551_v10  ;;  %v4848_v63 = vmax.f32 %v10781_v37, 0.0  ;;  %v10784_v49 = vld [vmem:[#allocation154_spill] sm:$0xff] }
 0x75e   :  { %5203 = vmatmul.f32.gmra.mxu2 %v4835_v53  ;;  %5302 = vmatpush.msrb.mxu0 %v4939_v45  ;;  %v10783_v53 = vld [vmem:[#allocation141_spill] sm:$0xff]  ;;  %v10787_v8 = vld [vmem:[#allocation142_spill] sm:$0xff] }
 0x75f   :  { %5367 = vmatpush.msrb.mxu1 %v4955_v60  ;;  %v4854_v12 = vmax.f32 %v10783_v53, 0.0 }
 0x760   :  { %v4488_v32 = vpop.f32.mrf.mxu3 }
 0x761   :  { %v4489_v2 = vadd.f32 %v4488_v32, %v4424_v1  ;;  %v4680_v22 = vpop.f32.mrf.mxu2  ;;  %v4556_v13 = vpop.f32.mrf.mxu0 }
 0x762   :  { %v9348_v47 = vadd.f32 %v4680_v22, %v4616_v42  ;;  %v4621_v38 = vpop.f32.mrf.mxu1  ;;  %v4855_v42 = vmax.f32 %v10784_v49, 0.0 }
 0x763   :  { %v4554_v5 = vadd.f32 %v4553_v18, %v4489_v2  ;;  %v4427_v18 = vadd.f32 %v9202_v58, %v4362_v21  ;;  %v10786_v58 = vld [vmem:[#allocation124_spill] sm:$0xff] }
 0x764   :  { %5079 = vmatmul.f32.gmra.mxu0 %v4847_v15 }
 0x765   :  { %6099 = vmatmul.msk.f32.gmra.mxu3 %vm1529_vm2, %v10678_v46  ;;  %5144 = vmatmul.f32.gmra.mxu1 %v4848_v63  ;;  %v4619_v61 = vadd.f32 %v4618_v55, %v4554_v5  ;;  %v10785_v46 = vld [vmem:[#allocation172_spill] sm:$0xff]  ;;  %v4365_v55 = vadd.f32 %v9193_v54, %v9223_v4  ;;  %v4861_v5 = vmax.f32 %v10787_v8, 0.0 }
 0x766   :  { %5206 = vmatmul.f32.gmra.mxu2 %v4842_v56  ;;  %v4849_v3 = vmax.f32 %v10785_v46, 0.0  ;;  %v10788_v63 = vld [vmem:[#allocation156_spill] sm:$0xff]  ;;  %v4856_v56 = vmax.f32 %v10789_v40, 0.0  ;;  %v10796_v40 = vld [vmem:[#allocation78_spill] sm:$0xff] }
 0x767   :  { %v4430_v1 = vadd.f32 %v9213_v19, %v4365_v55  ;;  %v4862_v54 = vmax.f32 %v10788_v63, 0.0 }
 0x768   :  { %v4491_v7 = vpop.f32.mrf.mxu3 }
 0x769   :  { %v4492_v10 = vadd.f32 %v4491_v7, %v4427_v18  ;;  %v4683_v48 = vpop.f32.mrf.mxu2  ;;  %v4559_v27 = vpop.f32.mrf.mxu0 }
 0x76a   :  { %v9358_v24 = vadd.f32 %v4683_v48, %v4619_v61  ;;  %v4624_v16 = vpop.f32.mrf.mxu1  ;;  %v10790_v48 = vld [vmem:[#allocation143_spill] sm:$0xff] }
 0x76b   :  { %v4557_v11 = vadd.f32 %v4556_v13, %v4492_v10 }
 0x76c   :  { %5082 = vmatmul.f32.gmra.mxu0 %v4854_v12  ;;  %v10791_v12 = vld [vmem:[#allocation158_spill] sm:$0xff] }
 0x76d   :  { %6100 = vmatmul.msk.f32.gmra.mxu3 %vm1529_vm2, %v10786_v58  ;;  %5147 = vmatmul.f32.gmra.mxu1 %v4855_v42  ;;  %v4622_v41 = vadd.f32 %v4621_v38, %v4557_v11  ;;  %v4368_v38 = vadd.f32 %v9204_v35, %v9223_v4  ;;  %v4869_v35 = vmax.f32 %v10791_v12, 0.0  ;;  %v10792_v11 = vld [vmem:[#allocation177_spill] sm:$0xff]  ;;  %v10793_v58 = vld [vmem:[#allocation176_spill] sm:$0xff] }
 0x76e   :  { %5209 = vmatmul.f32.gmra.mxu2 %v4849_v3  ;;  %v4863_v49 = vmax.f32 %v10792_v11, 0.0 }
 0x76f   :  { %v4433_v45 = vadd.f32 %v9226_v31, %v4368_v38 }
 0x770   :  { %v4494_v32 = vpop.f32.mrf.mxu3 }
 0x771   :  { %v4495_v2 = vadd.f32 %v4494_v32, %v4430_v1  ;;  %v4686_v22 = vpop.f32.mrf.mxu2  ;;  %v4562_v13 = vpop.f32.mrf.mxu0 }
 0x772   :  { %v9368_v28 = vadd.f32 %v4686_v22, %v4622_v41  ;;  %v4627_v15 = vpop.f32.mrf.mxu1  ;;  %v4767_v41 = vmax.f32 %v10793_v58, 0.0  ;;  %v10795_v22 = vld [vmem:[#allocation181_spill] sm:$0xff] }
 0x773   :  { %v4560_v37 = vadd.f32 %v4559_v27, %v4495_v2  ;;  %v4868_v27 = vmax.f32 %v10790_v48, 0.0 }
 0x774   :  { %5085 = vmatmul.f32.gmra.mxu0 %v4861_v5 }
 0x775   :  { %6101 = vmatmul.msk.f32.gmra.mxu3 %vm1529_vm2, %v10684_v29  ;;  %5150 = vmatmul.f32.gmra.mxu1 %v4862_v54  ;;  %v4625_v19 = vadd.f32 %v4624_v16, %v4560_v37  ;;  %v4371_v29 = vadd.f32 %v9215_v36, %v9223_v4  ;;  %v10794_v36 = vld [vmem:[#allocation183_spill] sm:$0xff] }
 0x776   :  { %5212 = vmatmul.f32.gmra.mxu2 %v4856_v56  ;;  %v4766_v4 = vmax.f32 %v10794_v36, 0.0  ;;  %v10797_v56 = vld [vmem:[#allocation184_spill] sm:$0xff] }
 0x777   :  { %v4436_v16 = vadd.f32 %v9238_v25, %v4371_v29  ;;  %v4773_v38 = vmax.f32 %v10797_v56, 0.0 }
 0x778   :  { %v4497_v60 = vpop.f32.mrf.mxu3 }
 0x779   :  { %v4498_v21 = vadd.f32 %v4497_v60, %v4433_v45  ;;  %v4689_v61 = vpop.f32.mrf.mxu2  ;;  %v4565_v18 = vpop.f32.mrf.mxu0  ;;  %v4775_v45 = vmax.f32 %v9074_v52, 0.0  ;;  %v4782_v52 = vmax.f32 %v9085_v51, 0.0  ;;  %v4789_v51 = vmax.f32 %v9096_v9, 0.0 }
 0x77a   :  { %v9378_v7 = vadd.f32 %v4689_v61, %v4625_v19  ;;  %v4630_v10 = vpop.f32.mrf.mxu1  ;;  %v4796_v9 = vmax.f32 %v9107_v23, 0.0  ;;  %v4803_v23 = vmax.f32 %v9118_v34, 0.0  ;;  %v4810_v34 = vmax.f32 %v9129_v39, 0.0 }
 0x77b   :  { %v4563_v53 = vadd.f32 %v4562_v13, %v4498_v21  ;;  %v4870_v13 = vmax.f32 %v10795_v22, 0.0  ;;  %v10803_v22 = vld [vmem:[#allocation40_spill] sm:$0xff]  ;;  %v4817_v39 = vmax.f32 %v9140_v17, 0.0 }
 0x77c   :  { %5088 = vmatmul.f32.gmra.mxu0 %v4868_v27  ;;  %v10799_v27 = vld [vmem:[#allocation185_spill] sm:$0xff] }
 0x77d   :  { %6102 = vmatmul.msk.f32.gmra.mxu3 %vm1529_vm2, %v10591_v50  ;;  %5153 = vmatmul.f32.gmra.mxu1 %v4869_v35  ;;  %v4628_v31 = vadd.f32 %v4627_v15, %v4563_v53  ;;  %v4768_v50 = vmax.f32 %v9063_v62, 0.0  ;;  %v4774_v62 = vmax.f32 %v10796_v40, 0.0  ;;  %v4780_v53 = vmax.f32 %v10799_v27, 0.0  ;;  %v10806_v27 = vld [vmem:[#allocation86_spill] sm:$0xff] }
 0x77e   :  { %5215 = vmatmul.f32.gmra.mxu2 %v4863_v49 }
 0x780   :  { %v4500_v42 = vpop.f32.mrf.mxu3 }
 0x781   :  { %v4501_v46 = vadd.f32 %v4500_v42, %v4436_v16  ;;  %v4692_v3 = vpop.f32.mrf.mxu2  ;;  %v9388_v55 = vpop.f32.mrf.mxu0  ;;  %v10801_v42 = vld [vmem:[#allocation186_spill] sm:$0xff] }
 0x782   :  { %v9391_v1 = vadd.f32 %v4692_v3, %v4628_v31  ;;  %v9393_v32 = vpop.f32.mrf.mxu1  ;;  %v10800_v31 = vld [vmem:[#allocation178_spill] sm:$0xff] }
 0x783   :  { %v4566_v2 = vadd.f32 %v4565_v18, %v4501_v46  ;;  %v4788_v16 = vmax.f32 %v10800_v31, 0.0  ;;  %v4787_v46 = vmax.f32 %v10801_v42, 0.0 }
 0x784   :  { %5303 = vmatmul.f32.vlgmr.msrb.gmra.mxu0 %v4767_v41 }
 0x785   :  { %5238 = vmatmul.f32.vlgmr.msrb.gmra.mxu3 %v4766_v4  ;;  %5368 = vmatmul.f32.vlgmr.msrb.gmra.mxu1 %v4768_v50  ;;  %v4631_v25 = vadd.f32 %v4630_v10, %v4566_v2  ;;  %v10798_v10 = vld [vmem:[#allocation182_spill] sm:$0xff]  ;;  %v10802_v50 = vld [vmem:[#allocation179_spill] sm:$0xff] }
 0x786   :  { %5218 = vmatmul.f32.gmra.mxu2 %v4870_v13  ;;  %v4781_v48 = vmax.f32 %v10798_v10, 0.0  ;;  %v4795_v2 = vmax.f32 %v10802_v50, 0.0  ;;  %v4794_v13 = vmax.f32 %v10803_v22, 0.0  ;;  %v9475_v50 = vld [vmem:[#allocation11] ss:$0 sm:$0xff] }
 0x788   :  { %v4715_v15 = vpop.f32.mrf.mxu3 }
 0x789   :  { %v4695_v8 = vpop.f32.mrf.mxu2  ;;  %v4716_v5 = vadd.f32 %v4715_v15, %v9248_v26  ;;  %v9399_v37 = vpop.f32.mrf.mxu0 }
 0x78a   :  { %v9401_v63 = vadd.f32 %v4695_v8, %v4631_v25  ;;  %v9403_v54 = vpop.f32.mrf.mxu1 }
 0x78b   :  { %v4769_v19 = vmax.f32 %v4716_v5, 0.0 }
 0x78c   :  { %5306 = vmatmul.f32.gmra.mxu0 %v4774_v62  ;;  %v10804_v62 = vld [vmem:[#allocation81_spill] sm:$0xff] }
 0x78d   :  { %5241 = vmatmul.f32.gmra.mxu3 %v4773_v38  ;;  %5371 = vmatmul.f32.gmra.mxu1 %v4775_v45  ;;  %v4802_v56 = vmax.f32 %v10804_v62, 0.0  ;;  %v10805_v38 = vld [vmem:[#allocation44_spill] sm:$0xff]  ;;  %v10811_v62 = vld [vmem:[#allocation161_spill] sm:$0xff] }
 0x78e   :  { %6103 = vmatmul.msk.f32.vlgmr.msrb.gmra.mxu2 %vm1529_vm2, %v4769_v19  ;;  %v4801_v19 = vmax.f32 %v10805_v38, 0.0  ;;  %v4822_v17 = vmax.f32 %v10811_v62, 0.0  ;;  %v4824_v38 = vmax.f32 %v9151_v30, 0.0 }
 0x790   :  { %v4718_v60 = vpop.f32.mrf.mxu3 }
 0x791   :  { %v4719_v26 = vadd.f32 %v4718_v60, %v9258_v14  ;;  %v9410_v21 = vpop.f32.mrf.mxu2  ;;  %v9412_v61 = vpop.f32.mrf.mxu0 }
 0x792   :  { %v9414_v18 = vpop.f32.mrf.mxu1 }
 0x793   :  { %v4776_v12 = vmax.f32 %v4719_v26, 0.0 }
 0x794   :  { %5309 = vmatmul.f32.gmra.mxu0 %v4781_v48 }
 0x795   :  { %5244 = vmatmul.f32.gmra.mxu3 %v4780_v53  ;;  %5374 = vmatmul.f32.gmra.mxu1 %v4782_v52  ;;  %v4809_v53 = vmax.f32 %v10806_v27, 0.0 }
 0x796   :  { %6104 = vmatmul.msk.f32.gmra.mxu2 %vm1529_vm2, %v4776_v12  ;;  %v10807_v12 = vld [vmem:[#allocation159_spill] sm:$0xff] }
 0x797   :  { %v4808_v52 = vmax.f32 %v10807_v12, 0.0 }
 0x798   :  { %v4721_v35 = vpop.f32.mrf.mxu3 }
 0x799   :  { %v4722_v14 = vadd.f32 %v4721_v35, %v9268_v6  ;;  %v9421_v11 = vpop.f32.mrf.mxu2  ;;  %v9423_v49 = vpop.f32.mrf.mxu0 }
 0x79a   :  { %v9425_v29 = vpop.f32.mrf.mxu1 }
 0x79b   :  { %v4783_v3 = vmax.f32 %v4722_v14, 0.0 }
 0x79c   :  { %5312 = vmatmul.f32.gmra.mxu0 %v4788_v16 }
 0x79d   :  { %5247 = vmatmul.f32.gmra.mxu3 %v4787_v46  ;;  %5377 = vmatmul.f32.gmra.mxu1 %v4789_v51  ;;  %v10808_v46 = vld [vmem:[#allocation180_spill] sm:$0xff] }
 0x79e   :  { %6105 = vmatmul.msk.f32.gmra.mxu2 %vm1529_vm2, %v4783_v3  ;;  %v4816_v3 = vmax.f32 %v10808_v46, 0.0  ;;  %v10809_v51 = vld [vmem:[#allocation48_spill] sm:$0xff] }
 0x7a0   :  { %v4724_v58 = vpop.f32.mrf.mxu3 }
 0x7a1   :  { %v4725_v6 = vadd.f32 %v4724_v58, %v9278_v59  ;;  %v9432_v41 = vpop.f32.mrf.mxu2  ;;  %v9434_v36 = vpop.f32.mrf.mxu0  ;;  %v4815_v58 = vmax.f32 %v10809_v51, 0.0 }
 0x7a2   :  { %v9436_v4 = vpop.f32.mrf.mxu1 }
 0x7a3   :  { %v4790_v25 = vmax.f32 %v4725_v6, 0.0 }
 0x7a4   :  { %5315 = vmatmul.f32.gmra.mxu0 %v4795_v2 }
 0x7a5   :  { %5250 = vmatmul.f32.gmra.mxu3 %v4794_v13  ;;  %5380 = vmatmul.f32.gmra.mxu1 %v4796_v9 }
 0x7a6   :  { %6106 = vmatmul.msk.f32.gmra.mxu2 %vm1529_vm2, %v4790_v25 }
 0x7a8   :  { %v4727_v15 = vpop.f32.mrf.mxu3 }
 0x7a9   :  { %v4728_v59 = vadd.f32 %v4727_v15, %v9288_v20  ;;  %v9443_v8 = vpop.f32.mrf.mxu2  ;;  %v9445_v5 = vpop.f32.mrf.mxu0  ;;  %v10810_v15 = vld [vmem:[#allocation89_spill] sm:$0xff] }
 0x7aa   :  { %v9447_v40 = vpop.f32.mrf.mxu1 }
 0x7ab   :  { %v4797_v45 = vmax.f32 %v4728_v59, 0.0  ;;  %v4823_v59 = vmax.f32 %v10810_v15, 0.0  ;;  %v10817_v15 = vld [vmem:[#allocation69_spill] sm:$0xff] }
 0x7ac   :  { %5318 = vmatmul.f32.gmra.mxu0 %v4802_v56 }
 0x7ad   :  { %5253 = vmatmul.f32.gmra.mxu3 %v4801_v19  ;;  %5383 = vmatmul.f32.gmra.mxu1 %v4803_v23 }
 0x7ae   :  { %6107 = vmatmul.msk.f32.gmra.mxu2 %vm1529_vm2, %v4797_v45 }
 0x7b0   :  { %v4730_v60 = vpop.f32.mrf.mxu3 }
 0x7b1   :  { %v4731_v20 = vadd.f32 %v4730_v60, %v9298_v33  ;;  %v9454_v26 = vpop.f32.mrf.mxu2  ;;  %v9456_v10 = vpop.f32.mrf.mxu0 }
 0x7b2   :  { %v9458_v48 = vpop.f32.mrf.mxu1 }
 0x7b3   :  { %v4804_v35 = vmax.f32 %v4731_v20, 0.0 }
 0x7b4   :  { %5321 = vmatmul.f32.gmra.mxu0 %v4809_v53  ;;  %v10812_v53 = vld [vmem:[#allocation92_spill] sm:$0xff] }
 0x7b5   :  { %5256 = vmatmul.f32.gmra.mxu3 %v4808_v52  ;;  %5386 = vmatmul.f32.gmra.mxu1 %v4810_v34  ;;  %v4830_v12 = vmax.f32 %v10812_v53, 0.0  ;;  %v10813_v52 = vld [vmem:[#allocation52_spill] sm:$0xff]  ;;  %v10814_v34 = vld [vmem:[#allocation65_spill] sm:$0xff] }
 0x7b6   :  { %6108 = vmatmul.msk.f32.gmra.mxu2 %vm1529_vm2, %v4804_v35  ;;  %v4829_v35 = vmax.f32 %v10813_v52, 0.0  ;;  %v10820_v52 = vld [vmem:[#allocation73_spill] sm:$0xff] }
 0x7b8   :  { %v4733_v14 = vpop.f32.mrf.mxu3 }
 0x7b9   :  { %v4734_v33 = vadd.f32 %v4733_v14, %v9308_v44  ;;  %v9465_v31 = vpop.f32.mrf.mxu2  ;;  %v9467_v16 = vpop.f32.mrf.mxu0  ;;  %v4831_v14 = vmax.f32 %v10814_v34, 0.0 }
 0x7ba   :  { %v9469_v42 = vpop.f32.mrf.mxu1 }
 0x7bb   :  { %v4811_v6 = vmax.f32 %v4734_v33, 0.0 }
 0x7bc   :  { %5324 = vmatmul.f32.gmra.mxu0 %v4816_v3 }
 0x7bd   :  { %5259 = vmatmul.f32.gmra.mxu3 %v4815_v58  ;;  %5389 = vmatmul.f32.gmra.mxu1 %v4817_v39 }
 0x7be   :  { %6109 = vmatmul.msk.f32.gmra.mxu2 %vm1529_vm2, %v4811_v6 }
 0x7c0   :  { %v4736_v44 = vpop.f32.mrf.mxu3 }
 0x7c1   :  { %v4737_v2 = vadd.f32 %v4736_v44, %v9318_v0  ;;  %v9478_v22 = vpop.f32.mrf.mxu2  ;;  %v5068_v13 = vpop.f32.mrf.mxu0  ;;  %v10815_v44 = vld [vmem:[#allocation130_spill] sm:$0xff] }
 0x7c2   :  { %v5069_v25 = vadd.f32 %v9475_v50, %v5068_v13  ;;  %v5133_v9 = vpop.f32.mrf.mxu1  ;;  %v10816_v13 = vld [vmem:[#allocation163_spill] sm:$0xff] }
 0x7c3   :  { %v4818_v56 = vmax.f32 %v4737_v2, 0.0  ;;  %v4837_v2 = vmax.f32 %v10815_v44, 0.0 }
 0x7c4   :  { %v5134_v19 = vadd.f32 %v5133_v9, %v5069_v25  ;;  %5327 = vmatmul.f32.gmra.mxu0 %v4823_v59  ;;  %v4836_v25 = vmax.f32 %v10816_v13, 0.0  ;;  %v4838_v59 = vmax.f32 %v10817_v15, 0.0  ;;  %v10823_v13 = vld [vmem:[#allocation77_spill] sm:$0xff] }
 0x7c5   :  { %5262 = vmatmul.f32.gmra.mxu3 %v4822_v17  ;;  %5392 = vmatmul.f32.gmra.mxu1 %v4824_v38 }
 0x7c6   :  { %6110 = vmatmul.msk.f32.gmra.mxu2 %vm1529_vm2, %v4818_v56 }
 0x7c8   :  { %v4739_v0 = vpop.f32.mrf.mxu3 }
 0x7c9   :  { %v4740_v45 = vadd.f32 %v4739_v0, %v9328_v43  ;;  %v9486_v23 = vpop.f32.mrf.mxu2  ;;  %v5071_v60 = vpop.f32.mrf.mxu0 }
 0x7ca   :  { %v5072_v20 = vadd.f32 %v9475_v50, %v5071_v60  ;;  %v5136_v27 = vpop.f32.mrf.mxu1  ;;  %v10818_v60 = vld [vmem:[#allocation19_spill] sm:$0xff] }
 0x7cb   :  { %v4825_v30 = vmax.f32 %v4740_v45, 0.0 }
 0x7cc   :  { %v5137_v33 = vadd.f32 %v5136_v27, %v5072_v20  ;;  %5330 = vmatmul.f32.gmra.mxu0 %v4830_v12  ;;  %v4844_v20 = vmax.f32 %v10818_v60, 0.0  ;;  %v10819_v27 = vld [vmem:[#allocation165_spill] sm:$0xff] }
 0x7cd   :  { %5265 = vmatmul.f32.gmra.mxu3 %v4829_v35  ;;  %5395 = vmatmul.f32.gmra.mxu1 %v4831_v14  ;;  %v4843_v53 = vmax.f32 %v10819_v27, 0.0  ;;  %v4845_v35 = vmax.f32 %v10820_v52, 0.0  ;;  %v10826_v27 = vld [vmem:[#allocation82_spill] sm:$0xff] }
 0x7ce   :  { %6111 = vmatmul.msk.f32.gmra.mxu2 %vm1529_vm2, %v4825_v30 }
 0x7d0   :  { %v4742_v43 = vpop.f32.mrf.mxu3 }
 0x7d1   :  { %v4743_v46 = vadd.f32 %v4742_v43, %v9338_v57  ;;  %v5198_v3 = vpop.f32.mrf.mxu2  ;;  %v5074_v51 = vpop.f32.mrf.mxu0 }
 0x7d2   :  { %v9494_v58 = vadd.f32 %v5198_v3, %v5134_v19  ;;  %v5075_v6 = vadd.f32 %v9475_v50, %v5074_v51  ;;  %v5139_v39 = vpop.f32.mrf.mxu1  ;;  %v10821_v51 = vld [vmem:[#allocation23_spill] sm:$0xff] }
 0x7d3   :  { %v4832_v9 = vmax.f32 %v4743_v46, 0.0 }
 0x7d4   :  { %v5140_v62 = vadd.f32 %v5139_v39, %v5075_v6  ;;  %5333 = vmatmul.f32.gmra.mxu0 %v4837_v2  ;;  %v4851_v6 = vmax.f32 %v10821_v51, 0.0  ;;  %v10822_v39 = vld [vmem:[#allocation167_spill] sm:$0xff] }
 0x7d5   :  { %5268 = vmatmul.f32.gmra.mxu3 %v4836_v25  ;;  %5398 = vmatmul.f32.gmra.mxu1 %v4838_v59  ;;  %v4850_v44 = vmax.f32 %v10822_v39, 0.0  ;;  %v4852_v25 = vmax.f32 %v10823_v13, 0.0  ;;  %v10829_v39 = vld [vmem:[#allocation85_spill] sm:$0xff] }
 0x7d6   :  { %6112 = vmatmul.msk.f32.gmra.mxu2 %vm1529_vm2, %v4832_v9 }
 0x7d8   :  { %v4745_v57 = vpop.f32.mrf.mxu3 }
 0x7d9   :  { %v4746_v17 = vadd.f32 %v4745_v57, %v9348_v47  ;;  %v5201_v56 = vpop.f32.mrf.mxu2  ;;  %v5077_v38 = vpop.f32.mrf.mxu0 }
 0x7da   :  { %v9502_v19 = vadd.f32 %v5201_v56, %v5137_v33  ;;  %v5078_v0 = vadd.f32 %v9475_v50, %v5077_v38  ;;  %v5142_v45 = vpop.f32.mrf.mxu1  ;;  %v10824_v38 = vld [vmem:[#allocation57_spill] sm:$0xff] }
 0x7db   :  { %v4839_v12 = vmax.f32 %v4746_v17, 0.0 }
 0x7dc   :  { %v5143_v30 = vadd.f32 %v5142_v45, %v5078_v0  ;;  %5336 = vmatmul.f32.gmra.mxu0 %v4844_v20  ;;  %v4858_v0 = vmax.f32 %v10824_v38, 0.0  ;;  %v10825_v45 = vld [vmem:[#allocation169_spill] sm:$0xff] }
 0x7dd   :  { %5271 = vmatmul.f32.gmra.mxu3 %v4843_v53  ;;  %5401 = vmatmul.f32.gmra.mxu1 %v4845_v35  ;;  %v4857_v60 = vmax.f32 %v10825_v45, 0.0  ;;  %v4859_v53 = vmax.f32 %v10826_v27, 0.0  ;;  %v10832_v45 = vld [vmem:[#allocation20_spill] sm:$0xff]  ;;  %v5045_v27 = vadd.f32 %v9475_v50, %v9388_v55 }
 0x7de   :  { %6113 = vmatmul.msk.f32.gmra.mxu2 %vm1529_vm2, %v4839_v12 }
 0x7e0   :  { %v4748_v47 = vpop.f32.mrf.mxu3 }
 0x7e1   :  { %v4749_v34 = vadd.f32 %v4748_v47, %v9358_v24  ;;  %v5204_v14 = vpop.f32.mrf.mxu2  ;;  %v5080_v33 = vpop.f32.mrf.mxu0 }
 0x7e2   :  { %v9510_v43 = vadd.f32 %v5204_v14, %v5140_v62  ;;  %v5081_v46 = vadd.f32 %v9475_v50, %v5080_v33  ;;  %v5145_v3 = vpop.f32.mrf.mxu1  ;;  %v10827_v33 = vld [vmem:[#allocation61_spill] sm:$0xff] }
 0x7e3   :  { %v4846_v2 = vmax.f32 %v4749_v34, 0.0 }
 0x7e4   :  { %v5146_v9 = vadd.f32 %v5145_v3, %v5081_v46  ;;  %5339 = vmatmul.f32.gmra.mxu0 %v4851_v6  ;;  %v4865_v46 = vmax.f32 %v10827_v33, 0.0  ;;  %v10828_v3 = vld [vmem:[#allocation170_spill] sm:$0xff] }
 0x7e5   :  { %5274 = vmatmul.f32.gmra.mxu3 %v4850_v44  ;;  %5404 = vmatmul.f32.gmra.mxu1 %v4852_v25  ;;  %v4864_v51 = vmax.f32 %v10828_v3, 0.0  ;;  %v4866_v44 = vmax.f32 %v10829_v39, 0.0 }
 0x7e6   :  { %6114 = vmatmul.msk.f32.gmra.mxu2 %vm1529_vm2, %v4846_v2 }
 0x7e8   :  { %v4751_v24 = vpop.f32.mrf.mxu3 }
 0x7e9   :  { %v4752_v15 = vadd.f32 %v4751_v24, %v9368_v28  ;;  %v5207_v59 = vpop.f32.mrf.mxu2  ;;  %v5083_v62 = vpop.f32.mrf.mxu0 }
 0x7ea   :  { %v9518_v57 = vadd.f32 %v5207_v59, %v5143_v30  ;;  %v5084_v17 = vadd.f32 %v9475_v50, %v5083_v62  ;;  %v5148_v56 = vpop.f32.mrf.mxu1  ;;  %v10830_v62 = vld [vmem:[#allocation175_spill] sm:$0xff] }
 0x7eb   :  { %v4853_v20 = vmax.f32 %v4752_v15, 0.0 }
 0x7ec   :  { %v5149_v12 = vadd.f32 %v5148_v56, %v5084_v17  ;;  %5342 = vmatmul.f32.gmra.mxu0 %v4858_v0  ;;  %v4872_v17 = vmax.f32 %v10830_v62, 0.0  ;;  %v10831_v56 = vld [vmem:[#allocation173_spill] sm:$0xff] }
 0x7ed   :  { %5277 = vmatmul.f32.gmra.mxu3 %v4857_v60  ;;  %5407 = vmatmul.f32.gmra.mxu1 %v4859_v53  ;;  %v4871_v38 = vmax.f32 %v10831_v56, 0.0  ;;  %v4873_v60 = vmax.f32 %v10832_v45, 0.0  ;;  %v5054_v56 = vadd.f32 %v9475_v50, %v9423_v49 }
 0x7ee   :  { %6115 = vmatmul.msk.f32.gmra.mxu2 %vm1529_vm2, %v4853_v20 }
 0x7f0   :  { %v4754_v28 = vpop.f32.mrf.mxu3 }
 0x7f1   :  { %v4755_v52 = vadd.f32 %v4754_v28, %v9378_v7  ;;  %v5210_v35 = vpop.f32.mrf.mxu2  ;;  %v5086_v30 = vpop.f32.mrf.mxu0 }
 0x7f2   :  { %v9526_v47 = vadd.f32 %v5210_v35, %v5146_v9  ;;  %v5087_v34 = vadd.f32 %v9475_v50, %v5086_v30  ;;  %v5151_v14 = vpop.f32.mrf.mxu1 }
 0x7f3   :  { %v4860_v6 = vmax.f32 %v4755_v52, 0.0 }
 0x7f4   :  { %v5152_v2 = vadd.f32 %v5151_v14, %v5087_v34  ;;  %5345 = vmatmul.f32.gmra.mxu0 %v4865_v46  ;;  %v5110_v34 = vadd.f32 %v9393_v32, %v5045_v27  ;;  %v5048_v46 = vadd.f32 %v9475_v50, %v9399_v37 }
 0x7f5   :  { %5280 = vmatmul.f32.gmra.mxu3 %v4864_v51  ;;  %5410 = vmatmul.f32.gmra.mxu1 %v4866_v44 }
 0x7f6   :  { %6116 = vmatmul.msk.f32.gmra.mxu2 %vm1529_vm2, %v4860_v6  ;;  %v5175_v14 = vadd.f32 %v9410_v21, %v5110_v34  ;;  %v5113_v44 = vadd.f32 %v9403_v54, %v5048_v46  ;;  %v5051_v21 = vadd.f32 %v9475_v50, %v9412_v61  ;;  %v5060_v46 = vadd.f32 %v9475_v50, %v9445_v5 }
 0x7f8   :  { %v4757_v7 = vpop.f32.mrf.mxu3  ;;  %v5116_v62 = vadd.f32 %v9414_v18, %v5051_v21 }
 0x7f9   :  { %v4758_v13 = vadd.f32 %v4757_v7, %v9391_v1  ;;  %v5213_v25 = vpop.f32.mrf.mxu2  ;;  %v5089_v9 = vpop.f32.mrf.mxu0 }
 0x7fa   :  { %v9534_v24 = vadd.f32 %v5213_v25, %v5149_v12  ;;  %v5090_v15 = vadd.f32 %v9475_v50, %v5089_v9  ;;  %v5154_v59 = vpop.f32.mrf.mxu1  ;;  %v5181_v54 = vadd.f32 %v9432_v41, %v5116_v62  ;;  %v5066_v62 = vadd.f32 %v9475_v50, %v9467_v16 }
 0x7fb   :  { %v4867_v0 = vmax.f32 %v4758_v13, 0.0 }
 0x7fc   :  { %v5155_v20 = vadd.f32 %v5154_v59, %v5090_v15  ;;  %5348 = vmatmul.f32.gmra.mxu0 %v4872_v17 }
 0x7fd   :  { %5283 = vmatmul.f32.gmra.mxu3 %v4871_v38  ;;  %5413 = vmatmul.f32.gmra.mxu1 %v4873_v60 }
 0x7fe   :  { %6117 = vmatmul.msk.f32.gmra.mxu2 %vm1529_vm2, %v4867_v0 }
 0x800   :  { %v4760_v1 = vpop.f32.mrf.mxu3 }
 0x801   :  { %v4761_v53 = vadd.f32 %v4760_v1, %v9401_v63  ;;  %v5216_v12 = vpop.f32.mrf.mxu2  ;;  %v5304_v28 = vpop.f32.mrf.mxu0  ;;  %v5119_v1 = vadd.f32 %v9425_v29, %v5054_v56 }
 0x802   :  { %v9544_v52 = vadd.f32 %v5216_v12, %v5152_v2  ;;  %v5369_v35 = vpop.f32.mrf.mxu1  ;;  %v5178_v2 = vadd.f32 %v9421_v11, %v5113_v44  ;;  %v5125_v44 = vadd.f32 %v9447_v40, %v5060_v46 }
 0x803   :  { %v4874_v30 = vmax.f32 %v4761_v53, 0.0  ;;  %v5184_v18 = vadd.f32 %v9443_v8, %v5119_v1  ;;  %v5057_v53 = vadd.f32 %v9475_v50, %v9434_v36 }
 0x806   :  { %6118 = vmatmul.msk.f32.gmra.mxu2 %vm1529_vm2, %v4874_v30 }
 0x808   :  { %v5239_v33 = vpop.f32.mrf.mxu3 }
 0x809   :  { %v5219_v3 = vpop.f32.mrf.mxu2  ;;  %v5240_v55 = vadd.f32 %v5239_v33, %v5175_v14  ;;  %v5307_v51 = vpop.f32.mrf.mxu0  ;;  %v5122_v14 = vadd.f32 %v9436_v4, %v5057_v53  ;;  %v5190_v4 = vadd.f32 %v9465_v31, %v5125_v44 }
 0x80a   :  { %v9551_v63 = vadd.f32 %v5219_v3, %v5155_v20  ;;  %v5372_v6 = vpop.f32.mrf.mxu1 }
 0x80b   :  { %v5305_v39 = vadd.f32 %v5304_v28, %v5240_v55  ;;  %v5187_v29 = vadd.f32 %v9454_v26, %v5122_v14 }
 0x80d   :  { %v5370_v7 = vadd.f32 %v5369_v35, %v5305_v39 }
 0x810   :  { %v5242_v32 = vpop.f32.mrf.mxu3 }
 0x811   :  { %v5243_v13 = vadd.f32 %v5242_v32, %v5178_v2  ;;  %v5434_v25 = vpop.f32.mrf.mxu2  ;;  %v5310_v9 = vpop.f32.mrf.mxu0  ;;  %v5063_v32 = vadd.f32 %v9475_v50, %v9456_v10 }
 0x812   :  { %v9557_v37 = vadd.f32 %v5434_v25, %v5370_v7  ;;  %v5375_v15 = vpop.f32.mrf.mxu1 }
 0x813   :  { %v5308_v59 = vadd.f32 %v5307_v51, %v5243_v13 }
 0x814   :  { %5482 = vmax.xlane.f32.xlu0 %v9557_v37 }
 0x815   :  { %v5373_v11 = vadd.f32 %v5372_v6, %v5308_v59 }
 0x818   :  { %v5245_v17 = vpop.f32.mrf.mxu3 }
 0x819   :  { %v5246_v38 = vadd.f32 %v5245_v17, %v5181_v54  ;;  %v5437_v61 = vpop.f32.mrf.mxu2  ;;  %v5313_v0 = vpop.f32.mrf.mxu0 }
 0x81a   :  { %v9564_v45 = vadd.f32 %v5437_v61, %v5373_v11  ;;  %v5378_v60 = vpop.f32.mrf.mxu1  ;;  %v5131_v61 = vadd.f32 %v9469_v42, %v5066_v62 }
 0x81b   :  { %v5311_v20 = vadd.f32 %v5310_v9, %v5246_v38 }
 0x81c   :  { %5484 = vmax.xlane.f32.xlu0 %v9564_v45 }
 0x81d   :  { %v5376_v41 = vadd.f32 %v5375_v15, %v5311_v20  ;;  %v5128_v15 = vadd.f32 %v9458_v48, %v5063_v32  ;;  %v5196_v48 = vadd.f32 %v9486_v23, %v5131_v61 }
 0x81f   :  { %v5193_v40 = vadd.f32 %v9478_v22, %v5128_v15 }
 0x820   :  { %v5248_v27 = vpop.f32.mrf.mxu3 }
 0x821   :  { %v5249_v12 = vadd.f32 %v5248_v27, %v5184_v18  ;;  %v5440_v49 = vpop.f32.mrf.mxu2  ;;  %v5316_v28 = vpop.f32.mrf.mxu0 }
 0x822   :  { %v9571_v35 = vadd.f32 %v5440_v49, %v5376_v41  ;;  %v5381_v30 = vpop.f32.mrf.mxu1 }
 0x823   :  { %v5314_v34 = vadd.f32 %v5313_v0, %v5249_v12 }
 0x824   :  { %5486 = vmax.xlane.f32.xlu1 %v9571_v35 }
 0x825   :  { %v5379_v8 = vadd.f32 %v5378_v60, %v5314_v34 }
 0x828   :  { %v5251_v33 = vpop.f32.mrf.mxu3 }
 0x829   :  { %v5252_v3 = vadd.f32 %v5251_v33, %v5187_v29  ;;  %v5443_v36 = vpop.f32.mrf.mxu2  ;;  %v5319_v55 = vpop.f32.mrf.mxu0 }
 0x82a   :  { %v9578_v51 = vadd.f32 %v5443_v36, %v5379_v8  ;;  %v5384_v6 = vpop.f32.mrf.mxu1 }
 0x82b   :  { %v5317_v39 = vadd.f32 %v5316_v28, %v5252_v3 }
 0x82c   :  { %5488 = vmax.xlane.f32.xlu1 %v9578_v51 }
 0x82d   :  { %v5382_v26 = vadd.f32 %v5381_v30, %v5317_v39 }
 0x830   :  { %v5254_v2 = vpop.f32.mrf.mxu3 }
 0x831   :  { %v5255_v7 = vadd.f32 %v5254_v2, %v5190_v4  ;;  %v5446_v5 = vpop.f32.mrf.mxu2  ;;  %v5322_v21 = vpop.f32.mrf.mxu0 }
 0x832   :  { %v9585_v13 = vadd.f32 %v5446_v5, %v5382_v26  ;;  %v5387_v25 = vpop.f32.mrf.mxu1 }
 0x833   :  { %v5320_v9 = vadd.f32 %v5319_v55, %v5255_v7 }
 0x834   :  { %5490 = vmax.xlane.f32.xlu2 %v9585_v13 }
 0x835   :  { %v5385_v31 = vadd.f32 %v5384_v6, %v5320_v9 }
 0x838   :  { %v5257_v59 = vpop.f32.mrf.mxu3 }
 0x839   :  { %v5258_v54 = vadd.f32 %v5257_v59, %v5193_v40  ;;  %v5449_v10 = vpop.f32.mrf.mxu2  ;;  %v5325_v17 = vpop.f32.mrf.mxu0 }
 0x83a   :  { %v9592_v11 = vadd.f32 %v5449_v10, %v5385_v31  ;;  %v5390_v56 = vpop.f32.mrf.mxu1 }
 0x83b   :  { %v5323_v38 = vadd.f32 %v5322_v21, %v5258_v54 }
 0x83c   :  { %5492 = vmax.xlane.f32.xlu2 %v9592_v11 }
 0x83d   :  { %v5388_v22 = vadd.f32 %v5387_v25, %v5323_v38 }
 0x840   :  { %v5260_v0 = vpop.f32.mrf.mxu3 }
 0x841   :  { %v5261_v60 = vadd.f32 %v5260_v0, %v5196_v48  ;;  %v5452_v20 = vpop.f32.mrf.mxu2  ;;  %v5328_v1 = vpop.f32.mrf.mxu0 }
 0x842   :  { %v9597_v18 = vadd.f32 %v5452_v20, %v5388_v22  ;;  %v5393_v16 = vpop.f32.mrf.mxu1 }
 0x843   :  { %v5326_v50 = vadd.f32 %v5325_v17, %v5261_v60 }
 0x844   :  { %5494 = vmax.xlane.f32.xlu0 %v9597_v18 }
 0x845   :  { %v5391_v41 = vadd.f32 %v5390_v56, %v5326_v50 }
 0x848   :  { %v5263_v27 = vpop.f32.mrf.mxu3 }
 0x849   :  { %v5264_v53 = vadd.f32 %v5263_v27, %v9494_v58  ;;  %v5455_v12 = vpop.f32.mrf.mxu2  ;;  %v5331_v49 = vpop.f32.mrf.mxu0 }
 0x84a   :  { %v9601_v42 = vadd.f32 %v5455_v12, %v5391_v41  ;;  %v5396_v23 = vpop.f32.mrf.mxu1 }
 0x84b   :  { %v5329_v28 = vadd.f32 %v5328_v1, %v5264_v53 }
 0x84c   :  { %5496 = vmax.xlane.f32.xlu1 %v9601_v42 }
 0x84d   :  { %v5394_v34 = vadd.f32 %v5393_v16, %v5329_v28 }
 0x850   :  { %v5266_v30 = vpop.f32.mrf.mxu3 }
 0x851   :  { %v5267_v14 = vadd.f32 %v5266_v30, %v9502_v19  ;;  %v5458_v29 = vpop.f32.mrf.mxu2  ;;  %v5334_v33 = vpop.f32.mrf.mxu0 }
 0x852   :  { %v9605_v8 = vadd.f32 %v5458_v29, %v5394_v34  ;;  %v5399_v58 = vpop.f32.mrf.mxu1 }
 0x853   :  { %v5332_v46 = vadd.f32 %v5331_v49, %v5267_v14 }
 0x854   :  { %5498 = vmax.xlane.f32.xlu2 %v9605_v8 }
 0x855   :  { %v5397_v36 = vadd.f32 %v5396_v23, %v5332_v46 }
 0x858   :  { %v5269_v3 = vpop.f32.mrf.mxu3 }
 0x859   :  { %v5270_v55 = vadd.f32 %v5269_v3, %v9510_v43  ;;  %v5461_v6 = vpop.f32.mrf.mxu2  ;;  %v5337_v44 = vpop.f32.mrf.mxu0 }
 0x85a   :  { %v9609_v39 = vadd.f32 %v5461_v6, %v5397_v36  ;;  %v5402_v19 = vpop.f32.mrf.mxu1 }
 0x85b   :  { %v5335_v4 = vadd.f32 %v5334_v33, %v5270_v55 }
 0x85c   :  { %5500 = vmax.xlane.f32.xlu0 %v9609_v39 }
 0x85d   :  { %v5400_v26 = vadd.f32 %v5399_v58, %v5335_v4 }
 0x860   :  { %v5272_v2 = vpop.f32.mrf.mxu3 }
 0x861   :  { %v5273_v32 = vadd.f32 %v5272_v2, %v9518_v57  ;;  %v5464_v7 = vpop.f32.mrf.mxu2  ;;  %v5340_v25 = vpop.f32.mrf.mxu0 }
 0x862   :  { %v9613_v5 = vadd.f32 %v5464_v7, %v5400_v26  ;;  %v5405_v15 = vpop.f32.mrf.mxu1 }
 0x863   :  { %v5338_v21 = vadd.f32 %v5337_v44, %v5273_v32 }
 0x864   :  { %5502 = vmax.xlane.f32.xlu1 %v9613_v5 }
 0x865   :  { %v5403_v9 = vadd.f32 %v5402_v19, %v5338_v21 }
 0x868   :  { %v5275_v43 = vpop.f32.mrf.mxu3 }
 0x869   :  { %v5276_v40 = vadd.f32 %v5275_v43, %v9526_v47  ;;  %v5467_v59 = vpop.f32.mrf.mxu2  ;;  %v5343_v54 = vpop.f32.mrf.mxu0 }
 0x86a   :  { %v9617_v31 = vadd.f32 %v5467_v59, %v5403_v9  ;;  %v5408_v61 = vpop.f32.mrf.mxu1 }
 0x86b   :  { %v5341_v62 = vadd.f32 %v5340_v25, %v5276_v40 }
 0x86c   :  { %5504 = vmax.xlane.f32.xlu2 %v9617_v31 }
 0x86d   :  { %v5406_v10 = vadd.f32 %v5405_v15, %v5341_v62 }
 0x870   :  { %v5278_v57 = vpop.f32.mrf.mxu3 }
 0x871   :  { %v5279_v17 = vadd.f32 %v5278_v57, %v9534_v24  ;;  %v5470_v56 = vpop.f32.mrf.mxu2  ;;  %v5346_v22 = vpop.f32.mrf.mxu0 }
 0x872   :  { %v9621_v38 = vadd.f32 %v5470_v56, %v5406_v10  ;;  %v5411_v50 = vpop.f32.mrf.mxu1 }
 0x873   :  { %v5344_v48 = vadd.f32 %v5343_v54, %v5279_v17 }
 0x874   :  { %5506 = vmax.xlane.f32.xlu0 %v9621_v38 }
 0x875   :  { %v5409_v47 = vadd.f32 %v5408_v61, %v5344_v48 }
 0x878   :  { %v5281_v0 = vpop.f32.mrf.mxu3 }
 0x879   :  { %v5282_v60 = vadd.f32 %v5281_v0, %v9544_v52  ;;  %v5473_v20 = vpop.f32.mrf.mxu2  ;;  %v5349_v49 = vpop.f32.mrf.mxu0 }
 0x87a   :  { %v9625_v1 = vadd.f32 %v5473_v20, %v5409_v47  ;;  %v5414_v28 = vpop.f32.mrf.mxu1 }
 0x87b   :  { %v5347_v16 = vadd.f32 %v5346_v22, %v5282_v60 }
 0x87c   :  { %5508 = vmax.xlane.f32.xlu1 %v9625_v1 }
 0x87d   :  { %v5412_v27 = vadd.f32 %v5411_v50, %v5347_v16 }
 0x880   :  { %v5284_v24 = vpop.f32.mrf.mxu3 }
 0x881   :  { %v5285_v41 = vadd.f32 %v5284_v24, %v9551_v63  ;;  %v5476_v53 = vpop.f32.mrf.mxu2 }
 0x882   :  { %v9629_v12 = vadd.f32 %v5476_v53, %v5412_v27 }
 0x883   :  { %v5350_v23 = vadd.f32 %v5349_v49, %v5285_v41 }
 0x884   :  { %5510 = vmax.xlane.f32.xlu2 %v9629_v12 }
 0x885   :  { %v5415_v34 = vadd.f32 %v5414_v28, %v5350_v23 }
 0x887   :  { %v5483_v52 = vpop.xlane.xlu0 %5482 }
 0x888   :  { %v5514_v30 = vsub.f32 %v9557_v37, %v5483_v52 }
 0x889   :  { %v5479_v14 = vpop.f32.mrf.mxu2 }
 0x88a   :  { %v5530_v29 = vmul.f32 1.442695, %v5514_v30  ;;  %v9633_v33 = vadd.f32 %v5479_v14, %v5415_v34 }
 0x88c   :  { %6143 = vpow2.f32 %v5530_v29  ;;  %5512 = vmax.xlane.f32.xlu0 %v9633_v33 }
 0x88f   :  { %v5485_v63 = vpop.xlane.xlu0 %5484 }
 0x890   :  { %v5515_v46 = vsub.f32 %v9564_v45, %v5485_v63 }
 0x892   :  { %v9637_v58 = vpop.eup %6143  ;;  %v5532_v3 = vmul.f32 1.442695, %v5515_v46 }
 0x893   :  { %5562 = vadd.xlane.f32.xlu1 %v9637_v58 }
 0x894   :  { %6145 = vpow2.f32 %v5532_v3 }
 0x897   :  { %v5487_v36 = vpop.xlane.xlu1 %5486 }
 0x898   :  { %v5516_v37 = vsub.f32 %v9571_v35, %v5487_v36 }
 0x89a   :  { %v9641_v55 = vpop.eup %6145  ;;  %v5534_v6 = vmul.f32 1.442695, %v5516_v37 }
 0x89b   :  { %5564 = vadd.xlane.f32.xlu2 %v9641_v55 }
 0x89c   :  { %6147 = vpow2.f32 %v5534_v6 }
 0x89f   :  { %v5489_v44 = vpop.xlane.xlu1 %5488 }
 0x8a0   :  { %v5517_v4 = vsub.f32 %v9578_v51, %v5489_v44 }
 0x8a2   :  { %v9645_v19 = vpop.eup %6147  ;;  %v5536_v45 = vmul.f32 1.442695, %v5517_v4 }
 0x8a3   :  { %5566 = vadd.xlane.f32.xlu0 %v9645_v19 }
 0x8a4   :  { %6149 = vpow2.f32 %v5536_v45 }
 0x8a7   :  { %v5491_v2 = vpop.xlane.xlu2 %5490 }
 0x8a8   :  { %v5518_v26 = vsub.f32 %v9585_v13, %v5491_v2 }
 0x8aa   :  { %v9649_v32 = vpop.eup %6149  ;;  %v5538_v35 = vmul.f32 1.442695, %v5518_v26 }
 0x8ab   :  { %5568 = vadd.xlane.f32.xlu1 %v9649_v32 }
 0x8ac   :  { %6151 = vpow2.f32 %v5538_v35 }
 0x8af   :  { %v5493_v7 = vpop.xlane.xlu2 %5492 }
 0x8b0   :  { %v5519_v21 = vsub.f32 %v9592_v11, %v5493_v7 }
 0x8b2   :  { %v9653_v25 = vpop.eup %6151  ;;  %v5540_v51 = vmul.f32 1.442695, %v5519_v21 }
 0x8b3   :  { %5570 = vadd.xlane.f32.xlu2 %v9653_v25 }
 0x8b4   :  { %6153 = vpow2.f32 %v5540_v51 }
 0x8b7   :  { %v5495_v43 = vpop.xlane.xlu0 %5494 }
 0x8b8   :  { %v5520_v9 = vsub.f32 %v9597_v18, %v5495_v43 }
 0x8ba   :  { %v9657_v15 = vpop.eup %6153  ;;  %v5542_v13 = vmul.f32 1.442695, %v5520_v9 }
 0x8bb   :  { %5572 = vadd.xlane.f32.xlu0 %v9657_v15 }
 0x8bc   :  { %6155 = vpow2.f32 %v5542_v13 }
 0x8bf   :  { %v5497_v40 = vpop.xlane.xlu1 %5496 }
 0x8c0   :  { %v5521_v59 = vsub.f32 %v9601_v42, %v5497_v40 }
 0x8c2   :  { %v9661_v62 = vpop.eup %6155  ;;  %v5544_v11 = vmul.f32 1.442695, %v5521_v59 }
 0x8c3   :  { %5574 = vadd.xlane.f32.xlu1 %v9661_v62 }
 0x8c4   :  { %6157 = vpow2.f32 %v5544_v11 }
 0x8c7   :  { %v5499_v54 = vpop.xlane.xlu2 %5498 }
 0x8c8   :  { %v5522_v57 = vsub.f32 %v9605_v8, %v5499_v54 }
 0x8ca   :  { %v9665_v10 = vpop.eup %6157  ;;  %v5546_v18 = vmul.f32 1.442695, %v5522_v57 }
 0x8cb   :  { %5576 = vadd.xlane.f32.xlu2 %v9665_v10 }
 0x8cc   :  { %6159 = vpow2.f32 %v5546_v18 }
 0x8cf   :  { %v5501_v17 = vpop.xlane.xlu0 %5500 }
 0x8d0   :  { %v5523_v56 = vsub.f32 %v9609_v39, %v5501_v17 }
 0x8d2   :  { %v9669_v61 = vpop.eup %6159  ;;  %v5548_v42 = vmul.f32 1.442695, %v5523_v56 }
 0x8d3   :  { %5578 = vadd.xlane.f32.xlu0 %v9669_v61 }
 0x8d4   :  { %6161 = vpow2.f32 %v5548_v42 }
 0x8d7   :  { %v5503_v48 = vpop.xlane.xlu1 %5502 }
 0x8d8   :  { %v5524_v0 = vsub.f32 %v9613_v5, %v5503_v48 }
 0x8da   :  { %v9673_v47 = vpop.eup %6161  ;;  %v5550_v8 = vmul.f32 1.442695, %v5524_v0 }
 0x8db   :  { %5580 = vadd.xlane.f32.xlu1 %v9673_v47 }
 0x8dc   :  { %6163 = vpow2.f32 %v5550_v8 }
 0x8df   :  { %v5505_v22 = vpop.xlane.xlu2 %5504 }
 0x8e0   :  { %v5525_v60 = vsub.f32 %v9617_v31, %v5505_v22 }
 0x8e2   :  { %v9677_v20 = vpop.eup %6163  ;;  %v5552_v39 = vmul.f32 1.442695, %v5525_v60 }
 0x8e3   :  { %5582 = vadd.xlane.f32.xlu2 %v9677_v20 }
 0x8e4   :  { %6165 = vpow2.f32 %v5552_v39 }
 0x8e7   :  { %v5507_v16 = vpop.xlane.xlu0 %5506 }
 0x8e8   :  { %v5526_v50 = vsub.f32 %v9621_v38, %v5507_v16 }
 0x8ea   :  { %v9681_v24 = vpop.eup %6165  ;;  %v5554_v5 = vmul.f32 1.442695, %v5526_v50 }
 0x8eb   :  { %5584 = vadd.xlane.f32.xlu0 %v9681_v24 }
 0x8ec   :  { %6167 = vpow2.f32 %v5554_v5 }
 0x8ef   :  { %v5509_v27 = vpop.xlane.xlu1 %5508 }
 0x8f0   :  { %v5527_v41 = vsub.f32 %v9625_v1, %v5509_v27 }
 0x8f2   :  { %v9685_v53 = vpop.eup %6167  ;;  %v5556_v31 = vmul.f32 1.442695, %v5527_v41 }
 0x8f3   :  { %5586 = vadd.xlane.f32.xlu1 %v9685_v53 }
 0x8f4   :  { %6169 = vpow2.f32 %v5556_v31 }
 0x8f7   :  { %v5511_v49 = vpop.xlane.xlu2 %5510 }
 0x8f8   :  { %v5528_v23 = vsub.f32 %v9629_v12, %v5511_v49 }
 0x8fa   :  { %v9689_v28 = vpop.eup %6169  ;;  %v5558_v38 = vmul.f32 1.442695, %v5528_v23 }
 0x8fb   :  { %5588 = vadd.xlane.f32.xlu2 %v9689_v28 }
 0x8fc   :  { %6171 = vpow2.f32 %v5558_v38 }
 0x8ff   :  { %v5513_v52 = vpop.xlane.xlu0 %5512 }
 0x900   :  { %v5529_v30 = vsub.f32 %v9633_v33, %v5513_v52 }
 0x902   :  { %v9693_v34 = vpop.eup %6171  ;;  %v5560_v1 = vmul.f32 1.442695, %v5529_v30 }
 0x903   :  { %5590 = vadd.xlane.f32.xlu0 %v9693_v34 }
 0x904   :  { %6173 = vpow2.f32 %v5560_v1 }
 0x906   :  { %v5563_v14 = vpop.xlane.xlu1 %5562 }
 0x907   :  { %6175 = vrcp.f32 %v5563_v14  ;;  %v5605_v36 = vand.u32 2147483648, %v5563_v14  ;;  %v5603_v33 = vand.u32 2147483647, %v5563_v14  ;;  %vm5599_vm4 = vweird.f32 %v5563_v14 }
 0x909   :  { %v5606_v4 = vor.u32 1.1754944e-38, %v5605_v36  ;;  %vm5604_vm6 = vcmp.eq.f32.partialorder %v5603_v33, 8.507059e+37 }
 0x90a   :  { %v9696_v29 = vpop.eup %6173 }
 0x90b   :  { %5592 = vadd.xlane.f32.xlu1 %v9696_v29 }
 0x90d   :  { %v6176_v12 = vpop.eup %6175 }
 0x90e   :  { %v5595_v63 = vmul.f32 %v6176_v12, %v5563_v14  ;;  %v5565_v46 = vpop.xlane.xlu2 %5564  ;;  %vm5600_vm3 = vweird.f32 %v6176_v12 }
 0x90f   :  { %6177 = vrcp.f32 %v5565_v46  ;;  %vm5601_vm5 = vmor %vm5599_vm4, %vm5600_vm3  ;;  %v5620_v51 = vand.u32 2147483648, %v5565_v46  ;;  %v5618_v9 = vand.u32 2147483647, %v5565_v46  ;;  %vm5614_vm8 = vweird.f32 %v5565_v46 }
 0x910   :  { %v5596_v3 = vsub.f32 1.0, %v5595_v63 }
 0x911   :  { %v5621_v59 = vor.u32 1.1754944e-38, %v5620_v51  ;;  %vm5619_vm10 = vcmp.eq.f32.partialorder %v5618_v9, 8.507059e+37 }
 0x912   :  { %v5597_v37 = vmul.f32 %v6176_v12, %v5596_v3 }
 0x914   :  { %v5598_v6 = vadd.f32 %v6176_v12, %v5597_v37 }
 0x915   :  { %v6178_v44 = vpop.eup %6177 }
 0x916   :  { %v5602_v45 = vsel %vm5601_vm5, %v6176_v12, %v5598_v6  ;;  %v5610_v2 = vmul.f32 %v6178_v44, %v5565_v46  ;;  %v5567_v26 = vpop.xlane.xlu0 %5566  ;;  %vm5615_vm7 = vweird.f32 %v6178_v44 }
 0x917   :  { %v5607_v35 = vsel %vm5604_vm6, %v5606_v4, %v5602_v45  ;;  %6179 = vrcp.f32 %v5567_v26  ;;  %vm5616_vm9 = vmor %vm5614_vm8, %vm5615_vm7  ;;  %v5635_v56 = vand.u32 2147483648, %v5567_v26  ;;  %v5633_v48 = vand.u32 2147483647, %v5567_v26 }
 0x918   :  { %v5608_v7 = vmul.f32 %v9637_v58, %v5607_v35  ;;  %v5611_v21 = vsub.f32 1.0, %v5610_v2  ;;  %vm5629_vm12 = vweird.f32 %v5567_v26 }
 0x919   :  { %v5636_v22 = vor.u32 1.1754944e-38, %v5635_v56  ;;  %vm5634_vm14 = vcmp.eq.f32.partialorder %v5633_v48, 8.507059e+37 }
 0x91a   :  { %5834 = vst [vmem:[#allocation13] sm:$0xff] %v5608_v7  ;;  %v5612_v43 = vmul.f32 %v6178_v44, %v5611_v21 }
 0x91c   :  { %v5613_v13 = vadd.f32 %v6178_v44, %v5612_v43 }
 0x91d   :  { %v6180_v40 = vpop.eup %6179 }
 0x91e   :  { %v5617_v11 = vsel %vm5616_vm9, %v6178_v44, %v5613_v13  ;;  %v5625_v54 = vmul.f32 %v6180_v40, %v5567_v26  ;;  %v5569_v57 = vpop.xlane.xlu1 %5568  ;;  %vm5630_vm11 = vweird.f32 %v6180_v40 }
 0x91f   :  { %v5622_v18 = vsel %vm5619_vm10, %v5621_v59, %v5617_v11  ;;  %6181 = vrcp.f32 %v5569_v57  ;;  %vm5631_vm13 = vmor %vm5629_vm12, %vm5630_vm11  ;;  %v5650_v27 = vand.u32 2147483648, %v5569_v57  ;;  %v5648_v31 = vand.u32 2147483647, %v5569_v57 }
 0x920   :  { %v5623_v17 = vmul.f32 %v9641_v55, %v5622_v18  ;;  %v5626_v58 = vsub.f32 1.0, %v5625_v54  ;;  %vm5644_vm0 = vweird.f32 %v5569_v57 }
 0x921   :  { %v5651_v38 = vor.u32 1.1754944e-38, %v5650_v27  ;;  %vm5649_vm2 = vcmp.eq.f32.partialorder %v5648_v31, 8.507059e+37 }
 0x922   :  { %5835 = vst [vmem:[#allocation13 + $0x8] sm:$0xff] %v5623_v17  ;;  %v5627_v42 = vmul.f32 %v6180_v40, %v5626_v58 }
 0x924   :  { %v5628_v0 = vadd.f32 %v6180_v40, %v5627_v42 }
 0x925   :  { %v6182_v8 = vpop.eup %6181 }
 0x926   :  { %v5632_v60 = vsel %vm5631_vm13, %v6180_v40, %v5628_v0  ;;  %v5640_v39 = vmul.f32 %v6182_v8, %v5569_v57  ;;  %v5571_v16 = vpop.xlane.xlu2 %5570  ;;  %vm5645_vm15 = vweird.f32 %v6182_v8 }
 0x927   :  { %v5637_v50 = vsel %vm5634_vm14, %v5636_v22, %v5632_v60  ;;  %6183 = vrcp.f32 %v5571_v16  ;;  %vm5646_vm1 = vmor %vm5644_vm0, %vm5645_vm15  ;;  %v5665_v63 = vand.u32 2147483648, %v5571_v16  ;;  %v5663_v3 = vand.u32 2147483647, %v5571_v16 }
 0x928   :  { %v5638_v5 = vmul.f32 %v9645_v19, %v5637_v50  ;;  %v5641_v55 = vsub.f32 1.0, %v5640_v39  ;;  %vm5659_vm4 = vweird.f32 %v5571_v16 }
 0x929   :  { %v5666_v33 = vor.u32 1.1754944e-38, %v5665_v63  ;;  %vm5664_vm6 = vcmp.eq.f32.partialorder %v5663_v3, 8.507059e+37 }
 0x92a   :  { %5836 = vst [vmem:[#allocation13 + $0x10] sm:$0xff] %v5638_v5  ;;  %v5642_v41 = vmul.f32 %v6182_v8, %v5641_v55 }
 0x92c   :  { %v5643_v49 = vadd.f32 %v6182_v8, %v5642_v41 }
 0x92d   :  { %v6184_v23 = vpop.eup %6183 }
 0x92e   :  { %v5647_v52 = vsel %vm5646_vm1, %v6182_v8, %v5643_v49  ;;  %v5655_v30 = vmul.f32 %v6184_v23, %v5571_v16  ;;  %v5573_v1 = vpop.xlane.xlu0 %5572  ;;  %vm5660_vm3 = vweird.f32 %v6184_v23 }
 0x92f   :  { %v5652_v14 = vsel %vm5649_vm2, %v5651_v38, %v5647_v52  ;;  %6185 = vrcp.f32 %v5573_v1  ;;  %vm5661_vm5 = vmor %vm5659_vm4, %vm5660_vm3  ;;  %v5680_v26 = vand.u32 2147483648, %v5573_v1  ;;  %v5678_v7 = vand.u32 2147483647, %v5573_v1 }
 0x930   :  { %v5653_v12 = vmul.f32 %v9649_v32, %v5652_v14  ;;  %v5656_v19 = vsub.f32 1.0, %v5655_v30  ;;  %vm5674_vm8 = vweird.f32 %v5573_v1 }
 0x931   :  { %v5681_v43 = vor.u32 1.1754944e-38, %v5680_v26  ;;  %vm5679_vm10 = vcmp.eq.f32.partialorder %v5678_v7, 8.507059e+37 }
 0x932   :  { %5837 = vst [vmem:[#allocation13 + $0x18] sm:$0xff] %v5653_v12  ;;  %v5657_v46 = vmul.f32 %v6184_v23, %v5656_v19 }
 0x934   :  { %v5658_v36 = vadd.f32 %v6184_v23, %v5657_v46 }
 0x935   :  { %v6186_v37 = vpop.eup %6185 }
 0x936   :  { %v5662_v6 = vsel %vm5661_vm5, %v6184_v23, %v5658_v36  ;;  %v5670_v44 = vmul.f32 %v6186_v37, %v5573_v1  ;;  %v5575_v4 = vpop.xlane.xlu1 %5574  ;;  %vm5675_vm7 = vweird.f32 %v6186_v37 }
 0x937   :  { %v5667_v45 = vsel %vm5664_vm6, %v5666_v33, %v5662_v6  ;;  %6187 = vrcp.f32 %v5575_v4  ;;  %vm5676_vm9 = vmor %vm5674_vm8, %vm5675_vm7  ;;  %v5695_v54 = vand.u32 2147483648, %v5575_v4  ;;  %v5693_v18 = vand.u32 2147483647, %v5575_v4 }
 0x938   :  { %v5668_v2 = vmul.f32 %v9653_v25, %v5667_v45  ;;  %v5671_v32 = vsub.f32 1.0, %v5670_v44  ;;  %vm5689_vm12 = vweird.f32 %v5575_v4 }
 0x939   :  { %v5696_v56 = vor.u32 1.1754944e-38, %v5695_v54  ;;  %vm5694_vm14 = vcmp.eq.f32.partialorder %v5693_v18, 8.507059e+37 }
 0x93a   :  { %5838 = vst [vmem:[#allocation13 + $0x20] sm:$0xff] %v5668_v2  ;;  %v5672_v35 = vmul.f32 %v6186_v37, %v5671_v32 }
 0x93c   :  { %v5673_v21 = vadd.f32 %v6186_v37, %v5672_v35 }
 0x93d   :  { %v6188_v51 = vpop.eup %6187 }
 0x93e   :  { %v5677_v9 = vsel %vm5676_vm9, %v6186_v37, %v5673_v21  ;;  %v5685_v13 = vmul.f32 %v6188_v51, %v5575_v4  ;;  %v5577_v40 = vpop.xlane.xlu2 %5576  ;;  %vm5690_vm11 = vweird.f32 %v6188_v51 }
 0x93f   :  { %v5682_v59 = vsel %vm5679_vm10, %v5681_v43, %v5677_v9  ;;  %6189 = vrcp.f32 %v5577_v40  ;;  %vm5691_vm13 = vmor %vm5689_vm12, %vm5690_vm11  ;;  %v5710_v60 = vand.u32 2147483648, %v5577_v40  ;;  %v5708_v16 = vand.u32 2147483647, %v5577_v40 }
 0x940   :  { %v5683_v11 = vmul.f32 %v9657_v15, %v5682_v59  ;;  %v5686_v25 = vsub.f32 1.0, %v5685_v13  ;;  %vm5704_vm0 = vweird.f32 %v5577_v40 }
 0x941   :  { %v5711_v55 = vor.u32 1.1754944e-38, %v5710_v60  ;;  %vm5709_vm2 = vcmp.eq.f32.partialorder %v5708_v16, 8.507059e+37 }
 0x942   :  { %5839 = vst [vmem:[#allocation13 + $0x28] sm:$0xff] %v5683_v11  ;;  %v5687_v57 = vmul.f32 %v6188_v51, %v5686_v25 }
 0x944   :  { %v5688_v17 = vadd.f32 %v6188_v51, %v5687_v57 }
 0x945   :  { %v6190_v58 = vpop.eup %6189 }
 0x946   :  { %v5692_v42 = vsel %vm5691_vm13, %v6188_v51, %v5688_v17  ;;  %v5700_v48 = vmul.f32 %v6190_v58, %v5577_v40  ;;  %v5579_v0 = vpop.xlane.xlu0 %5578  ;;  %vm5705_vm15 = vweird.f32 %v6190_v58 }
 0x947   :  { %v5697_v8 = vsel %vm5694_vm14, %v5696_v56, %v5692_v42  ;;  %6191 = vrcp.f32 %v5579_v0  ;;  %vm5706_vm1 = vmor %vm5704_vm0, %vm5705_vm15  ;;  %v5725_v38 = vand.u32 2147483648, %v5579_v0  ;;  %v5723_v30 = vand.u32 2147483647, %v5579_v0 }
 0x948   :  { %v5698_v22 = vmul.f32 %v9661_v62, %v5697_v8  ;;  %v5701_v15 = vsub.f32 1.0, %v5700_v48  ;;  %vm5719_vm4 = vweird.f32 %v5579_v0 }
 0x949   :  { %v5726_v12 = vor.u32 1.1754944e-38, %v5725_v38  ;;  %vm5724_vm6 = vcmp.eq.f32.partialorder %v5723_v30, 8.507059e+37 }
 0x94a   :  { %5840 = vst [vmem:[#allocation13 + $0x30] sm:$0xff] %v5698_v22  ;;  %v5702_v39 = vmul.f32 %v6190_v58, %v5701_v15 }
 0x94c   :  { %v5703_v50 = vadd.f32 %v6190_v58, %v5702_v39 }
 0x94d   :  { %v6192_v5 = vpop.eup %6191 }
 0x94e   :  { %v5707_v27 = vsel %vm5706_vm1, %v6190_v58, %v5703_v50  ;;  %v5715_v41 = vmul.f32 %v6192_v5, %v5579_v0  ;;  %v5581_v31 = vpop.xlane.xlu1 %5580  ;;  %vm5720_vm3 = vweird.f32 %v6192_v5 }
 0x94f   :  { %v5712_v49 = vsel %vm5709_vm2, %v5711_v55, %v5707_v27  ;;  %6193 = vrcp.f32 %v5581_v31  ;;  %vm5721_vm5 = vmor %vm5719_vm4, %vm5720_vm3  ;;  %v5740_v37 = vand.u32 2147483648, %v5581_v31  ;;  %v5738_v6 = vand.u32 2147483647, %v5581_v31 }
 0x950   :  { %v5713_v23 = vmul.f32 %v9665_v10, %v5712_v49  ;;  %v5716_v62 = vsub.f32 1.0, %v5715_v41  ;;  %vm5734_vm8 = vweird.f32 %v5581_v31 }
 0x951   :  { %v5741_v45 = vor.u32 1.1754944e-38, %v5740_v37  ;;  %vm5739_vm10 = vcmp.eq.f32.partialorder %v5738_v6, 8.507059e+37 }
 0x952   :  { %5841 = vst [vmem:[#allocation13 + $0x38] sm:$0xff] %v5713_v23  ;;  %v5717_v52 = vmul.f32 %v6192_v5, %v5716_v62 }
 0x954   :  { %v5718_v1 = vadd.f32 %v6192_v5, %v5717_v52 }
 0x955   :  { %v6194_v14 = vpop.eup %6193 }
 0x956   :  { %v5722_v19 = vsel %vm5721_vm5, %v6192_v5, %v5718_v1  ;;  %v5730_v63 = vmul.f32 %v6194_v14, %v5581_v31  ;;  %v5583_v46 = vpop.xlane.xlu2 %5582  ;;  %vm5735_vm7 = vweird.f32 %v6194_v14 }
 0x957   :  { %v5727_v3 = vsel %vm5724_vm6, %v5726_v12, %v5722_v19  ;;  %6195 = vrcp.f32 %v5583_v46  ;;  %vm5736_vm9 = vmor %vm5734_vm8, %vm5735_vm7  ;;  %v5755_v21 = vand.u32 2147483648, %v5583_v46  ;;  %v5753_v43 = vand.u32 2147483647, %v5583_v46 }
 0x958   :  { %v5728_v36 = vmul.f32 %v9669_v61, %v5727_v3  ;;  %v5731_v10 = vsub.f32 1.0, %v5730_v63  ;;  %vm5749_vm12 = vweird.f32 %v5583_v46 }
 0x959   :  { %v5756_v40 = vor.u32 1.1754944e-38, %v5755_v21  ;;  %vm5754_vm14 = vcmp.eq.f32.partialorder %v5753_v43, 8.507059e+37 }
 0x95a   :  { %5842 = vst [vmem:[#allocation13 + $0x40] sm:$0xff] %v5728_v36  ;;  %v5732_v33 = vmul.f32 %v6194_v14, %v5731_v10 }
 0x95c   :  { %v5733_v44 = vadd.f32 %v6194_v14, %v5732_v33 }
 0x95d   :  { %v6196_v4 = vpop.eup %6195 }
 0x95e   :  { %v5737_v2 = vsel %vm5736_vm9, %v6194_v14, %v5733_v44  ;;  %v5745_v32 = vmul.f32 %v6196_v4, %v5583_v46  ;;  %v5585_v26 = vpop.xlane.xlu0 %5584  ;;  %vm5750_vm11 = vweird.f32 %v6196_v4 }
 0x95f   :  { %v5742_v35 = vsel %vm5739_vm10, %v5741_v45, %v5737_v2  ;;  %6197 = vrcp.f32 %v5585_v26  ;;  %vm5751_vm13 = vmor %vm5749_vm12, %vm5750_vm11  ;;  %v5770_v18 = vand.u32 2147483648, %v5585_v26  ;;  %v5768_v58 = vand.u32 2147483647, %v5585_v26 }
 0x960   :  { %v5743_v7 = vmul.f32 %v9673_v47, %v5742_v35  ;;  %v5746_v61 = vsub.f32 1.0, %v5745_v32  ;;  %vm5764_vm0 = vweird.f32 %v5585_v26 }
 0x961   :  { %v5771_v48 = vor.u32 1.1754944e-38, %v5770_v18  ;;  %vm5769_vm2 = vcmp.eq.f32.partialorder %v5768_v58, 8.507059e+37 }
 0x962   :  { %5843 = vst [vmem:[#allocation13 + $0x48] sm:$0xff] %v5743_v7  ;;  %v5747_v51 = vmul.f32 %v6196_v4, %v5746_v61 }
 0x964   :  { %v5748_v9 = vadd.f32 %v6196_v4, %v5747_v51 }
 0x965   :  { %v6198_v13 = vpop.eup %6197 }
 0x966   :  { %v5752_v59 = vsel %vm5751_vm13, %v6196_v4, %v5748_v9  ;;  %v5760_v11 = vmul.f32 %v6198_v13, %v5585_v26  ;;  %v5587_v25 = vpop.xlane.xlu1 %5586  ;;  %vm5765_vm15 = vweird.f32 %v6198_v13 }
 0x967   :  { %v5757_v54 = vsel %vm5754_vm14, %v5756_v40, %v5752_v59  ;;  %6199 = vrcp.f32 %v5587_v25  ;;  %vm5766_vm1 = vmor %vm5764_vm0, %vm5765_vm15  ;;  %v5785_v39 = vand.u32 2147483648, %v5587_v25  ;;  %v5783_v50 = vand.u32 2147483647, %v5587_v25 }
 0x968   :  { %v5758_v57 = vmul.f32 %v9677_v20, %v5757_v54  ;;  %v5761_v47 = vsub.f32 1.0, %v5760_v11  ;;  %vm5779_vm4 = vweird.f32 %v5587_v25 }
 0x969   :  { %v5786_v27 = vor.u32 1.1754944e-38, %v5785_v39  ;;  %vm5784_vm6 = vcmp.eq.f32.partialorder %v5783_v50, 8.507059e+37 }
 0x96a   :  { %5844 = vst [vmem:[#allocation13 + $0x50] sm:$0xff] %v5758_v57  ;;  %v5762_v17 = vmul.f32 %v6198_v13, %v5761_v47 }
 0x96c   :  { %v5763_v56 = vadd.f32 %v6198_v13, %v5762_v17 }
 0x96d   :  { %v6200_v42 = vpop.eup %6199 }
 0x96e   :  { %v5767_v0 = vsel %vm5766_vm1, %v6198_v13, %v5763_v56  ;;  %v5775_v8 = vmul.f32 %v6200_v42, %v5587_v25  ;;  %v5589_v22 = vpop.xlane.xlu2 %5588  ;;  %vm5780_vm3 = vweird.f32 %v6200_v42 }
 0x96f   :  { %v5772_v15 = vsel %vm5769_vm2, %v5771_v48, %v5767_v0  ;;  %6201 = vrcp.f32 %v5589_v22  ;;  %vm5781_vm5 = vmor %vm5779_vm4, %vm5780_vm3  ;;  %v5800_v38 = vand.u32 2147483648, %v5589_v22  ;;  %v5798_v30 = vand.u32 2147483647, %v5589_v22 }
 0x970   :  { %v5773_v60 = vmul.f32 %v9681_v24, %v5772_v15  ;;  %v5776_v20 = vsub.f32 1.0, %v5775_v8  ;;  %vm5794_vm8 = vweird.f32 %v5589_v22 }
 0x971   :  { %v5801_v12 = vor.u32 1.1754944e-38, %v5800_v38  ;;  %vm5799_vm10 = vcmp.eq.f32.partialorder %v5798_v30, 8.507059e+37 }
 0x972   :  { %5845 = vst [vmem:[#allocation13 + $0x58] sm:$0xff] %v5773_v60  ;;  %v5777_v16 = vmul.f32 %v6200_v42, %v5776_v20 }
 0x974   :  { %v5778_v5 = vadd.f32 %v6200_v42, %v5777_v16 }
 0x975   :  { %v6202_v55 = vpop.eup %6201 }
 0x976   :  { %v5782_v41 = vsel %vm5781_vm5, %v6200_v42, %v5778_v5  ;;  %v5790_v31 = vmul.f32 %v6202_v55, %v5589_v22  ;;  %v5591_v49 = vpop.xlane.xlu0 %5590  ;;  %vm5795_vm7 = vweird.f32 %v6202_v55 }
 0x977   :  { %v5787_v23 = vsel %vm5784_vm6, %v5786_v27, %v5782_v41  ;;  %6203 = vrcp.f32 %v5591_v49  ;;  %vm5796_vm9 = vmor %vm5794_vm8, %vm5795_vm7  ;;  %v5815_v10 = vand.u32 2147483648, %v5591_v49  ;;  %v5813_v33 = vand.u32 2147483647, %v5591_v49 }
 0x978   :  { %v5788_v62 = vmul.f32 %v9685_v53, %v5787_v23  ;;  %v5791_v24 = vsub.f32 1.0, %v5790_v31  ;;  %vm5809_vm12 = vweird.f32 %v5591_v49 }
 0x979   :  { %v5816_v4 = vor.u32 1.1754944e-38, %v5815_v10  ;;  %vm5814_vm14 = vcmp.eq.f32.partialorder %v5813_v33, 8.507059e+37 }
 0x97a   :  { %5846 = vst [vmem:[#allocation13 + $0x60] sm:$0xff] %v5788_v62  ;;  %v5792_v52 = vmul.f32 %v6202_v55, %v5791_v24 }
 0x97c   :  { %v5793_v1 = vadd.f32 %v6202_v55, %v5792_v52 }
 0x97d   :  { %v6204_v14 = vpop.eup %6203 }
 0x97e   :  { %v5797_v19 = vsel %vm5796_vm9, %v6202_v55, %v5793_v1  ;;  %v5805_v63 = vmul.f32 %v6204_v14, %v5591_v49  ;;  %v5593_v46 = vpop.xlane.xlu1 %5592  ;;  %vm5810_vm11 = vweird.f32 %v6204_v14 }
 0x97f   :  { %v5802_v3 = vsel %vm5799_vm10, %v5801_v12, %v5797_v19  ;;  %6205 = vrcp.f32 %v5593_v46  ;;  %vm5811_vm13 = vmor %vm5809_vm12, %vm5810_vm11  ;;  %v5830_v7 = vand.u32 2147483648, %v5593_v46  ;;  %v5828_v61 = vand.u32 2147483647, %v5593_v46 }
 0x980   :  { %v5803_v36 = vmul.f32 %v9689_v28, %v5802_v3  ;;  %v5806_v53 = vsub.f32 1.0, %v5805_v63  ;;  %vm5824_vm0 = vweird.f32 %v5593_v46 }
 0x981   :  { %v5831_v51 = vor.u32 1.1754944e-38, %v5830_v7  ;;  %vm5829_vm2 = vcmp.eq.f32.partialorder %v5828_v61, 8.507059e+37 }
 0x982   :  { %5847 = vst [vmem:[#allocation13 + $0x68] sm:$0xff] %v5803_v36  ;;  %v5807_v37 = vmul.f32 %v6204_v14, %v5806_v53 }
 0x984   :  { %v5808_v6 = vadd.f32 %v6204_v14, %v5807_v37 }
 0x985   :  { %v6206_v44 = vpop.eup %6205 }
 0x986   :  { %v5812_v45 = vsel %vm5811_vm13, %v6204_v14, %v5808_v6  ;;  %v5820_v2 = vmul.f32 %v6206_v44, %v5593_v46  ;;  %vm5825_vm15 = vweird.f32 %v6206_v44 }
 0x987   :  { %v5817_v32 = vsel %vm5814_vm14, %v5816_v4, %v5812_v45  ;;  %vm5826_vm1 = vmor %vm5824_vm0, %vm5825_vm15 }
 0x988   :  { %v5818_v26 = vmul.f32 %v9693_v34, %v5817_v32  ;;  %v5821_v35 = vsub.f32 1.0, %v5820_v2 }
 0x98a   :  { %5848 = vst [vmem:[#allocation13 + $0x70] sm:$0xff] %v5818_v26  ;;  %v5822_v28 = vmul.f32 %v6206_v44, %v5821_v35 }
 0x98c   :  { %v5823_v21 = vadd.f32 %v6206_v44, %v5822_v28 }
 0x98e   :  { %v5827_v43 = vsel %vm5826_vm1, %v6206_v44, %v5823_v21 }
 0x98f   :  { %v5832_v9 = vsel %vm5829_vm2, %v5831_v51, %v5827_v43 }
 0x990   :  { %v5833_v34 = vmul.f32 %v9696_v29, %v5832_v9 }
 0x992   :  { %5849 = vst [vmem:[#allocation13 + $0x78] sm:$0xff] %v5833_v34 }
 0x993   :  { %5862 = dma.vmem_to_hbm [thread:$0]  %s5855_s11, 2048, %s5857_s2, [#allocation4], %s6397_s27, %s6397_s27, %s6398_s28  }
 0x994   :  { %6388 = dma.done.wait [#allocation4], 2048  }
 0x995   :  { %6389 = vsyncadd [#allocation4], 4294965248 }
 0x996   :  { %5867 = vsyncpa [#allocation3], 1 }
 0x997   :  { %5868 = vsyncpa [#allocation6], 1 }
 0x998   :  { %5869 = vsyncpa [#allocation9], 1 }
 0x999   :  { %5870 = vsyncpa [#allocation12], 1 }
 0x99a   :  { %5871 = vsyncpa [#allocation4], 1 }

</bundles_post_ra>
